<compile_context>
chip_gen: v6e
topology: v6e:2x2x1
jax: 0.10.0
libtpu: 0.0.40
codegen_flags: <defaults>
</compile_context>

<pallas_src>
import functools

import jax
import jax.numpy as jnp
from jax.experimental import pallas as pl
from jax.experimental.pallas import tpu as pltpu

_BN_EPS = 1e-5


# ---------------------------------------------------------------------------
# Fused kernel.  One grid step = one batch tile x one cout tile of the final
# output.  The conv1 result (padded for conv2's 3x3/pad=1 window) is kept in
# VMEM scratch and reused across the cout tiles of that batch tile.
# ---------------------------------------------------------------------------
def _residual_block_kernel(xp_ref, w1_ref, b1_ref, w2_ref, b2_ref, res_ref,
                           *rest, taps1, oh, ow, has_proj):
    if has_proj:
        wsc_ref, bsc_ref, out_ref, mid_ref = rest
    else:
        out_ref, mid_ref = rest

    bt = xp_ref.shape[0]
    cin = xp_ref.shape[-1]
    cmid = mid_ref.shape[-1]            # conv1/conv2 channel count (= cout)
    m = bt * oh * ow

    # ---- conv1 + BN1 + ReLU: once per batch tile (co == 0) ----------------
    @pl.when(pl.program_id(1) == 0)
    def _():
        # K-concatenated patches: (m, 9*cin) -> one MXU pass, f32 accumulate.
        parts = [xp_ref[:, p, di:di + oh, dj:dj + ow, :].reshape(m, cin)
                 for (p, di, dj) in taps1]
        patches = jnp.concatenate(parts, axis=-1)
        y1 = jnp.dot(patches, w1_ref[...],
                     preferred_element_type=jnp.float32)
        y1 = jnp.maximum(y1 + b1_ref[...], 0.0)
        y1 = y1.reshape(bt, oh, ow, cmid).astype(mid_ref.dtype)
        # Write into the spatially padded scratch (zero halo for conv2).
        zr = jnp.zeros((bt, 1, ow, cmid), mid_ref.dtype)
        zc = jnp.zeros((bt, oh + 2, 1, cmid), mid_ref.dtype)
        mid = jnp.concatenate([zr, y1, zr], axis=1)
        mid_ref[...] = jnp.concatenate([zc, mid, zc], axis=2)

    # ---- conv2 + BN2 for this cout tile (single K=9*cmid matmul) ----------
    parts2 = [mid_ref[:, di:di + oh, dj:dj + ow, :].reshape(m, cmid)
              for di in range(3) for dj in range(3)]
    patches2 = jnp.concatenate(parts2, axis=-1)
    y2 = jnp.dot(patches2, w2_ref[...],
                 preferred_element_type=jnp.float32) + b2_ref[...]

    # ---- shortcut fused into the epilogue ----------------------------------
    if has_proj:
        sc = jnp.dot(res_ref[...].reshape(m, cin), wsc_ref[...],
                     preferred_element_type=jnp.float32) + bsc_ref[...]
    else:
        sc = res_ref[...].reshape(m, y2.shape[-1]).astype(jnp.float32)

    # TODO(synk): f.dropout(p=0.5) is the identity in eval mode; training-mode
    # random masking (and training-mode BN statistics) are not implemented.
    y = jnp.maximum(y2 + sc, 0.0)
    out_ref[...] = y.reshape(out_ref.shape).astype(out_ref.dtype)


# ---------------------------------------------------------------------------
# Glue: BN folding, space-to-depth parity planes (strided conv -> stride-1
# taps), generation-aware VMEM budgeting.
# ---------------------------------------------------------------------------
def _fold_bn(w, bn):
    """Fold eval-mode BN scale into conv weights.

    Returns ((kh*kw*cin, cout) bf16 weights, (1, cout) f32 bias)."""
    gamma, beta, mean, var = bn
    scale = gamma * jax.lax.rsqrt(var + _BN_EPS)
    bias = (beta - mean * scale).astype(jnp.float32).reshape(1, -1)
    cout, cin, kh, kw = w.shape
    wf = (jnp.transpose(w, (2, 3, 1, 0)) * scale).astype(jnp.bfloat16)
    return wf.reshape(kh * kw * cin, cout), bias


def _make_planes(x_pad, kh, kw, stride, oh, ow):
    """(N, stride*stride, ph, pw, C) parity planes + tap list [(plane,di,dj)]
    so a strided conv becomes stride-1 shifted reads."""
    qh, qw = (kh - 1) // stride, (kw - 1) // stride
    ph, pw = oh + qh, ow + qw
    if stride == 1:
        x_planes = x_pad[:, None]                      # pure reshape, no copy
    else:
        planes = []
        for ri in range(stride):
            for rj in range(stride):
                p = x_pad[:, ri::stride, rj::stride, :][:, :ph, :pw, :]
                dh, dw = ph - p.shape[1], pw - p.shape[2]
                if dh or dw:
                    p = jnp.pad(p, ((0, 0), (0, dh), (0, dw), (0, 0)))
                planes.append(p)
        x_planes = jnp.stack(planes, axis=1)           # single ~1x copy
    taps = []
    for i in range(kh):
        for j in range(kw):
            taps.append(((i % stride) * stride + (j % stride),
                         i // stride, j // stride))
    return x_planes, taps


def _vmem_budget_bytes():
    """Generation-aware VMEM budget (v7x only has 64 MiB physical VMEM)."""
    try:
        cap = int(pltpu.get_tpu_info().vmem_capacity_bytes)
    except Exception:
        cap = 64 << 20
    return max(16 << 20, min((cap * 3) // 5, 48 << 20))


def residual_block(x_nhwc, p, stride, out_dtype=jnp.bfloat16):
    """Forward of the PyTorch ResidualBlock (eval mode), NHWC activations,
    fused into a single pallas_call."""
    n, h, w, cin = x_nhwc.shape
    cout = p["conv1_w"].shape[0]
    oh = (h + 2 - 3) // stride + 1
    ow = (w + 2 - 3) // stride + 1
    has_proj = "sc_w" in p

    xb = x_nhwc.astype(jnp.bfloat16)
    x_pad = jnp.pad(xb, ((0, 0), (1, 1), (1, 1), (0, 0)))
    x_planes, taps1 = _make_planes(x_pad, 3, 3, stride, oh, ow)
    npl, ph, pw = x_planes.shape[1:4]

    w1, b1 = _fold_bn(p["conv1_w"], p["bn1"])         # (9*cin,  cout)
    w2, b2 = _fold_bn(p["conv2_w"], p["bn2"])         # (9*cout, cout)
    if has_proj:
        wsc, bsc = _fold_bn(p["sc_w"], p["sc_bn"])    # (cin, cout)
        res = xb[:, ::stride, ::stride, :][:, :oh, :ow, :]
        res = res.reshape(n, oh * ow, cin)
        res_c = cin
    else:
        assert stride == 1 and cin == cout
        res = xb.reshape(n, oh * ow, cout)
        res_c = cout

    # Lane-dense cout tiles whenever the channel count allows it.
    if cout % 256 == 0:
        tco = 256
    elif cout % 128 == 0:
        tco = 128
    else:
        tco = cout            # lane-sparse fallback: correct, slower stores
    nco = cout // tco
    out_isz = jnp.dtype(out_dtype).itemsize

    def _vmem_bytes(bt):
        m = bt * oh * ow
        est = 2 * (bt * npl * ph * pw * cin * 2)            # x planes (2-buf)
        est += 2 * (9 * cin * cout * 2 + cout * 4)          # w1, b1
        est += 2 * (9 * cout * tco * 2 + tco * 4)           # w2, b2
        est += 2 * (bt * oh * ow * res_c * 2)               # residual input
        if has_proj:
            est += 2 * (cin * tco * 2 + tco * 4)            # wsc, bsc
        est += 2 * (bt * oh * ow * tco * out_isz)           # output
        est += bt * (oh + 2) * (ow + 2) * cout * 2          # mid scratch
        est += m * 9 * cin * 2 + m * 9 * cout * 2           # K-concat patches
        est += 3 * m * max(cout, tco) * 4                   # f32 temporaries
        return est

    # Fold as much batch into M as the VMEM budget allows.
    budget = _vmem_budget_bytes()
    bt = n
    while bt > 1 and (n % bt != 0 or _vmem_bytes(bt) > budget):
        bt -= 1
    # TODO(synk): for very large feature maps even bt=1 can exceed the budget;
    # spatial (row) tiling with a 2-row halo would be needed there.
    vmem_limit = int(min(max(_vmem_bytes(bt) + (2 << 20), 16 << 20), budget))

    kernel = functools.partial(_residual_block_kernel, taps1=tuple(taps1),
                               oh=oh, ow=ow, has_proj=has_proj)

    in_specs = [
        pl.BlockSpec((bt, npl, ph, pw, cin), lambda b, co: (b, 0, 0, 0, 0)),
        pl.BlockSpec((9 * cin, cout), lambda b, co: (0, 0)),   # resident
        pl.BlockSpec((1, cout), lambda b, co: (0, 0)),
        pl.BlockSpec((9 * cout, tco), lambda b, co: (0, co)),
        pl.BlockSpec((1, tco), lambda b, co: (0, co)),
    ]
    args = [x_planes, w1, b1, w2, b2]
    if has_proj:
        in_specs += [pl.BlockSpec((bt, oh * ow, cin), lambda b, co: (b, 0, 0)),
                     pl.BlockSpec((cin, tco), lambda b, co: (0, co)),
                     pl.BlockSpec((1, tco), lambda b, co: (0, co))]
        args += [res, wsc, bsc]
    else:
        in_specs.append(
            pl.BlockSpec((bt, oh * ow, tco), lambda b, co: (b, 0, co)))
        args.append(res)

    out = pl.pallas_call(
        kernel,
        grid=(n // bt, nco),
        in_specs=in_specs,
        out_specs=pl.BlockSpec((bt, oh * ow, tco), lambda b, co: (b, 0, co)),
        out_shape=jax.ShapeDtypeStruct((n, oh * ow, cout), out_dtype),
        scratch_shapes=[pltpu.VMEM((bt, oh + 2, ow + 2, cout), jnp.bfloat16)],
        compiler_params=pltpu.CompilerParams(
            dimension_semantics=("parallel", "arbitrary"),
            vmem_limit_bytes=vmem_limit),
    )(*args)
    return out.reshape(n, oh, ow, cout)


# ---------------------------------------------------------------------------
# Pure-JAX reference (same bf16 quantization points) and parameter init.
# ---------------------------------------------------------------------------
def _ref_conv_bn(x, w, bn, stride, pad, act, residual=None):
    gamma, beta, mean, var = bn
    scale = gamma * jax.lax.rsqrt(var + _BN_EPS)
    bias = beta - mean * scale
    w_hwio = (jnp.transpose(w, (2, 3, 1, 0)) * scale
              ).astype(jnp.bfloat16).astype(jnp.float32)
    y = jax.lax.conv_general_dilated(
        x, w_hwio, (stride, stride), [(pad, pad), (pad, pad)],
        dimension_numbers=("NHWC", "HWIO", "NHWC"),
        precision=jax.lax.Precision.HIGHEST)
    y = y + bias
    if residual is not None:
        y = y + residual
    if act == "relu":
        y = jnp.maximum(y, 0.0)
    return y


def ref_residual_block(x_nhwc, p, stride):
    xq = x_nhwc.astype(jnp.bfloat16).astype(jnp.float32)
    out = _ref_conv_bn(xq, p["conv1_w"], p["bn1"], stride, 1, "relu")
    out = out.astype(jnp.bfloat16).astype(jnp.float32)
    if "sc_w" in p:
        sc = _ref_conv_bn(xq, p["sc_w"], p["sc_bn"], stride, 0, "none")
    else:
        sc = xq
    return _ref_conv_bn(out, p["conv2_w"], p["bn2"], 1, 1, "relu", residual=sc)


def init_block_params(key, cin, cout, stride):
    ks = iter(jax.random.split(key, 16))

    def conv(co, ci, k):
        fan_in = ci * k * k
        return (jax.random.normal(next(ks), (co, ci, k, k), jnp.float32)
                / (fan_in ** 0.5))

    def bn(c):
        gamma = 1.0 + 0.1 * jax.random.normal(next(ks), (c,), jnp.float32)
        beta = 0.1 * jax.random.normal(next(ks), (c,), jnp.float32)
        mean = 0.1 * jax.random.normal(next(ks), (c,), jnp.float32)
        var = 1.0 + 0.1 * jnp.abs(jax.random.normal(next(ks), (c,), jnp.float32))
        return (gamma, beta, mean, var)

    p = {"conv1_w": conv(cout, cin, 3), "bn1": bn(cout),
         "conv2_w": conv(cout, cout, 3), "bn2": bn(cout)}
    if stride != 1 or cin != cout:
        p["sc_w"] = conv(cout, cin, 1)
        p["sc_bn"] = bn(cout)
    return p


if __name__ == "__main__":
    key = jax.random.PRNGKey(0)
    kp1, kp2, kx = jax.random.split(key, 3)
    # Block 1: downsampling (stride=2, channel change -> 1x1 conv shortcut).
    p1 = init_block_params(kp1, 64, 128, stride=2)
    # Block 2: identity-shortcut block (stride=1, same channels).
    p2 = init_block_params(kp2, 128, 128, stride=1)

    # PyTorch-style NCHW input.
    x_nchw = jax.random.normal(kx, (2, 64, 16, 16), jnp.float32)

    @jax.jit
    def forward(x, pa, pb):
        xh = jnp.transpose(x, (0, 2, 3, 1))                # NCHW -> NHWC
        y = residual_block(xh, pa, stride=2, out_dtype=jnp.bfloat16)
        y = residual_block(y, pb, stride=1, out_dtype=jnp.float32)
        return jnp.transpose(y, (0, 3, 1, 2))              # NHWC -> NCHW

    out = jax.block_until_ready(forward(x_nchw, p1, p2))
    assert out.shape == (2, 128, 8, 8), out.shape
    assert bool(jnp.all(jnp.isfinite(out)))
    assert bool(jnp.all(out >= 0.0))                       # final ReLU

    # Reference check (same quantization points -> tight agreement expected).
    xh = jnp.transpose(x_nchw, (0, 2, 3, 1))
    ref = ref_residual_block(xh, p1, 2)
    ref = ref_residual_block(ref, p2, 1)
    ref = jnp.transpose(ref, (0, 3, 1, 2))
    rel_err = float(jnp.max(jnp.abs(out - ref))
                    / (jnp.max(jnp.abs(ref)) + 1e-6))
    assert rel_err < 2e-2, rel_err
    print("KERNEL_OK")
</pallas_src>

<mosaic_0001>
module attributes {stable_mosaic.version = 11 : i64} {
  func.func @_residual_block_kernel(%arg0: i32, %arg1: i32, %arg2: memref<2x4x9x9x64xbf16, #tpu.memory_space<vmem>>, %arg3: memref<576x128xbf16, #tpu.memory_space<vmem>>, %arg4: memref<1x128xf32, #tpu.memory_space<vmem>>, %arg5: memref<1152x128xbf16, #tpu.memory_space<vmem>>, %arg6: memref<1x128xf32, #tpu.memory_space<vmem>>, %arg7: memref<2x64x64xbf16, #tpu.memory_space<vmem>>, %arg8: memref<64x128xbf16, #tpu.memory_space<vmem>>, %arg9: memref<1x128xf32, #tpu.memory_space<vmem>>, %arg10: memref<2x64x128xbf16, #tpu.memory_space<vmem>>, %arg11: memref<2x10x10x128xbf16, #tpu.memory_space<vmem>>) attributes {dimension_semantics = [#tpu.dimension_semantics<parallel>, #tpu.dimension_semantics<arbitrary>], iteration_bounds = array<i64: 1, 1>, scalar_prefetch = 0 : i64, scratch_operands = 1 : i64, tpu.core_type = #tpu.core_type<tc>, window_params = [{transform_indices = @transform_0, window_bounds = array<i64: 2, 4, 9, 9, 64>}, {pipeline_mode = #tpu.pipeline_mode<synchronous>, transform_indices = @transform_1, window_bounds = array<i64: 576, 128>}, {pipeline_mode = #tpu.pipeline_mode<synchronous>, transform_indices = @transform_2, window_bounds = array<i64: 1, 128>}, {transform_indices = @transform_3, window_bounds = array<i64: 1152, 128>}, {transform_indices = @transform_4, window_bounds = array<i64: 1, 128>}, {transform_indices = @transform_5, window_bounds = array<i64: 2, 64, 64>}, {transform_indices = @transform_6, window_bounds = array<i64: 64, 128>}, {transform_indices = @transform_7, window_bounds = array<i64: 1, 128>}, {transform_indices = @transform_8, window_bounds = array<i64: 2, 64, 128>}]} {
    %c0_i32 = arith.constant 0 : i32
    %0 = arith.cmpi eq, %arg1, %c0_i32 : i32
    %1 = arith.extui %0 : i1 to i32
    %c0_i32_0 = arith.constant 0 : i32
    %2 = arith.cmpi ne, %1, %c0_i32_0 : i32
    scf.if %2 {
      %c0_50 = arith.constant 0 : index
      %c0_51 = arith.constant 0 : index
      %c0_52 = arith.constant 0 : index
      %c0_53 = arith.constant 0 : index
      %c0_54 = arith.constant 0 : index
      %40 = vector.load %arg2[%c0_50, %c0_51, %c0_52, %c0_53, %c0_54] : memref<2x4x9x9x64xbf16, #tpu.memory_space<vmem>>, vector<2x1x8x8x64xbf16>
      %41 = vector.shape_cast %40 : vector<2x1x8x8x64xbf16> to vector<2x8x8x64xbf16>
      %42 = vector.shape_cast %41 : vector<2x8x8x64xbf16> to vector<128x64xbf16>
      %c0_55 = arith.constant 0 : index
      %c1_56 = arith.constant 1 : index
      %c0_57 = arith.constant 0 : index
      %c0_58 = arith.constant 0 : index
      %c0_59 = arith.constant 0 : index
      %43 = vector.load %arg2[%c0_55, %c1_56, %c0_57, %c0_58, %c0_59] : memref<2x4x9x9x64xbf16, #tpu.memory_space<vmem>>, vector<2x1x8x8x64xbf16>
      %44 = vector.shape_cast %43 : vector<2x1x8x8x64xbf16> to vector<2x8x8x64xbf16>
      %45 = vector.shape_cast %44 : vector<2x8x8x64xbf16> to vector<128x64xbf16>
      %c0_60 = arith.constant 0 : index
      %c0_61 = arith.constant 0 : index
      %c0_62 = arith.constant 0 : index
      %c1_63 = arith.constant 1 : index
      %c0_64 = arith.constant 0 : index
      %46 = vector.load %arg2[%c0_60, %c0_61, %c0_62, %c1_63, %c0_64] : memref<2x4x9x9x64xbf16, #tpu.memory_space<vmem>>, vector<2x1x8x8x64xbf16>
      %47 = vector.shape_cast %46 : vector<2x1x8x8x64xbf16> to vector<2x8x8x64xbf16>
      %48 = vector.shape_cast %47 : vector<2x8x8x64xbf16> to vector<128x64xbf16>
      %c0_65 = arith.constant 0 : index
      %c2_66 = arith.constant 2 : index
      %c0_67 = arith.constant 0 : index
      %c0_68 = arith.constant 0 : index
      %c0_69 = arith.constant 0 : index
      %49 = vector.load %arg2[%c0_65, %c2_66, %c0_67, %c0_68, %c0_69] : memref<2x4x9x9x64xbf16, #tpu.memory_space<vmem>>, vector<2x1x8x8x64xbf16>
      %50 = vector.shape_cast %49 : vector<2x1x8x8x64xbf16> to vector<2x8x8x64xbf16>
      %51 = vector.shape_cast %50 : vector<2x8x8x64xbf16> to vector<128x64xbf16>
      %c0_70 = arith.constant 0 : index
      %c3 = arith.constant 3 : index
      %c0_71 = arith.constant 0 : index
      %c0_72 = arith.constant 0 : index
      %c0_73 = arith.constant 0 : index
      %52 = vector.load %arg2[%c0_70, %c3, %c0_71, %c0_72, %c0_73] : memref<2x4x9x9x64xbf16, #tpu.memory_space<vmem>>, vector<2x1x8x8x64xbf16>
      %53 = vector.shape_cast %52 : vector<2x1x8x8x64xbf16> to vector<2x8x8x64xbf16>
      %54 = vector.shape_cast %53 : vector<2x8x8x64xbf16> to vector<128x64xbf16>
      %c0_74 = arith.constant 0 : index
      %c2_75 = arith.constant 2 : index
      %c0_76 = arith.constant 0 : index
      %c1_77 = arith.constant 1 : index
      %c0_78 = arith.constant 0 : index
      %55 = vector.load %arg2[%c0_74, %c2_75, %c0_76, %c1_77, %c0_78] : memref<2x4x9x9x64xbf16, #tpu.memory_space<vmem>>, vector<2x1x8x8x64xbf16>
      %56 = vector.shape_cast %55 : vector<2x1x8x8x64xbf16> to vector<2x8x8x64xbf16>
      %57 = vector.shape_cast %56 : vector<2x8x8x64xbf16> to vector<128x64xbf16>
      %c0_79 = arith.constant 0 : index
      %c0_80 = arith.constant 0 : index
      %c1_81 = arith.constant 1 : index
      %c0_82 = arith.constant 0 : index
      %c0_83 = arith.constant 0 : index
      %58 = vector.load %arg2[%c0_79, %c0_80, %c1_81, %c0_82, %c0_83] : memref<2x4x9x9x64xbf16, #tpu.memory_space<vmem>>, vector<2x1x8x8x64xbf16>
      %59 = vector.shape_cast %58 : vector<2x1x8x8x64xbf16> to vector<2x8x8x64xbf16>
      %60 = vector.shape_cast %59 : vector<2x8x8x64xbf16> to vector<128x64xbf16>
      %c0_84 = arith.constant 0 : index
      %c1_85 = arith.constant 1 : index
      %c1_86 = arith.constant 1 : index
      %c0_87 = arith.constant 0 : index
      %c0_88 = arith.constant 0 : index
      %61 = vector.load %arg2[%c0_84, %c1_85, %c1_86, %c0_87, %c0_88] : memref<2x4x9x9x64xbf16, #tpu.memory_space<vmem>>, vector<2x1x8x8x64xbf16>
      %62 = vector.shape_cast %61 : vector<2x1x8x8x64xbf16> to vector<2x8x8x64xbf16>
      %63 = vector.shape_cast %62 : vector<2x8x8x64xbf16> to vector<128x64xbf16>
      %c0_89 = arith.constant 0 : index
      %c0_90 = arith.constant 0 : index
      %c1_91 = arith.constant 1 : index
      %c1_92 = arith.constant 1 : index
      %c0_93 = arith.constant 0 : index
      %64 = vector.load %arg2[%c0_89, %c0_90, %c1_91, %c1_92, %c0_93] : memref<2x4x9x9x64xbf16, #tpu.memory_space<vmem>>, vector<2x1x8x8x64xbf16>
      %65 = vector.shape_cast %64 : vector<2x1x8x8x64xbf16> to vector<2x8x8x64xbf16>
      %66 = vector.shape_cast %65 : vector<2x8x8x64xbf16> to vector<128x64xbf16>
      %67 = tpu.concatenate %42, %45, %48, %51, %54, %57, %60, %63, %66 in 1 : vector<128x64xbf16>, vector<128x64xbf16>, vector<128x64xbf16>, vector<128x64xbf16>, vector<128x64xbf16>, vector<128x64xbf16>, vector<128x64xbf16>, vector<128x64xbf16>, vector<128x64xbf16> -> vector<128x576xbf16>
      %c0_94 = arith.constant 0 : index
      %c0_95 = arith.constant 0 : index
      %68 = vector.load %arg3[%c0_94, %c0_95] : memref<576x128xbf16, #tpu.memory_space<vmem>>, vector<576x128xbf16>
      %cst_96 = arith.constant dense<0.000000e+00> : vector<128x128xf32>
      %69 = tpu.matmul %67, %68, %cst_96 {dimension_numbers = #tpu.dot_dimension_numbers<[1], [0], [0], [1], [0, 0, 1, 1], [], []>} : vector<128x576xbf16>, vector<576x128xbf16>, vector<128x128xf32> -> vector<128x128xf32>
      %c0_97 = arith.constant 0 : index
      %c0_98 = arith.constant 0 : index
      %70 = vector.load %arg4[%c0_97, %c0_98] : memref<1x128xf32, #tpu.memory_space<vmem>>, vector<1x128xf32>
      %71 = vector.broadcast %70 : vector<1x128xf32> to vector<128x128xf32>
      %72 = arith.addf %69, %71 : vector<128x128xf32>
      %cst_99 = arith.constant 0.000000e+00 : f32
      %73 = vector.broadcast %cst_99 : f32 to vector<128x128xf32>
      %74 = arith.maximumf %72, %73 : vector<128x128xf32>
      %75 = vector.shape_cast %74 : vector<128x128xf32> to vector<2x8x8x128xf32>
      %76 = arith.truncf %75 : vector<2x8x8x128xf32> to vector<2x8x8x128xbf16>
      %cst_100 = arith.constant 0.000000e+00 : bf16
      %77 = vector.broadcast %cst_100 : bf16 to vector<2x1x8x128xbf16>
      %cst_101 = arith.constant 0.000000e+00 : bf16
      %78 = vector.broadcast %cst_101 : bf16 to vector<2x10x1x128xbf16>
      %79 = tpu.concatenate %77, %76, %77 in 1 : vector<2x1x8x128xbf16>, vector<2x8x8x128xbf16>, vector<2x1x8x128xbf16> -> vector<2x10x8x128xbf16>
      %80 = tpu.concatenate %78, %79, %78 in 2 : vector<2x10x1x128xbf16>, vector<2x10x8x128xbf16>, vector<2x10x1x128xbf16> -> vector<2x10x10x128xbf16>
      %c0_102 = arith.constant 0 : index
      %c0_103 = arith.constant 0 : index
      %c0_104 = arith.constant 0 : index
      %c0_105 = arith.constant 0 : index
      %81 = vector.load %arg11[%c0_102, %c0_103, %c0_104, %c0_105] : memref<2x10x10x128xbf16, #tpu.memory_space<vmem>>, vector<2x10x10x128xbf16>
      tpu.vector_store %arg11[%c0_102, %c0_103, %c0_104, %c0_105], %80 {strides = array<i32>} : memref<2x10x10x128xbf16, #tpu.memory_space<vmem>>, vector<2x10x10x128xbf16>,
    } else {
    }
    %c0 = arith.constant 0 : index
    %c0_1 = arith.constant 0 : index
    %c0_2 = arith.constant 0 : index
    %c0_3 = arith.constant 0 : index
    %3 = vector.load %arg11[%c0, %c0_1, %c0_2, %c0_3] : memref<2x10x10x128xbf16, #tpu.memory_space<vmem>>, vector<2x8x8x128xbf16>
    %4 = vector.shape_cast %3 : vector<2x8x8x128xbf16> to vector<128x128xbf16>
    %c0_4 = arith.constant 0 : index
    %c0_5 = arith.constant 0 : index
    %c1 = arith.constant 1 : index
    %c0_6 = arith.constant 0 : index
    %5 = vector.load %arg11[%c0_4, %c0_5, %c1, %c0_6] : memref<2x10x10x128xbf16, #tpu.memory_space<vmem>>, vector<2x8x8x128xbf16>
    %6 = vector.shape_cast %5 : vector<2x8x8x128xbf16> to vector<128x128xbf16>
    %c0_7 = arith.constant 0 : index
    %c0_8 = arith.constant 0 : index
    %c2 = arith.constant 2 : index
    %c0_9 = arith.constant 0 : index
    %7 = vector.load %arg11[%c0_7, %c0_8, %c2, %c0_9] : memref<2x10x10x128xbf16, #tpu.memory_space<vmem>>, vector<2x8x8x128xbf16>
    %8 = vector.shape_cast %7 : vector<2x8x8x128xbf16> to vector<128x128xbf16>
    %c0_10 = arith.constant 0 : index
    %c1_11 = arith.constant 1 : index
    %c0_12 = arith.constant 0 : index
    %c0_13 = arith.constant 0 : index
    %9 = vector.load %arg11[%c0_10, %c1_11, %c0_12, %c0_13] : memref<2x10x10x128xbf16, #tpu.memory_space<vmem>>, vector<2x8x8x128xbf16>
    %10 = vector.shape_cast %9 : vector<2x8x8x128xbf16> to vector<128x128xbf16>
    %c0_14 = arith.constant 0 : index
    %c1_15 = arith.constant 1 : index
    %c1_16 = arith.constant 1 : index
    %c0_17 = arith.constant 0 : index
    %11 = vector.load %arg11[%c0_14, %c1_15, %c1_16, %c0_17] : memref<2x10x10x128xbf16, #tpu.memory_space<vmem>>, vector<2x8x8x128xbf16>
    %12 = vector.shape_cast %11 : vector<2x8x8x128xbf16> to vector<128x128xbf16>
    %c0_18 = arith.constant 0 : index
    %c1_19 = arith.constant 1 : index
    %c2_20 = arith.constant 2 : index
    %c0_21 = arith.constant 0 : index
    %13 = vector.load %arg11[%c0_18, %c1_19, %c2_20, %c0_21] : memref<2x10x10x128xbf16, #tpu.memory_space<vmem>>, vector<2x8x8x128xbf16>
    %14 = vector.shape_cast %13 : vector<2x8x8x128xbf16> to vector<128x128xbf16>
    %c0_22 = arith.constant 0 : index
    %c2_23 = arith.constant 2 : index
    %c0_24 = arith.constant 0 : index
    %c0_25 = arith.constant 0 : index
    %15 = vector.load %arg11[%c0_22, %c2_23, %c0_24, %c0_25] : memref<2x10x10x128xbf16, #tpu.memory_space<vmem>>, vector<2x8x8x128xbf16>
    %16 = vector.shape_cast %15 : vector<2x8x8x128xbf16> to vector<128x128xbf16>
    %c0_26 = arith.constant 0 : index
    %c2_27 = arith.constant 2 : index
    %c1_28 = arith.constant 1 : index
    %c0_29 = arith.constant 0 : index
    %17 = vector.load %arg11[%c0_26, %c2_27, %c1_28, %c0_29] : memref<2x10x10x128xbf16, #tpu.memory_space<vmem>>, vector<2x8x8x128xbf16>
    %18 = vector.shape_cast %17 : vector<2x8x8x128xbf16> to vector<128x128xbf16>
    %c0_30 = arith.constant 0 : index
    %c2_31 = arith.constant 2 : index
    %c2_32 = arith.constant 2 : index
    %c0_33 = arith.constant 0 : index
    %19 = vector.load %arg11[%c0_30, %c2_31, %c2_32, %c0_33] : memref<2x10x10x128xbf16, #tpu.memory_space<vmem>>, vector<2x8x8x128xbf16>
    %20 = vector.shape_cast %19 : vector<2x8x8x128xbf16> to vector<128x128xbf16>
    %21 = tpu.concatenate %4, %6, %8, %10, %12, %14, %16, %18, %20 in 1 : vector<128x128xbf16>, vector<128x128xbf16>, vector<128x128xbf16>, vector<128x128xbf16>, vector<128x128xbf16>, vector<128x128xbf16>, vector<128x128xbf16>, vector<128x128xbf16>, vector<128x128xbf16> -> vector<128x1152xbf16>
    %c0_34 = arith.constant 0 : index
    %c0_35 = arith.constant 0 : index
    %22 = vector.load %arg5[%c0_34, %c0_35] : memref<1152x128xbf16, #tpu.memory_space<vmem>>, vector<1152x128xbf16>
    %cst = arith.constant dense<0.000000e+00> : vector<128x128xf32>
    %23 = tpu.matmul %21, %22, %cst {dimension_numbers = #tpu.dot_dimension_numbers<[1], [0], [0], [1], [0, 0, 1, 1], [], []>} : vector<128x1152xbf16>, vector<1152x128xbf16>, vector<128x128xf32> -> vector<128x128xf32>
    %c0_36 = arith.constant 0 : index
    %c0_37 = arith.constant 0 : index
    %24 = vector.load %arg6[%c0_36, %c0_37] : memref<1x128xf32, #tpu.memory_space<vmem>>, vector<1x128xf32>
    %25 = vector.broadcast %24 : vector<1x128xf32> to vector<128x128xf32>
    %26 = arith.addf %23, %25 : vector<128x128xf32>
    %c0_38 = arith.constant 0 : index
    %c0_39 = arith.constant 0 : index
    %c0_40 = arith.constant 0 : index
    %27 = vector.load %arg7[%c0_38, %c0_39, %c0_40] : memref<2x64x64xbf16, #tpu.memory_space<vmem>>, vector<2x64x64xbf16>
    %28 = vector.shape_cast %27 : vector<2x64x64xbf16> to vector<128x64xbf16>
    %c0_41 = arith.constant 0 : index
    %c0_42 = arith.constant 0 : index
    %29 = vector.load %arg8[%c0_41, %c0_42] : memref<64x128xbf16, #tpu.memory_space<vmem>>, vector<64x128xbf16>
    %cst_43 = arith.constant dense<0.000000e+00> : vector<128x128xf32>
    %30 = tpu.matmul %28, %29, %cst_43 {dimension_numbers = #tpu.dot_dimension_numbers<[1], [0], [0], [1], [0, 0, 1, 1], [], []>} : vector<128x64xbf16>, vector<64x128xbf16>, vector<128x128xf32> -> vector<128x128xf32>
    %c0_44 = arith.constant 0 : index
    %c0_45 = arith.constant 0 : index
    %31 = vector.load %arg9[%c0_44, %c0_45] : memref<1x128xf32, #tpu.memory_space<vmem>>, vector<1x128xf32>
    %32 = vector.broadcast %31 : vector<1x128xf32> to vector<128x128xf32>
    %33 = arith.addf %30, %32 : vector<128x128xf32>
    %34 = arith.addf %26, %33 : vector<128x128xf32>
    %cst_46 = arith.constant 0.000000e+00 : f32
    %35 = vector.broadcast %cst_46 : f32 to vector<128x128xf32>
    %36 = arith.maximumf %34, %35 : vector<128x128xf32>
    %37 = vector.shape_cast %36 : vector<128x128xf32> to vector<2x64x128xf32>
    %38 = arith.truncf %37 : vector<2x64x128xf32> to vector<2x64x128xbf16>
    %c0_47 = arith.constant 0 : index
    %c0_48 = arith.constant 0 : index
    %c0_49 = arith.constant 0 : index
    %39 = vector.load %arg10[%c0_47, %c0_48, %c0_49] : memref<2x64x128xbf16, #tpu.memory_space<vmem>>, vector<2x64x128xbf16>
    tpu.vector_store %arg10[%c0_47, %c0_48, %c0_49], %38 {strides = array<i32>} : memref<2x64x128xbf16, #tpu.memory_space<vmem>>, vector<2x64x128xbf16>,
    return
  }
  func.func @transform_0(%arg0: i32, %arg1: i32) -> (i32, i32, i32, i32, i32) {
    %c0_i32 = arith.constant 0 : i32
    %c0_i32_0 = arith.constant 0 : i32
    %c0_i32_1 = arith.constant 0 : i32
    %c0_i32_2 = arith.constant 0 : i32
    %c0_i32_3 = arith.constant 0 : i32
    return %arg0, %c0_i32, %c0_i32_0, %c0_i32_1, %c0_i32_2 : i32, i32, i32, i32, i32
  }
  func.func @transform_1(%arg0: i32, %arg1: i32) -> (i32, i32) {
    %c0_i32 = arith.constant 0 : i32
    %c0_i32_0 = arith.constant 0 : i32
    %c0_i32_1 = arith.constant 0 : i32
    return %c0_i32, %c0_i32_0 : i32, i32
  }
  func.func @transform_2(%arg0: i32, %arg1: i32) -> (i32, i32) {
    %c0_i32 = arith.constant 0 : i32
    %c0_i32_0 = arith.constant 0 : i32
    %c0_i32_1 = arith.constant 0 : i32
    return %c0_i32, %c0_i32_0 : i32, i32
  }
  func.func @transform_3(%arg0: i32, %arg1: i32) -> (i32, i32) {
    %c0_i32 = arith.constant 0 : i32
    %c0_i32_0 = arith.constant 0 : i32
    return %c0_i32, %arg1 : i32, i32
  }
  func.func @transform_4(%arg0: i32, %arg1: i32) -> (i32, i32) {
    %c0_i32 = arith.constant 0 : i32
    %c0_i32_0 = arith.constant 0 : i32
    return %c0_i32, %arg1 : i32, i32
  }
  func.func @transform_5(%arg0: i32, %arg1: i32) -> (i32, i32, i32) {
    %c0_i32 = arith.constant 0 : i32
    %c0_i32_0 = arith.constant 0 : i32
    %c0_i32_1 = arith.constant 0 : i32
    return %arg0, %c0_i32, %c0_i32_0 : i32, i32, i32
  }
  func.func @transform_6(%arg0: i32, %arg1: i32) -> (i32, i32) {
    %c0_i32 = arith.constant 0 : i32
    %c0_i32_0 = arith.constant 0 : i32
    return %c0_i32, %arg1 : i32, i32
  }
  func.func @transform_7(%arg0: i32, %arg1: i32) -> (i32, i32) {
    %c0_i32 = arith.constant 0 : i32
    %c0_i32_0 = arith.constant 0 : i32
    return %c0_i32, %arg1 : i32, i32
  }
  func.func @transform_8(%arg0: i32, %arg1: i32) -> (i32, i32, i32) {
    %c0_i32 = arith.constant 0 : i32
    %c0_i32_0 = arith.constant 0 : i32
    return %arg0, %c0_i32, %arg1 : i32, i32, i32
  }
}

module attributes {stable_mosaic.version = 11 : i64} {
  func.func @_residual_block_kernel(%arg0: i32, %arg1: i32, %arg2: memref<2x1x10x10x128xbf16, #tpu.memory_space<vmem>>, %arg3: memref<1152x128xbf16, #tpu.memory_space<vmem>>, %arg4: memref<1x128xf32, #tpu.memory_space<vmem>>, %arg5: memref<1152x128xbf16, #tpu.memory_space<vmem>>, %arg6: memref<1x128xf32, #tpu.memory_space<vmem>>, %arg7: memref<2x64x128xbf16, #tpu.memory_space<vmem>>, %arg8: memref<2x64x128xf32, #tpu.memory_space<vmem>>, %arg9: memref<2x10x10x128xbf16, #tpu.memory_space<vmem>>) attributes {dimension_semantics = [#tpu.dimension_semantics<parallel>, #tpu.dimension_semantics<arbitrary>], iteration_bounds = array<i64: 1, 1>, scalar_prefetch = 0 : i64, scratch_operands = 1 : i64, tpu.core_type = #tpu.core_type<tc>, window_params = [{transform_indices = @transform_0, window_bounds = array<i64: 2, 1, 10, 10, 128>}, {pipeline_mode = #tpu.pipeline_mode<synchronous>, transform_indices = @transform_1, window_bounds = array<i64: 1152, 128>}, {pipeline_mode = #tpu.pipeline_mode<synchronous>, transform_indices = @transform_2, window_bounds = array<i64: 1, 128>}, {transform_indices = @transform_3, window_bounds = array<i64: 1152, 128>}, {transform_indices = @transform_4, window_bounds = array<i64: 1, 128>}, {transform_indices = @transform_5, window_bounds = array<i64: 2, 64, 128>}, {transform_indices = @transform_6, window_bounds = array<i64: 2, 64, 128>}]} {
    %c0_i32 = arith.constant 0 : i32
    %0 = arith.cmpi eq, %arg1, %c0_i32 : i32
    %1 = arith.extui %0 : i1 to i32
    %c0_i32_0 = arith.constant 0 : i32
    %2 = arith.cmpi ne, %1, %c0_i32_0 : i32
    scf.if %2 {
      %c0_45 = arith.constant 0 : index
      %c0_46 = arith.constant 0 : index
      %c0_47 = arith.constant 0 : index
      %c0_48 = arith.constant 0 : index
      %c0_49 = arith.constant 0 : index
      %35 = vector.load %arg2[%c0_45, %c0_46, %c0_47, %c0_48, %c0_49] : memref<2x1x10x10x128xbf16, #tpu.memory_space<vmem>>, vector<2x1x8x8x128xbf16>
      %36 = vector.shape_cast %35 : vector<2x1x8x8x128xbf16> to vector<2x8x8x128xbf16>
      %37 = vector.shape_cast %36 : vector<2x8x8x128xbf16> to vector<128x128xbf16>
      %c0_50 = arith.constant 0 : index
      %c0_51 = arith.constant 0 : index
      %c0_52 = arith.constant 0 : index
      %c1_53 = arith.constant 1 : index
      %c0_54 = arith.constant 0 : index
      %38 = vector.load %arg2[%c0_50, %c0_51, %c0_52, %c1_53, %c0_54] : memref<2x1x10x10x128xbf16, #tpu.memory_space<vmem>>, vector<2x1x8x8x128xbf16>
      %39 = vector.shape_cast %38 : vector<2x1x8x8x128xbf16> to vector<2x8x8x128xbf16>
      %40 = vector.shape_cast %39 : vector<2x8x8x128xbf16> to vector<128x128xbf16>
      %c0_55 = arith.constant 0 : index
      %c0_56 = arith.constant 0 : index
      %c0_57 = arith.constant 0 : index
      %c2_58 = arith.constant 2 : index
      %c0_59 = arith.constant 0 : index
      %41 = vector.load %arg2[%c0_55, %c0_56, %c0_57, %c2_58, %c0_59] : memref<2x1x10x10x128xbf16, #tpu.memory_space<vmem>>, vector<2x1x8x8x128xbf16>
      %42 = vector.shape_cast %41 : vector<2x1x8x8x128xbf16> to vector<2x8x8x128xbf16>
      %43 = vector.shape_cast %42 : vector<2x8x8x128xbf16> to vector<128x128xbf16>
      %c0_60 = arith.constant 0 : index
      %c0_61 = arith.constant 0 : index
      %c1_62 = arith.constant 1 : index
      %c0_63 = arith.constant 0 : index
      %c0_64 = arith.constant 0 : index
      %44 = vector.load %arg2[%c0_60, %c0_61, %c1_62, %c0_63, %c0_64] : memref<2x1x10x10x128xbf16, #tpu.memory_space<vmem>>, vector<2x1x8x8x128xbf16>
      %45 = vector.shape_cast %44 : vector<2x1x8x8x128xbf16> to vector<2x8x8x128xbf16>
      %46 = vector.shape_cast %45 : vector<2x8x8x128xbf16> to vector<128x128xbf16>
      %c0_65 = arith.constant 0 : index
      %c0_66 = arith.constant 0 : index
      %c1_67 = arith.constant 1 : index
      %c1_68 = arith.constant 1 : index
      %c0_69 = arith.constant 0 : index
      %47 = vector.load %arg2[%c0_65, %c0_66, %c1_67, %c1_68, %c0_69] : memref<2x1x10x10x128xbf16, #tpu.memory_space<vmem>>, vector<2x1x8x8x128xbf16>
      %48 = vector.shape_cast %47 : vector<2x1x8x8x128xbf16> to vector<2x8x8x128xbf16>
      %49 = vector.shape_cast %48 : vector<2x8x8x128xbf16> to vector<128x128xbf16>
      %c0_70 = arith.constant 0 : index
      %c0_71 = arith.constant 0 : index
      %c1_72 = arith.constant 1 : index
      %c2_73 = arith.constant 2 : index
      %c0_74 = arith.constant 0 : index
      %50 = vector.load %arg2[%c0_70, %c0_71, %c1_72, %c2_73, %c0_74] : memref<2x1x10x10x128xbf16, #tpu.memory_space<vmem>>, vector<2x1x8x8x128xbf16>
      %51 = vector.shape_cast %50 : vector<2x1x8x8x128xbf16> to vector<2x8x8x128xbf16>
      %52 = vector.shape_cast %51 : vector<2x8x8x128xbf16> to vector<128x128xbf16>
      %c0_75 = arith.constant 0 : index
      %c0_76 = arith.constant 0 : index
      %c2_77 = arith.constant 2 : index
      %c0_78 = arith.constant 0 : index
      %c0_79 = arith.constant 0 : index
      %53 = vector.load %arg2[%c0_75, %c0_76, %c2_77, %c0_78, %c0_79] : memref<2x1x10x10x128xbf16, #tpu.memory_space<vmem>>, vector<2x1x8x8x128xbf16>
      %54 = vector.shape_cast %53 : vector<2x1x8x8x128xbf16> to vector<2x8x8x128xbf16>
      %55 = vector.shape_cast %54 : vector<2x8x8x128xbf16> to vector<128x128xbf16>
      %c0_80 = arith.constant 0 : index
      %c0_81 = arith.constant 0 : index
      %c2_82 = arith.constant 2 : index
      %c1_83 = arith.constant 1 : index
      %c0_84 = arith.constant 0 : index
      %56 = vector.load %arg2[%c0_80, %c0_81, %c2_82, %c1_83, %c0_84] : memref<2x1x10x10x128xbf16, #tpu.memory_space<vmem>>, vector<2x1x8x8x128xbf16>
      %57 = vector.shape_cast %56 : vector<2x1x8x8x128xbf16> to vector<2x8x8x128xbf16>
      %58 = vector.shape_cast %57 : vector<2x8x8x128xbf16> to vector<128x128xbf16>
      %c0_85 = arith.constant 0 : index
      %c0_86 = arith.constant 0 : index
      %c2_87 = arith.constant 2 : index
      %c2_88 = arith.constant 2 : index
      %c0_89 = arith.constant 0 : index
      %59 = vector.load %arg2[%c0_85, %c0_86, %c2_87, %c2_88, %c0_89] : memref<2x1x10x10x128xbf16, #tpu.memory_space<vmem>>, vector<2x1x8x8x128xbf16>
      %60 = vector.shape_cast %59 : vector<2x1x8x8x128xbf16> to vector<2x8x8x128xbf16>
      %61 = vector.shape_cast %60 : vector<2x8x8x128xbf16> to vector<128x128xbf16>
      %62 = tpu.concatenate %37, %40, %43, %46, %49, %52, %55, %58, %61 in 1 : vector<128x128xbf16>, vector<128x128xbf16>, vector<128x128xbf16>, vector<128x128xbf16>, vector<128x128xbf16>, vector<128x128xbf16>, vector<128x128xbf16>, vector<128x128xbf16>, vector<128x128xbf16> -> vector<128x1152xbf16>
      %c0_90 = arith.constant 0 : index
      %c0_91 = arith.constant 0 : index
      %63 = vector.load %arg3[%c0_90, %c0_91] : memref<1152x128xbf16, #tpu.memory_space<vmem>>, vector<1152x128xbf16>
      %cst_92 = arith.constant dense<0.000000e+00> : vector<128x128xf32>
      %64 = tpu.matmul %62, %63, %cst_92 {dimension_numbers = #tpu.dot_dimension_numbers<[1], [0], [0], [1], [0, 0, 1, 1], [], []>} : vector<128x1152xbf16>, vector<1152x128xbf16>, vector<128x128xf32> -> vector<128x128xf32>
      %c0_93 = arith.constant 0 : index
      %c0_94 = arith.constant 0 : index
      %65 = vector.load %arg4[%c0_93, %c0_94] : memref<1x128xf32, #tpu.memory_space<vmem>>, vector<1x128xf32>
      %66 = vector.broadcast %65 : vector<1x128xf32> to vector<128x128xf32>
      %67 = arith.addf %64, %66 : vector<128x128xf32>
      %cst_95 = arith.constant 0.000000e+00 : f32
      %68 = vector.broadcast %cst_95 : f32 to vector<128x128xf32>
      %69 = arith.maximumf %67, %68 : vector<128x128xf32>
      %70 = vector.shape_cast %69 : vector<128x128xf32> to vector<2x8x8x128xf32>
      %71 = arith.truncf %70 : vector<2x8x8x128xf32> to vector<2x8x8x128xbf16>
      %cst_96 = arith.constant 0.000000e+00 : bf16
      %72 = vector.broadcast %cst_96 : bf16 to vector<2x1x8x128xbf16>
      %cst_97 = arith.constant 0.000000e+00 : bf16
      %73 = vector.broadcast %cst_97 : bf16 to vector<2x10x1x128xbf16>
      %74 = tpu.concatenate %72, %71, %72 in 1 : vector<2x1x8x128xbf16>, vector<2x8x8x128xbf16>, vector<2x1x8x128xbf16> -> vector<2x10x8x128xbf16>
      %75 = tpu.concatenate %73, %74, %73 in 2 : vector<2x10x1x128xbf16>, vector<2x10x8x128xbf16>, vector<2x10x1x128xbf16> -> vector<2x10x10x128xbf16>
      %c0_98 = arith.constant 0 : index
      %c0_99 = arith.constant 0 : index
      %c0_100 = arith.constant 0 : index
      %c0_101 = arith.constant 0 : index
      %76 = vector.load %arg9[%c0_98, %c0_99, %c0_100, %c0_101] : memref<2x10x10x128xbf16, #tpu.memory_space<vmem>>, vector<2x10x10x128xbf16>
      tpu.vector_store %arg9[%c0_98, %c0_99, %c0_100, %c0_101], %75 {strides = array<i32>} : memref<2x10x10x128xbf16, #tpu.memory_space<vmem>>, vector<2x10x10x128xbf16>,
    } else {
    }
    %c0 = arith.constant 0 : index
    %c0_1 = arith.constant 0 : index
    %c0_2 = arith.constant 0 : index
    %c0_3 = arith.constant 0 : index
    %3 = vector.load %arg9[%c0, %c0_1, %c0_2, %c0_3] : memref<2x10x10x128xbf16, #tpu.memory_space<vmem>>, vector<2x8x8x128xbf16>
    %4 = vector.shape_cast %3 : vector<2x8x8x128xbf16> to vector<128x128xbf16>
    %c0_4 = arith.constant 0 : index
    %c0_5 = arith.constant 0 : index
    %c1 = arith.constant 1 : index
    %c0_6 = arith.constant 0 : index
    %5 = vector.load %arg9[%c0_4, %c0_5, %c1, %c0_6] : memref<2x10x10x128xbf16, #tpu.memory_space<vmem>>, vector<2x8x8x128xbf16>
    %6 = vector.shape_cast %5 : vector<2x8x8x128xbf16> to vector<128x128xbf16>
    %c0_7 = arith.constant 0 : index
    %c0_8 = arith.constant 0 : index
    %c2 = arith.constant 2 : index
    %c0_9 = arith.constant 0 : index
    %7 = vector.load %arg9[%c0_7, %c0_8, %c2, %c0_9] : memref<2x10x10x128xbf16, #tpu.memory_space<vmem>>, vector<2x8x8x128xbf16>
    %8 = vector.shape_cast %7 : vector<2x8x8x128xbf16> to vector<128x128xbf16>
    %c0_10 = arith.constant 0 : index
    %c1_11 = arith.constant 1 : index
    %c0_12 = arith.constant 0 : index
    %c0_13 = arith.constant 0 : index
    %9 = vector.load %arg9[%c0_10, %c1_11, %c0_12, %c0_13] : memref<2x10x10x128xbf16, #tpu.memory_space<vmem>>, vector<2x8x8x128xbf16>
    %10 = vector.shape_cast %9 : vector<2x8x8x128xbf16> to vector<128x128xbf16>
    %c0_14 = arith.constant 0 : index
    %c1_15 = arith.constant 1 : index
    %c1_16 = arith.constant 1 : index
    %c0_17 = arith.constant 0 : index
    %11 = vector.load %arg9[%c0_14, %c1_15, %c1_16, %c0_17] : memref<2x10x10x128xbf16, #tpu.memory_space<vmem>>, vector<2x8x8x128xbf16>
    %12 = vector.shape_cast %11 : vector<2x8x8x128xbf16> to vector<128x128xbf16>
    %c0_18 = arith.constant 0 : index
    %c1_19 = arith.constant 1 : index
    %c2_20 = arith.constant 2 : index
    %c0_21 = arith.constant 0 : index
    %13 = vector.load %arg9[%c0_18, %c1_19, %c2_20, %c0_21] : memref<2x10x10x128xbf16, #tpu.memory_space<vmem>>, vector<2x8x8x128xbf16>
    %14 = vector.shape_cast %13 : vector<2x8x8x128xbf16> to vector<128x128xbf16>
    %c0_22 = arith.constant 0 : index
    %c2_23 = arith.constant 2 : index
    %c0_24 = arith.constant 0 : index
    %c0_25 = arith.constant 0 : index
    %15 = vector.load %arg9[%c0_22, %c2_23, %c0_24, %c0_25] : memref<2x10x10x128xbf16, #tpu.memory_space<vmem>>, vector<2x8x8x128xbf16>
    %16 = vector.shape_cast %15 : vector<2x8x8x128xbf16> to vector<128x128xbf16>
    %c0_26 = arith.constant 0 : index
    %c2_27 = arith.constant 2 : index
    %c1_28 = arith.constant 1 : index
    %c0_29 = arith.constant 0 : index
    %17 = vector.load %arg9[%c0_26, %c2_27, %c1_28, %c0_29] : memref<2x10x10x128xbf16, #tpu.memory_space<vmem>>, vector<2x8x8x128xbf16>
    %18 = vector.shape_cast %17 : vector<2x8x8x128xbf16> to vector<128x128xbf16>
    %c0_30 = arith.constant 0 : index
    %c2_31 = arith.constant 2 : index
    %c2_32 = arith.constant 2 : index
    %c0_33 = arith.constant 0 : index
    %19 = vector.load %arg9[%c0_30, %c2_31, %c2_32, %c0_33] : memref<2x10x10x128xbf16, #tpu.memory_space<vmem>>, vector<2x8x8x128xbf16>
    %20 = vector.shape_cast %19 : vector<2x8x8x128xbf16> to vector<128x128xbf16>
    %21 = tpu.concatenate %4, %6, %8, %10, %12, %14, %16, %18, %20 in 1 : vector<128x128xbf16>, vector<128x128xbf16>, vector<128x128xbf16>, vector<128x128xbf16>, vector<128x128xbf16>, vector<128x128xbf16>, vector<128x128xbf16>, vector<128x128xbf16>, vector<128x128xbf16> -> vector<128x1152xbf16>
    %c0_34 = arith.constant 0 : index
    %c0_35 = arith.constant 0 : index
    %22 = vector.load %arg5[%c0_34, %c0_35] : memref<1152x128xbf16, #tpu.memory_space<vmem>>, vector<1152x128xbf16>
    %cst = arith.constant dense<0.000000e+00> : vector<128x128xf32>
    %23 = tpu.matmul %21, %22, %cst {dimension_numbers = #tpu.dot_dimension_numbers<[1], [0], [0], [1], [0, 0, 1, 1], [], []>} : vector<128x1152xbf16>, vector<1152x128xbf16>, vector<128x128xf32> -> vector<128x128xf32>
    %c0_36 = arith.constant 0 : index
    %c0_37 = arith.constant 0 : index
    %24 = vector.load %arg6[%c0_36, %c0_37] : memref<1x128xf32, #tpu.memory_space<vmem>>, vector<1x128xf32>
    %25 = vector.broadcast %24 : vector<1x128xf32> to vector<128x128xf32>
    %26 = arith.addf %23, %25 : vector<128x128xf32>
    %c0_38 = arith.constant 0 : index
    %c0_39 = arith.constant 0 : index
    %c0_40 = arith.constant 0 : index
    %27 = vector.load %arg7[%c0_38, %c0_39, %c0_40] : memref<2x64x128xbf16, #tpu.memory_space<vmem>>, vector<2x64x128xbf16>
    %28 = vector.shape_cast %27 : vector<2x64x128xbf16> to vector<128x128xbf16>
    %29 = arith.extf %28 : vector<128x128xbf16> to vector<128x128xf32>
    %30 = arith.addf %26, %29 : vector<128x128xf32>
    %cst_41 = arith.constant 0.000000e+00 : f32
    %31 = vector.broadcast %cst_41 : f32 to vector<128x128xf32>
    %32 = arith.maximumf %30, %31 : vector<128x128xf32>
    %33 = vector.shape_cast %32 : vector<128x128xf32> to vector<2x64x128xf32>
    %c0_42 = arith.constant 0 : index
    %c0_43 = arith.constant 0 : index
    %c0_44 = arith.constant 0 : index
    %34 = vector.load %arg8[%c0_42, %c0_43, %c0_44] : memref<2x64x128xf32, #tpu.memory_space<vmem>>, vector<2x64x128xf32>
    tpu.vector_store %arg8[%c0_42, %c0_43, %c0_44], %33 {strides = array<i32>} : memref<2x64x128xf32, #tpu.memory_space<vmem>>, vector<2x64x128xf32>,
    return
  }
  func.func @transform_0(%arg0: i32, %arg1: i32) -> (i32, i32, i32, i32, i32) {
    %c0_i32 = arith.constant 0 : i32
    %c0_i32_0 = arith.constant 0 : i32
    %c0_i32_1 = arith.constant 0 : i32
    %c0_i32_2 = arith.constant 0 : i32
    %c0_i32_3 = arith.constant 0 : i32
    return %arg0, %c0_i32, %c0_i32_0, %c0_i32_1, %c0_i32_2 : i32, i32, i32, i32, i32
  }
  func.func @transform_1(%arg0: i32, %arg1: i32) -> (i32, i32) {
    %c0_i32 = arith.constant 0 : i32
    %c0_i32_0 = arith.constant 0 : i32
    %c0_i32_1 = arith.constant 0 : i32
    return %c0_i32, %c0_i32_0 : i32, i32
  }
  func.func @transform_2(%arg0: i32, %arg1: i32) -> (i32, i32) {
    %c0_i32 = arith.constant 0 : i32
    %c0_i32_0 = arith.constant 0 : i32
    %c0_i32_1 = arith.constant 0 : i32
    return %c0_i32, %c0_i32_0 : i32, i32
  }
  func.func @transform_3(%arg0: i32, %arg1: i32) -> (i32, i32) {
    %c0_i32 = arith.constant 0 : i32
    %c0_i32_0 = arith.constant 0 : i32
    return %c0_i32, %arg1 : i32, i32
  }
  func.func @transform_4(%arg0: i32, %arg1: i32) -> (i32, i32) {
    %c0_i32 = arith.constant 0 : i32
    %c0_i32_0 = arith.constant 0 : i32
    return %c0_i32, %arg1 : i32, i32
  }
  func.func @transform_5(%arg0: i32, %arg1: i32) -> (i32, i32, i32) {
    %c0_i32 = arith.constant 0 : i32
    %c0_i32_0 = arith.constant 0 : i32
    return %arg0, %c0_i32, %arg1 : i32, i32, i32
  }
  func.func @transform_6(%arg0: i32, %arg1: i32) -> (i32, i32, i32) {
    %c0_i32 = arith.constant 0 : i32
    %c0_i32_0 = arith.constant 0 : i32
    return %arg0, %c0_i32, %arg1 : i32, i32, i32
  }
}

</mosaic_0001>

<bundles_post_ra>
// kernel: forward.2
= control target key start
LH: loop header
LB: loop body
LE: loop exit
PB: predicated region body
PF: predicated region fallthrough
CT: control target
= control target key end

     0   :  { %s6453_s17 = smov 64   ;;  %vm83_vm0 = vsmask.f32 3328  ;;  %vm84_vm1 = vsmask.f32 7440  ;;  %vm1234_vm3 = vcmask 523264   ;;  %s8827_s0 = inlined_call_operand.vmem [shape: bf16[2,4,9,9,64], index: 0, kind: input, shape index: {}]   ;;  %s8828_s1 = inlined_call_operand.vmem [shape: bf16[576,128], index: 1, kind: input, shape index: {}]   ;;  %s8829_s3 = inlined_call_operand.vmem [shape: bf16[1152,128], index: 3, kind: input, shape index: {}]   ;;  %s8830_s2 = inlined_call_operand.vmem [shape: f32[1,128], index: 2, kind: input, shape index: {}]   ;;  %s8831_s6 = inlined_call_operand.vmem [shape: bf16[64,128], index: 6, kind: input, shape index: {}]   ;;  %s8832_s5 = inlined_call_operand.vmem [shape: bf16[2,64,64], index: 5, kind: input, shape index: {}]   ;;  %s8833_s4 = inlined_call_operand.vmem [shape: f32[1,128], index: 4, kind: input, shape index: {}]   ;;  %s8834_s7 = inlined_call_operand.vmem [shape: f32[1,128], index: 7, kind: input, shape index: {}]   ;;  %s8835_s8 = inlined_call_operand.vmem [shape: bf16[2,64,128], index: 8, kind: output, shape index: {}]  }
   0x1   :  { %v5205_v0 = vld [vmem:[%s8827_s0 + $0x90] sm:$0xf]  ;;  %v5206_v1 = vld [vmem:[%s8827_s0 + $0x98] sm:$0xf]  ;;  %v5207_v2 = vld [vmem:[%s8827_s0 + $0xa0] sm:$0xf] }
   0x2   :  { %v375_v3 = vshrl.u32 %v5206_v1, 16  ;;  %v378_v4 = vshll.u32 %v5206_v1, 16  ;;  %v5325_v5 = vcombine.low %v5205_v0, %v5206_v1  ;;  %v361_v6 = vshrl.u32 %v5205_v0, 16  ;;  %v5208_v7 = vld [vmem:[%s8827_s0 + $0xa8] sm:$0xf]  ;;  %v6282_v8 = vld [vmem:[%s8828_s1 + $0x78] sm:$0xff]   ;;  %vm6673_vm2 = vmor %vm83_vm0, %vm84_vm1 }
   0x3   :  { %v364_v9 = vshll.u32 %v5205_v0, 16  ;;  %v403_v10 = vshrl.u32 %v5208_v7, 16  ;;  %v406_v11 = vshll.u32 %v5208_v7, 16  ;;  %v5326_v12 = vcombine.low %v5207_v2, %v5208_v7  ;;  %v6283_v13 = vld [vmem:[%s8828_s1 + $0x38] sm:$0xff]   ;;  %5745 = vmatprep.subr.bf16.mxu0 %v6282_v8  ;;  %v6261_v22 = vld [vmem:[%s8827_s0 + $0x48] ss:$8 sps:$4 sm:$0xff]  }
   0x4   :  { %v377_v14 = vrot.slane %v375_v3, 4  ;;  %v380_v15 = vrot.slane %v378_v4, 5  ;;  %1018 = vrot.lane.b32.xlu0 %v5325_v5, %s6453_s17  ;;  %v363_v16 = vrot.slane %v361_v6, 4  ;;  %v389_v17 = vshrl.u32 %v5207_v2, 16  ;;  %5746 = vmatpush3.bf16.msra.mxu0 %v6283_v13  ;;  %v6285_v25 = vld [vmem:[%s8828_s1 + $0x70] sm:$0xff]   ;;  %v6287_v34 = vld [vmem:[%s8828_s1 + $0x68] sm:$0xff]  }
   0x5   :  { %v366_v18 = vrot.slane %v364_v9, 5  ;;  %v405_v19 = vrot.slane %v403_v10, 4  ;;  %v408_v20 = vrot.slane %v406_v11, 5  ;;  %1020 = vrot.lane.b32.xlu1 %v5326_v12, %s6453_s17  ;;  %v392_v21 = vshll.u32 %v5207_v2, 16  ;;  %v6262_v28 = vld [vmem:[%s8827_s0 + $0x58] ss:$8 sps:$4 sm:$0xff]   ;;  %5747 = vmatprep.subr.bf16.mxu0 %v6285_v25 }
   0x6   :  { %v381_v23 = vor.u32 %v380_v15, %v377_v14  ;;  %v391_v24 = vrot.slane %v389_v17, 4  ;;  %v5209_v29 = vld [vmem:[%s8827_s0 + $0xb0] sm:$0xf]  ;;  %v5210_v32 = vld [vmem:[%s8827_s0 + $0xb8] sm:$0xf]  ;;  %v6288_v35 = vld [vmem:[%s8828_s1 + $0x28] sm:$0xff]  }
   0x7   :  { %v367_v26 = vor.u32 %v366_v18, %v363_v16  ;;  %v394_v27 = vrot.slane %v392_v21, 5  ;;  %v6286_v30 = vld [vmem:[%s8828_s1 + $0x30] sm:$0xff]   ;;  %v409_v31 = vor.u32 %v408_v20, %v405_v19  ;;  %v417_v33 = vshrl.u32 %v5209_v29, 16  ;;  %v6289_v40 = vld [vmem:[%s8828_s1 + $0x60] sm:$0xff]   ;;  %v5212_v48 = vld [vmem:[%s8827_s0 + $0xc8] sm:$0xf] }
   0x8   :  { %938 = vrot.lane.b32.xlu0 %v6261_v22, %s6453_s17  ;;  %5748 = vmatpush3.bf16.msra.mxu0 %v6286_v30  ;;  %v6546_v36 = vrot.slane %v381_v23, 4  ;;  %v420_v38 = vshll.u32 %v5209_v29, 16  ;;  %v5327_v39 = vcombine.low %v5209_v29, %v5210_v32  ;;  %v431_v42 = vshrl.u32 %v5210_v32, 16  ;;  %v6264_v44 = vld [vmem:[%s8827_s0 + $0x68] ss:$8 sps:$4 sm:$0xff]   ;;  %v6290_v53 = vld [vmem:[%s8828_s1 + $0x20] sm:$0xff]  }
   0x9   :  { %940 = vrot.lane.b32.xlu1 %v6262_v28, %s6453_s17  ;;  %v6548_v37 = vrot.slane %v367_v26, 4  ;;  %5749 = vmatprep.subr.bf16.mxu0 %v6287_v34  ;;  %v395_v41 = vor.u32 %v394_v27, %v391_v24  ;;  %v434_v43 = vshll.u32 %v5210_v32, 16  ;;  %v5211_v45 = vld [vmem:[%s8827_s0 + $0xc0] sm:$0xf]  ;;  %v6559_v46 = vrot.slane %v409_v31, 4 }
   0xa   :  { %v6561_v47 = vrot.slane %v417_v33, 4  ;;  %v445_v49 = vshrl.u32 %v5211_v45, 16  ;;  %v448_v50 = vshll.u32 %v5211_v45, 16  ;;  %v459_v51 = vshrl.u32 %v5212_v48, 16  ;;  %v6266_v56 = vld [vmem:[%s8827_s0 + $0x78] ss:$8 sps:$4 sm:$0xff]  }
   0xb   :  { %v5328_v52 = vcombine.low %v5211_v45, %v5212_v48  ;;  %v6571_v54 = vrot.slane %v420_v38, 5  ;;  %v462_v55 = vshll.u32 %v5212_v48, 16  ;;  %v5213_v57 = vld [vmem:[%s8827_s0 + $0x1b0] sm:$0xf]  ;;  %v6579_v58 = vrot.slane %v395_v41, 4 }
   0xc   :  { %1022 = vrot.lane.b32.xlu0 %v5327_v39, %s6453_s17  ;;  %5750 = vmatpush3.bf16.msra.mxu0 %v6288_v35  ;;  %v6581_v59 = vrot.slane %v431_v42, 4  ;;  %v6583_v60 = vrot.slane %v434_v43, 5  ;;  %v5214_v61 = vld [vmem:[%s8827_s0 + $0x1b8] sm:$0xf]  ;;  %v473_v62 = vshrl.u32 %v5213_v57, 16  ;;  %v6588_v63 = vrot.slane %v445_v49, 4 }
   0xd   :  { %942 = vrot.lane.b32.xlu1 %v6264_v44, %s6453_s17  ;;  %5751 = vmatprep.subr.bf16.mxu0 %v6289_v40  ;;  %v476_v0 = vshll.u32 %v5213_v57, 16  ;;  %v5329_v1 = vcombine.low %v5213_v57, %v5214_v61  ;;  %v6591_v2 = vrot.slane %v448_v50, 5  ;;  %v6593_v3 = vrot.slane %v459_v51, 4  ;;  %v6268_v4 = vld [vmem:[%s8827_s0 + $0x168] ss:$8 sps:$4 sm:$0xff]  }
   0xe   :  { %v5215_v5 = vld [vmem:[%s8827_s0 + $0x1c0] sm:$0xf]  ;;  %v6602_v6 = vrot.slane %v462_v55, 5  ;;  %v6604_v7 = vrot.slane %v473_v62, 4  ;;  %v487_v8 = vshrl.u32 %v5214_v61, 16  ;;  %v490_v9 = vshll.u32 %v5214_v61, 16 }
   0xf   :  { %v5216_v10 = vld [vmem:[%s8827_s0 + $0x1c8] sm:$0xf]  ;;  %v501_v11 = vshrl.u32 %v5215_v5, 16  ;;  %v504_v12 = vshll.u32 %v5215_v5, 16  ;;  %v6609_v13 = vrot.slane %v476_v0, 5  ;;  %v423_v57 = vor.u32 %v6571_v54, %v6561_v47 }
  0x10   :  { %1024 = vrot.lane.b32.xlu0 %v5328_v52, %s6453_s17  ;;  %5752 = vmatpush3.bf16.msra.mxu0 %v6290_v53  ;;  %v515_v14 = vshrl.u32 %v5216_v10, 16  ;;  %v518_v15 = vshll.u32 %v5216_v10, 16  ;;  %v5330_v16 = vcombine.low %v5215_v5, %v5216_v10  ;;  %v5217_v17 = vld [vmem:[%s8827_s0 + $0x1d0] sm:$0xf]  ;;  %v6270_v18 = vld [vmem:[%s8827_s0 + $0x178] ss:$8 sps:$4 sm:$0xff]   ;;  %v437_v61 = vor.u32 %v6583_v60, %v6581_v59 }
  0x11   :  { %944 = vrot.lane.b32.xlu1 %v6266_v56, %s6453_s17  ;;  %v5218_v19 = vld [vmem:[%s8827_s0 + $0x1d8] sm:$0xf]  ;;  %v529_v20 = vshrl.u32 %v5217_v17, 16  ;;  %v532_v21 = vshll.u32 %v5217_v17, 16  ;;  %v6622_v24 = vrot.slane %v487_v8, 4  ;;  %v6624_v25 = vrot.slane %v490_v9, 5 }
  0x12   :  { %v543_v22 = vshrl.u32 %v5218_v19, 16  ;;  %v546_v23 = vshll.u32 %v5218_v19, 16  ;;  %v6626_v26 = vrot.slane %v501_v11, 4  ;;  %v6628_v27 = vrot.slane %v504_v12, 5  ;;  %v5219_v28 = vld [vmem:[%s8827_s0 + $0x1e0] sm:$0xf] }
  0x13   :  { %v6633_v29 = vrot.slane %v515_v14, 4  ;;  %v6635_v30 = vrot.slane %v518_v15, 5  ;;  %v5331_v31 = vcombine.low %v5217_v17, %v5218_v19  ;;  %v6272_v32 = vld [vmem:[%s8827_s0 + $0x188] ss:$8 sps:$4 sm:$0xff]   ;;  %v557_v33 = vshrl.u32 %v5219_v28, 16 }
  0x14   :  { %1026 = vrot.lane.b32.xlu0 %v5329_v1, %s6453_s17  ;;  %v6645_v34 = vld [vmem:[%s8827_s0 + $0x1e8] sm:$0xf]  ;;  %v6647_v35 = vrot.slane %v529_v20, 4  ;;  %v6649_v38 = vrot.slane %v532_v21, 5  ;;  %v6651_v39 = vrot.slane %v543_v22, 4  ;;  %v6653_v40 = vrot.slane %v546_v23, 5 }
  0x15   :  { %946 = vrot.lane.b32.xlu1 %v6268_v4, %s6453_s17  ;;  %v6655_v41 = vrot.slane %v557_v33, 4  ;;  %v560_v42 = vshll.u32 %v5219_v28, 16  ;;  %v571_v43 = vshrl.u32 %v6645_v34, 16  ;;  %v574_v44 = vshll.u32 %v6645_v34, 16  ;;  %v5237_v48 = vld [vmem:[%s8827_s0 + $0x94] sm:$0x1] }
  0x16   :  { %v5332_v45 = vcombine.low %v5219_v28, %v6645_v34  ;;  %v5238_v49 = vld [vmem:[%s8827_s0 + $0x9c] sm:$0x1]  ;;  %v6274_v50 = vld [vmem:[%s8827_s0 + $0x198] ss:$8 sps:$4 sm:$0xff]   ;;  %v370_v52 = vshll.u32 %v5237_v48, 16  ;;  %v451_v54 = vor.u32 %v6591_v2, %v6588_v63  ;;  %v465_v59 = vor.u32 %v6602_v6, %v6593_v3  ;;  %v6293_v48 = vld [vmem:[%s8828_s1 + $0x50] sm:$0xff]  }
  0x17   :  { %v384_v53 = vshll.u32 %v5238_v49, 16  ;;  %v5239_v55 = vld [vmem:[%s8827_s0 + $0xa4] sm:$0x1]  ;;  %v5240_v56 = vld [vmem:[%s8827_s0 + $0xac] sm:$0x1]  ;;  %v479_v60 = vor.u32 %v6609_v13, %v6604_v7  ;;  %v6710_v14 = vrot.slane %v560_v42, 5  ;;  %v493_v20 = vor.u32 %v6624_v25, %v6622_v24 }
  0x18   :  { %1028 = vrot.lane.b32.xlu0 %v5330_v16, %s6453_s17  ;;  %v372_v62 = vrot.slane %v370_v52, 5  ;;  %v398_v1 = vshll.u32 %v5239_v55, 16  ;;  %v412_v4 = vshll.u32 %v5240_v56, 16  ;;  %v6275_v5 = vld [vmem:[%s8827_s0 + $0x50] ss:$8 sps:$4 sm:$0xff]   ;;  %v424_v3 = vrot.slane %v423_v57, 4 }
  0x19   :  { %948 = vrot.lane.b32.xlu1 %v6270_v18, %s6453_s17  ;;  %v386_v0 = vrot.slane %v384_v53, 5  ;;  %v5241_v8 = vld [vmem:[%s8827_s0 + $0xb4] sm:$0x1]  ;;  %v5242_v47 = vld [vmem:[%s8827_s0 + $0xbc] sm:$0x1]  ;;  %v438_v13 = vrot.slane %v437_v61, 4  ;;  %v521_v53 = vor.u32 %v6635_v30, %v6633_v29 }
  0x1a   :  { %v373_v9 = vsel %vm6673_vm2, %v6548_v37, %v372_v62  ;;  %v400_v11 = vrot.slane %v398_v1, 5  ;;  %v414_v12 = vrot.slane %v412_v4, 5  ;;  %v6276_v2 = vld [vmem:[%s8827_s0 + $0x60] ss:$8 sps:$4 sm:$0xff]   ;;  %v426_v6 = vshll.u32 %v5241_v8, 16  ;;  %v6291_v7 = vld [vmem:[%s8828_s1 + $0x58] sm:$0xff]  }
  0x1b   :  { %v387_v10 = vsel %vm6673_vm2, %v6546_v36, %v386_v0  ;;  %v440_v15 = vshll.u32 %v5242_v47, 16  ;;  %v5243_v16 = vld [vmem:[%s8827_s0 + $0xc4] sm:$0x1]  ;;  %v5244_v17 = vld [vmem:[%s8827_s0 + $0xcc] sm:$0x1]  ;;  %v6730_v18 = vrot.slane %v571_v43, 4  ;;  %5753 = vmatprep.subr.bf16.mxu0 %v6291_v7  ;;  %v535_v8 = vor.u32 %v6649_v38, %v6647_v35 }
  0x1c   :  { %1030 = vrot.lane.b32.xlu0 %v5331_v31, %s6453_s17  ;;  %v5341_v63 = vcombine.low %v373_v9, %v387_v10  ;;  %v401_v37 = vsel %vm6673_vm2, %v6579_v58, %v400_v11  ;;  %v415_v36 = vsel %vm6673_vm2, %v6559_v46, %v414_v12  ;;  %v428_v19 = vrot.slane %v426_v6, 5  ;;  %v6292_v46 = vld [vmem:[%s8828_s1 + $0x18] sm:$0xff]   ;;  %v5245_v24 = vld [vmem:[%s8827_s0 + $0x1b4] sm:$0x1]  ;;  %v5247_v62 = vld [vmem:[%s8827_s0 + $0x1c4] sm:$0x1] }
  0x1d   :  { %950 = vrot.lane.b32.xlu1 %v6272_v32, %s6453_s17  ;;  %v454_v58 = vshll.u32 %v5243_v16, 16  ;;  %v5342_v21 = vcombine.low %v401_v37, %v415_v36  ;;  %v442_v22 = vrot.slane %v440_v15, 5  ;;  %v452_v23 = vrot.slane %v451_v54, 4  ;;  %v5246_v25 = vld [vmem:[%s8827_s0 + $0x1bc] sm:$0x1]  ;;  %5754 = vmatpush3.bf16.msra.mxu0 %v6292_v46  ;;  %v6294_v1 = vld [vmem:[%s8828_s1 + $0x10] sm:$0xff]  }
  0x1e   :  { %v468_v28 = vshll.u32 %v5244_v17, 16  ;;  %v429_v31 = vsel %vm6673_vm2, %v424_v3, %v428_v19  ;;  %v466_v33 = vrot.slane %v465_v59, 4  ;;  %v6747_v34 = vrot.slane %v574_v44, 5  ;;  %v6277_v49 = vld [vmem:[%s8827_s0 + $0x70] ss:$8 sps:$4 sm:$0xff]   ;;  %5755 = vmatprep.subr.bf16.mxu0 %v6293_v48  ;;  %v6295_v35 = vld [vmem:[%s8828_s1 + $0x48] sm:$0xff]  }
  0x1f   :  { %v456_v32 = vrot.slane %v454_v58, 5  ;;  %v443_v42 = vsel %vm6673_vm2, %v438_v13, %v442_v22  ;;  %v496_v52 = vshll.u32 %v5246_v25, 16  ;;  %v507_v44 = vor.u32 %v6628_v27, %v6626_v26  ;;  %v5248_v0 = vld [vmem:[%s8827_s0 + $0x1cc] sm:$0x1]  ;;  %v6278_v4 = vld [vmem:[%s8827_s0 + $0x80] ss:$8 sps:$4 sm:$0xff]  }
  0x20   :  { %1032 = vrot.lane.b32.xlu0 %v5332_v45, %s6453_s17  ;;  %v470_v43 = vrot.slane %v468_v28, 5  ;;  %v482_v45 = vshll.u32 %v5245_v24, 16  ;;  %v5343_v55 = vcombine.low %v429_v31, %v443_v42  ;;  %v494_v61 = vrot.slane %v493_v20, 4  ;;  %v5250_v9 = vld [vmem:[%s8827_s0 + $0x1dc] sm:$0x1]  ;;  %v6296_v12 = vld [vmem:[%s8828_s1 + $0x8] sm:$0xff]  }
  0x21   :  { %952 = vrot.lane.b32.xlu1 %v6274_v50, %s6453_s17  ;;  %v480_v50 = vrot.slane %v479_v60, 4  ;;  %v457_v56 = vsel %vm6673_vm2, %v452_v23, %v456_v32  ;;  %v498_v27 = vrot.slane %v496_v52, 5  ;;  %v510_v29 = vshll.u32 %v5247_v62, 16  ;;  %5756 = vmatpush3.bf16.msra.mxu0 %v6294_v1  ;;  %v5251_v36 = vld [vmem:[%s8827_s0 + $0x1e4] sm:$0x1]  ;;  %v6299_v48 = vld [vmem:[%s8828_s1 + $0xf8] sm:$0xff]  }
  0x22   :  { %v484_v57 = vrot.slane %v482_v45, 5  ;;  %v471_v26 = vsel %vm6673_vm2, %v466_v33, %v470_v43  ;;  %v524_v30 = vshll.u32 %v5248_v0, 16  ;;  %v549_v47 = vor.u32 %v6653_v40, %v6651_v39  ;;  %5757 = vmatprep.subr.bf16.mxu0 %v6295_v35  ;;  %v5252_v13 = vld [vmem:[%s8827_s0 + $0x1ec] sm:$0x1]  ;;  %v6297_v22 = vld [vmem:[%s8828_s1 + $0x40] sm:$0xff]   ;;  %5809 = vmatprep.subr.bf16.mxu1 %v6299_v48  ;;  %v6303_v52 = vld [vmem:[%s8828_s1 + $0xf0] sm:$0xff]  }
  0x23   :  { %v508_v54 = vrot.slane %v507_v44, 4  ;;  %v512_v59 = vrot.slane %v510_v29, 5  ;;  %v522_v60 = vrot.slane %v521_v53, 4  ;;  %v563_v10 = vor.u32 %v6710_v14, %v6655_v41  ;;  %v6298_v28 = vld [vmem:[%s8828_s1] sm:$0xff]   ;;  %v6281_v32 = vld [vmem:[%s8827_s0 + $0x190] ss:$8 sps:$4 sm:$0xff]  }
  0x24   :  { %1194 = vrot.lane.b32.xlu0 %v6275_v5, %s6453_s17  ;;  %v5249_v5 = vld [vmem:[%s8827_s0 + $0x1d4] sm:$0x1]  ;;  %v5344_v38 = vcombine.low %v457_v56, %v471_v26  ;;  %v526_v39 = vrot.slane %v524_v30, 5  ;;  %v552_v11 = vshll.u32 %v5250_v9, 16  ;;  %v485_v41 = vsel %vm6673_vm2, %v480_v50, %v484_v57  ;;  %v6284_v43 = vld [vmem:[%s8827_s0 + $0x1a0] ss:$8 sps:$4 sm:$0xff]  }
  0x25   :  { %1098 = vrot.lane.b32.xlu1 %v5341_v63, %s6453_s17  ;;  %v538_v40 = vshll.u32 %v5249_v5, 16  ;;  %v6279_v63 = vld [vmem:[%s8827_s0 + $0x170] ss:$8 sps:$4 sm:$0xff]   ;;  %v499_v14 = vsel %vm6673_vm2, %v494_v61, %v498_v27  ;;  %v536_v3 = vrot.slane %v535_v8, 4  ;;  %v550_v6 = vrot.slane %v549_v47, 4  ;;  %5758 = vmatpush3.bf16.msra.mxu0 %v6296_v12  ;;  %v6305_v53 = vld [vmem:[%s8828_s1 + $0xe8] sm:$0xff]  }
  0x26   :  { %v554_v37 = vrot.slane %v552_v11, 5  ;;  %v5345_v15 = vcombine.low %v485_v41, %v499_v14  ;;  %v564_v16 = vrot.slane %v563_v10, 4  ;;  %v566_v17 = vshll.u32 %v5251_v36, 16  ;;  %5759 = vmatprep.subr.bf16.mxu0 %v6297_v22  ;;  %v6860_v50 = vld [vmem:[%s8828_s1 + $0x118] sm:$0xff]   ;;  %v6304_v44 = vld [vmem:[%s8828_s1 + $0xb0] sm:$0xff]   ;;  %v6308_v56 = vld [vmem:[%s8828_s1 + $0xe0] sm:$0xff]  }
  0x27   :  { %v540_v7 = vrot.slane %v538_v40, 5  ;;  %v513_v19 = vsel %vm6673_vm2, %v508_v54, %v512_v59  ;;  %v527_v58 = vsel %vm6673_vm2, %v522_v60, %v526_v39  ;;  %v580_v46 = vshll.u32 %v5252_v13, 16  ;;  %v6309_v57 = vld [vmem:[%s8828_s1 + $0xa0] sm:$0xff]   ;;  %v6310_v61 = vld [vmem:[%s8828_s1 + $0xd8] sm:$0xff]   ;;  %v6314_v0 = vld [vmem:[%s8828_s1 + $0xd0] sm:$0xff]  }
  0x28   :  { %1196 = vrot.lane.b32.xlu0 %v6276_v2, %s6453_s17  ;;  %v577_v2 = vor.u32 %v6747_v34, %v6730_v18  ;;  %v6280_v18 = vld [vmem:[%s8827_s0 + $0x180] ss:$8 sps:$4 sm:$0xff]   ;;  %v5346_v31 = vcombine.low %v513_v19, %v527_v58  ;;  %v555_v24 = vsel %vm6673_vm2, %v550_v6, %v554_v37  ;;  %v6311_v62 = vld [vmem:[%s8828_s1 + $0x98] sm:$0xff]   ;;  %v6315_v26 = vld [vmem:[%s8828_s1 + $0x90] sm:$0xff]   ;;  %vm2142_vm4 = vsmask.f32 256 }
  0x29   :  { %1100 = vrot.lane.b32.xlu1 %v5342_v21, %s6453_s17  ;;  %v568_v21 = vrot.slane %v566_v17, 5  ;;  %v582_v23 = vrot.slane %v580_v46, 5  ;;  %v541_v33 = vsel %vm6673_vm2, %v536_v3, %v540_v7  ;;  %5760 = vmatpush3.bf16.msra.mxu0 %v6298_v28  ;;  %v6316_v27 = vld [vmem:[%s8828_s1 + $0xc8] sm:$0xff]   ;;  %v6319_v30 = vld [vmem:[%s8828_s1 + $0xc0] sm:$0xff]   ;;  %v6918_v8 = vld [vmem:[%s8827_s0 + $0x10] sm:$0xf] }
  0x2a   :  { %v578_v20 = vrot.slane %v577_v2, 4  ;;  %v5347_v25 = vcombine.low %v541_v33, %v555_v24  ;;  %6169 = vmatprep.subr.bf16.mxu0 %v6860_v50  ;;  %v6317_v29 = vld [vmem:[%s8828_s1 + $0x88] sm:$0xff]   ;;  %v6320_v1 = vld [vmem:[%s8828_s1 + $0x80] sm:$0xff]   ;;  %v6923_v47 = vld [vmem:[%s8827_s0 + $0x18] sm:$0xf]  ;;  %v115_v10 = vshrl.u32 %v6918_v8, 16 }
  0x2b   :  { %v569_v34 = vsel %vm6673_vm2, %v564_v16, %v568_v21  ;;  %v6913_v5 = vld [vmem:[%s8827_s0 + $0x8] sm:$0xf]  ;;  %v118_v35 = vshll.u32 %v6918_v8, 16  ;;  %v132_v39 = vshll.u32 %v6923_v47, 16  ;;  %v67_v40 = vld [vmem:[%s8827_s0 + $0x4] sm:$0x1] }
  0x2c   :  { %1198 = vrot.lane.b32.xlu0 %v6277_v49, %s6453_s17  ;;  %v583_v42 = vsel %vm6673_vm2, %v578_v20, %v582_v23  ;;  %v6300_v49 = vld [vmem:[%s8828_s1 + $0xb8] sm:$0xff]   ;;  %v101_v60 = vshrl.u32 %v6913_v5, 16  ;;  %v104_v9 = vshll.u32 %v6913_v5, 16  ;;  %v68_v11 = vld [vmem:[%s8827_s0 + $0xc] sm:$0x1]  ;;  %v117_v6 = vrot.slane %v115_v10, 4 }
  0x2d   :  { %1102 = vrot.lane.b32.xlu1 %v5343_v55, %s6453_s17  ;;  %v5348_v45 = vcombine.low %v569_v34, %v583_v42  ;;  %5810 = vmatpush3.bf16.msra.mxu1 %v6300_v49  ;;  %v6306_v55 = vld [vmem:[%s8828_s1 + $0xa8] sm:$0xff]   ;;  %v69_v2 = vld [vmem:[%s8827_s0 + $0x14] sm:$0x1]  ;;  %v70_v3 = vld [vmem:[%s8827_s0 + $0x1c] sm:$0x1]  ;;  %v120_v7 = vrot.slane %v118_v35, 5 }
  0x2e   :  { %5811 = vmatprep.subr.bf16.mxu1 %v6303_v52  ;;  %v103_v41 = vrot.slane %v101_v60, 4  ;;  %v106_v14 = vrot.slane %v104_v9, 5  ;;  %v134_v36 = vrot.slane %v132_v39, 5  ;;  %v6948_v13 = vld [vmem:[%s8827_s0 + $0x20] sm:$0xf]  ;;  %v110_v16 = vshll.u32 %v68_v11, 16 }
  0x2f   :  { %v6953_v17 = vld [vmem:[%s8827_s0 + $0x28] sm:$0xf]  ;;  %v124_v58 = vshll.u32 %v69_v2, 16  ;;  %v138_v20 = vshll.u32 %v70_v3, 16  ;;  %v121_v46 = vor.u32 %v120_v7, %v117_v6  ;;  %v143_v22 = vshrl.u32 %v6948_v13, 16 }
  0x30   :  { %1200 = vrot.lane.b32.xlu0 %v6278_v4, %s6453_s17  ;;  %v6908_v4 = vld [vmem:[%s8827_s0] sm:$0xf]  ;;  %v107_v19 = vor.u32 %v106_v14, %v103_v41  ;;  %v146_v23 = vshll.u32 %v6948_v13, 16  ;;  %v157_v28 = vshrl.u32 %v6953_v17, 16  ;;  %v71_v48 = vld [vmem:[%s8827_s0 + $0x24] sm:$0x1] }
  0x31   :  { %1104 = vrot.lane.b32.xlu1 %v5344_v38, %s6453_s17  ;;  %5812 = vmatpush3.bf16.msra.mxu1 %v6304_v44  ;;  %v87_v54 = vshrl.u32 %v6908_v4, 16  ;;  %v90_v59 = vshll.u32 %v6908_v4, 16  ;;  %v129_v38 = vshrl.u32 %v6923_v47, 16  ;;  %v122_v34 = vrot.slane %v121_v46, 4  ;;  %v6997_v11 = vld [vmem:[%s8827_s0 + $0x128] sm:$0xf] }
  0x32   :  { %5813 = vmatprep.subr.bf16.mxu1 %v6305_v53  ;;  %v108_v24 = vrot.slane %v107_v19, 4  ;;  %v126_v42 = vrot.slane %v124_v58, 5  ;;  %v145_v49 = vrot.slane %v143_v22, 4  ;;  %v148_v52 = vrot.slane %v146_v23, 5  ;;  %v74_v6 = vld [vmem:[%s8827_s0 + $0x3c] sm:$0x1] }
  0x33   :  { %v89_v12 = vrot.slane %v87_v54, 4  ;;  %v131_v37 = vrot.slane %v129_v38, 4  ;;  %v159_v44 = vrot.slane %v157_v28, 4  ;;  %v5301_v35 = vcombine.low %v6908_v4, %v6913_v5  ;;  %v73_v4 = vld [vmem:[%s8827_s0 + $0x34] sm:$0x1] }
  0x34   :  { %1202 = vrot.lane.b32.xlu0 %v6279_v63, %s6453_s17  ;;  %v92_v63 = vrot.slane %v90_v59, 5  ;;  %v216_v19 = vshll.u32 %v6997_v11, 16  ;;  %v180_v58 = vshll.u32 %v73_v4, 16  ;;  %v6312_v22 = vld [vmem:[%s8828_s1 + $0x110] sm:$0xff]   ;;  %v194_v23 = vshll.u32 %v74_v6, 16 }
  0x35   :  { %1106 = vrot.lane.b32.xlu1 %v5345_v15, %s6453_s17  ;;  %5814 = vmatpush3.bf16.msra.mxu1 %v6306_v55  ;;  %v96_v15 = vshll.u32 %v67_v40, 16  ;;  %v135_v21 = vor.u32 %v134_v36, %v131_v37  ;;  %v72_v55 = vld [vmem:[%s8827_s0 + $0x2c] sm:$0x1]  ;;  %v6992_v40 = vld [vmem:[%s8827_s0 + $0x120] sm:$0xf]  ;;  %v5303_v4 = vcombine.low %v6948_v13, %v6953_v17  ;;  %vm2141_vm6 = vcmask 1040384  }
  0x36   :  { %5815 = vmatprep.subr.bf16.mxu1 %v6308_v56  ;;  %v6968_v56 = vld [vmem:[%s8827_s0 + $0x30] sm:$0xf]  ;;  %v78_v6 = vld [vmem:[%s8827_s0 + $0x13c] sm:$0x1]  ;;  %v7067_v13 = vld [vmem:[%s8827_s0 + $0x140] sm:$0xf] }
  0x37   :  { %v98_v33 = vrot.slane %v96_v15, 5  ;;  %v171_v54 = vshrl.u32 %v6968_v56, 16  ;;  %v174_v60 = vshll.u32 %v6968_v56, 16  ;;  %v199_v15 = vshrl.u32 %v6992_v40, 16  ;;  %vm7527_vm8 = vmand %vm2141_vm6, %vm2142_vm4 }
  0x38   :  { %1204 = vrot.lane.b32.xlu0 %v6280_v18, %s6453_s17  ;;  %v93_v18 = vor.u32 %v92_v63, %v89_v12  ;;  %vm2162_vm5 = vsmask.f32 4352  ;;  %vm2161_vm7 = vcmask 1044480   ;;  %vm2647_vm10 = vcmask 1042432  }
  0x39   :  { %1108 = vrot.lane.b32.xlu1 %v5346_v31, %s6453_s17  ;;  %5816 = vmatpush3.bf16.msra.mxu1 %v6309_v57  ;;  %v160_v31 = vshll.u32 %v6953_v17, 16  ;;  %v173_v5 = vrot.slane %v171_v54, 4  ;;  %v176_v7 = vrot.slane %v174_v60, 5  ;;  %vm7532_vm9 = vmand %vm2161_vm7, %vm2162_vm5  ;;  %vm2648_vm11 = vcmask 1046532  }
  0x3a   :  { %5817 = vmatprep.subr.bf16.mxu1 %v6310_v61  ;;  %vm7650_vm12 = vmor %vm2647_vm10, %vm2648_vm11 }
  0x3b   :  { %v162_v53 = vrot.slane %v160_v31, 5 }
  0x3c   :  { %1206 = vrot.lane.b32.xlu0 %v6281_v32, %s6453_s17  ;;  %v94_v32 = vrot.slane %v93_v18, 4  ;;  %v213_v18 = vshrl.u32 %v6997_v11, 16 }
  0x3d   :  { %1110 = vrot.lane.b32.xlu1 %v5347_v25, %s6453_s17  ;;  %5818 = vmatpush3.bf16.msra.mxu1 %v6311_v62  ;;  %v112_v25 = vrot.slane %v110_v16, 5  ;;  %v6977_v62 = vld [vmem:[%s8827_s0 + $0x38] sm:$0xf]  ;;  %v202_v16 = vshll.u32 %v6992_v40, 16 }
  0x3e   :  { %5819 = vmatprep.subr.bf16.mxu1 %v6314_v0  ;;  %v99_v57 = vsel %vm6673_vm2, %v94_v32, %v98_v33  ;;  %v127_v0 = vsel %vm6673_vm2, %v122_v34, %v126_v42  ;;  %v185_v9 = vshrl.u32 %v6977_v62, 16  ;;  %v188_v10 = vshll.u32 %v6977_v62, 16  ;;  %v76_v34 = vld [vmem:[%s8827_s0 + $0x12c] sm:$0x1] }
  0x3f   :  { %v113_v61 = vsel %vm6673_vm2, %v108_v24, %v112_v25  ;;  %v177_v33 = vor.u32 %v176_v7, %v173_v5  ;;  %v75_v25 = vld [vmem:[%s8827_s0 + $0x124] sm:$0x1]  ;;  %v201_v42 = vrot.slane %v199_v15, 4 }
  0x40   :  { %1208 = vrot.lane.b32.xlu0 %v6284_v43, %s6453_s17  ;;  %v136_v43 = vrot.slane %v135_v21, 4  ;;  %v5317_v59 = vcombine.low %v99_v57, %v113_v61  ;;  %v187_v37 = vrot.slane %v185_v9, 4  ;;  %v190_v36 = vrot.slane %v188_v10, 5  ;;  %v6323_v61 = vld [vmem:[%s8828_s1 + $0x108] sm:$0xff]  }
  0x41   :  { %1112 = vrot.lane.b32.xlu1 %v5348_v45, %s6453_s17  ;;  %5820 = vmatpush3.bf16.msra.mxu1 %v6315_v26  ;;  %v140_v45 = vrot.slane %v138_v20, 5  ;;  %v196_v57 = vrot.slane %v194_v23, 5  ;;  %v7084_v23 = vld [vmem:[%s8827_s0 + $0x8] sm:$0xf] }
  0x42   :  { %5821 = vmatprep.subr.bf16.mxu1 %v6316_v27  ;;  %v152_v27 = vshll.u32 %v71_v48, 16  ;;  %v191_v24 = vor.u32 %v190_v36, %v187_v37  ;;  %v218_v48 = vrot.slane %v216_v19, 5  ;;  %v7074_v19 = vld [vmem:[%s8827_s0 + $0x148] sm:$0xf] }
  0x43   :  { %v141_v26 = vsel %vm6673_vm2, %v136_v43, %v140_v45  ;;  %v204_v43 = vrot.slane %v202_v16, 5  ;;  %v215_v45 = vrot.slane %v213_v18, 4 }
  0x44   :  { %v5318_v38 = vcombine.low %v127_v0, %v141_v26  ;;  %v154_v39 = vrot.slane %v152_v27, 5  ;;  %v192_v0 = vrot.slane %v191_v24, 4  ;;  %v208_v26 = vshll.u32 %v75_v25, 16 }
  0x45   :  { %5822 = vmatpush3.bf16.msra.mxu1 %v6317_v29  ;;  %v149_v29 = vor.u32 %v148_v52, %v145_v49  ;;  %v5302_v49 = vcombine.low %v6918_v8, %v6923_v47  ;;  %v182_v52 = vrot.slane %v180_v58, 5  ;;  %v178_v47 = vrot.slane %v177_v33, 4 }
  0x46   :  { %5823 = vmatprep.subr.bf16.mxu1 %v6319_v30  ;;  %v163_v30 = vor.u32 %v162_v53, %v159_v44  ;;  %v7031_v44 = vld [vmem:[%s8827_s0 + $0x130] sm:$0xf]  ;;  %v222_v27 = vshll.u32 %v76_v34, 16  ;;  %v258_v25 = vshll.u32 %v7067_v13, 16  ;;  %v269_v34 = vshrl.u32 %v7074_v19, 16 }
  0x47   :  { %v150_v63 = vrot.slane %v149_v29, 4  ;;  %v205_v29 = vor.u32 %v204_v43, %v201_v42  ;;  %v272_v42 = vshll.u32 %v7074_v19, 16 }
  0x48   :  { %v164_v41 = vrot.slane %v163_v30, 4  ;;  %v219_v30 = vor.u32 %v218_v48, %v215_v45  ;;  %v7098_v45 = vld [vmem:[%s8827_s0 + $0x10] sm:$0xf]  ;;  %v635_v48 = vshrl.u32 %v7084_v23, 16 }
  0x49   :  { %5824 = vmatpush3.bf16.msra.mxu1 %v6320_v1  ;;  %v166_v1 = vshll.u32 %v72_v55, 16  ;;  %v155_v21 = vsel %vm6673_vm2, %v150_v63, %v154_v39  ;;  %v197_v63 = vsel %vm6673_vm2, %v192_v0, %v196_v57  ;;  %v206_v5 = vrot.slane %v205_v29, 4  ;;  %v79_v0 = vld [vmem:[%s8827_s0 + $0x144] sm:$0x1] }
  0x4a   :  { %v271_v29 = vrot.slane %v269_v34, 4  ;;  %v7171_v34 = vld [vmem:[%s8827_s0 + $0x28] sm:$0xf] }
  0x4b   :  { %v168_v14 = vrot.slane %v166_v1, 5  ;;  %v227_v1 = vshrl.u32 %v7031_v44, 16 }
  0x4d   :  { %v169_v32 = vsel %vm6673_vm2, %v164_v41, %v168_v14  ;;  %v210_v41 = vrot.slane %v208_v26, 5  ;;  %v224_v14 = vrot.slane %v222_v27, 5  ;;  %v229_v7 = vrot.slane %v227_v1, 4 }
  0x4e   :  { %v5319_v55 = vcombine.low %v155_v21, %v169_v32  ;;  %v250_v21 = vshll.u32 %v78_v6, 16  ;;  %v255_v32 = vshrl.u32 %v7067_v13, 16  ;;  %v260_v27 = vrot.slane %v258_v25, 5 }
  0x4f   :  { %v211_v58 = vsel %vm6673_vm2, %v206_v5, %v210_v41  ;;  %v7137_v41 = vld [vmem:[%s8827_s0 + $0x158] sm:$0xf] }
  0x76   :  { %v1019_v12 = vpop.permute.xlu0 %1018 }
  0x77   :  { %v1021_v2 = vpop.permute.xlu1 %1020  ;;  %v1269_v3 = vsel %vm1234_vm3, %v5317_v59, %v1019_v12  ;;  %v230_v59 = vshll.u32 %v7031_v44, 16  ;;  %v183_v12 = vsel %vm6673_vm2, %v178_v47, %v182_v52  ;;  %v638_v52 = vshll.u32 %v7084_v23, 16 }
  0x78   :  { %1714 = vmatprep.mubr.bf16.mxu0 %v1269_v3  ;;  %v1273_v46 = vsel %vm1234_vm3, %v5318_v38, %v1021_v2  ;;  %v6330_v38 = vld [vmem:[%s8828_s1 + $0x100] sm:$0xff]   ;;  %v220_v2 = vrot.slane %v219_v30, 4  ;;  %v77_v3 = vld [vmem:[%s8827_s0 + $0x134] sm:$0x1]  ;;  %v5320_v18 = vcombine.low %v183_v12, %v197_v63  ;;  %v252_v47 = vrot.slane %v250_v21, 5 }
  0x79   :  { %v232_v37 = vrot.slane %v230_v59, 5  ;;  %v274_v30 = vrot.slane %v272_v42, 5  ;;  %v652_v59 = vshll.u32 %v7098_v45, 16  ;;  %v264_v63 = vshll.u32 %v79_v0, 16 }
  0x7a   :  { %v939_v20 = vpop.permute.xlu0 %938  ;;  %v5305_v21 = vcombine.low %v6992_v40, %v6997_v11  ;;  %v7176_v40 = vld [vmem:[%s8827_s0 + $0x30] sm:$0xf] }
  0x7b   :  { %v941_v28 = vpop.permute.xlu1 %940  ;;  %v1237_v31 = vsel %vm1234_vm3, %v5301_v35, %v939_v20  ;;  %v225_v20 = vsel %vm6673_vm2, %v220_v2, %v224_v14  ;;  %v266_v11 = vrot.slane %v264_v63, 5  ;;  %v5288_v63 = vld [vmem:[%s8827_s0 + $0x24] sm:$0x1] }
  0x7c   :  { %1715 = vmatmul.mubr.bf16.vlgmr.msra.gmra.mxu0 %v1237_v31  ;;  %v1241_v54 = vsel %vm1234_vm3, %v5302_v49, %v941_v28  ;;  %v233_v28 = vor.u32 %v232_v37, %v229_v7  ;;  %v5304_v49 = vcombine.low %v6968_v56, %v6977_v62  ;;  %v80_v56 = vld [vmem:[%s8827_s0 + $0x14c] sm:$0x1]  ;;  %v257_v62 = vrot.slane %v255_v32, 4  ;;  %v5256_v7 = vld [vmem:[%s8827_s0 + $0x20] sm:$0xf] }
  0x7d   :  { %6170 = vmatpush3.bf16.msra.mxu0 %v6860_v50  ;;  %1722 = vmatprep.mubr.bf16.mxu0 %v1273_v46  ;;  %v7039_v50 = vld [vmem:[%s8827_s0 + $0x138] sm:$0xf]  ;;  %v236_v46 = vshll.u32 %v77_v3, 16  ;;  %v278_v2 = vshll.u32 %v80_v56, 16  ;;  %v680_v32 = vshll.u32 %v5256_v7, 16  ;;  %v654_v56 = vrot.slane %v652_v59, 5 }
  0x7e   :  { %v1023_v53 = vpop.permute.xlu0 %1022  ;;  %6171 = vmatprep.subr.bf16.mxu0 %v6312_v22  ;;  %v241_v60 = vshrl.u32 %v7039_v50, 16  ;;  %v244_v9 = vshll.u32 %v7039_v50, 16  ;;  %v234_v57 = vrot.slane %v233_v28, 4  ;;  %v261_v37 = vor.u32 %v260_v27, %v257_v62  ;;  %v6326_v59 = vld [vmem:[%s8827_s0 + $0xe8] ss:$8 sps:$4 sm:$0xff]  }
  0x7f   :  { %v943_v8 = vpop.permute.xlu1 %942  ;;  %v1277_v35 = vsel %vm1234_vm3, %v5319_v55, %v1023_v53  ;;  %v649_v53 = vshrl.u32 %v7098_v45, 16  ;;  %v5321_v55 = vcombine.low %v211_v58, %v225_v20  ;;  %v6322_v58 = vld [vmem:[%s8827_s0 + $0xd8] ss:$8 sps:$4 sm:$0xff]  }
  0x80   :  { %v243_v36 = vrot.slane %v241_v60, 4  ;;  %v246_v15 = vrot.slane %v244_v9, 5  ;;  %v5349_v60 = vcombine.low %v7084_v23, %v7098_v45  ;;  %v7123_v9 = vld [vmem:[%s8827_s0 + $0x18] sm:$0xf]  ;;  %v262_v45 = vrot.slane %v261_v37, 4 }
  0x81   :  { %6172 = vmatpush3.bf16.msra.mxu0 %v6312_v22  ;;  %v1245_v22 = vsel %vm1234_vm3, %v5303_v4, %v943_v8  ;;  %v666_v12 = vshll.u32 %v7123_v9, 16 }
  0x82   :  { %v1025_v10 = vpop.permute.xlu0 %1024  ;;  %6173 = vmatprep.subr.bf16.mxu0 %v6323_v61  ;;  %v247_v31 = vor.u32 %v246_v15, %v243_v36  ;;  %v275_v36 = vor.u32 %v274_v30, %v271_v29 }
  0x83   :  { %v7050_v39 = vpop.permute.xlu1 %944  ;;  %v1281_v24 = vsel %vm1234_vm3, %v5320_v18, %v1025_v10  ;;  %v7128_v10 = vld [vmem:[%s8827_s0 + $0x150] sm:$0xf]  ;;  %v7154_v18 = vrot.slane %v649_v53, 4  ;;  %v668_v28 = vrot.slane %v666_v12, 5 }
  0x84   :  { %1723 = vmatmul.mubr.bf16.gmra.mxu0 %v1241_v54  ;;  %v248_v8 = vrot.slane %v247_v31, 4  ;;  %v7115_v54 = vrot.slane %v635_v48, 4  ;;  %v1249_v14 = vsel %vm1234_vm3, %v5304_v49, %v7050_v39  ;;  %v283_v15 = vshrl.u32 %v7128_v10, 16 }
  0x85   :  { %1730 = vmatprep.mubr.bf16.mxu0 %v1277_v35  ;;  %6174 = vmatpush3.bf16.msra.mxu0 %v6323_v61  ;;  %v238_v61 = vrot.slane %v236_v46, 5  ;;  %v7130_v35 = vrot.slane %v638_v52, 5  ;;  %v286_v20 = vshll.u32 %v7128_v10, 16  ;;  %v300_v46 = vshll.u32 %v7137_v41, 16  ;;  %v81_v52 = vld [vmem:[%s8827_s0 + $0x154] sm:$0x1] }
  0x86   :  { %v1027_v16 = vpop.permute.xlu0 %1026  ;;  %6175 = vmatprep.subr.bf16.mxu0 %v6330_v38  ;;  %v253_v5 = vsel %vm6673_vm2, %v248_v8, %v252_v47  ;;  %v677_v31 = vshrl.u32 %v5256_v7, 16  ;;  %v276_v48 = vrot.slane %v275_v36, 4  ;;  %v280_v49 = vrot.slane %v278_v2, 5 }
  0x87   :  { %v7069_v17 = vpop.permute.xlu1 %946  ;;  %v239_v4 = vsel %vm6673_vm2, %v234_v57, %v238_v61  ;;  %v1285_v6 = vsel %vm1234_vm3, %v5321_v55, %v1027_v16  ;;  %v297_v16 = vshrl.u32 %v7137_v41, 16  ;;  %v285_v53 = vrot.slane %v283_v15, 4  ;;  %v82_v61 = vld [vmem:[%s8827_s0 + $0x15c] sm:$0x1] }
  0x88   :  { %v5322_v25 = vcombine.low %v239_v4, %v253_v5  ;;  %v288_v8 = vrot.slane %v286_v20, 5  ;;  %v302_v0 = vrot.slane %v300_v46, 5  ;;  %v679_v29 = vrot.slane %v677_v31, 4 }
  0x89   :  { %6176 = vmatpush3.bf16.msra.mxu0 %v6330_v38  ;;  %v663_v38 = vshrl.u32 %v7123_v9, 16  ;;  %v299_v47 = vrot.slane %v297_v16, 4  ;;  %v1253_v30 = vsel %vm1234_vm3, %v5305_v21, %v7069_v17  ;;  %v267_v17 = vsel %vm6673_vm2, %v262_v45, %v266_v11 }
  0x8a   :  { %v7087_v33 = vpop.permute.xlu0 %1028  ;;  %v292_v4 = vshll.u32 %v81_v52, 16  ;;  %v306_v5 = vshll.u32 %v82_v61, 16  ;;  %v289_v37 = vor.u32 %v288_v8, %v285_v53  ;;  %v641_v15 = vor.u32 %v7130_v35, %v7115_v54  ;;  %v6329_v52 = vld [vmem:[%s8827_s0 + $0xf8] ss:$8 sps:$4 sm:$0xff]  }
  0x8b   :  { %v7093_v43 = vpop.permute.xlu1 %948  ;;  %v665_v23 = vrot.slane %v663_v38, 4  ;;  %v682_v38 = vrot.slane %v680_v32, 5  ;;  %v303_v36 = vor.u32 %v302_v0, %v299_v47  ;;  %v686_v16 = vshll.u32 %v5288_v63, 16  ;;  %v5285_v47 = vld [vmem:[%s8827_s0 + $0xc] sm:$0x1] }
  0x8c   :  { %1731 = vmatmul.mubr.bf16.gmra.mxu0 %v1245_v22  ;;  %v5287_v22 = vld [vmem:[%s8827_s0 + $0x1c] sm:$0x1]  ;;  %v5306_v46 = vcombine.low %v7031_v44, %v7039_v50  ;;  %v294_v31 = vrot.slane %v292_v4, 5  ;;  %v290_v35 = vrot.slane %v289_v37, 4  ;;  %v308_v32 = vrot.slane %v306_v5, 5 }
  0x8d   :  { %1738 = vmatprep.mubr.bf16.mxu0 %v1281_v24  ;;  %v5350_v24 = vcombine.low %v7123_v9, %v5256_v7  ;;  %v672_v27 = vshll.u32 %v5287_v22, 16  ;;  %v669_v9 = vor.u32 %v668_v28, %v665_v23  ;;  %v281_v7 = vsel %vm6673_vm2, %v276_v48, %v280_v49  ;;  %v5260_v44 = vld [vmem:[%s8827_s0 + $0x40] sm:$0xf]  ;;  %v5286_v0 = vld [vmem:[%s8827_s0 + $0x14] sm:$0x1] }
  0x8e   :  { %v7108_v26 = vpop.permute.xlu0 %1030  ;;  %v683_v21 = vor.u32 %v682_v38, %v679_v29  ;;  %v5323_v28 = vcombine.low %v267_v17, %v281_v7  ;;  %v7221_v50 = vrot.slane %v641_v15, 4  ;;  %v7233_v49 = vrot.slane %v686_v16, 5  ;;  %v5261_v63 = vld [vmem:[%s8827_s0 + $0x128] sm:$0xf] }
  0x8f   :  { %v7113_v1 = vpop.permute.xlu1 %950  ;;  %v7208_v20 = vrot.slane %v672_v27, 5  ;;  %v295_v61 = vsel %vm6673_vm2, %v290_v35, %v294_v31  ;;  %v736_v38 = vshll.u32 %v5260_v44, 16  ;;  %v750_v4 = vshll.u32 %v5261_v63, 16  ;;  %v6333_v16 = vld [vmem:[%s8827_s0 + $0x108] ss:$8 sps:$4 sm:$0xff]  }
  0x90   :  { %v7231_v48 = vrot.slane %v683_v21, 4  ;;  %v1293_v53 = vsel %vm1234_vm3, %v5323_v28, %v7108_v26 }
  0x91   :  { %v7289_v35 = vrot.slane %v750_v4, 5 }
  0x92   :  { %v7145_v3 = vpop.permute.xlu0 %1032  ;;  %v689_v28 = vsel %vm6673_vm2, %v7231_v48, %v7233_v49  ;;  %v5295_v48 = vld [vmem:[%s8827_s0 + $0x13c] sm:$0x1]  ;;  %v7389_v49 = vld [vmem:[%s8827_s0 + $0x158] sm:$0xf] }
  0x93   :  { %v7152_v39 = vpop.permute.xlu1 %952 }
  0x94   :  { %1739 = vmatmul.mubr.bf16.gmra.mxu0 %v1249_v14  ;;  %v1289_v14 = vsel %vm1234_vm3, %v5322_v25, %v7087_v33  ;;  %v7206_v33 = vrot.slane %v669_v9, 4  ;;  %v5259_v25 = vld [vmem:[%s8827_s0 + $0x38] sm:$0xf]  ;;  %v733_v9 = vshrl.u32 %v5260_v44, 16 }
  0x95   :  { %1746 = vmatprep.mubr.bf16.mxu0 %v1285_v6  ;;  %v719_v29 = vshrl.u32 %v5259_v25, 16 }
  0x96   :  { %v1195_v42 = vpop.permute.xlu0 %1194  ;;  %v675_v45 = vsel %vm6673_vm2, %v7206_v33, %v7208_v20 }
  0x97   :  { %v1099_v55 = vpop.permute.xlu1 %1098  ;;  %v1333_v57 = vsel %vm1234_vm3, %v5349_v60, %v1195_v42  ;;  %v5351_v60 = vcombine.low %v7171_v34, %v7176_v40  ;;  %v1257_v42 = vsel %vm1234_vm3, %v5306_v46, %v7093_v43  ;;  %v694_v43 = vshll.u32 %v7171_v34, 16 }
  0x98   :  { %1811 = vmatprep.mubr.bf16.mxu1 %v1333_v57  ;;  %v1301_v62 = vsel %vm1234_vm3, %v6322_v58, %v1099_v55  ;;  %v655_v58 = vor.u32 %v654_v56, %v7154_v18  ;;  %v304_v18 = vrot.slane %v303_v36, 4  ;;  %v5352_v57 = vcombine.low %v5259_v25, %v5260_v44 }
  0x99   :  { %1812 = vmatmul.mubr.bf16.vlgmr.msra.gmra.mxu1 %v1301_v62  ;;  %v708_v56 = vshll.u32 %v7176_v40, 16  ;;  %v5307_v62 = vcombine.low %v7067_v13, %v7074_v19  ;;  %v696_v17 = vrot.slane %v694_v43, 5  ;;  %v5262_v13 = vld [vmem:[%s8827_s0 + $0x130] sm:$0xf]  ;;  %v747_v19 = vshrl.u32 %v5261_v63, 16 }
  0x9a   :  { %v1197_v12 = vpop.permute.xlu0 %1196  ;;  %v7223_v11 = vrot.slane %v655_v58, 4  ;;  %v309_v8 = vsel %vm6673_vm2, %v304_v18, %v308_v32  ;;  %v764_v7 = vshll.u32 %v5262_v13, 16  ;;  %v7267_v36 = vrot.slane %v719_v29, 4  ;;  %v5290_v32 = vld [vmem:[%s8827_s0 + $0x34] sm:$0x1] }
  0x9b   :  { %v1101_v2 = vpop.permute.xlu1 %1100  ;;  %v1337_v6 = vsel %vm1234_vm3, %v5350_v24, %v1197_v12  ;;  %v691_v24 = vshrl.u32 %v7171_v34, 16  ;;  %v705_v34 = vshrl.u32 %v7176_v40, 16  ;;  %v5324_v12 = vcombine.low %v295_v61, %v309_v8 }
  0x9c   :  { %1747 = vmatmul.mubr.bf16.gmra.mxu0 %v1253_v30  ;;  %1819 = vmatprep.mubr.bf16.mxu1 %v1337_v6  ;;  %v1305_v22 = vsel %vm1234_vm3, %v6326_v59, %v1101_v2  ;;  %v722_v30 = vshll.u32 %v5259_v25, 16  ;;  %v644_v59 = vshll.u32 %v5285_v47, 16  ;;  %v710_v2 = vrot.slane %v708_v56, 5 }
  0x9d   :  { %1754 = vmatprep.mubr.bf16.mxu0 %v1289_v14  ;;  %v7251_v26 = vrot.slane %v691_v24, 4  ;;  %v658_v14 = vshll.u32 %v5286_v0, 16  ;;  %v707_v5 = vrot.slane %v705_v34, 4  ;;  %v761_v6 = vshrl.u32 %v5262_v13, 16 }
  0x9e   :  { %v1199_v23 = vpop.permute.xlu0 %1198  ;;  %v1261_v37 = vsel %vm1234_vm3, %v5307_v62, %v7113_v1  ;;  %v7269_v15 = vrot.slane %v722_v30, 5  ;;  %v7271_v58 = vrot.slane %v733_v9, 4  ;;  %v7276_v46 = vrot.slane %v736_v38, 5  ;;  %v5289_v1 = vld [vmem:[%s8827_s0 + $0x2c] sm:$0x1] }
  0x9f   :  { %v1341_v54 = vsel %vm1234_vm3, %v5351_v60, %v1199_v23  ;;  %v1103_v55 = vpop.permute.xlu1 %1102  ;;  %v1297_v21 = vsel %vm1234_vm3, %v5324_v12, %v7145_v3  ;;  %v660_v23 = vrot.slane %v658_v14, 5  ;;  %v5353_v18 = vcombine.low %v5261_v63, %v5262_v13  ;;  %v7294_v3 = vld [vmem:[%s8827_s0 + $0x138] sm:$0xf]  ;;  %v5292_v9 = vld [vmem:[%s8827_s0 + $0x44] sm:$0x1] }
  0xa0   :  { %v1309_v60 = vsel %vm1234_vm3, %v6329_v52, %v1103_v55  ;;  %v697_v24 = vor.u32 %v696_v17, %v7251_v26  ;;  %v7300_v44 = vrot.slane %v761_v6, 4  ;;  %v775_v52 = vshrl.u32 %v7294_v3, 16  ;;  %v6336_v62 = vld [vmem:[%s8827_s0 + $0x1f8] ss:$8 sps:$4 sm:$0xff]   ;;  %v7348_v14 = vld [vmem:[%s8827_s0 + $0x150] sm:$0xf] }
  0xa1   :  { %1820 = vmatmul.mubr.bf16.gmra.mxu1 %v1305_v22  ;;  %v646_v22 = vrot.slane %v644_v59, 5  ;;  %v5308_v55 = vcombine.low %v7128_v10, %v7137_v41  ;;  %v778_v43 = vshll.u32 %v7294_v3, 16  ;;  %v661_v47 = vsel %vm6673_vm2, %v7223_v11, %v660_v23  ;;  %v5291_v11 = vld [vmem:[%s8827_s0 + $0x3c] sm:$0x1]  ;;  %v7343_v59 = vld [vmem:[%s8827_s0 + $0x148] sm:$0xf] }
  0xa2   :  { %1827 = vmatprep.mubr.bf16.mxu1 %v1341_v54  ;;  %v1201_v27 = vpop.permute.xlu0 %1200  ;;  %v7287_v54 = vrot.slane %v747_v19, 4  ;;  %v714_v0 = vshll.u32 %v5290_v32, 16  ;;  %v725_v26 = vor.u32 %v7269_v15, %v7267_v36  ;;  %v739_v10 = vor.u32 %v7276_v46, %v7271_v58 }
  0xa3   :  { %v1345_v40 = vsel %vm1234_vm3, %v5352_v57, %v1201_v27  ;;  %v1105_v31 = vpop.permute.xlu1 %1104  ;;  %v700_v57 = vshll.u32 %v5289_v1, 16  ;;  %v647_v8 = vsel %vm6673_vm2, %v7221_v50, %v646_v22  ;;  %v5264_v50 = vld [vmem:[%s8827_s0 + $0x140] sm:$0xf]  ;;  %v7333_v27 = vrot.slane %v775_v52, 4 }
  0xa4   :  { %1755 = vmatmul.mubr.bf16.gmra.mxu0 %v1257_v42  ;;  %v7302_v42 = vrot.slane %v764_v7, 5  ;;  %v1313_v61 = vsel %vm1234_vm3, %v6333_v16, %v1105_v31  ;;  %v753_v41 = vor.u32 %v7289_v35, %v7287_v54  ;;  %v789_v29 = vshrl.u32 %v5264_v50, 16 }
  0xa5   :  { %1762 = vmatprep.mubr.bf16.mxu0 %v1293_v53  ;;  %v711_v53 = vor.u32 %v710_v2, %v707_v5  ;;  %v792_v30 = vshll.u32 %v5264_v50, 16  ;;  %v1265_v38 = vsel %vm1234_vm3, %v5308_v55, %v7152_v39  ;;  %v698_v12 = vrot.slane %v697_v24, 4  ;;  %v5293_v39 = vld [vmem:[%s8827_s0 + $0x12c] sm:$0x1] }
  0xa6   :  { %v1203_v25 = vpop.permute.xlu0 %1202  ;;  %v767_v56 = vor.u32 %v7302_v42, %v7300_v44  ;;  %v702_v63 = vrot.slane %v700_v57, 5  ;;  %v7350_v17 = vrot.slane %v778_v43, 5  ;;  %v716_v13 = vrot.slane %v714_v0, 5  ;;  %v6338_v42 = vld [vmem:[%s8827_s0 + $0x208] ss:$8 sps:$4 sm:$0xff]  }
  0xa7   :  { %v1349_v34 = vsel %vm1234_vm3, %v5353_v18, %v1203_v25  ;;  %v728_v19 = vshll.u32 %v5291_v11, 16  ;;  %v1107_v4 = vpop.permute.xlu1 %1106  ;;  %v5354_v5 = vcombine.low %v7294_v3, %v5264_v50  ;;  %v742_v2 = vshll.u32 %v5292_v9, 16  ;;  %v5298_v50 = vld [vmem:[%s8827_s0 + $0x154] sm:$0x1] }
  0xa8   :  { %v803_v6 = vshrl.u32 %v7343_v59, 16  ;;  %v806_v7 = vshll.u32 %v7343_v59, 16  ;;  %v791_v15 = vrot.slane %v789_v29, 4  ;;  %v794_v58 = vrot.slane %v792_v30, 5 }
  0xa9   :  { %1828 = vmatmul.mubr.bf16.gmra.mxu1 %v1309_v60  ;;  %v5365_v60 = vcombine.low %v647_v8, %v661_v47  ;;  %v817_v16 = vshrl.u32 %v7348_v14, 16  ;;  %v820_v46 = vshll.u32 %v7348_v14, 16  ;;  %v726_v22 = vrot.slane %v725_v26, 4  ;;  %v5268_v8 = vld [vmem:[%s8827_s0 + $0x160] sm:$0xf] }
  0xaa   :  { %1835 = vmatprep.mubr.bf16.mxu1 %v1345_v40  ;;  %v712_v40 = vrot.slane %v711_v53, 4  ;;  %v1205_v36 = vpop.permute.xlu0 %1204  ;;  %v740_v23 = vrot.slane %v739_v10, 4  ;;  %v756_v1 = vshll.u32 %v5293_v39, 16  ;;  %v1317_v31 = vsel %vm1234_vm3, %v6336_v62, %v1107_v4 }
  0xab   :  { %v730_v35 = vrot.slane %v728_v19, 5  ;;  %v1353_v3 = vsel %vm1234_vm3, %v5354_v5, %v1205_v36  ;;  %v744_v32 = vrot.slane %v742_v2, 5  ;;  %v805_v24 = vrot.slane %v803_v6, 4  ;;  %v1109_v47 = vpop.permute.xlu1 %1108  ;;  %v6340_v19 = vld [vmem:[%s8827_s0 + $0x218] ss:$8 sps:$4 sm:$0xff]  }
  0xac   :  { %1763 = vmatmul.mubr.bf16.gmra.mxu0 %v1261_v37  ;;  %v5294_v37 = vld [vmem:[%s8827_s0 + $0x134] sm:$0x1]  ;;  %v717_v54 = vsel %vm6673_vm2, %v712_v40, %v716_v13  ;;  %v808_v25 = vrot.slane %v806_v7, 5  ;;  %v5366_v44 = vcombine.low %v675_v45, %v689_v28  ;;  %v819_v52 = vrot.slane %v817_v16, 4 }
  0xad   :  { %1770 = vmatprep.mubr.bf16.mxu0 %v1297_v21  ;;  %v703_v21 = vsel %vm6673_vm2, %v698_v12, %v702_v63  ;;  %v770_v18 = vshll.u32 %v5294_v37, 16  ;;  %v822_v53 = vrot.slane %v820_v46, 5  ;;  %v754_v43 = vrot.slane %v753_v41, 4 }
  0xae   :  { %v5367_v55 = vcombine.low %v703_v21, %v717_v54  ;;  %v758_v57 = vrot.slane %v756_v1, 5  ;;  %v781_v33 = vor.u32 %v7350_v17, %v7333_v27  ;;  %v795_v20 = vor.u32 %v794_v58, %v791_v15  ;;  %v1207_v11 = vpop.permute.xlu0 %1206  ;;  %v5299_v15 = vld [vmem:[%s8827_s0 + $0x15c] sm:$0x1] }
  0xaf   :  { %v768_v45 = vrot.slane %v767_v56, 4  ;;  %v772_v28 = vrot.slane %v770_v18, 5  ;;  %v731_v0 = vsel %vm6673_vm2, %v726_v22, %v730_v35  ;;  %v745_v26 = vsel %vm6673_vm2, %v740_v23, %v744_v32  ;;  %v5300_v22 = vld [vmem:[%s8827_s0 + $0x164] sm:$0x1]  ;;  %v1111_v23 = vpop.permute.xlu1 %1110 }
  0xb0   :  { %v809_v10 = vor.u32 %v808_v25, %v805_v24  ;;  %v5355_v41 = vcombine.low %v7343_v59, %v7348_v14  ;;  %v823_v56 = vor.u32 %v822_v53, %v819_v52  ;;  %v784_v62 = vshll.u32 %v5295_v48, 16 }
  0xb1   :  { %1836 = vmatmul.mubr.bf16.gmra.mxu1 %v1313_v61  ;;  %v5296_v61 = vld [vmem:[%s8827_s0 + $0x144] sm:$0x1]  ;;  %v831_v27 = vshrl.u32 %v7389_v49, 16  ;;  %v834_v29 = vshll.u32 %v7389_v49, 16  ;;  %v759_v30 = vsel %vm6673_vm2, %v754_v43, %v758_v57  ;;  %v1321_v12 = vsel %vm1234_vm3, %v6338_v42, %v1109_v47  ;;  %v6343_v47 = vld [vmem:[%s8829_s3 + $0x78] sm:$0xff]  }
  0xb2   :  { %1843 = vmatprep.mubr.bf16.mxu1 %v1349_v34  ;;  %v5297_v34 = vld [vmem:[%s8827_s0 + $0x14c] sm:$0x1]  ;;  %v798_v9 = vshll.u32 %v5296_v61, 16  ;;  %v773_v63 = vsel %vm6673_vm2, %v768_v45, %v772_v28  ;;  %v826_v14 = vshll.u32 %v5298_v50, 16  ;;  %v5368_v17 = vcombine.low %v731_v0, %v745_v26  ;;  %v1209_v54 = vpop.permute.xlu0 %1208  ;;  %v6344_v0 = vld [vmem:[%s8829_s3 + $0x38] sm:$0xff]   ;;  %5885 = vmatprep.subr.bf16.mxu1 %v6343_v47  ;;  %v6345_v26 = vld [vmem:[%s8829_s3 + $0x70] sm:$0xff]  }
  0xb3   :  { %v812_v59 = vshll.u32 %v5297_v34, 16  ;;  %v1357_v40 = vsel %vm1234_vm3, %v5355_v41, %v1207_v11  ;;  %v782_v13 = vrot.slane %v781_v33, 4  ;;  %v786_v39 = vrot.slane %v784_v62, 5  ;;  %v6342_v33 = vld [vmem:[%s8827_s0 + $0x228] ss:$8 sps:$4 sm:$0xff]   ;;  %5886 = vmatpush3.bf16.msra.mxu1 %v6344_v0  ;;  %v6351_v50 = vld [vmem:[%s8829_s3 + $0xf8] sm:$0xff]  }
  0xb4   :  { %1771 = vmatmul.mubr.bf16.gmra.mxu0 %v1265_v38  ;;  %v845_v38 = vshrl.u32 %v5268_v8, 16  ;;  %v796_v4 = vrot.slane %v795_v20, 4  ;;  %v833_v5 = vrot.slane %v831_v27, 4  ;;  %v836_v2 = vrot.slane %v834_v29, 5  ;;  %v1113_v20 = vpop.permute.xlu1 %1112  ;;  %5887 = vmatprep.subr.bf16.mxu1 %v6345_v26  ;;  %v6347_v41 = vld [vmem:[%s8829_s3 + $0x68] sm:$0xff]   ;;  %v6349_v11 = vld [vmem:[%s8829_s3 + $0x60] sm:$0xff]  }
  0xb5   :  { %6177 = vmatprep.mubr.msk.bf16.mxu0 %vm1234_vm3, %v5365_v60  ;;  %v848_v60 = vshll.u32 %v5268_v8, 16  ;;  %v5369_v6 = vcombine.low %v759_v30, %v773_v63  ;;  %v800_v7 = vrot.slane %v798_v9, 5  ;;  %v810_v58 = vrot.slane %v809_v10, 4  ;;  %v6346_v10 = vld [vmem:[%s8829_s3 + $0x30] sm:$0xff]   ;;  %v6348_v34 = vld [vmem:[%s8829_s3 + $0x28] sm:$0xff]   ;;  %v6352_v62 = vld [vmem:[%s8829_s3 + $0xb8] sm:$0xff]   ;;  %5949 = vmatprep.subr.bf16.mxu0 %v6351_v50 }
  0xb6   :  { %v847_v37 = vrot.slane %v845_v38, 4  ;;  %v814_v16 = vrot.slane %v812_v59, 5  ;;  %v824_v46 = vrot.slane %v823_v56, 4  ;;  %v828_v21 = vrot.slane %v826_v14, 5  ;;  %v6350_v56 = vld [vmem:[%s8829_s3 + $0x20] sm:$0xff]   ;;  %v6354_v27 = vld [vmem:[%s8829_s3 + $0xf0] sm:$0xff]  }
  0xb7   :  { %v850_v36 = vrot.slane %v848_v60, 5  ;;  %v5356_v1 = vcombine.low %v7389_v49, %v5268_v8  ;;  %v837_v35 = vor.u32 %v836_v2, %v833_v5  ;;  %v801_v18 = vsel %vm6673_vm2, %v796_v4, %v800_v7  ;;  %5888 = vmatpush3.bf16.msra.mxu1 %v6346_v10  ;;  %v6356_v29 = vld [vmem:[%s8829_s3 + $0xb0] sm:$0xff]   ;;  %v6357_v30 = vld [vmem:[%s8829_s3 + $0xe8] sm:$0xff]   ;;  %v6360_v38 = vld [vmem:[%s8829_s3 + $0xe0] sm:$0xff]  }
  0xb8   :  { %v840_v32 = vshll.u32 %v5299_v15, 16  ;;  %v854_v24 = vshll.u32 %v5300_v22, 16  ;;  %v1325_v25 = vsel %vm1234_vm3, %v6340_v19, %v1111_v23  ;;  %v829_v42 = vsel %vm6673_vm2, %v824_v46, %v828_v21  ;;  %5889 = vmatprep.subr.bf16.mxu1 %v6347_v41  ;;  %v6358_v9 = vld [vmem:[%s8829_s3 + $0xa8] sm:$0xff]   ;;  %v6362_v60 = vld [vmem:[%s8829_s3 + $0xa0] sm:$0xff]   ;;  %v6355_v63 = vld [vmem:[%s8829_s3 + $0x18] sm:$0xff]  }
  0xb9   :  { %1844 = vmatmul.mubr.bf16.gmra.mxu1 %v1317_v31  ;;  %v787_v31 = vsel %vm6673_vm2, %v782_v13, %v786_v39  ;;  %v1361_v52 = vsel %vm1234_vm3, %v5356_v1, %v1209_v54  ;;  %v1329_v61 = vsel %vm1234_vm3, %v6342_v33, %v1113_v20  ;;  %v6363_v59 = vld [vmem:[%s8829_s3 + $0xd8] sm:$0xff]   ;;  %v6366_v13 = vld [vmem:[%s8829_s3 + $0xd0] sm:$0xff]   ;;  %v6454_v39 = vmov 0   ;;  %v6369_v7 = vld [vmem:[%s8829_s3 + $0xc8] sm:$0xff]  }
  0xba   :  { %1851 = vmatprep.mubr.bf16.mxu1 %v1353_v3  ;;  %v851_v3 = vor.u32 %v850_v36, %v847_v37  ;;  %v5370_v53 = vcombine.low %v787_v31, %v801_v18  ;;  %v842_v57 = vrot.slane %v840_v32, 5  ;;  %v856_v49 = vrot.slane %v854_v24, 5  ;;  %v6364_v14 = vld [vmem:[%s8829_s3 + $0x98] sm:$0xff]   ;;  %v6368_v19 = vld [vmem:[%s8829_s3 + $0x90] sm:$0xff]   ;;  %v6370_v36 = vld [vmem:[%s8829_s3 + $0x88] sm:$0xff]  }
  0xbb   :  { %5890 = vmatpush3.bf16.msra.mxu1 %v6348_v34  ;;  %v2008_v4 = vrot.slane %v6454_v39, 7  ;;  %v6367_v46 = vld [vmem:[%s8829_s3 + $0x8] sm:$0xff]   ;;  %v6372_v21 = vld [vmem:[%s8829_s3 + $0xc0] sm:$0xff]   ;;  %v6392_v0 = vld [vmem:[%s8829_s3 + $0x1f8] sm:$0xff]  }
  0xbc   :  { %6178 = vmatmul.mubr.msk.bf16.vlgmr.msra.gmra.mxu0 %vm1234_vm3, %v5366_v44  ;;  %v815_v44 = vsel %vm6673_vm2, %v810_v58, %v814_v16  ;;  %v852_v48 = vrot.slane %v851_v3, 4  ;;  %5891 = vmatprep.subr.bf16.mxu1 %v6349_v11  ;;  %v6365_v16 = vld [vmem:[%s8829_s3 + $0x48] sm:$0xff]   ;;  %v6374_v22 = vld [vmem:[%s8829_s3 + $0x80] sm:$0xff]   ;;  %v6377_v3 = vld [vmem:[%s8829_s3 + $0x178] sm:$0xff]  }
  0xbd   :  { %6181 = vmatprep.mubr.msk.bf16.mxu0 %vm1234_vm3, %v5367_v55  ;;  %v838_v55 = vrot.slane %v837_v35, 4  ;;  %v5371_v43 = vcombine.low %v815_v44, %v829_v42  ;;  %5950 = vmatpush3.bf16.msra.mxu0 %v6352_v62  ;;  %v6371_v23 = vld [vmem:[%s8829_s3 + $0x40] sm:$0xff]  }
  0xbe   :  { %v857_v28 = vsel %vm6673_vm2, %v852_v48, %v856_v49  ;;  %5951 = vmatprep.subr.bf16.mxu0 %v6354_v27  ;;  %v6373_v1 = vld [vmem:[%s8829_s3] sm:$0xff]  }
  0xbf   :  { %v843_v45 = vsel %vm6673_vm2, %v838_v55, %v842_v57  ;;  %5892 = vmatpush3.bf16.msra.mxu1 %v6350_v56 }
  0xc0   :  { %v5372_v8 = vcombine.low %v843_v45, %v857_v28 }
  0xc1   :  { %1852 = vmatmul.mubr.bf16.gmra.mxu1 %v1321_v12  ;;  %5952 = vmatpush3.bf16.msra.mxu0 %v6356_v29  ;;  %v6353_v12 = vld [vmem:[%s8829_s3 + $0x58] sm:$0xff]  }
  0xc2   :  { %1859 = vmatprep.mubr.bf16.mxu1 %v1357_v40  ;;  %5953 = vmatprep.subr.bf16.mxu0 %v6357_v30  ;;  %v6361_v40 = vld [vmem:[%s8829_s3 + $0x10] sm:$0xff]  }
  0xc3   :  { %5893 = vmatprep.subr.bf16.mxu1 %v6353_v12 }
  0xc4   :  { %6182 = vmatmul.mubr.msk.bf16.gmra.mxu0 %vm1234_vm3, %v5368_v17  ;;  %5894 = vmatpush3.bf16.msra.mxu1 %v6355_v63  ;;  %v6359_v17 = vld [vmem:[%s8829_s3 + $0x50] sm:$0xff]  }
  0xc5   :  { %6185 = vmatprep.mubr.msk.bf16.mxu0 %vm1234_vm3, %v5369_v6  ;;  %5954 = vmatpush3.bf16.msra.mxu0 %v6358_v9  ;;  %v2144_v6 = vsel %vm7527_vm8, 0, %v2008_v4 }
  0xc6   :  { %5955 = vmatprep.subr.bf16.mxu0 %v6360_v38  ;;  %5895 = vmatprep.subr.bf16.mxu1 %v6359_v17  ;;  %v2164_v37 = vsel %vm7532_vm9, %v2144_v6, 0 }
  0xc7   :  { %v5418_v15 = vcombine.low %v2164_v37, %v2164_v37  ;;  %v5419_v58 = vcombine.high %v2164_v37, %v2164_v37 }
  0xc8   :  { %5896 = vmatpush3.bf16.msra.mxu1 %v6361_v40 }
  0xc9   :  { %1860 = vmatmul.mubr.bf16.gmra.mxu1 %v1325_v25  ;;  %5956 = vmatpush3.bf16.msra.mxu0 %v6362_v60  ;;  %2300 = vst [vmem:[#allocation2] sm:$0xf] %v5418_v15  ;;  %2301 = vst [vmem:[#allocation2 + $0x4] sm:$0x1] %v5419_v58 }
  0xca   :  { %1867 = vmatprep.mubr.bf16.mxu1 %v1361_v52  ;;  %5957 = vmatprep.subr.bf16.mxu0 %v6363_v59  ;;  %2318 = vst [vmem:[#allocation2 + $0x48] sm:$0xf] %v5418_v15  ;;  %2319 = vst [vmem:[#allocation2 + $0x4c] sm:$0x1] %v5419_v58 }
  0xcb   :  { %2320 = vst [vmem:[#allocation2 + $0x50] sm:$0xf] %v5418_v15  ;;  %2321 = vst [vmem:[#allocation2 + $0x54] sm:$0x1] %v5419_v58  ;;  %5897 = vmatprep.subr.bf16.mxu1 %v6365_v16 }
  0xcc   :  { %6186 = vmatmul.mubr.msk.bf16.gmra.mxu0 %vm1234_vm3, %v5370_v53  ;;  %2338 = vst [vmem:[#allocation2 + $0x98] sm:$0xf] %v5418_v15  ;;  %2339 = vst [vmem:[#allocation2 + $0x9c] sm:$0x1] %v5419_v58  ;;  %5898 = vmatpush3.bf16.msra.mxu1 %v6367_v46 }
  0xcd   :  { %6189 = vmatprep.mubr.msk.bf16.mxu0 %vm1234_vm3, %v5371_v43  ;;  %5958 = vmatpush3.bf16.msra.mxu0 %v6364_v14 }
  0xce   :  { %5959 = vmatprep.subr.bf16.mxu0 %v6366_v13  ;;  %5899 = vmatprep.subr.bf16.mxu1 %v6371_v23 }
  0xd0   :  { %5900 = vmatpush3.bf16.msra.mxu1 %v6373_v1  ;;  %v7608_v10 = vld [vmem:[#allocation2] sm:$0xf]  ;;  %v2356_v59 = vld [vmem:[#allocation2 + $0x4] sm:$0x1] }
  0xd1   :  { %1868 = vmatmul.mubr.bf16.gmra.mxu1 %v1329_v61  ;;  %5960 = vmatpush3.bf16.msra.mxu0 %v6368_v19  ;;  %v2376_v11 = vshrl.u32 %v7608_v10, 16  ;;  %v2379_v56 = vshll.u32 %v7608_v10, 16  ;;  %v2599_v17 = vld [vmem:[#allocation2] sm:$0xe]  ;;  %v2385_v13 = vshll.u32 %v2356_v59, 16  ;;  %v2652_v37 = vrot.slane %v2356_v59, 5 }
  0xd2   :  { %5961 = vmatprep.subr.bf16.mxu0 %v6369_v7  ;;  %6013 = vmatprep.subr.bf16.mxu1 %v6377_v3  ;;  %v2348_v19 = vld [vmem:[#allocation2 + $0x50] sm:$0xf]  ;;  %v5452_v7 = vrot.slane %v2599_v17, 9 }
  0xd3   :  { %v2378_v9 = vrot.slane %v2376_v11, 4  ;;  %v2381_v38 = vrot.slane %v2379_v56, 5  ;;  %v2491_v15 = vshll.u32 %v2348_v19, 16 }
  0xd4   :  { %6190 = vmatmul.mubr.msk.bf16.gmra.mxu0 %vm1234_vm3, %v5372_v8  ;;  %v7657_v56 = vsel %vm7650_vm12, %v5452_v7, %v2652_v37 }
  0xd5   :  { %5962 = vmatpush3.bf16.msra.mxu0 %v6370_v36  ;;  %v2382_v40 = vor.u32 %v2381_v38, %v2378_v9  ;;  %v2488_v36 = vshrl.u32 %v2348_v19, 16  ;;  %v2364_v9 = vld [vmem:[#allocation2 + $0x54] sm:$0x1]  ;;  %v2493_v59 = vrot.slane %v2491_v15, 5 }
  0xd6   :  { %5963 = vmatprep.subr.bf16.mxu0 %v6372_v21  ;;  %v7642_v21 = vrot.slane %v2385_v13, 5 }
  0xd7   :  { %v7640_v46 = vrot.slane %v2382_v40, 4  ;;  %v2490_v38 = vrot.slane %v2488_v36, 4  ;;  %v2684_v36 = vrot.slane %v2364_v9, 5 }
  0xd9   :  { %5964 = vmatpush3.bf16.msra.mxu0 %v6374_v22  ;;  %v7647_v22 = vld [vmem:[%s8830_s2] ss:$0 sm:$0xff] }
  0xda   :  { %6077 = vmatprep.subr.bf16.mxu0 %v6392_v0  ;;  %v6450_v0 = vld [vmem:[%s8832_s5 + $0x38] sm:$0xff]  }
 0x13c   :  { %v5761_v31 = vpop.f32.mrf.mxu0 }
 0x13e   :  { %v5762_v54 = vpop.f32.mrf.mxu0 }
 0x13f   :  { %v5763_v58 = vadd.f32 %v5762_v54, %v5761_v31  ;;  %v2607_v31 = vld [vmem:[#allocation2 + $0x50] sm:$0xe] }
 0x140   :  { %v5764_v35 = vpop.f32.mrf.mxu0  ;;  %v5460_v37 = vrot.slane %v2607_v31, 9 }
 0x142   :  { %v5765_v18 = vpop.f32.mrf.mxu0 }
 0x143   :  { %v5766_v23 = vadd.f32 %v5765_v18, %v5764_v35  ;;  %v1717_v35 = vadd.f32 %v5763_v58, %v7647_v22 }
 0x144   :  { %v7567_v32 = vpop.f32.mrf.mxu0 }
 0x146   :  { %v5768_v24 = vpop.f32.mrf.mxu0 }
 0x147   :  { %v5769_v54 = vadd.f32 %v5768_v24, %v7567_v32  ;;  %v2388_v32 = vsel %vm6673_vm2, %v7640_v46, %v7642_v21  ;;  %v1720_v24 = vadd.f32 %v5766_v23, %v7647_v22 }
 0x148   :  { %v7569_v25 = vpop.f32.mrf.mxu0 }
 0x149   :  { %v1725_v15 = vadd.f32 %v5769_v54, %v7647_v22 }
 0x14a   :  { %v7571_v44 = vpop.f32.mrf.mxu0 }
 0x14b   :  { %v5772_v18 = vadd.f32 %v7571_v44, %v7569_v25 }
 0x14c   :  { %v7573_v42 = vpop.f32.mrf.mxu0 }
 0x14e   :  { %v7575_v52 = vpop.f32.mrf.mxu0 }
 0x14f   :  { %v5775_v17 = vadd.f32 %v7575_v52, %v7573_v42  ;;  %v2497_v52 = vshll.u32 %v2364_v9, 16 }
 0x150   :  { %v7577_v53 = vpop.f32.mrf.mxu0 }
 0x151   :  { %v1733_v23 = vadd.f32 %v5775_v17, %v7647_v22 }
 0x152   :  { %v7579_v55 = vpop.f32.mrf.mxu0 }
 0x153   :  { %v5778_v13 = vadd.f32 %v7579_v55, %v7577_v53 }
 0x154   :  { %v7581_v43 = vpop.f32.mrf.mxu0 }
 0x156   :  { %v7583_v57 = vpop.f32.mrf.mxu0 }
 0x157   :  { %v5781_v19 = vadd.f32 %v7583_v57, %v7581_v43  ;;  %v2494_v43 = vor.u32 %v2493_v59, %v2490_v38  ;;  %v1728_v57 = vadd.f32 %v5772_v18, %v7647_v22 }
 0x158   :  { %v7585_v48 = vpop.f32.mrf.mxu0 }
 0x159   :  { %v7587_v49 = vpop.f32.mrf.mxu1  ;;  %v1741_v31 = vadd.f32 %v5781_v19, %v7647_v22  ;;  %v7703_v38 = vrot.slane %v2494_v43, 4 }
 0x15a   :  { %v7589_v33 = vpop.f32.mrf.mxu0 }
 0x15b   :  { %v7591_v20 = vpop.f32.mrf.mxu1  ;;  %v5784_v25 = vadd.f32 %v7589_v33, %v7585_v48 }
 0x15c   :  { %v7593_v45 = vpop.f32.mrf.mxu0  ;;  %v5827_v44 = vadd.f32 %v7591_v20, %v7587_v49  ;;  %v1736_v20 = vadd.f32 %v5778_v13, %v7647_v22 }
 0x15d   :  { %v7595_v28 = vpop.f32.mrf.mxu1 }
 0x15e   :  { %v7597_v61 = vpop.f32.mrf.mxu0  ;;  %v1814_v9 = vadd.f32 %v5827_v44, %v1717_v35 }
 0x15f   :  { %v7599_v8 = vpop.f32.mrf.mxu1  ;;  %v5787_v58 = vadd.f32 %v7597_v61, %v7593_v45 }
 0x160   :  { %v7601_v47 = vpop.f32.mrf.mxu0  ;;  %v5830_v48 = vadd.f32 %v7599_v8, %v7595_v28  ;;  %v7694_v28 = vrot.slane %v2497_v52, 5  ;;  %v7698_v8 = vsel %vm7650_vm12, %v5460_v37, %v2684_v36 }
 0x161   :  { %v7606_v26 = vpop.f32.mrf.mxu1 }
 0x162   :  { %v7610_v41 = vpop.f32.mrf.mxu0  ;;  %v1817_v18 = vadd.f32 %v5830_v48, %v1720_v24 }
 0x163   :  { %v5832_v34 = vpop.f32.mrf.mxu1  ;;  %v5790_v49 = vadd.f32 %v7610_v41, %v7601_v47  ;;  %v1749_v47 = vadd.f32 %v5787_v58, %v7647_v22 }
 0x164   :  { %v7612_v50 = vpop.f32.mrf.mxu0  ;;  %v5833_v53 = vadd.f32 %v5832_v34, %v7606_v26  ;;  %v1744_v34 = vadd.f32 %v5784_v25, %v7647_v22 }
 0x165   :  { %v7616_v62 = vpop.f32.mrf.mxu1 }
 0x166   :  { %v7618_v27 = vpop.f32.mrf.mxu0 }
 0x167   :  { %v7620_v29 = vpop.f32.mrf.mxu1  ;;  %v5793_v45 = vadd.f32 %v7618_v27, %v7612_v50  ;;  %v1822_v27 = vadd.f32 %v5833_v53, %v1725_v15 }
 0x168   :  { %v7622_v30 = vpop.f32.mrf.mxu0  ;;  %v5836_v61 = vadd.f32 %v7620_v29, %v7616_v62  ;;  %v1752_v62 = vadd.f32 %v5790_v49, %v7647_v22 }
 0x169   :  { %v7624_v60 = vpop.f32.mrf.mxu1  ;;  %v1757_v17 = vadd.f32 %v5793_v45, %v7647_v22 }
 0x16a   :  { %v7626_v12 = vpop.f32.mrf.mxu0  ;;  %v1825_v19 = vadd.f32 %v5836_v61, %v1728_v57 }
 0x16b   :  { %v7628_v63 = vpop.f32.mrf.mxu1  ;;  %v5796_v41 = vadd.f32 %v7626_v12, %v7622_v30 }
 0x16c   :  { %v7630_v14 = vpop.f32.mrf.mxu0  ;;  %v5839_v29 = vadd.f32 %v7628_v63, %v7624_v60 }
 0x16d   :  { %v7632_v39 = vpop.f32.mrf.mxu1  ;;  %v7715_v60 = vadd.f32 %v5796_v41, %v7647_v22 }
 0x16e   :  { %v7634_v4 = vpop.f32.mrf.mxu0  ;;  %v1830_v53 = vadd.f32 %v5839_v29, %v1733_v23 }
 0x16f   :  { %v7636_v6 = vpop.f32.mrf.mxu1  ;;  %v5799_v59 = vadd.f32 %v7634_v4, %v7630_v14 }
 0x170   :  { %v7638_v16 = vpop.f32.mrf.mxu0  ;;  %v5842_v13 = vadd.f32 %v7636_v6, %v7632_v39 }
 0x171   :  { %v5843_v1 = vpop.f32.mrf.mxu1  ;;  %v7718_v15 = vadd.f32 %v5799_v59, %v7647_v22 }
 0x172   :  { %v5801_v3 = vpop.f32.mrf.mxu0 }
 0x173   :  { %v5844_v11 = vpop.f32.mrf.mxu1  ;;  %v5802_v37 = vadd.f32 %v5801_v3, %v7638_v16 }
 0x174   :  { %v5803_v40 = vpop.f32.mrf.mxu0  ;;  %v5845_v25 = vadd.f32 %v5844_v11, %v5843_v1  ;;  %v7720_v11 = vadd.f32 %v5842_v13, %v1736_v20 }
 0x175   :  { %v5846_v7 = vpop.f32.mrf.mxu1 }
 0x176   :  { %v5804_v42 = vpop.f32.mrf.mxu0 }
 0x177   :  { %v5847_v55 = vpop.f32.mrf.mxu1  ;;  %v5805_v44 = vadd.f32 %v5804_v42, %v5803_v40  ;;  %v7723_v40 = vadd.f32 %v5802_v37, %v7647_v22 }
 0x178   :  { %v5806_v33 = vpop.f32.mrf.mxu0  ;;  %v5848_v52 = vadd.f32 %v5847_v55, %v5846_v7  ;;  %v1838_v55 = vadd.f32 %v5845_v25, %v1741_v31 }
 0x179   :  { %v5849_v26 = vpop.f32.mrf.mxu1  ;;  %v7726_v7 = vadd.f32 %v5805_v44, %v7647_v22 }
 0x17a   :  { %v5807_v54 = vpop.f32.mrf.mxu0  ;;  %v1841_v57 = vadd.f32 %v5848_v52, %v1744_v34 }
 0x17b   :  { %v5850_v50 = vpop.f32.mrf.mxu1  ;;  %v5808_v63 = vadd.f32 %v5807_v54, %v5806_v33 }
 0x17c   :  { %v6179_v35 = vpop.f32.mrf.mxu0  ;;  %v5851_v39 = vadd.f32 %v5850_v50, %v5849_v26 }
 0x17d   :  { %v1919_v30 = vadd.f32 %v6179_v35, %v1822_v27  ;;  %v5852_v12 = vpop.f32.mrf.mxu1  ;;  %v7729_v48 = vadd.f32 %v5808_v63, %v7647_v22 }
 0x17e   :  { %v1910_v36 = vpop.f32.mrf.mxu0  ;;  %v7731_v54 = vadd.f32 %v5851_v39, %v1749_v47 }
 0x17f   :  { %v1975_v14 = vmax.f32 %v1919_v30, 0.0  ;;  %v1911_v4 = vadd.f32 %v1910_v36, %v1814_v9  ;;  %v5853_v24 = vpop.f32.mrf.mxu1 }
 0x180   :  { %v5854_v6 = vadd.f32 %v5853_v24, %v5852_v12  ;;  %v6180_v58 = vpop.f32.mrf.mxu0 }
 0x181   :  { %v1991_v43 = vpack.c.bf16 %v1975_v14, %v1975_v14  ;;  %v1973_v16 = vmax.f32 %v1911_v4, 0.0  ;;  %v1922_v1 = vadd.f32 %v6180_v58, %v1825_v19  ;;  %v5855_v3 = vpop.f32.mrf.mxu1 }
 0x182   :  { %v1913_v42 = vpop.f32.mrf.mxu0  ;;  %v7733_v9 = vadd.f32 %v5854_v6, %v1752_v62 }
 0x183   :  { %v2027_v49 = vshrl.u32 %v1991_v43, 16  ;;  %v1989_v23 = vpack.c.bf16 %v1973_v16, %v1973_v16  ;;  %v1976_v33 = vmax.f32 %v1922_v1, 0.0  ;;  %v5856_v45 = vpop.f32.mrf.mxu1  ;;  %v1914_v61 = vadd.f32 %v1913_v42, %v1817_v18 }
 0x184   :  { %v5857_v26 = vadd.f32 %v5856_v45, %v5855_v3  ;;  %v6183_v20 = vpop.f32.mrf.mxu0  ;;  %v2030_v50 = vshll.u32 %v1991_v43, 16 }
 0x185   :  { %v2029_v41 = vrot.slane %v2027_v49, 7  ;;  %v2013_v27 = vshrl.u32 %v1989_v23, 16  ;;  %v1992_v29 = vpack.c.bf16 %v1976_v33, %v1976_v33  ;;  %v5858_v31 = vpop.f32.mrf.mxu1  ;;  %v2016_v34 = vshll.u32 %v1989_v23, 16 }
 0x186   :  { %v1974_v59 = vmax.f32 %v1914_v61, 0.0  ;;  %v1935_v22 = vadd.f32 %v6183_v20, %v1838_v55  ;;  %v1926_v35 = vpop.f32.mrf.mxu0  ;;  %v7735_v13 = vadd.f32 %v5857_v26, %v1757_v17 }
 0x187   :  { %v2032_v30 = vor.u32 %v2030_v50, %v2029_v41  ;;  %v2015_v12 = vrot.slane %v2013_v27, 7  ;;  %v2034_v18 = vshrl.u32 %v1992_v29, 16  ;;  %v2037_v19 = vshll.u32 %v1992_v29, 16  ;;  %v5859_v37 = vpop.f32.mrf.mxu1 }
 0x188   :  { %v1990_v47 = vpack.c.bf16 %v1974_v59, %v1974_v59  ;;  %v1979_v25 = vmax.f32 %v1935_v22, 0.0  ;;  %v1927_v62 = vadd.f32 %v1926_v35, %v1830_v53  ;;  %v7737_v44 = vadd.f32 %v5859_v37, %v5858_v31  ;;  %v6184_v52 = vpop.f32.mrf.mxu0 }
 0x189   :  { %v2147_v36 = vsel %vm7527_vm8, 0, %v2032_v30  ;;  %v2018_v63 = vor.u32 %v2016_v34, %v2015_v12  ;;  %v2036_v14 = vrot.slane %v2034_v18, 7  ;;  %v1938_v4 = vadd.f32 %v6184_v52, %v1841_v57  ;;  %v5861_v24 = vpop.f32.mrf.mxu1 }
 0x18a   :  { %v2167_v17 = vsel %vm7532_vm9, %v2147_v36, 0  ;;  %v2020_v39 = vshrl.u32 %v1990_v47, 16  ;;  %v2023_v6 = vshll.u32 %v1990_v47, 16  ;;  %v1995_v58 = vpack.c.bf16 %v1979_v25, %v1979_v25  ;;  %v1929_v43 = vpop.f32.mrf.mxu0 }
 0x18b   :  { %v5424_v16 = vcombine.low %v2167_v17, %v2167_v17  ;;  %v5425_v1 = vcombine.high %v2167_v17, %v2167_v17  ;;  %v2145_v53 = vsel %vm7527_vm8, 0, %v2018_v63  ;;  %v2039_v3 = vor.u32 %v2037_v19, %v2036_v14  ;;  %v5862_v42 = vpop.f32.mrf.mxu1 }
 0x18c   :  { %v2165_v55 = vsel %vm7532_vm9, %v2145_v53, 0  ;;  %v2022_v49 = vrot.slane %v2020_v39, 7  ;;  %v2055_v57 = vshrl.u32 %v1995_v58, 16  ;;  %v2058_v23 = vshll.u32 %v1995_v58, 16  ;;  %v6187_v33 = vpop.f32.mrf.mxu0 }
 0x18d   :  { %2306 = vst [vmem:[#allocation2 + $0x18] sm:$0xf] %v5424_v16  ;;  %2307 = vst [vmem:[#allocation2 + $0x1c] sm:$0x1] %v5425_v1  ;;  %v5420_v45 = vcombine.low %v2165_v55, %v2165_v55  ;;  %v5421_v61 = vcombine.high %v2165_v55, %v2165_v55  ;;  %v2148_v26 = vsel %vm7527_vm8, 0, %v2039_v3  ;;  %v1977_v20 = vmax.f32 %v1927_v62, 0.0  ;;  %v5864_v41 = vpop.f32.mrf.mxu1 }
 0x18e   :  { %v2168_v50 = vsel %vm7532_vm9, %v2148_v26, 0  ;;  %v2025_v27 = vor.u32 %v2023_v6, %v2022_v49  ;;  %v2057_v29 = vrot.slane %v2055_v57, 7  ;;  %v1980_v31 = vmax.f32 %v1938_v4, 0.0  ;;  %v1942_v34 = vpop.f32.mrf.mxu0 }
 0x18f   :  { %2302 = vst [vmem:[#allocation2 + $0x8] sm:$0xf] %v5420_v45  ;;  %2303 = vst [vmem:[#allocation2 + $0xc] sm:$0x1] %v5421_v61  ;;  %v5426_v59 = vcombine.low %v2168_v50, %v2168_v50  ;;  %v5427_v22 = vcombine.high %v2168_v50, %v2168_v50  ;;  %v1993_v35 = vpack.c.bf16 %v1977_v20, %v1977_v20  ;;  %v5865_v12 = vpop.f32.mrf.mxu1 }
 0x190   :  { %v1930_v30 = vadd.f32 %v1929_v43, %v7720_v11  ;;  %v2146_v18 = vsel %vm7527_vm8, 0, %v2025_v27  ;;  %v2060_v19 = vor.u32 %v2058_v23, %v2057_v29  ;;  %v1996_v37 = vpack.c.bf16 %v1980_v31, %v1980_v31  ;;  %v6188_v25 = vpop.f32.mrf.mxu0 }
 0x191   :  { %v7754_v47 = vadd.f32 %v5862_v42, %v5861_v24  ;;  %2308 = vst [vmem:[#allocation2 + $0x20] sm:$0xf] %v5426_v59  ;;  %2309 = vst [vmem:[#allocation2 + $0x24] sm:$0x1] %v5427_v22  ;;  %v2166_v62 = vsel %vm7532_vm9, %v2146_v18, 0  ;;  %v2041_v52 = vshrl.u32 %v1993_v35, 16  ;;  %v5867_v14 = vpop.f32.mrf.mxu1  ;;  %v1951_v42 = vadd.f32 %v6187_v33, %v7735_v13 }
 0x192   :  { %v2044_v36 = vshll.u32 %v1993_v35, 16  ;;  %v1978_v63 = vmax.f32 %v1930_v30, 0.0  ;;  %v5422_v4 = vcombine.low %v2166_v62, %v2166_v62  ;;  %v5423_v11 = vcombine.high %v2166_v62, %v2166_v62  ;;  %v1945_v6 = vpop.f32.mrf.mxu0 }
 0x193   :  { %v2151_v17 = vsel %vm7527_vm8, 0, %v2060_v19  ;;  %v2062_v39 = vshrl.u32 %v1996_v37, 16  ;;  %v2043_v58 = vrot.slane %v2041_v52, 7  ;;  %v2065_v43 = vshll.u32 %v1996_v37, 16  ;;  %v5868_v55 = vpop.f32.mrf.mxu1 }
 0x194   :  { %v2171_v24 = vsel %vm7532_vm9, %v2151_v17, 0  ;;  %v1994_v16 = vpack.c.bf16 %v1978_v63, %v1978_v63  ;;  %2304 = vst [vmem:[#allocation2 + $0x10] sm:$0xf] %v5422_v4  ;;  %2305 = vst [vmem:[#allocation2 + $0x14] sm:$0x1] %v5423_v11  ;;  %v1943_v45 = vadd.f32 %v1942_v34, %v7731_v54  ;;  %v6191_v61 = vpop.f32.mrf.mxu0  ;;  %v1983_v20 = vmax.f32 %v1951_v42, 0.0 }
 0x195   :  { %v5432_v1 = vcombine.low %v2171_v24, %v2171_v24  ;;  %v5433_v53 = vcombine.high %v2171_v24, %v2171_v24  ;;  %v2064_v3 = vrot.slane %v2062_v39, 7  ;;  %v2046_v49 = vor.u32 %v2044_v36, %v2043_v58  ;;  %v5870_v35 = vpop.f32.mrf.mxu1 }
 0x196   :  { %v2048_v57 = vshrl.u32 %v1994_v16, 16  ;;  %v2051_v23 = vshll.u32 %v1994_v16, 16  ;;  %v5866_v50 = vadd.f32 %v5865_v12, %v5864_v41  ;;  %v1857_v27 = vadd.f32 %v7737_v44, %v7715_v60  ;;  %v1958_v12 = vpop.f32.mrf.mxu0 }
 0x197   :  { %2314 = vst [vmem:[#allocation2 + $0x38] sm:$0xf] %v5432_v1  ;;  %2315 = vst [vmem:[#allocation2 + $0x3c] sm:$0x1] %v5433_v53  ;;  %v2067_v26 = vor.u32 %v2065_v43, %v2064_v3  ;;  %v2149_v29 = vsel %vm7527_vm8, 0, %v2046_v49  ;;  %v1981_v13 = vmax.f32 %v1943_v45, 0.0  ;;  %v1946_v33 = vadd.f32 %v1945_v6, %v7733_v9  ;;  %v5871_v39 = vpop.f32.mrf.mxu1 }
 0x198   :  { %v2050_v31 = vrot.slane %v2048_v57, 7  ;;  %v2169_v59 = vsel %vm7532_vm9, %v2149_v29, 0  ;;  %v1999_v34 = vpack.c.bf16 %v1983_v20, %v1983_v20  ;;  %v1954_v22 = vadd.f32 %v6188_v25, %v1857_v27  ;;  %v6192_v16 = vpop.f32.mrf.mxu0 }
 0x199   :  { %v2152_v54 = vsel %vm7527_vm8, 0, %v2067_v26  ;;  %v5428_v41 = vcombine.low %v2169_v59, %v2169_v59  ;;  %v5429_v30 = vcombine.high %v2169_v59, %v2169_v59  ;;  %v1997_v52 = vpack.c.bf16 %v1981_v13, %v1981_v13 }
 0x19a   :  { %v2172_v60 = vsel %vm7532_vm9, %v2152_v54, 0  ;;  %v2053_v44 = vor.u32 %v2051_v23, %v2050_v31  ;;  %v2083_v37 = vshrl.u32 %v1999_v34, 16  ;;  %v2086_v9 = vshll.u32 %v1999_v34, 16 }
 0x19b   :  { %v5434_v18 = vcombine.low %v2172_v60, %v2172_v60  ;;  %v5435_v19 = vcombine.high %v2172_v60, %v2172_v60  ;;  %2310 = vst [vmem:[#allocation2 + $0x28] sm:$0xf] %v5428_v41  ;;  %2311 = vst [vmem:[#allocation2 + $0x2c] sm:$0x1] %v5429_v30  ;;  %v1984_v36 = vmax.f32 %v1954_v22, 0.0  ;;  %v1982_v25 = vmax.f32 %v1946_v33, 0.0 }
 0x19c   :  { %v2150_v62 = vsel %vm7527_vm8, 0, %v2053_v44  ;;  %v2085_v4 = vrot.slane %v2083_v37, 7  ;;  %v5869_v11 = vadd.f32 %v5868_v55, %v5867_v14  ;;  %v1862_v17 = vadd.f32 %v7754_v47, %v7718_v15 }
 0x19d   :  { %2316 = vst [vmem:[#allocation2 + $0x40] sm:$0xf] %v5434_v18  ;;  %2317 = vst [vmem:[#allocation2 + $0x44] sm:$0x1] %v5435_v19  ;;  %v2170_v63 = vsel %vm7532_vm9, %v2150_v62, 0  ;;  %v2069_v58 = vshrl.u32 %v1997_v52, 16  ;;  %v2000_v53 = vpack.c.bf16 %v1984_v36, %v1984_v36  ;;  %v1998_v3 = vpack.c.bf16 %v1982_v25, %v1982_v25 }
 0x19e   :  { %v5430_v6 = vcombine.low %v2170_v63, %v2170_v63  ;;  %v5431_v24 = vcombine.high %v2170_v63, %v2170_v63  ;;  %v2072_v43 = vshll.u32 %v1997_v52, 16  ;;  %v2088_v1 = vor.u32 %v2086_v9, %v2085_v4  ;;  %v7796_v9 = vld [vmem:[#allocation2 + $0x8] sm:$0xf]  ;;  %v2716_v63 = vld [vmem:[#allocation2 + $0x10] sm:$0xf] }
 0x19f   :  { %v1870_v42 = vadd.f32 %v5869_v11, %v7726_v7  ;;  %v2071_v49 = vrot.slane %v2069_v58, 7  ;;  %v1959_v57 = vadd.f32 %v1958_v12, %v1862_v17  ;;  %v5872_v23 = vadd.f32 %v5871_v39, %v5870_v35  ;;  %v1961_v7 = vpop.f32.mrf.mxu0 }
 0x1a0   :  { %2312 = vst [vmem:[#allocation2 + $0x30] sm:$0xf] %v5430_v6  ;;  %2313 = vst [vmem:[#allocation2 + $0x34] sm:$0x1] %v5431_v24  ;;  %v1865_v14 = vadd.f32 %v5866_v50, %v7723_v40  ;;  %v2155_v15 = vsel %vm7527_vm8, 0, %v2088_v1  ;;  %v2090_v47 = vshrl.u32 %v2000_v53, 16 }
 0x1a1   :  { %v2093_v55 = vshll.u32 %v2000_v53, 16  ;;  %v2076_v45 = vshrl.u32 %v1998_v3, 16  ;;  %v2175_v26 = vsel %vm7532_vm9, %v2155_v15, 0  ;;  %v2074_v20 = vor.u32 %v2072_v43, %v2071_v49 }
 0x1a2   :  { %v2079_v27 = vshll.u32 %v1998_v3, 16  ;;  %v1967_v29 = vadd.f32 %v6191_v61, %v1870_v42  ;;  %v5440_v31 = vcombine.low %v2175_v26, %v2175_v26  ;;  %v5441_v13 = vcombine.high %v2175_v26, %v2175_v26  ;;  %v2361_v46 = vld [vmem:[#allocation2 + $0x2c] sm:$0x1] }
 0x1a3   :  { %v2092_v33 = vrot.slane %v2090_v47, 7  ;;  %v2078_v59 = vrot.slane %v2076_v45, 7  ;;  %v2153_v40 = vsel %vm7527_vm8, 0, %v2074_v20  ;;  %v1985_v54 = vmax.f32 %v1959_v57, 0.0 }
 0x1a4   :  { %v1987_v50 = vmax.f32 %v1967_v29, 0.0  ;;  %v1873_v34 = vadd.f32 %v5872_v23, %v7729_v48  ;;  %2326 = vst [vmem:[#allocation2 + $0x68] sm:$0xf] %v5440_v31  ;;  %2327 = vst [vmem:[#allocation2 + $0x6c] sm:$0x1] %v5441_v13  ;;  %v2173_v22 = vsel %vm7532_vm9, %v2153_v40, 0  ;;  %v1962_v61 = vadd.f32 %v1961_v7, %v1865_v14 }
 0x1a5   :  { %v2095_v35 = vor.u32 %v2093_v55, %v2092_v33  ;;  %v2081_v41 = vor.u32 %v2079_v27, %v2078_v59  ;;  %v5436_v30 = vcombine.low %v2173_v22, %v2173_v22  ;;  %v5437_v60 = vcombine.high %v2173_v22, %v2173_v22 }
 0x1a6   :  { %v2003_v44 = vpack.c.bf16 %v1987_v50, %v1987_v50  ;;  %v2001_v12 = vpack.c.bf16 %v1985_v54, %v1985_v54  ;;  %v1970_v37 = vadd.f32 %v6192_v16, %v1873_v34  ;;  %v1986_v48 = vmax.f32 %v1962_v61, 0.0  ;;  %v7810_v54 = vld [vmem:[#allocation2 + $0xc] sm:$0x1]  ;;  %v2600_v34 = vld [vmem:[#allocation2 + $0x8] sm:$0xe] }
 0x1a7   :  { %v2156_v18 = vsel %vm7527_vm8, 0, %v2095_v35  ;;  %v2154_v19 = vsel %vm7527_vm8, 0, %v2081_v41  ;;  %2322 = vst [vmem:[#allocation2 + $0x58] sm:$0xf] %v5436_v30  ;;  %2323 = vst [vmem:[#allocation2 + $0x5c] sm:$0x1] %v5437_v60  ;;  %v2500_v30 = vsel %vm6673_vm2, %v7703_v38, %v7694_v28 }
 0x1a8   :  { %v2176_v62 = vsel %vm7532_vm9, %v2156_v18, 0  ;;  %v2174_v52 = vsel %vm7532_vm9, %v2154_v19, 0  ;;  %v2111_v36 = vshrl.u32 %v2003_v44, 16  ;;  %v2114_v25 = vshll.u32 %v2003_v44, 16  ;;  %v2717_v61 = vld [vmem:[#allocation2 + $0x18] sm:$0xf] }
 0x1a9   :  { %v5442_v4 = vcombine.low %v2176_v62, %v2176_v62  ;;  %v5443_v11 = vcombine.high %v2176_v62, %v2176_v62  ;;  %v5438_v17 = vcombine.low %v2174_v52, %v2174_v52  ;;  %v5439_v39 = vcombine.high %v2174_v52, %v2174_v52 }
 0x1aa   :  { %v2113_v6 = vrot.slane %v2111_v36, 7  ;;  %v2097_v24 = vshrl.u32 %v2001_v12, 16  ;;  %v2100_v58 = vshll.u32 %v2001_v12, 16  ;;  %v1988_v43 = vmax.f32 %v1970_v37, 0.0 }
 0x1ab   :  { %2328 = vst [vmem:[#allocation2 + $0x70] sm:$0xf] %v5442_v4  ;;  %2329 = vst [vmem:[#allocation2 + $0x74] sm:$0x1] %v5443_v11  ;;  %v2002_v16 = vpack.c.bf16 %v1986_v48, %v1986_v48  ;;  %v2748_v1 = vshrl.u32 %v7796_v9, 16  ;;  %v2751_v53 = vshll.u32 %v7796_v9, 16  ;;  %v5524_v18 = vcombine.low %v7796_v9, %v2716_v63 }
 0x1ac   :  { %2324 = vst [vmem:[#allocation2 + $0x60] sm:$0xf] %v5438_v17  ;;  %2325 = vst [vmem:[#allocation2 + $0x64] sm:$0x1] %v5439_v39  ;;  %v2762_v3 = vshrl.u32 %v2716_v63, 16  ;;  %v2116_v42 = vor.u32 %v2114_v25, %v2113_v6  ;;  %v2099_v49 = vrot.slane %v2097_v24, 7  ;;  %v2004_v57 = vpack.c.bf16 %v1988_v43, %v1988_v43 }
 0x1ad   :  { %v2765_v23 = vshll.u32 %v2716_v63, 16  ;;  %v2104_v14 = vshrl.u32 %v2002_v16, 16  ;;  %v2107_v15 = vshll.u32 %v2002_v16, 16  ;;  %v2750_v47 = vrot.slane %v2748_v1, 4  ;;  %4500 = vmatprep.mubr.bf16.mxu0 %v5524_v18  ;;  %v2718_v4 = vld [vmem:[#allocation2 + $0x20] sm:$0xf] }
 0x1ae   :  { %v2753_v55 = vrot.slane %v2751_v53, 5  ;;  %v2159_v45 = vsel %vm7527_vm8, 0, %v2116_v42  ;;  %v2102_v26 = vor.u32 %v2100_v58, %v2099_v49  ;;  %v2118_v20 = vshrl.u32 %v2004_v57, 16  ;;  %v7830_v6 = vld [vmem:[#allocation2 + $0x8] sm:$0xf]  ;;  %v6394_v1 = vld [vmem:[%s8829_s3 + $0x1b8] sm:$0xff]  }
 0x1af   :  { %v2121_v27 = vshll.u32 %v2004_v57, 16  ;;  %v2179_v29 = vsel %vm7532_vm9, %v2159_v45, 0  ;;  %v2106_v7 = vrot.slane %v2104_v14, 7  ;;  %v2764_v13 = vrot.slane %v2762_v3, 4  ;;  %v7836_v16 = vld [vmem:[#allocation2 + $0x10] sm:$0xf] }
 0x1b0   :  { %v2754_v31 = vor.u32 %v2753_v55, %v2750_v47  ;;  %v5448_v33 = vcombine.low %v2179_v29, %v2179_v29  ;;  %v5449_v59 = vcombine.high %v2179_v29, %v2179_v29  ;;  %v2157_v40 = vsel %vm7527_vm8, 0, %v2102_v26  ;;  %v7844_v49 = vld [vmem:[#allocation2 + $0x18] sm:$0xf]  ;;  %v6396_v57 = vld [vmem:[%s8829_s3 + $0x1f0] sm:$0xff]  }
 0x1b1   :  { %v2120_v50 = vrot.slane %v2118_v20, 7  ;;  %v2177_v22 = vsel %vm7532_vm9, %v2157_v40, 0  ;;  %v2109_v35 = vor.u32 %v2107_v15, %v2106_v7  ;;  %v2767_v41 = vrot.slane %v2765_v23, 5  ;;  %v6399_v55 = vld [vmem:[%s8829_s3 + $0x1b0] sm:$0xff]   ;;  %v6400_v40 = vld [vmem:[%s8829_s3 + $0x1e8] sm:$0xff]  }
 0x1b2   :  { %2334 = vst [vmem:[#allocation2 + $0x88] sm:$0xf] %v5448_v33  ;;  %2335 = vst [vmem:[#allocation2 + $0x8c] sm:$0x1] %v5449_v59  ;;  %v5444_v60 = vcombine.low %v2177_v22, %v2177_v22  ;;  %v5445_v44 = vcombine.high %v2177_v22, %v2177_v22  ;;  %v5453_v48 = vrot.slane %v2600_v34, 9  ;;  %v2656_v62 = vrot.slane %v7810_v54, 5 }
 0x1b3   :  { %v2123_v12 = vor.u32 %v2121_v27, %v2120_v50  ;;  %v2158_v19 = vsel %vm7527_vm8, 0, %v2109_v35  ;;  %v2768_v37 = vor.u32 %v2767_v41, %v2764_v13  ;;  %v7826_v25 = vrot.slane %v2754_v31, 4  ;;  %v2601_v29 = vld [vmem:[#allocation2 + $0x10] sm:$0xe]  ;;  %v2359_v33 = vld [vmem:[#allocation2 + $0x1c] sm:$0x1] }
 0x1b4   :  { %2330 = vst [vmem:[#allocation2 + $0x78] sm:$0xf] %v5444_v60  ;;  %2331 = vst [vmem:[#allocation2 + $0x7c] sm:$0x1] %v5445_v44  ;;  %v2178_v36 = vsel %vm7532_vm9, %v2158_v19, 0  ;;  %v2776_v9 = vshrl.u32 %v2717_v61, 16  ;;  %v2657_v43 = vsel %vm7650_vm12, %v5453_v48, %v2656_v62  ;;  %v5525_v23 = vcombine.low %v2717_v61, %v2718_v4 }
 0x1b5   :  { %v2160_v52 = vsel %vm7527_vm8, 0, %v2123_v12  ;;  %v5446_v11 = vcombine.low %v2178_v36, %v2178_v36  ;;  %v5447_v17 = vcombine.high %v2178_v36, %v2178_v36  ;;  %v2779_v39 = vshll.u32 %v2717_v61, 16  ;;  %v2602_v35 = vld [vmem:[#allocation2 + $0x18] sm:$0xe]  ;;  %v2719_v44 = vld [vmem:[#allocation2 + $0x28] sm:$0xf] }
 0x1b6   :  { %v2180_v63 = vsel %vm7532_vm9, %v2160_v52, 0  ;;  %v7832_v5 = vrot.slane %v2768_v37, 4  ;;  %v5516_v2 = vcombine.low %v7657_v56, %v2657_v43  ;;  %v7842_v53 = vrot.slane %v2776_v9, 4  ;;  %v2358_v56 = vld [vmem:[#allocation2 + $0x14] sm:$0x1]  ;;  %v6402_v9 = vld [vmem:[%s8829_s3 + $0x1a8] sm:$0xff]  }
 0x1b7   :  { %v5450_v24 = vcombine.low %v2180_v63, %v2180_v63  ;;  %v5451_v58 = vcombine.high %v2180_v63, %v2180_v63  ;;  %2332 = vst [vmem:[#allocation2 + $0x80] sm:$0xf] %v5446_v11  ;;  %2333 = vst [vmem:[#allocation2 + $0x84] sm:$0x1] %v5447_v17  ;;  %v2790_v3 = vshrl.u32 %v2718_v4, 16  ;;  %v2793_v42 = vshll.u32 %v2718_v4, 16 }
 0x1b8   :  { %v2390_v14 = vshrl.u32 %v7830_v6, 16  ;;  %v2393_v15 = vshll.u32 %v7830_v6, 16  ;;  %v2399_v47 = vshll.u32 %v7810_v54, 16  ;;  %4501 = vmatmul.mubr.bf16.vlgmr.msra.gmra.mxu0 %v5516_v2  ;;  %v7855_v45 = vrot.slane %v2779_v39, 5  ;;  %v2720_v48 = vld [vmem:[#allocation2 + $0x30] sm:$0xf] }
 0x1b9   :  { %2336 = vst [vmem:[#allocation2 + $0x90] sm:$0xf] %v5450_v24  ;;  %2337 = vst [vmem:[#allocation2 + $0x94] sm:$0x1] %v5451_v58  ;;  %v7857_v26 = vrot.slane %v2790_v3, 4  ;;  %v7859_v20 = vrot.slane %v2793_v42, 5  ;;  %4508 = vmatprep.mubr.bf16.mxu0 %v5525_v23  ;;  %v5500_v13 = vcombine.low %v7608_v10, %v7830_v6  ;;  %6078 = vmatpush3.bf16.msra.mxu0 %v6394_v1 }
 0x1ba   :  { %v2404_v27 = vshrl.u32 %v7836_v16, 16  ;;  %v2392_v7 = vrot.slane %v2390_v14, 4  ;;  %v2395_v31 = vrot.slane %v2393_v15, 5  ;;  %v2407_v59 = vshll.u32 %v7836_v16, 16  ;;  %6079 = vmatprep.subr.bf16.mxu0 %v6396_v57  ;;  %v6404_v6 = vld [vmem:[%s8829_s3 + $0x1e0] sm:$0xff]   ;;  %v6379_v58 = vld [vmem:[%s8829_s3 + $0x138] sm:$0xff]  }
 0x1bb   :  { %v2413_v54 = vshll.u32 %v2358_v56, 16  ;;  %v2418_v34 = vshrl.u32 %v7844_v49, 16  ;;  %v2421_v22 = vshll.u32 %v7844_v49, 16  ;;  %v2401_v61 = vrot.slane %v2399_v47, 5  ;;  %v6381_v3 = vld [vmem:[%s8829_s3 + $0x170] sm:$0xff]  }
 0x1bc   :  { %v2406_v50 = vrot.slane %v2404_v27, 4  ;;  %v2396_v41 = vor.u32 %v2395_v31, %v2392_v7  ;;  %v2409_v60 = vrot.slane %v2407_v59, 5  ;;  %v5454_v10 = vrot.slane %v2601_v29, 9  ;;  %v7893_v15 = vld [vmem:[#allocation2 + $0x20] sm:$0xf]  ;;  %v6383_v59 = vld [vmem:[%s8829_s3 + $0x130] sm:$0xff]  }
 0x1bd   :  { %v2420_v12 = vrot.slane %v2418_v34, 4  ;;  %v2423_v18 = vrot.slane %v2421_v22, 5  ;;  %v2427_v19 = vshll.u32 %v2359_v33, 16  ;;  %v2660_v37 = vrot.slane %v2358_v56, 5  ;;  %6080 = vmatpush3.bf16.msra.mxu0 %v6399_v55  ;;  %v7895_v47 = vld [vmem:[#allocation2 + $0x24] sm:$0x1] }
 0x1be   :  { %v2397_v62 = vrot.slane %v2396_v41, 4  ;;  %v2410_v52 = vor.u32 %v2409_v60, %v2406_v50  ;;  %v2415_v36 = vrot.slane %v2413_v54, 5  ;;  %v5455_v4 = vrot.slane %v2602_v35, 9  ;;  %6081 = vmatprep.subr.bf16.mxu0 %v6400_v40  ;;  %v7903_v7 = vld [vmem:[#allocation2 + $0x28] sm:$0xf]  ;;  %v6407_v50 = vld [vmem:[%s8829_s3 + $0x1a0] sm:$0xff]  }
 0x1bf   :  { %v2424_v63 = vor.u32 %v2423_v18, %v2420_v12  ;;  %v2661_v11 = vsel %vm7650_vm12, %v5454_v10, %v2660_v37  ;;  %v2664_v17 = vrot.slane %v2359_v33, 5  ;;  %v2804_v39 = vshrl.u32 %v2719_v44, 16  ;;  %v2603_v40 = vld [vmem:[#allocation2 + $0x20] sm:$0xe]  ;;  %v7918_v41 = vld [vmem:[#allocation2 + $0x38] sm:$0xf] }
 0x1c0   :  { %v2402_v24 = vsel %vm6673_vm2, %v2397_v62, %v2401_v61  ;;  %v2411_v43 = vrot.slane %v2410_v52, 4  ;;  %v2807_v1 = vshll.u32 %v2719_v44, 16  ;;  %v2818_v2 = vshrl.u32 %v2720_v48, 16  ;;  %v6408_v61 = vld [vmem:[%s8829_s3 + $0x1d8] sm:$0xff]   ;;  %v2604_v12 = vld [vmem:[#allocation2 + $0x28] sm:$0xe] }
 0x1c1   :  { %v5508_v42 = vcombine.low %v2388_v32, %v2402_v24  ;;  %v2425_v57 = vrot.slane %v2424_v63, 4  ;;  %v2429_v23 = vrot.slane %v2427_v19, 5  ;;  %v2665_v14 = vsel %vm7650_vm12, %v5455_v4, %v2664_v17  ;;  %6082 = vmatpush3.bf16.msra.mxu0 %v6402_v9  ;;  %v6385_v18 = vld [vmem:[%s8829_s3 + $0x168] sm:$0xff]   ;;  %v2722_v52 = vld [vmem:[#allocation2 + $0x40] sm:$0xf]  ;;  %v6410_v9 = vld [vmem:[%s8829_s3 + $0x198] sm:$0xff]  }
 0x1c2   :  { %v2416_v56 = vsel %vm6673_vm2, %v2411_v43, %v2415_v36  ;;  %v5517_v55 = vcombine.low %v2661_v11, %v2665_v14  ;;  %v7899_v27 = vrot.slane %v2804_v39, 4  ;;  %v7901_v29 = vrot.slane %v2807_v1, 5  ;;  %6083 = vmatprep.subr.bf16.mxu0 %v6404_v6  ;;  %v6412_v6 = vld [vmem:[%s8829_s3 + $0x1d0] sm:$0xff]  }
 0x1c3   :  { %4403 = vmatprep.mubr.bf16.mxu1 %v5508_v42  ;;  %v2430_v21 = vsel %vm6673_vm2, %v2425_v57, %v2429_v23  ;;  %v7907_v32 = vrot.slane %v2818_v2, 4  ;;  %v2821_v31 = vshll.u32 %v2720_v48, 16  ;;  %v5526_v33 = vcombine.low %v2719_v44, %v2720_v48  ;;  %v6387_v2 = vld [vmem:[%s8829_s3 + $0x128] sm:$0xff]   ;;  %v6415_v42 = vld [vmem:[%s8829_s3 + $0x190] sm:$0xff]  }
 0x1c4   :  { %4404 = vmatmul.mubr.bf16.vlgmr.msra.gmra.mxu1 %v5500_v13  ;;  %v5509_v54 = vcombine.low %v2416_v56, %v2430_v21  ;;  %4509 = vmatmul.mubr.bf16.gmra.mxu0 %v5517_v55  ;;  %v2432_v34 = vshrl.u32 %v7893_v15, 16  ;;  %v2435_v22 = vshll.u32 %v7893_v15, 16  ;;  %v2441_v35 = vshll.u32 %v7895_v47, 16  ;;  %v7954_v56 = vld [vmem:[#allocation2 + $0x30] sm:$0xf] }
 0x1c5   :  { %6014 = vmatpush3.bf16.msra.mxu1 %v6379_v58  ;;  %4516 = vmatprep.mubr.bf16.mxu0 %v5526_v33  ;;  %v5501_v60 = vcombine.low %v7836_v16, %v7844_v49  ;;  %v2446_v13 = vshrl.u32 %v7903_v7, 16  ;;  %v2449_v10 = vshll.u32 %v7903_v7, 16  ;;  %v2455_v44 = vshll.u32 %v2361_v46, 16  ;;  %v2362_v55 = vld [vmem:[#allocation2 + $0x34] sm:$0x1] }
 0x1c6   :  { %4411 = vmatprep.mubr.bf16.mxu1 %v5509_v54  ;;  %v7930_v19 = vrot.slane %v2821_v31, 5  ;;  %6015 = vmatprep.subr.bf16.mxu1 %v6381_v3  ;;  %v2434_v37 = vrot.slane %v2432_v34, 4  ;;  %v2437_v48 = vrot.slane %v2435_v22, 5  ;;  %v5456_v62 = vrot.slane %v2603_v40, 9  ;;  %v6389_v3 = vld [vmem:[%s8829_s3 + $0x160] sm:$0xff]   ;;  %v6416_v40 = vld [vmem:[%s8829_s3 + $0x1c8] sm:$0xff]  }
 0x1c7   :  { %v2443_v36 = vrot.slane %v2441_v35, 5  ;;  %v2448_v16 = vrot.slane %v2446_v13, 4  ;;  %v2451_v49 = vrot.slane %v2449_v10, 5  ;;  %v2668_v4 = vrot.slane %v7895_v47, 5  ;;  %6084 = vmatpush3.bf16.msra.mxu0 %v6407_v50  ;;  %v2363_v35 = vld [vmem:[#allocation2 + $0x3c] sm:$0x1] }
 0x1c8   :  { %v2438_v63 = vor.u32 %v2437_v48, %v2434_v37  ;;  %v5457_v11 = vrot.slane %v2604_v12, 9  ;;  %v2672_v17 = vrot.slane %v2361_v46, 5  ;;  %v2832_v39 = vshrl.u32 %v7918_v41, 16  ;;  %6085 = vmatprep.subr.bf16.mxu0 %v6408_v61  ;;  %v2605_v61 = vld [vmem:[#allocation2 + $0x30] sm:$0xe]  ;;  %v6391_v12 = vld [vmem:[%s8829_s3 + $0x120] sm:$0xff]  }
 0x1c9   :  { %6016 = vmatpush3.bf16.msra.mxu1 %v6383_v59  ;;  %v2452_v24 = vor.u32 %v2451_v49, %v2448_v16  ;;  %v2457_v58 = vrot.slane %v2455_v44, 5  ;;  %v2835_v43 = vshll.u32 %v7918_v41, 16  ;;  %v2846_v1 = vshrl.u32 %v2722_v52, 16  ;;  %v7960_v59 = vld [vmem:[#allocation2 + $0x38] sm:$0xf] }
 0x1ca   :  { %v2439_v57 = vrot.slane %v2438_v63, 4  ;;  %v2669_v23 = vsel %vm7650_vm12, %v5456_v62, %v2668_v4  ;;  %v2673_v14 = vsel %vm7650_vm12, %v5457_v11, %v2672_v17  ;;  %v2849_v47 = vshll.u32 %v2722_v52, 16  ;;  %6017 = vmatprep.subr.bf16.mxu1 %v6385_v18  ;;  %v6417_v18 = vld [vmem:[%s8829_s3 + $0x188] sm:$0xff]   ;;  %v2723_v16 = vld [vmem:[#allocation2 + $0x58] sm:$0xf] }
 0x1cb   :  { %v2453_v46 = vrot.slane %v2452_v24, 4  ;;  %v5518_v21 = vcombine.low %v2669_v23, %v2673_v14  ;;  %v7956_v31 = vrot.slane %v2832_v39, 4  ;;  %v7958_v33 = vrot.slane %v2835_v43, 5  ;;  %6086 = vmatpush3.bf16.msra.mxu0 %v6410_v9  ;;  %v2724_v11 = vld [vmem:[#allocation2 + $0x60] sm:$0xf] }
 0x1cc   :  { %4412 = vmatmul.mubr.bf16.gmra.mxu1 %v5501_v60  ;;  %v2444_v50 = vsel %vm6673_vm2, %v2439_v57, %v2443_v36  ;;  %v7967_v54 = vrot.slane %v2846_v1, 4  ;;  %v7969_v34 = vrot.slane %v2849_v47, 5  ;;  %v5527_v22 = vcombine.low %v7918_v41, %v2722_v52  ;;  %6087 = vmatprep.subr.bf16.mxu0 %v6412_v6  ;;  %v6395_v41 = vld [vmem:[%s8829_s3 + $0x158] sm:$0xff]  }
 0x1cd   :  { %v2458_v13 = vsel %vm6673_vm2, %v2453_v46, %v2457_v58  ;;  %4517 = vmatmul.mubr.bf16.gmra.mxu0 %v5518_v21  ;;  %6018 = vmatpush3.bf16.msra.mxu1 %v6387_v2  ;;  %v2460_v10 = vshrl.u32 %v7954_v56, 16  ;;  %v2463_v60 = vshll.u32 %v7954_v56, 16  ;;  %v2469_v44 = vshll.u32 %v2362_v55, 16  ;;  %v2606_v36 = vld [vmem:[#allocation2 + $0x38] sm:$0xe] }
 0x1ce   :  { %v5510_v37 = vcombine.low %v2444_v50, %v2458_v13  ;;  %4524 = vmatprep.mubr.bf16.mxu0 %v5527_v22  ;;  %v5502_v48 = vcombine.low %v7893_v15, %v7903_v7  ;;  %v2474_v62 = vshrl.u32 %v7960_v59, 16  ;;  %v2477_v52 = vshll.u32 %v7960_v59, 16  ;;  %6019 = vmatprep.subr.bf16.mxu1 %v6389_v3  ;;  %v6419_v15 = vld [vmem:[%s8829_s3 + $0x1c0] sm:$0xff]   ;;  %v6398_v2 = vld [vmem:[%s8829_s3 + $0x118] sm:$0xff]   ;;  %v6403_v3 = vld [vmem:[%s8829_s3 + $0x150] sm:$0xff]  }
 0x1cf   :  { %v2462_v49 = vrot.slane %v2460_v10, 4  ;;  %v2465_v4 = vrot.slane %v2463_v60, 5  ;;  %v2483_v9 = vshll.u32 %v2363_v35, 16  ;;  %v5458_v63 = vrot.slane %v2605_v61, 9  ;;  %6088 = vmatpush3.bf16.msra.mxu0 %v6415_v42  ;;  %v8000_v47 = vld [vmem:[#allocation2 + $0x58] sm:$0xf] }
 0x1d0   :  { %4419 = vmatprep.mubr.bf16.mxu1 %v5510_v37  ;;  %v2471_v17 = vrot.slane %v2469_v44, 5  ;;  %v2476_v39 = vrot.slane %v2474_v62, 4  ;;  %v2479_v6 = vrot.slane %v2477_v52, 5  ;;  %v2676_v24 = vrot.slane %v2362_v55, 5  ;;  %6089 = vmatprep.subr.bf16.mxu0 %v6416_v40  ;;  %v8002_v55 = vld [vmem:[#allocation2 + $0x68] sm:$0xf] }
 0x1d1   :  { %v2466_v7 = vor.u32 %v2465_v4, %v2462_v49  ;;  %v5459_v58 = vrot.slane %v2606_v36, 9  ;;  %v2680_v43 = vrot.slane %v2363_v35, 5  ;;  %v2860_v1 = vshrl.u32 %v2723_v16, 16  ;;  %6020 = vmatpush3.bf16.msra.mxu1 %v6391_v12  ;;  %v2365_v22 = vld [vmem:[#allocation2 + $0x5c] sm:$0x1]  ;;  %v6422_v35 = vld [vmem:[%s8829_s3 + $0x180] sm:$0xff]  }
 0x1d2   :  { %v2480_v42 = vor.u32 %v2479_v6, %v2476_v39  ;;  %v2677_v57 = vsel %vm7650_vm12, %v5458_v63, %v2676_v24  ;;  %v2863_v23 = vshll.u32 %v2723_v16, 16  ;;  %v2874_v14 = vshrl.u32 %v2724_v11, 16  ;;  %6021 = vmatprep.subr.bf16.mxu1 %v6395_v41  ;;  %v2608_v44 = vld [vmem:[#allocation2 + $0x58] sm:$0xe]  ;;  %v6406_v62 = vld [vmem:[%s8829_s3 + $0x110] sm:$0xff]  }
 0x1d3   :  { %v2467_v46 = vrot.slane %v2466_v7, 4  ;;  %v2485_v21 = vrot.slane %v2483_v9, 5  ;;  %v2681_v40 = vsel %vm7650_vm12, %v5459_v58, %v2680_v43  ;;  %v2877_v50 = vshll.u32 %v2724_v11, 16  ;;  %6090 = vmatpush3.bf16.msra.mxu0 %v6417_v18  ;;  %v8016_v12 = vld [vmem:[%s8831_s6 + $0x18] sm:$0xff]   ;;  %v2726_v9 = vld [vmem:[#allocation2 + $0x70] sm:$0xf] }
 0x1d4   :  { %4420 = vmatmul.mubr.bf16.gmra.mxu1 %v5502_v48  ;;  %v2481_v61 = vrot.slane %v2480_v42, 4  ;;  %v5519_v13 = vcombine.low %v2677_v57, %v2681_v40  ;;  %v8009_v10 = vrot.slane %v2860_v1, 4  ;;  %v8011_v60 = vrot.slane %v2863_v23, 5  ;;  %6091 = vmatprep.subr.bf16.mxu0 %v6419_v15  ;;  %v8035_v6 = vld [vmem:[#allocation2 + $0x60] sm:$0xf] }
 0x1d5   :  { %v2472_v41 = vsel %vm6673_vm2, %v2467_v46, %v2471_v17  ;;  %v8020_v18 = vrot.slane %v2874_v14, 4  ;;  %v8022_v37 = vrot.slane %v2877_v50, 5  ;;  %v5528_v48 = vcombine.low %v2723_v16, %v2724_v11  ;;  %6022 = vmatpush3.bf16.msra.mxu1 %v6398_v2  ;;  %v6411_v16 = vld [vmem:[%s8829_s3 + $0x148] sm:$0xff]   ;;  %v2366_v1 = vld [vmem:[#allocation2 + $0x64] sm:$0x1] }
 0x1d6   :  { %v2486_v52 = vsel %vm6673_vm2, %v2481_v61, %v2485_v21  ;;  %4525 = vmatmul.mubr.bf16.gmra.mxu0 %v5519_v13  ;;  %v2502_v36 = vshrl.u32 %v8000_v47, 16  ;;  %v2505_v49 = vshll.u32 %v8000_v47, 16  ;;  %v2511_v4 = vshll.u32 %v2365_v22, 16  ;;  %6023 = vmatprep.subr.bf16.mxu1 %v6403_v3  ;;  %v8037_v24 = vld [vmem:[#allocation2 + $0x68] sm:$0xf] }
 0x1d7   :  { %v5511_v63 = vcombine.low %v2472_v41, %v2486_v52  ;;  %4532 = vmatprep.mubr.bf16.mxu0 %v5528_v48  ;;  %v5461_v11 = vrot.slane %v2608_v44, 9  ;;  %v2688_v17 = vrot.slane %v2365_v22, 5  ;;  %v2888_v39 = vshrl.u32 %v8002_v55, 16  ;;  %6092 = vmatpush3.bf16.msra.mxu0 %v6422_v35  ;;  %v6414_v2 = vld [vmem:[%s8829_s3 + $0x108] sm:$0xff]   ;;  %v2609_v40 = vld [vmem:[#allocation2 + $0x60] sm:$0xe] }
 0x1d8   :  { %v5503_v15 = vcombine.low %v7954_v56, %v7960_v59  ;;  %v2504_v7 = vrot.slane %v2502_v36, 4  ;;  %v2507_v58 = vrot.slane %v2505_v49, 5  ;;  %v2891_v43 = vshll.u32 %v8002_v55, 16  ;;  %6225 = vmatprep.subr.bf16.mxu0 %v8016_v12  ;;  %v6418_v56 = vld [vmem:[%s8829_s3 + $0x140] sm:$0xff]   ;;  %v2367_v61 = vld [vmem:[#allocation2 + $0x6c] sm:$0x1] }
 0x1d9   :  { %4427 = vmatprep.mubr.bf16.mxu1 %v5511_v63  ;;  %v2513_v3 = vrot.slane %v2511_v4, 5  ;;  %v2689_v42 = vsel %vm7650_vm12, %v5461_v11, %v2688_v17  ;;  %v2902_v57 = vshrl.u32 %v2726_v9, 16  ;;  %v2905_v23 = vshll.u32 %v2726_v9, 16  ;;  %6024 = vmatpush3.bf16.msra.mxu1 %v6406_v62  ;;  %v2610_v62 = vld [vmem:[#allocation2 + $0x68] sm:$0xe] }
 0x1da   :  { %v2508_v59 = vor.u32 %v2507_v58, %v2504_v7  ;;  %v5520_v14 = vcombine.low %v7698_v8, %v2689_v42  ;;  %v8052_v46 = vrot.slane %v2888_v39, 4  ;;  %v8054_v21 = vrot.slane %v2891_v43, 5  ;;  %6025 = vmatprep.subr.bf16.mxu1 %v6411_v16  ;;  %v6451_v52 = vld [vmem:[#allocation2 + $0x50] sm:$0xf]  ;;  %v2727_v63 = vld [vmem:[#allocation2 + $0x78] sm:$0xf] }
 0x1db   :  { %v8056_v50 = vrot.slane %v2902_v57, 4  ;;  %v8058_v22 = vrot.slane %v2905_v23, 5  ;;  %v5529_v35 = vcombine.low %v8002_v55, %v2726_v9  ;;  %v2516_v13 = vshrl.u32 %v8035_v6, 16  ;;  %v6421_v55 = vld [vmem:[%s8829_s3 + $0x100] sm:$0xff]  }
 0x1dc   :  { %4428 = vmatmul.mubr.bf16.gmra.mxu1 %v5503_v15  ;;  %v2509_v44 = vrot.slane %v2508_v59, 4  ;;  %v2519_v41 = vshll.u32 %v8035_v6, 16  ;;  %v2525_v8 = vshll.u32 %v2366_v1, 16  ;;  %v2530_v48 = vshrl.u32 %v8037_v24, 16  ;;  %v2728_v15 = vld [vmem:[#allocation2 + $0x80] sm:$0xf] }
 0x1dd   :  { %v5504_v36 = vcombine.low %v6451_v52, %v8000_v47  ;;  %v2518_v49 = vrot.slane %v2516_v13, 4  ;;  %v2533_v4 = vshll.u32 %v8037_v24, 16  ;;  %v5462_v16 = vrot.slane %v2609_v40, 9  ;;  %6026 = vmatpush3.bf16.msra.mxu1 %v6414_v2  ;;  %v8074_v47 = vld [vmem:[%s8829_s3 + $0x238] sm:$0xff]   ;;  %v8083_v13 = vld [vmem:[#allocation2 + $0x70] sm:$0xf] }
 0x1de   :  { %v2514_v9 = vsel %vm6673_vm2, %v2509_v44, %v2513_v3  ;;  %4533 = vmatmul.mubr.bf16.gmra.mxu0 %v5520_v14  ;;  %v2521_v11 = vrot.slane %v2519_v41, 5  ;;  %v2532_v17 = vrot.slane %v2530_v48, 4  ;;  %v2539_v39 = vshll.u32 %v2367_v61, 16  ;;  %6027 = vmatprep.subr.bf16.mxu1 %v6418_v56  ;;  %v2368_v44 = vld [vmem:[#allocation2 + $0x74] sm:$0x1] }
 0x1df   :  { %v5512_v7 = vcombine.low %v2500_v30, %v2514_v9  ;;  %4540 = vmatprep.mubr.bf16.mxu0 %v5529_v35  ;;  %v2527_v58 = vrot.slane %v2525_v8, 5  ;;  %v2535_v43 = vrot.slane %v2533_v4, 5  ;;  %v2692_v2 = vrot.slane %v2366_v1, 5  ;;  %v8087_v35 = vld [vmem:[#allocation2 + $0x78] sm:$0xf] }
 0x1e0   :  { %v2522_v3 = vor.u32 %v2521_v11, %v2518_v49  ;;  %v5463_v42 = vrot.slane %v2610_v62, 9  ;;  %v2696_v57 = vrot.slane %v2367_v61, 5  ;;  %v2916_v23 = vshrl.u32 %v2727_v63, 16  ;;  %v2369_v62 = vld [vmem:[#allocation2 + $0x7c] sm:$0x1] }
 0x1e1   :  { %4435 = vmatprep.mubr.bf16.mxu1 %v5512_v7  ;;  %v2536_v56 = vor.u32 %v2535_v43, %v2532_v17  ;;  %v2693_v59 = vsel %vm7650_vm12, %v5462_v16, %v2692_v2  ;;  %v2919_v14 = vshll.u32 %v2727_v63, 16  ;;  %v2930_v40 = vshrl.u32 %v2728_v15, 16  ;;  %6028 = vmatpush3.bf16.msra.mxu1 %v6421_v55  ;;  %v2611_v55 = vld [vmem:[#allocation2 + $0x70] sm:$0xe]  ;;  %v2729_v7 = vld [vmem:[#allocation2 + $0x88] sm:$0xf] }
 0x1e2   :  { %v2523_v28 = vrot.slane %v2522_v3, 4  ;;  %v2541_v38 = vrot.slane %v2539_v39, 5  ;;  %v2697_v30 = vsel %vm7650_vm12, %v5463_v42, %v2696_v57  ;;  %v2933_v1 = vshll.u32 %v2728_v15, 16  ;;  %6193 = vmatprep.subr.bf16.mxu1 %v8074_v47  ;;  %v2612_v3 = vld [vmem:[#allocation2 + $0x78] sm:$0xe] }
 0x1e3   :  { %v2537_v61 = vrot.slane %v2536_v56, 4  ;;  %v5521_v41 = vcombine.low %v2693_v59, %v2697_v30  ;;  %v8090_v8 = vrot.slane %v2916_v23, 4  ;;  %v8092_v48 = vrot.slane %v2919_v14, 5  ;;  %v2730_v23 = vld [vmem:[#allocation2 + $0x90] sm:$0xf] }
 0x1e4   :  { %4436 = vmatmul.mubr.bf16.gmra.mxu1 %v5504_v36  ;;  %v2528_v52 = vsel %vm6673_vm2, %v2523_v28, %v2527_v58  ;;  %v8096_v49 = vrot.slane %v2930_v40, 4  ;;  %v8098_v4 = vrot.slane %v2933_v1, 5  ;;  %v5530_v16 = vcombine.low %v2727_v63, %v2728_v15 }
 0x1e5   :  { %v2542_v9 = vsel %vm6673_vm2, %v2537_v61, %v2541_v38  ;;  %v2544_v11 = vshrl.u32 %v8083_v13, 16  ;;  %v2547_v17 = vshll.u32 %v8083_v13, 16  ;;  %v2553_v39 = vshll.u32 %v2368_v44, 16 }
 0x1e6   :  { %v5513_v43 = vcombine.low %v2528_v52, %v2542_v9  ;;  %4541 = vmatmul.mubr.bf16.gmra.mxu0 %v5521_v41  ;;  %v2558_v36 = vshrl.u32 %v8087_v35, 16  ;;  %v2561_v58 = vshll.u32 %v8087_v35, 16  ;;  %v2567_v2 = vshll.u32 %v2369_v62, 16  ;;  %v8108_v9 = vld [vmem:[#allocation2 + $0x80] sm:$0xf] }
 0x1e7   :  { %4548 = vmatprep.mubr.bf16.mxu0 %v5530_v16  ;;  %v5505_v63 = vcombine.low %v8035_v6, %v8037_v24  ;;  %v2546_v15 = vrot.slane %v2544_v11, 4  ;;  %v2549_v42 = vrot.slane %v2547_v17, 5  ;;  %v5464_v57 = vrot.slane %v2611_v55, 9  ;;  %v8110_v6 = vld [vmem:[#allocation2 + $0x88] sm:$0xf] }
 0x1e8   :  { %4443 = vmatprep.mubr.bf16.mxu1 %v5513_v43  ;;  %v2555_v56 = vrot.slane %v2553_v39, 5  ;;  %v2560_v59 = vrot.slane %v2558_v36, 4  ;;  %v2563_v14 = vrot.slane %v2561_v58, 5  ;;  %v2700_v40 = vrot.slane %v2368_v44, 5  ;;  %v2370_v17 = vld [vmem:[#allocation2 + $0x84] sm:$0x1] }
 0x1e9   :  { %v2550_v28 = vor.u32 %v2549_v42, %v2546_v15  ;;  %v5465_v38 = vrot.slane %v2612_v3, 9  ;;  %v2704_v30 = vrot.slane %v2369_v62, 5  ;;  %v2944_v1 = vshrl.u32 %v2729_v7, 16  ;;  %v2371_v39 = vld [vmem:[#allocation2 + $0x8c] sm:$0x1] }
 0x1ea   :  { %v2564_v61 = vor.u32 %v2563_v14, %v2560_v59  ;;  %v2569_v41 = vrot.slane %v2567_v2, 5  ;;  %v2947_v52 = vshll.u32 %v2729_v7, 16  ;;  %v2958_v16 = vshrl.u32 %v2730_v23, 16  ;;  %v2613_v2 = vld [vmem:[#allocation2 + $0x80] sm:$0xe] }
 0x1eb   :  { %v2551_v24 = vrot.slane %v2550_v28, 4  ;;  %v2701_v55 = vsel %vm7650_vm12, %v5464_v57, %v2700_v40  ;;  %v2705_v11 = vsel %vm7650_vm12, %v5465_v38, %v2704_v30  ;;  %v2961_v44 = vshll.u32 %v2730_v23, 16  ;;  %v8130_v28 = vld [vmem:[#allocation2 + $0x10] sm:$0xf] }
 0x1ec   :  { %4444 = vmatmul.mubr.bf16.gmra.mxu1 %v5505_v63  ;;  %v2565_v62 = vrot.slane %v2564_v61, 4  ;;  %v5522_v43 = vcombine.low %v2701_v55, %v2705_v11  ;;  %v8116_v36 = vrot.slane %v2944_v1, 4  ;;  %v8118_v58 = vrot.slane %v2947_v52, 5  ;;  %v8136_v1 = vld [vmem:[#allocation2 + $0x18] sm:$0xf] }
 0x1ed   :  { %v2556_v3 = vsel %vm6673_vm2, %v2551_v24, %v2555_v56  ;;  %v8122_v15 = vrot.slane %v2958_v16, 4  ;;  %v8124_v42 = vrot.slane %v2961_v44, 5  ;;  %v5531_v57 = vcombine.low %v2729_v7, %v2730_v23  ;;  %v2614_v23 = vld [vmem:[#allocation2 + $0x88] sm:$0xe]  ;;  %v8138_v61 = vld [vmem:[#allocation2 + $0x14] sm:$0x1] }
 0x1ee   :  { %v2570_v59 = vsel %vm6673_vm2, %v2565_v62, %v2569_v41  ;;  %4549 = vmatmul.mubr.bf16.gmra.mxu0 %v5522_v43  ;;  %v2572_v63 = vshrl.u32 %v8108_v9, 16  ;;  %v2575_v14 = vshll.u32 %v8108_v9, 16  ;;  %v2581_v40 = vshll.u32 %v2370_v17, 16  ;;  %8848 = vst [vmem:[#allocation5_spill] sm:$0xff] %v8138_v61  ;;  %v8140_v43 = vld [vmem:[#allocation2 + $0x1c] sm:$0x1] }
 0x1ef   :  { %8846 = vst [vmem:[#allocation3_spill] sm:$0xff] %v8122_v15  ;;  %8847 = vst [vmem:[#allocation4_spill] sm:$0xff] %v8124_v42  ;;  %v5514_v38 = vcombine.low %v2556_v3, %v2570_v59  ;;  %4556 = vmatprep.mubr.bf16.mxu0 %v5531_v57  ;;  %v5506_v56 = vcombine.low %v8083_v13, %v8087_v35  ;;  %v2586_v30 = vshrl.u32 %v8110_v6, 16  ;;  %v2589_v7 = vshll.u32 %v8110_v6, 16  ;;  %v2731_v59 = vld [vmem:[#allocation2 + $0xc] sm:$0x1] }
 0x1f0   :  { %v2574_v41 = vrot.slane %v2572_v63, 4  ;;  %v2577_v52 = vrot.slane %v2575_v14, 5  ;;  %v2595_v16 = vshll.u32 %v2371_v39, 16  ;;  %v5466_v24 = vrot.slane %v2613_v2, 9  ;;  %8849 = vst [vmem:[#allocation6_spill] sm:$0xff] %v8140_v43 }
 0x1f1   :  { %4451 = vmatprep.mubr.bf16.mxu1 %v5514_v38  ;;  %v2583_v55 = vrot.slane %v2581_v40, 5  ;;  %v2588_v11 = vrot.slane %v2586_v30, 4  ;;  %v2591_v44 = vrot.slane %v2589_v7, 5  ;;  %v2708_v62 = vrot.slane %v2370_v17, 5  ;;  %v2732_v40 = vld [vmem:[#allocation2 + $0x14] sm:$0x1] }
 0x1f2   :  { %v2578_v13 = vor.u32 %v2577_v52, %v2574_v41  ;;  %v5467_v35 = vrot.slane %v2614_v23, 9  ;;  %v2712_v3 = vrot.slane %v2371_v39, 5  ;;  %v3117_v57 = vshrl.u32 %v8130_v28, 16  ;;  %v2971_v7 = vld [vmem:[#allocation2 + $0x8] sm:$0xe] }
 0x1f3   :  { %v2592_v42 = vor.u32 %v2591_v44, %v2588_v11  ;;  %v2709_v63 = vsel %vm7650_vm12, %v5466_v24, %v2708_v62  ;;  %v3120_v14 = vshll.u32 %v8130_v28, 16  ;;  %v3126_v2 = vshll.u32 %v8138_v61, 16  ;;  %v2972_v61 = vld [vmem:[#allocation2 + $0x10] sm:$0xe] }
 0x1f4   :  { %4452 = vmatmul.mubr.bf16.gmra.mxu1 %v5506_v56  ;;  %v2579_v38 = vrot.slane %v2578_v13, 4  ;;  %v2713_v17 = vsel %vm7650_vm12, %v5467_v35, %v2712_v3  ;;  %v3119_v30 = vrot.slane %v3117_v57, 4  ;;  %v3131_v39 = vshrl.u32 %v8136_v1, 16 }
 0x1f5   :  { %v2593_v23 = vrot.slane %v2592_v42, 4  ;;  %v2597_v41 = vrot.slane %v2595_v16, 5  ;;  %v5523_v52 = vcombine.low %v2709_v63, %v2713_v17  ;;  %v3122_v11 = vrot.slane %v3120_v14, 5  ;;  %v8156_v42 = vld [vmem:[#allocation2 + $0x20] sm:$0xf] }
 0x1f6   :  { %v2584_v24 = vsel %vm6673_vm2, %v2579_v38, %v2583_v55  ;;  %v3133_v44 = vrot.slane %v3131_v39, 4  ;;  %v3134_v62 = vshll.u32 %v8136_v1, 16  ;;  %v3140_v56 = vshll.u32 %v8140_v43, 16  ;;  %v8160_v38 = vld [vmem:[#allocation2 + $0x24] sm:$0x1] }
 0x1f7   :  { %v2598_v13 = vsel %vm6673_vm2, %v2593_v23, %v2597_v41  ;;  %4557 = vmatmul.mubr.bf16.gmra.mxu0 %v5523_v52  ;;  %v3123_v35 = vor.u32 %v3122_v11, %v3119_v30  ;;  %v3128_v3 = vrot.slane %v3126_v2, 5  ;;  %v2757_v57 = vshll.u32 %v2731_v59, 16  ;;  %v8162_v52 = vld [vmem:[#allocation2 + $0x28] sm:$0xf] }
 0x1f8   :  { %v5515_v16 = vcombine.low %v2584_v24, %v2598_v13  ;;  %v3136_v63 = vrot.slane %v3134_v62, 5  ;;  %v5507_v55 = vcombine.low %v8108_v9, %v8110_v6  ;;  %v2771_v14 = vshll.u32 %v2732_v40, 16  ;;  %v8168_v6 = vld [vmem:[#allocation2 + $0x2c] sm:$0x1] }
 0x1f9   :  { %v3124_v17 = vrot.slane %v3123_v35, 4  ;;  %v3142_v39 = vrot.slane %v3140_v56, 5  ;;  %v5468_v43 = vrot.slane %v2971_v7, 9  ;;  %v3021_v15 = vrot.slane %v2731_v59, 5 }
 0x1fa   :  { %4459 = vmatprep.mubr.bf16.mxu1 %v5515_v16  ;;  %v3137_v23 = vor.u32 %v3136_v63, %v3133_v44  ;;  %v2759_v30 = vrot.slane %v2757_v57, 5  ;;  %v5469_v2 = vrot.slane %v2972_v61, 9  ;;  %v3025_v41 = vrot.slane %v2732_v40, 5  ;;  %v8184_v63 = vld [vmem:[#allocation2 + $0x24] sm:$0x1] }
 0x1fb   :  { %v3129_v11 = vsel %vm6673_vm2, %v3124_v17, %v3128_v3  ;;  %v2773_v24 = vrot.slane %v2771_v14, 5  ;;  %v3022_v9 = vsel %vm7650_vm12, %v5468_v43, %v3021_v15  ;;  %v3145_v62 = vshrl.u32 %v8156_v42, 16  ;;  %v8177_v15 = vld [vmem:[#allocation2 + $0x1c] sm:$0x1] }
 0x1fc   :  { %v3138_v7 = vrot.slane %v3137_v23, 4  ;;  %4460 = vmatmul.mubr.bf16.gmra.mxu1 %v5507_v55  ;;  %v3026_v59 = vsel %vm7650_vm12, %v5469_v2, %v3025_v41  ;;  %v3148_v61 = vshll.u32 %v8156_v42, 16  ;;  %v3154_v40 = vshll.u32 %v8160_v38, 16  ;;  %v2973_v55 = vld [vmem:[#allocation2 + $0x18] sm:$0xe] }
 0x1fd   :  { %v5540_v44 = vcombine.low %v3022_v9, %v3026_v59  ;;  %v3147_v56 = vrot.slane %v3145_v62, 4  ;;  %v3159_v13 = vshrl.u32 %v8162_v52, 16  ;;  %v3162_v35 = vshll.u32 %v8162_v52, 16  ;;  %v2974_v41 = vld [vmem:[#allocation2 + $0x20] sm:$0xe] }
 0x1fe   :  { %v3143_v43 = vsel %vm6673_vm2, %v3138_v7, %v3142_v39  ;;  %v5548_v3 = vcombine.low %v8130_v28, %v8136_v1  ;;  %v3150_v57 = vrot.slane %v3148_v61, 5  ;;  %v3168_v16 = vshll.u32 %v8168_v6, 16  ;;  %v8190_v1 = vld [vmem:[#allocation2 + $0x30] sm:$0xf] }
 0x1ff   :  { %v5556_v14 = vcombine.low %v3129_v11, %v3143_v43  ;;  %4597 = vmatprep.mubr.bf16.mxu1 %v5540_v44  ;;  %v3156_v17 = vrot.slane %v3154_v40, 5  ;;  %v3161_v23 = vrot.slane %v3159_v13, 4  ;;  %v3164_v2 = vrot.slane %v3162_v35, 5  ;;  %v6426_v39 = vld [vmem:[%s8829_s3 + $0x230] sm:$0xff]  }
 0x200   :  { %v3151_v9 = vor.u32 %v3150_v57, %v3147_v56  ;;  %v3170_v62 = vrot.slane %v3168_v16, 5  ;;  %v3398_v59 = vrot.slane %v8160_v38, 5  ;;  %v2760_v28 = vsel %vm6673_vm2, %v7826_v25, %v2759_v30  ;;  %v8198_v11 = vld [vmem:[%s8831_s6 + $0x10] sm:$0xff]   ;;  %v8204_v30 = vld [vmem:[#allocation2 + $0x38] sm:$0xf]  ;;  %v8214_v16 = vld [vmem:[%s8831_s6 + $0x8] sm:$0xff]  }
 0x201   :  { %4694 = vmatprep.mubr.bf16.mxu0 %v5556_v14  ;;  %v3165_v7 = vor.u32 %v3164_v2, %v3161_v23  ;;  %v2774_v61 = vsel %vm6673_vm2, %v7832_v5, %v2773_v24  ;;  %v5470_v40 = vrot.slane %v2973_v55, 9  ;;  %v3029_v25 = vrot.slane %v8177_v15, 5  ;;  %v8206_v44 = vld [vmem:[#allocation2 + $0x34] sm:$0x1]  ;;  %v8209_v57 = vld [vmem:[#allocation2 + $0x3c] sm:$0x1] }
 0x202   :  { %4695 = vmatmul.mubr.bf16.vlgmr.msra.gmra.mxu0 %v5548_v3  ;;  %v3152_v56 = vrot.slane %v3151_v9, 4  ;;  %v5532_v13 = vcombine.low %v2760_v28, %v2774_v61  ;;  %v5471_v35 = vrot.slane %v2974_v41, 9  ;;  %v3033_v43 = vrot.slane %v8184_v63, 5  ;;  %v2975_v9 = vld [vmem:[#allocation2 + $0x28] sm:$0xe] }
 0x203   :  { %v3166_v5 = vrot.slane %v3165_v7, 4  ;;  %v3030_v24 = vsel %vm7650_vm12, %v5470_v40, %v3029_v25  ;;  %v5549_v55 = vcombine.low %v8156_v42, %v8162_v52  ;;  %v3173_v3 = vshrl.u32 %v8190_v1, 16  ;;  %6226 = vmatpush3.bf16.msra.mxu0 %v8016_v12  ;;  %v8234_v25 = vld [vmem:[#allocation2 + $0x2c] sm:$0x1] }
 0x204   :  { %v3157_v14 = vsel %vm6673_vm2, %v3152_v56, %v3156_v17  ;;  %4598 = vmatmul.mubr.bf16.vlgmr.msra.gmra.mxu1 %v5532_v13  ;;  %v3034_v23 = vsel %vm7650_vm12, %v5471_v35, %v3033_v43  ;;  %v3176_v2 = vshll.u32 %v8190_v1, 16  ;;  %v3182_v41 = vshll.u32 %v8206_v44, 16  ;;  %6227 = vmatprep.subr.bf16.mxu0 %v8198_v11  ;;  %v8236_v56 = vld [vmem:[#allocation2 + $0x34] sm:$0x1]  ;;  %v6444_v38 = vld [vmem:[%s8832_s5 + $0x8] sm:$0xff]  }
 0x205   :  { %v3171_v42 = vsel %vm6673_vm2, %v3166_v5, %v3170_v62  ;;  %6194 = vmatpush3.bf16.msra.mxu1 %v8074_v47  ;;  %v5541_v12 = vcombine.low %v3030_v24, %v3034_v23  ;;  %v3175_v52 = vrot.slane %v3173_v3, 4  ;;  %v3187_v17 = vshrl.u32 %v8204_v30, 16  ;;  %v6428_v62 = vld [vmem:[%s8829_s3 + $0x228] sm:$0xff]   ;;  %v2976_v23 = vld [vmem:[#allocation2 + $0x30] sm:$0xe] }
 0x206   :  { %v5557_v28 = vcombine.low %v3157_v14, %v3171_v42  ;;  %v3178_v7 = vrot.slane %v3176_v2, 5  ;;  %v3184_v61 = vrot.slane %v3182_v41, 5  ;;  %v3190_v40 = vshll.u32 %v8204_v30, 16  ;;  %6195 = vmatprep.subr.bf16.mxu1 %v6426_v39  ;;  %v8253_v2 = vld [vmem:[%s8831_s6] sm:$0xff]  }
 0x207   :  { %4605 = vmatprep.mubr.bf16.mxu1 %v5541_v12  ;;  %v3189_v47 = vrot.slane %v3187_v17, 4  ;;  %v3196_v13 = vshll.u32 %v8209_v57, 16  ;;  %v2782_v35 = vor.u32 %v7855_v45, %v7842_v53  ;;  %v2785_v43 = vshll.u32 %v8177_v15, 16  ;;  %6228 = vmatpush3.bf16.msra.mxu0 %v8198_v11 }
 0x208   :  { %4702 = vmatprep.mubr.bf16.mxu0 %v5557_v28  ;;  %v3179_v5 = vor.u32 %v3178_v7, %v3175_v52  ;;  %v3192_v24 = vrot.slane %v3190_v40, 5  ;;  %v2796_v3 = vor.u32 %v7859_v20, %v7857_v26  ;;  %v2799_v14 = vshll.u32 %v8184_v63, 16  ;;  %6229 = vmatprep.subr.bf16.mxu0 %v8214_v16  ;;  %v8255_v20 = vld [vmem:[#allocation2 + $0x40] sm:$0xf] }
 0x209   :  { %v3198_v53 = vrot.slane %v3196_v13, 5  ;;  %v2783_v45 = vrot.slane %v2782_v35, 4  ;;  %v2787_v15 = vrot.slane %v2785_v43, 5  ;;  %6196 = vmatpush3.bf16.msra.mxu1 %v6426_v39  ;;  %v5472_v41 = vrot.slane %v2975_v9, 9  ;;  %v6430_v63 = vld [vmem:[%s8829_s3 + $0x220] sm:$0xff]  }
 0x20a   :  { %4703 = vmatmul.mubr.bf16.gmra.mxu0 %v5549_v55  ;;  %v3180_v42 = vrot.slane %v3179_v5, 4  ;;  %v3193_v12 = vor.u32 %v3192_v24, %v3189_v47  ;;  %v2797_v52 = vrot.slane %v2796_v3, 4  ;;  %v2801_v26 = vrot.slane %v2799_v14, 5  ;;  %6197 = vmatprep.subr.bf16.mxu1 %v6428_v62  ;;  %v8264_v55 = vld [vmem:[#allocation2 + $0x44] sm:$0x1] }
 0x20b   :  { %v2788_v17 = vsel %vm6673_vm2, %v2783_v45, %v2787_v15  ;;  %v3037_v28 = vrot.slane %v8234_v25, 5  ;;  %v5473_v7 = vrot.slane %v2976_v23, 9  ;;  %v3041_v39 = vrot.slane %v8236_v56, 5  ;;  %6230 = vmatpush3.bf16.msra.mxu0 %v8214_v16  ;;  %v8273_v35 = vld [vmem:[#allocation2 + $0x48] sm:$0xf]  ;;  %v6432_v45 = vld [vmem:[%s8829_s3 + $0x218] sm:$0xff]  }
 0x20c   :  { %v3185_v9 = vsel %vm6673_vm2, %v3180_v42, %v3184_v61  ;;  %v3194_v40 = vrot.slane %v3193_v12, 4  ;;  %v2802_v47 = vsel %vm6673_vm2, %v2797_v52, %v2801_v26  ;;  %v5550_v13 = vcombine.low %v8190_v1, %v8204_v30  ;;  %6231 = vmatprep.subr.bf16.mxu0 %v8253_v2  ;;  %v8283_v23 = vld [vmem:[#allocation2 + $0x4c] sm:$0x1] }
 0x20d   :  { %v5533_v43 = vcombine.low %v2788_v17, %v2802_v47  ;;  %v3038_v5 = vsel %vm7650_vm12, %v5472_v41, %v3037_v28  ;;  %v3042_v24 = vsel %vm7650_vm12, %v5473_v7, %v3041_v39  ;;  %v3201_v61 = vshrl.u32 %v8255_v20, 16  ;;  %6198 = vmatpush3.bf16.msra.mxu1 %v6428_v62  ;;  %v2977_v28 = vld [vmem:[#allocation2 + $0x38] sm:$0xe]  ;;  %v2978_v47 = vld [vmem:[#allocation2 + $0x40] sm:$0xe] }
 0x20e   :  { %v3199_v3 = vsel %vm6673_vm2, %v3194_v40, %v3198_v53  ;;  %v5542_v14 = vcombine.low %v3038_v5, %v3042_v24  ;;  %v3204_v1 = vshll.u32 %v8255_v20, 16  ;;  %v3210_v30 = vshll.u32 %v8264_v55, 16  ;;  %6199 = vmatprep.subr.bf16.mxu1 %v6430_v63  ;;  %v8292_v53 = vld [vmem:[#allocation2 + $0x3c] sm:$0x1] }
 0x20f   :  { %v5558_v15 = vcombine.low %v3185_v9, %v3199_v3  ;;  %4606 = vmatmul.mubr.bf16.gmra.mxu1 %v5533_v43  ;;  %v3203_v41 = vrot.slane %v3201_v61, 4  ;;  %v3215_v62 = vshrl.u32 %v8273_v35, 16  ;;  %v3218_v42 = vshll.u32 %v8273_v35, 16  ;;  %6232 = vmatpush3.bf16.msra.mxu0 %v8253_v2  ;;  %v8302_v3 = vld [vmem:[#allocation2 + $0x44] sm:$0x1] }
 0x210   :  { %4613 = vmatprep.mubr.bf16.mxu1 %v5542_v14  ;;  %v3206_v12 = vrot.slane %v3204_v1, 5  ;;  %v3212_v52 = vrot.slane %v3210_v30, 5  ;;  %v3224_v26 = vshll.u32 %v8283_v23, 16  ;;  %v2810_v17 = vor.u32 %v7901_v29, %v7899_v27  ;;  %v6435_v27 = vld [vmem:[%s8829_s3 + $0x210] sm:$0xff]  }
 0x211   :  { %4710 = vmatprep.mubr.bf16.mxu0 %v5558_v15  ;;  %v3217_v7 = vrot.slane %v3215_v62, 4  ;;  %v3220_v39 = vrot.slane %v3218_v42, 5  ;;  %v2813_v9 = vshll.u32 %v8234_v25, 16  ;;  %v2824_v40 = vor.u32 %v7930_v19, %v7907_v32  ;;  %6200 = vmatpush3.bf16.msra.mxu1 %v6430_v63  ;;  %v8307_v32 = vld [vmem:[#allocation2 + $0x60] sm:$0xf] }
 0x212   :  { %4711 = vmatmul.mubr.bf16.gmra.mxu0 %v5550_v13  ;;  %v3207_v43 = vor.u32 %v3206_v12, %v3203_v41  ;;  %v3226_v5 = vrot.slane %v3224_v26, 5  ;;  %v2811_v24 = vrot.slane %v2810_v17, 4  ;;  %v2827_v61 = vshll.u32 %v8236_v56, 16  ;;  %6201 = vmatprep.subr.bf16.mxu1 %v6432_v45  ;;  %v8315_v42 = vld [vmem:[#allocation2 + $0x64] sm:$0x1] }
 0x213   :  { %v3221_v29 = vor.u32 %v3220_v39, %v3217_v7  ;;  %v2815_v25 = vrot.slane %v2813_v9, 5  ;;  %v2825_v14 = vrot.slane %v2824_v40, 4  ;;  %v5474_v1 = vrot.slane %v2977_v28, 9  ;;  %v8323_v28 = vld [vmem:[#allocation2 + $0x68] sm:$0xf] }
 0x214   :  { %v3208_v19 = vrot.slane %v3207_v43, 4  ;;  %v2829_v63 = vrot.slane %v2827_v61, 5  ;;  %v3045_v13 = vrot.slane %v8292_v53, 5  ;;  %v5475_v30 = vrot.slane %v2978_v47, 9  ;;  %v8325_v7 = vld [vmem:[#allocation2 + $0x6c] sm:$0x1] }
 0x215   :  { %v3222_v15 = vrot.slane %v3221_v29, 4  ;;  %v2816_v56 = vsel %vm6673_vm2, %v2811_v24, %v2815_v25  ;;  %v3049_v41 = vrot.slane %v8302_v3, 5  ;;  %v5551_v62 = vcombine.low %v8255_v20, %v8273_v35  ;;  %6202 = vmatpush3.bf16.msra.mxu1 %v6432_v45  ;;  %v6437_v24 = vld [vmem:[%s8829_s3 + $0x208] sm:$0xff]  }
 0x216   :  { %v3213_v12 = vsel %vm6673_vm2, %v3208_v19, %v3212_v52  ;;  %v2830_v26 = vsel %vm6673_vm2, %v2825_v14, %v2829_v63  ;;  %v3046_v17 = vsel %vm7650_vm12, %v5474_v1, %v3045_v13  ;;  %v3229_v39 = vshrl.u32 %v8307_v32, 16  ;;  %6203 = vmatprep.subr.bf16.mxu1 %v6435_v27  ;;  %v8340_v14 = vld [vmem:[#allocation2 + $0x5c] sm:$0x1] }
 0x217   :  { %v3227_v20 = vsel %vm6673_vm2, %v3222_v15, %v3226_v5  ;;  %v5534_v35 = vcombine.low %v2816_v56, %v2830_v26  ;;  %v3050_v45 = vsel %vm7650_vm12, %v5475_v30, %v3049_v41  ;;  %v3232_v52 = vshll.u32 %v8307_v32, 16  ;;  %v8347_v30 = vld [vmem:[#allocation2 + $0x64] sm:$0x1]  ;;  %v2979_v15 = vld [vmem:[#allocation2 + $0x58] sm:$0xe] }
 0x218   :  { %v5559_v9 = vcombine.low %v3213_v12, %v3227_v20  ;;  %v5543_v40 = vcombine.low %v3046_v17, %v3050_v45  ;;  %v3231_v47 = vrot.slane %v3229_v39, 4  ;;  %v3238_v43 = vshll.u32 %v8315_v42, 16  ;;  %v2980_v17 = vld [vmem:[#allocation2 + $0x60] sm:$0xe]  ;;  %v8354_v45 = vld [vmem:[#allocation2 + $0x70] sm:$0xf] }
 0x219   :  { %4614 = vmatmul.mubr.bf16.gmra.mxu1 %v5534_v35  ;;  %v3234_v61 = vrot.slane %v3232_v52, 5  ;;  %v3243_v29 = vshrl.u32 %v8323_v28, 16  ;;  %v3246_v5 = vshll.u32 %v8323_v28, 16  ;;  %v3252_v25 = vshll.u32 %v8325_v7, 16 }
 0x21a   :  { %4718 = vmatprep.mubr.bf16.mxu0 %v5559_v9  ;;  %4621 = vmatprep.mubr.bf16.mxu1 %v5543_v40  ;;  %v3240_v1 = vrot.slane %v3238_v43, 5  ;;  %v2838_v19 = vor.u32 %v7958_v33, %v7956_v31  ;;  %v2841_v63 = vshll.u32 %v8292_v53, 16  ;;  %v2852_v13 = vor.u32 %v7969_v34, %v7967_v54  ;;  %v6440_v33 = vld [vmem:[%s8829_s3 + $0x200] sm:$0xff]  }
 0x21b   :  { %4719 = vmatmul.mubr.bf16.gmra.mxu0 %v5551_v62  ;;  %v3235_v56 = vor.u32 %v3234_v61, %v3231_v47  ;;  %v3245_v41 = vrot.slane %v3243_v29, 4  ;;  %v3248_v12 = vrot.slane %v3246_v5, 5  ;;  %v3254_v26 = vrot.slane %v3252_v25, 5  ;;  %6204 = vmatpush3.bf16.msra.mxu1 %v6435_v27  ;;  %v8367_v5 = vld [vmem:[#allocation2 + $0x78] sm:$0xf] }
 0x21c   :  { %v2839_v39 = vrot.slane %v2838_v19, 4  ;;  %v2843_v20 = vrot.slane %v2841_v63, 5  ;;  %v2853_v35 = vrot.slane %v2852_v13, 4  ;;  %v2855_v31 = vshll.u32 %v8302_v3, 16  ;;  %6205 = vmatprep.subr.bf16.mxu1 %v6437_v24  ;;  %v8359_v3 = vld [vmem:[#allocation2 + $0x74] sm:$0x1] }
 0x21d   :  { %v3236_v54 = vrot.slane %v3235_v56, 4  ;;  %v3249_v34 = vor.u32 %v3248_v12, %v3245_v41  ;;  %v5476_v53 = vrot.slane %v2979_v15, 9  ;;  %v3053_v62 = vrot.slane %v8340_v14, 5  ;;  %v8373_v63 = vld [vmem:[#allocation2 + $0x7c] sm:$0x1] }
 0x21e   :  { %v2844_v27 = vsel %vm6673_vm2, %v2839_v39, %v2843_v20  ;;  %v2857_v52 = vrot.slane %v2855_v31, 5  ;;  %v5477_v9 = vrot.slane %v2980_v17, 9  ;;  %v3057_v40 = vrot.slane %v8347_v30, 5 }
 0x21f   :  { %v3241_v47 = vsel %vm6673_vm2, %v3236_v54, %v3240_v1  ;;  %v3250_v43 = vrot.slane %v3249_v34, 4  ;;  %v3054_v61 = vsel %vm7650_vm12, %v5476_v53, %v3053_v62  ;;  %v5552_v29 = vcombine.low %v8307_v32, %v8323_v28  ;;  %6206 = vmatpush3.bf16.msra.mxu1 %v6437_v24  ;;  %v2981_v54 = vld [vmem:[#allocation2 + $0x68] sm:$0xe] }
 0x220   :  { %v2858_v25 = vsel %vm6673_vm2, %v2853_v35, %v2857_v52  ;;  %v3058_v19 = vsel %vm7650_vm12, %v5477_v9, %v3057_v40  ;;  %v3257_v1 = vshrl.u32 %v8354_v45, 16  ;;  %v3260_v13 = vshll.u32 %v8354_v45, 16  ;;  %6207 = vmatprep.subr.bf16.mxu1 %v6440_v33  ;;  %v2982_v52 = vld [vmem:[#allocation2 + $0x70] sm:$0xe] }
 0x221   :  { %v3255_v15 = vsel %vm6673_vm2, %v3250_v43, %v3254_v26  ;;  %v5535_v32 = vcombine.low %v2844_v27, %v2858_v25  ;;  %v5544_v28 = vcombine.low %v3054_v61, %v3058_v19  ;;  %v3266_v24 = vshll.u32 %v8359_v3, 16  ;;  %v2741_v27 = vld [vmem:[#allocation2 + $0x6c] sm:$0x1]  ;;  %v2742_v61 = vld [vmem:[#allocation2 + $0x74] sm:$0x1] }
 0x222   :  { %v5560_v56 = vcombine.low %v3241_v47, %v3255_v15  ;;  %v3259_v41 = vrot.slane %v3257_v1, 4  ;;  %v3262_v12 = vrot.slane %v3260_v13, 5  ;;  %v3271_v17 = vshrl.u32 %v8367_v5, 16  ;;  %v8389_v1 = vld [vmem:[#allocation2 + $0x80] sm:$0xf] }
 0x223   :  { %4622 = vmatmul.mubr.bf16.gmra.mxu1 %v5535_v32  ;;  %v3268_v39 = vrot.slane %v3266_v24, 5  ;;  %v3274_v20 = vshll.u32 %v8367_v5, 16  ;;  %v3280_v35 = vshll.u32 %v8373_v63, 16  ;;  %v2866_v31 = vor.u32 %v8011_v60, %v8009_v10  ;;  %v8405_v24 = vld [vmem:[#allocation2 + $0x88] sm:$0xf] }
 0x224   :  { %4726 = vmatprep.mubr.bf16.mxu0 %v5560_v56  ;;  %4629 = vmatprep.mubr.bf16.mxu1 %v5544_v28  ;;  %v3263_v26 = vor.u32 %v3262_v12, %v3259_v41  ;;  %v3273_v34 = vrot.slane %v3271_v17, 4  ;;  %v2869_v53 = vshll.u32 %v8340_v14, 16  ;;  %v2880_v62 = vor.u32 %v8022_v37, %v8020_v18  ;;  %v8394_v18 = vld [vmem:[%s8831_s6 + $0x18] sm:$0xff]  }
 0x225   :  { %4727 = vmatmul.mubr.bf16.gmra.mxu0 %v5552_v29  ;;  %v3276_v9 = vrot.slane %v3274_v20, 5  ;;  %v3282_v40 = vrot.slane %v3280_v35, 5  ;;  %v2867_v47 = vrot.slane %v2866_v31, 4  ;;  %v2883_v43 = vshll.u32 %v8347_v30, 16  ;;  %6208 = vmatpush3.bf16.msra.mxu1 %v6440_v33  ;;  %v8397_v30 = vld [vmem:[#allocation2 + $0x84] sm:$0x1] }
 0x226   :  { %v3264_v10 = vrot.slane %v3263_v26, 4  ;;  %v2871_v60 = vrot.slane %v2869_v53, 5  ;;  %v2881_v25 = vrot.slane %v2880_v62, 4  ;;  %v5478_v19 = vrot.slane %v2981_v54, 9  ;;  %6249 = vmatprep.subr.bf16.mxu1 %v8394_v18  ;;  %v8414_v35 = vld [vmem:[#allocation2 + $0x8c] sm:$0x1] }
 0x227   :  { %v3277_v37 = vor.u32 %v3276_v9, %v3273_v34  ;;  %v2885_v14 = vrot.slane %v2883_v43, 5  ;;  %v3061_v29 = vrot.slane %v2741_v27, 5  ;;  %v5479_v13 = vrot.slane %v2982_v52, 9 }
 0x228   :  { %v3269_v33 = vsel %vm6673_vm2, %v3264_v10, %v3268_v39  ;;  %v2872_v15 = vsel %vm6673_vm2, %v2867_v47, %v2871_v60  ;;  %v3065_v32 = vrot.slane %v2742_v61, 5  ;;  %v5553_v28 = vcombine.low %v8354_v45, %v8367_v5  ;;  %v2983_v47 = vld [vmem:[#allocation2 + $0x78] sm:$0xe] }
 0x229   :  { %v3278_v56 = vrot.slane %v3277_v37, 4  ;;  %v2886_v41 = vsel %vm6673_vm2, %v2881_v25, %v2885_v14  ;;  %v3062_v12 = vsel %vm7650_vm12, %v5478_v19, %v3061_v29  ;;  %v3285_v17 = vshrl.u32 %v8389_v1, 16 }
 0x22a   :  { %v5536_v20 = vcombine.low %v2872_v15, %v2886_v41  ;;  %v3066_v39 = vsel %vm7650_vm12, %v5479_v13, %v3065_v32  ;;  %v3288_v31 = vshll.u32 %v8389_v1, 16  ;;  %v3294_v45 = vshll.u32 %v8397_v30, 16  ;;  %v2744_v13 = vld [vmem:[#allocation2 + $0x84] sm:$0x1] }
 0x22b   :  { %v3283_v5 = vsel %vm6673_vm2, %v3278_v56, %v3282_v40  ;;  %v5545_v54 = vcombine.low %v3062_v12, %v3066_v39  ;;  %v3287_v26 = vrot.slane %v3285_v17, 4  ;;  %v3299_v34 = vshrl.u32 %v8405_v24, 16  ;;  %v2743_v40 = vld [vmem:[#allocation2 + $0x7c] sm:$0x1] }
 0x22c   :  { %v5561_v53 = vcombine.low %v3269_v33, %v3283_v5  ;;  %4630 = vmatmul.mubr.bf16.gmra.mxu1 %v5536_v20  ;;  %v3290_v62 = vrot.slane %v3288_v31, 5  ;;  %v3296_v52 = vrot.slane %v3294_v45, 5  ;;  %v3302_v9 = vshll.u32 %v8405_v24, 16  ;;  %v2984_v33 = vld [vmem:[#allocation2 + $0x80] sm:$0xe] }
 0x22d   :  { %4637 = vmatprep.mubr.bf16.mxu1 %v5545_v54  ;;  %v3301_v43 = vrot.slane %v3299_v34, 4  ;;  %v3308_v10 = vshll.u32 %v8414_v35, 16  ;;  %v2894_v60 = vor.u32 %v8054_v21, %v8052_v46  ;;  %v2897_v25 = vshll.u32 %v2741_v27, 16  ;;  %v8427_v21 = vld [vmem:[#allocation2 + $0x90] sm:$0xf] }
 0x22e   :  { %4734 = vmatprep.mubr.bf16.mxu0 %v5561_v53  ;;  %v3291_v19 = vor.u32 %v3290_v62, %v3287_v26  ;;  %v3304_v37 = vrot.slane %v3302_v9, 5  ;;  %v2908_v14 = vor.u32 %v8058_v22, %v8056_v50  ;;  %v2911_v29 = vshll.u32 %v2742_v61, 16  ;;  %v8431_v22 = vld [vmem:[#allocation2 + $0x94] sm:$0x1]  ;;  %v8439_v54 = vld [vmem:[#allocation2 + $0x98] sm:$0xf] }
 0x22f   :  { %4735 = vmatmul.mubr.bf16.gmra.mxu0 %v5553_v28  ;;  %v3310_v15 = vrot.slane %v3308_v10, 5  ;;  %v2895_v32 = vrot.slane %v2894_v60, 4  ;;  %v2899_v56 = vrot.slane %v2897_v25, 5  ;;  %v5480_v41 = vrot.slane %v2983_v47, 9  ;;  %v8448_v47 = vld [vmem:[#allocation2 + $0x9c] sm:$0x1] }
 0x230   :  { %v3292_v12 = vrot.slane %v3291_v19, 4  ;;  %v3305_v17 = vor.u32 %v3304_v37, %v3301_v43  ;;  %v2909_v20 = vrot.slane %v2908_v14, 4  ;;  %v2913_v46 = vrot.slane %v2911_v29, 5  ;;  %v2745_v19 = vld [vmem:[#allocation2 + $0x8c] sm:$0x1] }
 0x231   :  { %v2900_v27 = vsel %vm6673_vm2, %v2895_v32, %v2899_v56  ;;  %v3069_v39 = vrot.slane %v2743_v40, 5  ;;  %v5481_v31 = vrot.slane %v2984_v33, 9  ;;  %v3073_v50 = vrot.slane %v2744_v13, 5 }
 0x232   :  { %v3297_v61 = vsel %vm6673_vm2, %v3292_v12, %v3296_v52  ;;  %v3306_v28 = vrot.slane %v3305_v17, 4  ;;  %v2914_v45 = vsel %vm6673_vm2, %v2909_v20, %v2913_v46  ;;  %v5554_v5 = vcombine.low %v8389_v1, %v8405_v24  ;;  %v2986_v17 = vld [vmem:[#allocation2 + $0x90] sm:$0xe] }
 0x233   :  { %v5537_v26 = vcombine.low %v2900_v27, %v2914_v45  ;;  %v3070_v34 = vsel %vm7650_vm12, %v5480_v41, %v3069_v39  ;;  %v3074_v53 = vsel %vm7650_vm12, %v5481_v31, %v3073_v50  ;;  %v3313_v62 = vshrl.u32 %v8427_v21, 16  ;;  %v2746_v31 = vld [vmem:[#allocation2 + $0x94] sm:$0x1] }
 0x234   :  { %v3311_v52 = vsel %vm6673_vm2, %v3306_v28, %v3310_v15  ;;  %v5546_v9 = vcombine.low %v3070_v34, %v3074_v53  ;;  %v3316_v43 = vshll.u32 %v8427_v21, 16  ;;  %v3322_v1 = vshll.u32 %v8431_v22, 16  ;;  %v2985_v15 = vld [vmem:[#allocation2 + $0x88] sm:$0xe] }
 0x235   :  { %v5562_v24 = vcombine.low %v3297_v61, %v3311_v52  ;;  %4638 = vmatmul.mubr.bf16.gmra.mxu1 %v5537_v26  ;;  %v3315_v10 = vrot.slane %v3313_v62, 4  ;;  %v3327_v60 = vshrl.u32 %v8439_v54, 16  ;;  %v3330_v25 = vshll.u32 %v8439_v54, 16 }
 0x236   :  { %4645 = vmatprep.mubr.bf16.mxu1 %v5546_v9  ;;  %v3318_v37 = vrot.slane %v3316_v43, 5  ;;  %v3324_v14 = vrot.slane %v3322_v1, 5  ;;  %v3336_v29 = vshll.u32 %v8448_v47, 16  ;;  %v2922_v33 = vor.u32 %v8092_v48, %v8090_v8  ;;  %v3340_v9 = vld [vmem:[#allocation2 + $0x10] sm:$0xe] }
 0x237   :  { %4742 = vmatprep.mubr.bf16.mxu0 %v5562_v24  ;;  %v3329_v32 = vrot.slane %v3327_v60, 4  ;;  %v3332_v56 = vrot.slane %v3330_v25, 5  ;;  %v2925_v41 = vshll.u32 %v2743_v40, 16  ;;  %v2936_v12 = vor.u32 %v8098_v4, %v8096_v49 }
 0x238   :  { %4743 = vmatmul.mubr.bf16.gmra.mxu0 %v5554_v5  ;;  %v3319_v20 = vor.u32 %v3318_v37, %v3315_v10  ;;  %v3338_v46 = vrot.slane %v3336_v29, 5  ;;  %v2923_v27 = vrot.slane %v2922_v33, 4  ;;  %v2939_v39 = vshll.u32 %v2744_v13, 16  ;;  %v3342_v10 = vld [vmem:[#allocation2 + $0x20] sm:$0xe]  ;;  %v8851_v29 = vld [vmem:[#allocation4_spill] sm:$0xff] }
 0x239   :  { %v3333_v50 = vor.u32 %v3332_v56, %v3329_v32  ;;  %v2927_v61 = vrot.slane %v2925_v41, 5  ;;  %v2937_v28 = vrot.slane %v2936_v12, 4  ;;  %v5482_v45 = vrot.slane %v2985_v15, 9  ;;  %v3341_v15 = vld [vmem:[#allocation2 + $0x18] sm:$0xe] }
 0x23a   :  { %v3320_v8 = vrot.slane %v3319_v20, 4  ;;  %v2941_v48 = vrot.slane %v2939_v39, 5  ;;  %v3077_v26 = vrot.slane %v2745_v19, 5  ;;  %v5483_v34 = vrot.slane %v2986_v17, 9  ;;  %v3344_v17 = vld [vmem:[#allocation2 + $0x30] sm:$0xe] }
 0x23b   :  { %v3402_v40 = vrot.slane %v8168_v6, 5  ;;  %v3334_v53 = vrot.slane %v3333_v50, 4  ;;  %v2928_v49 = vsel %vm6673_vm2, %v2923_v27, %v2927_v61  ;;  %v3081_v4 = vrot.slane %v2746_v31, 5  ;;  %v3345_v39 = vld [vmem:[#allocation2 + $0x38] sm:$0xe] }
 0x23c   :  { %v3325_v5 = vsel %vm6673_vm2, %v3320_v8, %v3324_v14  ;;  %v2942_v13 = vsel %vm6673_vm2, %v2937_v28, %v2941_v48  ;;  %v3078_v62 = vsel %vm7650_vm12, %v5482_v45, %v3077_v26  ;;  %v2950_v52 = vor.u32 %v8118_v58, %v8116_v36  ;;  %v8850_v14 = vld [vmem:[#allocation3_spill] sm:$0xff]  ;;  %v3343_v58 = vld [vmem:[#allocation2 + $0x28] sm:$0xe]  ;;  %v8853_v28 = vld [vmem:[#allocation6_spill] sm:$0xff] }
 0x23d   :  { %v3339_v6 = vsel %vm6673_vm2, %v3334_v53, %v3338_v46  ;;  %v5538_v43 = vcombine.low %v2928_v49, %v2942_v13  ;;  %v3082_v1 = vsel %vm7650_vm12, %v5483_v34, %v3081_v4  ;;  %v2953_v24 = vshll.u32 %v2745_v19, 16  ;;  %v6443_v36 = vld [vmem:[%s8832_s5] sm:$0xff]   ;;  %v8852_v19 = vld [vmem:[#allocation5_spill] sm:$0xff] }
 0x23e   :  { %v5563_v60 = vcombine.low %v3325_v5, %v3339_v6  ;;  %v5547_v25 = vcombine.low %v3078_v62, %v3082_v1  ;;  %v2951_v37 = vrot.slane %v2950_v52, 4  ;;  %v2964_v33 = vor.u32 %v8851_v29, %v8850_v14  ;;  %v3348_v6 = vld [vmem:[#allocation2 + $0x60] sm:$0xe] }
 0x23f   :  { %4646 = vmatmul.mubr.bf16.gmra.mxu1 %v5538_v43  ;;  %v5555_v32 = vcombine.low %v8427_v21, %v8439_v54  ;;  %v2967_v56 = vshll.u32 %v2746_v31, 16  ;;  %v5484_v41 = vrot.slane %v3340_v9, 9  ;;  %v3390_v12 = vrot.slane %v8852_v19, 5  ;;  %v3347_v9 = vld [vmem:[#allocation2 + $0x48] sm:$0xe]  ;;  %v6446_v43 = vld [vmem:[%s8832_s5 + $0x18] sm:$0xff]  }
 0x240   :  { %4750 = vmatprep.mubr.bf16.mxu0 %v5563_v60  ;;  %4653 = vmatprep.mubr.bf16.mxu1 %v5547_v25  ;;  %v2955_v20 = vrot.slane %v2953_v24, 5  ;;  %v2965_v46 = vrot.slane %v2964_v33, 4  ;;  %v5486_v27 = vrot.slane %v3342_v10, 9  ;;  %v5485_v61 = vrot.slane %v3341_v15, 9  ;;  %v3349_v25 = vld [vmem:[#allocation2 + $0x68] sm:$0xe] }
 0x241   :  { %4751 = vmatmul.mubr.bf16.gmra.mxu0 %v5555_v32  ;;  %v2969_v50 = vrot.slane %v2967_v56, 5  ;;  %v3394_v45 = vrot.slane %v8853_v28, 5  ;;  %v5487_v8 = vrot.slane %v3343_v58, 9  ;;  %v3391_v54 = vsel %vm7650_vm12, %v5484_v41, %v3390_v12  ;;  %v3353_v19 = vld [vmem:[#allocation2 + $0x88] sm:$0xe] }
 0x242   :  { %v2956_v21 = vsel %vm6673_vm2, %v2951_v37, %v2955_v20  ;;  %6233 = vmatprep.mubr.msk.bf16.mxu0 %vm1234_vm3, %v6443_v36  ;;  %v5488_v31 = vrot.slane %v3344_v17, 9  ;;  %v3406_v48 = vrot.slane %v8206_v44, 5  ;;  %v3399_v34 = vsel %vm7650_vm12, %v5486_v27, %v3398_v59 }
 0x243   :  { %v2970_v26 = vsel %vm6673_vm2, %v2965_v46, %v2969_v50  ;;  %v3403_v53 = vsel %vm7650_vm12, %v5487_v8, %v3402_v40  ;;  %v5489_v49 = vrot.slane %v3345_v39, 9  ;;  %v3410_v62 = vrot.slane %v8209_v57, 5  ;;  %v6445_v40 = vld [vmem:[%s8832_s5 + $0x10] sm:$0xff]   ;;  %v3346_v57 = vld [vmem:[#allocation2 + $0x40] sm:$0xe] }
 0x244   :  { %v5539_v4 = vcombine.low %v2956_v21, %v2970_v26  ;;  %v5565_v5 = vcombine.low %v3399_v34, %v3403_v53  ;;  %v3407_v13 = vsel %vm7650_vm12, %v5488_v31, %v3406_v48  ;;  %v3395_v51 = vsel %vm7650_vm12, %v5485_v61, %v3394_v45  ;;  %v3355_v61 = vld [vmem:[#allocation2 + $0x98] sm:$0xe] }
 0x245   :  { %v5564_v44 = vcombine.low %v3391_v54, %v3395_v51  ;;  %v3411_v59 = vsel %vm7650_vm12, %v5489_v49, %v3410_v62  ;;  %v5490_v1 = vrot.slane %v3346_v57, 9  ;;  %v3414_v24 = vrot.slane %v8264_v55, 5  ;;  %v8572_v51 = vld [vmem:[%s8833_s4] ss:$0 sm:$0xff] }
 0x246   :  { %v5566_v52 = vcombine.low %v3407_v13, %v3411_v59  ;;  %v5491_v10 = vrot.slane %v3347_v9, 9  ;;  %v3418_v60 = vrot.slane %v8283_v23, 5  ;;  %v5492_v37 = vrot.slane %v3348_v6, 9 }
 0x247   :  { %4654 = vmatmul.mubr.bf16.gmra.mxu1 %v5539_v4  ;;  %v3422_v14 = vrot.slane %v8315_v42, 5  ;;  %v5493_v29 = vrot.slane %v3349_v25, 9  ;;  %v3426_v33 = vrot.slane %v8325_v7, 5  ;;  %v3415_v55 = vsel %vm7650_vm12, %v5490_v1, %v3414_v24  ;;  %v3351_v42 = vld [vmem:[#allocation2 + $0x78] sm:$0xe] }
 0x248   :  { %6209 = vmatprep.mubr.bf16.mxu1 %v5564_v44  ;;  %v3419_v23 = vsel %vm7650_vm12, %v5491_v10, %v3418_v60  ;;  %v3350_v7 = vld [vmem:[#allocation2 + $0x70] sm:$0xe]  ;;  %v5495_v56 = vrot.slane %v3351_v42, 9  ;;  %v3434_v41 = vrot.slane %v8373_v63, 5  ;;  %v3438_v17 = vrot.slane %v8397_v30, 5 }
 0x249   :  { %6234 = vmatmul.mubr.msk.bf16.vlgmr.msra.gmra.mxu0 %vm1234_vm3, %v6444_v38  ;;  %v3423_v15 = vsel %vm7650_vm12, %v5492_v37, %v3422_v14  ;;  %v5567_v36 = vcombine.low %v3415_v55, %v3419_v23  ;;  %v3427_v58 = vsel %vm7650_vm12, %v5493_v29, %v3426_v33  ;;  %v5494_v20 = vrot.slane %v3350_v7, 9  ;;  %v3354_v63 = vld [vmem:[#allocation2 + $0x90] sm:$0xe] }
 0x24a   :  { %6237 = vmatprep.mubr.msk.bf16.mxu0 %vm1234_vm3, %v6445_v40  ;;  %v5568_v32 = vcombine.low %v3423_v15, %v3427_v58  ;;  %v5497_v46 = vrot.slane %v3353_v19, 9  ;;  %v3442_v27 = vrot.slane %v8414_v35, 5  ;;  %v3435_v39 = vsel %vm7650_vm12, %v5495_v56, %v3434_v41 }
 0x24b   :  { %v5498_v35 = vrot.slane %v3354_v63, 9  ;;  %v3446_v45 = vrot.slane %v8431_v22, 5  ;;  %v5499_v8 = vrot.slane %v3355_v61, 9  ;;  %v3450_v21 = vrot.slane %v8448_v47, 5  ;;  %v6448_v22 = vld [vmem:[%s8832_s5 + $0x28] sm:$0xff]   ;;  %v6449_v47 = vld [vmem:[%s8832_s5 + $0x30] sm:$0xff]  }
 0x24d   :  { %v3447_v54 = vsel %vm7650_vm12, %v5498_v35, %v3446_v45  ;;  %v3451_v31 = vsel %vm7650_vm12, %v5499_v8, %v3450_v21 }
 0x24e   :  { %v5571_v48 = vcombine.low %v3447_v54, %v3451_v31 }
 0x24f   :  { %6210 = vmatmul.mubr.bf16.vlgmr.msra.gmra.mxu1 %v5565_v5 }
 0x250   :  { %6253 = vmatpush3.bf16.msra.mxu1 %v8394_v18  ;;  %6213 = vmatprep.mubr.bf16.mxu1 %v5566_v52  ;;  %v3352_v18 = vld [vmem:[#allocation2 + $0x80] sm:$0xe] }
 0x251   :  { %6250 = vmatprep.subr.bf16.mxu1 %v8198_v11  ;;  %6238 = vmatmul.mubr.msk.bf16.gmra.mxu0 %vm1234_vm3, %v6446_v43  ;;  %v5496_v12 = vrot.slane %v3352_v18, 9 }
 0x253   :  { %v3439_v50 = vsel %vm7650_vm12, %v5496_v12, %v3438_v17 }
 0x254   :  { %6254 = vmatpush3.bf16.msra.mxu1 %v8198_v11  ;;  %v3430_v11 = vrot.slane %v8359_v3, 5 }
 0x255   :  { %6251 = vmatprep.subr.bf16.mxu1 %v8214_v16 }
 0x256   :  { %v3431_v30 = vsel %vm7650_vm12, %v5494_v20, %v3430_v11 }
 0x257   :  { %6214 = vmatmul.mubr.bf16.gmra.mxu1 %v5567_v36  ;;  %v5569_v3 = vcombine.low %v3431_v30, %v3435_v39 }
 0x258   :  { %6217 = vmatprep.mubr.bf16.mxu1 %v5568_v32  ;;  %6255 = vmatpush3.bf16.msra.mxu1 %v8214_v16  ;;  %v3443_v16 = vsel %vm7650_vm12, %v5497_v46, %v3442_v27 }
 0x259   :  { %6252 = vmatprep.subr.bf16.mxu1 %v8253_v2  ;;  %v5570_v28 = vcombine.low %v3439_v50, %v3443_v16 }
 0x25c   :  { %6256 = vmatpush3.bf16.msra.mxu1 %v8253_v2  ;;  %v6447_v2 = vld [vmem:[%s8832_s5 + $0x20] sm:$0xff]  }
 0x25f   :  { %6218 = vmatmul.mubr.bf16.gmra.mxu1 %v5569_v3 }
 0x260   :  { %6221 = vmatprep.mubr.bf16.mxu1 %v5570_v28 }
 0x267   :  { %6222 = vmatmul.mubr.bf16.gmra.mxu1 %v5571_v48 }
 0x268   :  { %6241 = vmatprep.mubr.msk.bf16.mxu1 %vm1234_vm3, %v6447_v2 }
 0x26f   :  { %6242 = vmatmul.mubr.msk.bf16.vlgmr.msra.gmra.mxu1 %vm1234_vm3, %v6448_v22 }
 0x270   :  { %6245 = vmatprep.mubr.msk.bf16.mxu1 %vm1234_vm3, %v6449_v47 }
 0x277   :  { %6246 = vmatmul.mubr.msk.bf16.gmra.mxu1 %vm1234_vm3, %v6450_v0 }
 0x278   :  { %v5965_v26 = vpop.f32.mrf.mxu0 }
 0x27a   :  { %v5966_v34 = vpop.f32.mrf.mxu0 }
 0x27b   :  { %v5967_v53 = vadd.f32 %v5966_v34, %v5965_v26 }
 0x27c   :  { %v5968_v49 = vpop.f32.mrf.mxu0 }
 0x27e   :  { %v5969_v4 = vpop.f32.mrf.mxu0 }
 0x27f   :  { %v5970_v5 = vadd.f32 %v5969_v4, %v5968_v49 }
 0x284   :  { %v5901_v13 = vpop.f32.mrf.mxu1  ;;  %v5971_v62 = vpop.f32.mrf.mxu0 }
 0x286   :  { %v5902_v38 = vpop.f32.mrf.mxu1  ;;  %v5972_v44 = vpop.f32.mrf.mxu0 }
 0x287   :  { %v5903_v59 = vadd.f32 %v5902_v38, %v5901_v13  ;;  %v5973_v40 = vadd.f32 %v5972_v44, %v5971_v62 }
 0x288   :  { %v5904_v52 = vpop.f32.mrf.mxu1  ;;  %v5974_v57 = vpop.f32.mrf.mxu0 }
 0x289   :  { %v4406_v9 = vadd.f32 %v5903_v59, %v8572_v51 }
 0x28a   :  { %v5905_v6 = vpop.f32.mrf.mxu1  ;;  %v5975_v43 = vpop.f32.mrf.mxu0 }
 0x28b   :  { %v5906_v1 = vadd.f32 %v5905_v6, %v5904_v52  ;;  %v5976_v24 = vadd.f32 %v5975_v43, %v5974_v57  ;;  %v8575_v10 = vadd.f32 %v5967_v53, %v4406_v9 }
 0x28c   :  { %v5907_v60 = vpop.f32.mrf.mxu1 }
 0x28d   :  { %v4409_v25 = vadd.f32 %v5906_v1, %v8572_v51  ;;  %v5977_v37 = vpop.f32.mrf.mxu0 }
 0x28e   :  { %v5908_v14 = vpop.f32.mrf.mxu1 }
 0x28f   :  { %v5909_v29 = vadd.f32 %v5908_v14, %v5907_v60  ;;  %v5978_v33 = vpop.f32.mrf.mxu0  ;;  %v8578_v55 = vadd.f32 %v5970_v5, %v4409_v25 }
 0x290   :  { %v5910_v23 = vpop.f32.mrf.mxu1  ;;  %v5979_v15 = vadd.f32 %v5978_v33, %v5977_v37 }
 0x291   :  { %v4414_v42 = vadd.f32 %v5909_v29, %v8572_v51  ;;  %v5980_v18 = vpop.f32.mrf.mxu0 }
 0x292   :  { %v5911_v36 = vpop.f32.mrf.mxu1 }
 0x293   :  { %v5912_v58 = vadd.f32 %v5911_v36, %v5910_v23  ;;  %v5981_v7 = vpop.f32.mrf.mxu0  ;;  %v8581_v32 = vadd.f32 %v5973_v40, %v4414_v42 }
 0x294   :  { %v5913_v56 = vpop.f32.mrf.mxu1  ;;  %v5982_v41 = vadd.f32 %v5981_v7, %v5980_v18 }
 0x295   :  { %v4417_v19 = vadd.f32 %v5912_v58, %v8572_v51 }
 0x296   :  { %v5914_v12 = vpop.f32.mrf.mxu1  ;;  %v5983_v17 = vpop.f32.mrf.mxu0 }
 0x297   :  { %v5915_v20 = vadd.f32 %v5914_v12, %v5913_v56  ;;  %v8584_v11 = vadd.f32 %v5976_v24, %v4417_v19 }
 0x298   :  { %v5916_v46 = vpop.f32.mrf.mxu1  ;;  %v5984_v27 = vpop.f32.mrf.mxu0 }
 0x299   :  { %v4422_v39 = vadd.f32 %v5915_v20, %v8572_v51  ;;  %v5985_v63 = vadd.f32 %v5984_v27, %v5983_v17 }
 0x29a   :  { %v5917_v50 = vpop.f32.mrf.mxu1  ;;  %v5986_v61 = vpop.f32.mrf.mxu0 }
 0x29b   :  { %v5918_v30 = vadd.f32 %v5917_v50, %v5916_v46  ;;  %v8587_v3 = vadd.f32 %v5979_v15, %v4422_v39 }
 0x29c   :  { %v5919_v16 = vpop.f32.mrf.mxu1  ;;  %v5987_v35 = vpop.f32.mrf.mxu0 }
 0x29d   :  { %v4425_v28 = vadd.f32 %v5918_v30, %v8572_v51  ;;  %v5988_v45 = vadd.f32 %v5987_v35, %v5986_v61 }
 0x29e   :  { %v5920_v8 = vpop.f32.mrf.mxu1  ;;  %v5989_v21 = vpop.f32.mrf.mxu0 }
 0x29f   :  { %v5921_v54 = vadd.f32 %v5920_v8, %v5919_v16  ;;  %v8590_v31 = vadd.f32 %v5982_v41, %v4425_v28 }
 0x2a0   :  { %v5922_v2 = vpop.f32.mrf.mxu1  ;;  %v5990_v48 = vpop.f32.mrf.mxu0 }
 0x2a1   :  { %v4430_v22 = vadd.f32 %v5921_v54, %v8572_v51  ;;  %v5991_v47 = vadd.f32 %v5990_v48, %v5989_v21 }
 0x2a2   :  { %v5923_v0 = vpop.f32.mrf.mxu1  ;;  %v5992_v26 = vpop.f32.mrf.mxu0 }
 0x2a3   :  { %v5924_v34 = vadd.f32 %v5923_v0, %v5922_v2  ;;  %v8593_v53 = vadd.f32 %v5985_v63, %v4430_v22 }
 0x2a4   :  { %v5925_v49 = vpop.f32.mrf.mxu1  ;;  %v5993_v4 = vpop.f32.mrf.mxu0 }
 0x2a5   :  { %v4433_v5 = vadd.f32 %v5924_v34, %v8572_v51  ;;  %v5994_v13 = vadd.f32 %v5993_v4, %v5992_v26 }
 0x2a6   :  { %v5926_v62 = vpop.f32.mrf.mxu1  ;;  %v5995_v38 = vpop.f32.mrf.mxu0 }
 0x2a7   :  { %v5927_v44 = vadd.f32 %v5926_v62, %v5925_v49  ;;  %v8596_v59 = vadd.f32 %v5988_v45, %v4433_v5 }
 0x2a8   :  { %v5928_v40 = vpop.f32.mrf.mxu1  ;;  %v5996_v52 = vpop.f32.mrf.mxu0 }
 0x2a9   :  { %v4438_v57 = vadd.f32 %v5927_v44, %v8572_v51  ;;  %v5997_v9 = vadd.f32 %v5996_v52, %v5995_v38 }
 0x2aa   :  { %v5929_v6 = vpop.f32.mrf.mxu1  ;;  %v5998_v43 = vpop.f32.mrf.mxu0 }
 0x2ab   :  { %v5930_v1 = vadd.f32 %v5929_v6, %v5928_v40  ;;  %v8599_v24 = vadd.f32 %v5991_v47, %v4438_v57 }
 0x2ac   :  { %v5931_v60 = vpop.f32.mrf.mxu1  ;;  %v5999_v25 = vpop.f32.mrf.mxu0 }
 0x2ad   :  { %v4441_v37 = vadd.f32 %v5930_v1, %v8572_v51  ;;  %v6000_v14 = vadd.f32 %v5999_v25, %v5998_v43 }
 0x2ae   :  { %v5932_v29 = vpop.f32.mrf.mxu1  ;;  %v6001_v33 = vpop.f32.mrf.mxu0 }
 0x2af   :  { %v5933_v23 = vadd.f32 %v5932_v29, %v5931_v60  ;;  %v8602_v15 = vadd.f32 %v5994_v13, %v4441_v37 }
 0x2b0   :  { %v5934_v42 = vpop.f32.mrf.mxu1  ;;  %v6002_v18 = vpop.f32.mrf.mxu0 }
 0x2b1   :  { %v4446_v36 = vadd.f32 %v5933_v23, %v8572_v51  ;;  %v6003_v58 = vadd.f32 %v6002_v18, %v6001_v33 }
 0x2b2   :  { %v5935_v7 = vpop.f32.mrf.mxu1  ;;  %v6004_v56 = vpop.f32.mrf.mxu0 }
 0x2b3   :  { %v5936_v41 = vadd.f32 %v5935_v7, %v5934_v42  ;;  %v8605_v19 = vadd.f32 %v5997_v9, %v4446_v36 }
 0x2b4   :  { %v5937_v12 = vpop.f32.mrf.mxu1  ;;  %v6005_v17 = vpop.f32.mrf.mxu0 }
 0x2b5   :  { %v4449_v20 = vadd.f32 %v5936_v41, %v8572_v51  ;;  %v6006_v46 = vadd.f32 %v6005_v17, %v6004_v56 }
 0x2b6   :  { %v5938_v27 = vpop.f32.mrf.mxu1 }
 0x2b7   :  { %v5939_v39 = vadd.f32 %v5938_v27, %v5937_v12  ;;  %v6007_v63 = vpop.f32.mrf.mxu0  ;;  %v8608_v50 = vadd.f32 %v6000_v14, %v4449_v20 }
 0x2b8   :  { %v5940_v61 = vpop.f32.mrf.mxu1 }
 0x2b9   :  { %v4454_v30 = vadd.f32 %v5939_v39, %v8572_v51  ;;  %v6008_v16 = vpop.f32.mrf.mxu0 }
 0x2ba   :  { %v6009_v35 = vadd.f32 %v6008_v16, %v6007_v63  ;;  %v5941_v28 = vpop.f32.mrf.mxu1 }
 0x2bb   :  { %v5942_v45 = vadd.f32 %v5941_v28, %v5940_v61  ;;  %v6010_v8 = vpop.f32.mrf.mxu0  ;;  %v8611_v21 = vadd.f32 %v6003_v58, %v4454_v30 }
 0x2bc   :  { %v5943_v54 = vpop.f32.mrf.mxu1 }
 0x2bd   :  { %8854 = vst [vmem:[#allocation3_spill] sm:$0xff] %v8611_v21  ;;  %v4457_v2 = vadd.f32 %v5942_v45, %v8572_v51  ;;  %v6011_v48 = vpop.f32.mrf.mxu0 }
 0x2be   :  { %v6012_v22 = vadd.f32 %v6011_v48, %v6010_v8  ;;  %v5944_v47 = vpop.f32.mrf.mxu1 }
 0x2bf   :  { %v5945_v0 = vadd.f32 %v5944_v47, %v5943_v54  ;;  %v8614_v26 = vadd.f32 %v6006_v46, %v4457_v2 }
 0x2c0   :  { %v5946_v34 = vpop.f32.mrf.mxu1 }
 0x2c1   :  { %8855 = vst [vmem:[#allocation4_spill] sm:$0xff] %v8614_v26  ;;  %v4462_v49 = vadd.f32 %v5945_v0, %v8572_v51 }
 0x2c2   :  { %v6093_v4 = vpop.f32.mrf.mxu0  ;;  %v5947_v5 = vpop.f32.mrf.mxu1 }
 0x2c3   :  { %v5948_v13 = vadd.f32 %v5947_v5, %v5946_v34  ;;  %v8617_v62 = vadd.f32 %v6009_v35, %v4462_v49 }
 0x2c4   :  { %v6094_v38 = vpop.f32.mrf.mxu0  ;;  %v6029_v44 = vpop.f32.mrf.mxu1 }
 0x2c5   :  { %8856 = vst [vmem:[#allocation5_spill] sm:$0xff] %v8617_v62  ;;  %v6095_v40 = vadd.f32 %v6094_v38, %v6093_v4  ;;  %v4465_v52 = vadd.f32 %v5948_v13, %v8572_v51 }
 0x2c6   :  { %v8620_v57 = vpop.f32.mrf.mxu0  ;;  %v6030_v9 = vpop.f32.mrf.mxu1 }
 0x2c7   :  { %v6031_v6 = vadd.f32 %v6030_v9, %v6029_v44  ;;  %v8622_v43 = vadd.f32 %v6012_v22, %v4465_v52 }
 0x2c8   :  { %v8624_v1 = vpop.f32.mrf.mxu0  ;;  %v8626_v60 = vpop.f32.mrf.mxu1 }
 0x2c9   :  { %8857 = vst [vmem:[#allocation6_spill] sm:$0xff] %v8622_v43  ;;  %v4600_v25 = vadd.f32 %v6031_v6, %v8575_v10 }
 0x2ca   :  { %v8629_v37 = vpop.f32.mrf.mxu0  ;;  %v8631_v14 = vpop.f32.mrf.mxu1 }
 0x2cb   :  { %v8633_v29 = vadd.f32 %v6095_v40, %v4600_v25 }
 0x2cc   :  { %v8635_v33 = vpop.f32.mrf.mxu0 }
 0x2ce   :  { %v8637_v51 = vpop.f32.mrf.mxu0 }
 0x2cf   :  { %v6035_v23 = vpop.f32.mrf.mxu1 }
 0x2d0   :  { %v8639_v42 = vpop.f32.mrf.mxu0 }
 0x2d1   :  { %v6036_v18 = vpop.f32.mrf.mxu1 }
 0x2d2   :  { %v8641_v36 = vpop.f32.mrf.mxu0 }
 0x2d3   :  { %v6038_v58 = vpop.f32.mrf.mxu1 }
 0x2d4   :  { %v8643_v7 = vpop.f32.mrf.mxu0 }
 0x2d5   :  { %v6039_v10 = vpop.f32.mrf.mxu1 }
 0x2d6   :  { %v8645_v56 = vpop.f32.mrf.mxu0 }
 0x2d8   :  { %v8647_v41 = vpop.f32.mrf.mxu0 }
 0x2d9   :  { %v6041_v12 = vpop.f32.mrf.mxu1 }
 0x2db   :  { %v6042_v17 = vpop.f32.mrf.mxu1  ;;  %v8649_v20 = vpop.f32.mrf.mxu0 }
 0x2dd   :  { %v8651_v46 = vpop.f32.mrf.mxu1  ;;  %v8653_v27 = vpop.f32.mrf.mxu0 }
 0x2df   :  { %v8655_v39 = vpop.f32.mrf.mxu1  ;;  %v8657_v63 = vpop.f32.mrf.mxu0 }
 0x2e1   :  { %v8659_v61 = vpop.f32.mrf.mxu0 }
 0x2e3   :  { %v6047_v30 = vpop.f32.mrf.mxu1 }
 0x2e5   :  { %v6048_v16 = vpop.f32.mrf.mxu1  ;;  %v6117_v35 = vpop.f32.mrf.mxu0 }
 0x2e7   :  { %v6050_v28 = vpop.f32.mrf.mxu1  ;;  %v6118_v45 = vpop.f32.mrf.mxu0 }
 0x2e8   :  { %v6119_v8 = vadd.f32 %v6118_v45, %v6117_v35 }
 0x2e9   :  { %v6051_v54 = vpop.f32.mrf.mxu1  ;;  %v8661_v2 = vpop.f32.mrf.mxu0 }
 0x2eb   :  { %v8663_v48 = vpop.f32.mrf.mxu0 }
 0x2ec   :  { %8858 = vst [vmem:[#allocation7_spill] sm:$0xff] %v8663_v48  ;;  %v6053_v22 = vpop.f32.mrf.mxu1 }
 0x2ee   :  { %v6054_v47 = vpop.f32.mrf.mxu1 }
 0x2ef   :  { %v6055_v0 = vadd.f32 %v6054_v47, %v6053_v22  ;;  %v8665_v34 = vpop.f32.mrf.mxu0 }
 0x2f0   :  { %v8667_v49 = vpop.f32.mrf.mxu1 }
 0x2f1   :  { %v4632_v4 = vadd.f32 %v6055_v0, %v8599_v24  ;;  %v8670_v5 = vpop.f32.mrf.mxu0 }
 0x2f2   :  { %v8672_v13 = vpop.f32.mrf.mxu1 }
 0x2f3   :  { %v8674_v38 = vpop.f32.mrf.mxu0  ;;  %v8676_v44 = vadd.f32 %v6119_v8, %v4632_v4 }
 0x2f5   :  { %8859 = vst [vmem:[#allocation8_spill] sm:$0xff] %v8676_v44  ;;  %v8678_v40 = vpop.f32.mrf.mxu1  ;;  %v8680_v52 = vpop.f32.mrf.mxu0 }
 0x2f7   :  { %v8682_v9 = vpop.f32.mrf.mxu1 }
 0x2f8   :  { %v8684_v6 = vpop.f32.mrf.mxu0 }
 0x2f9   :  { %8860 = vst [vmem:[#allocation9_spill] sm:$0xff] %v8684_v6  ;;  %v8686_v25 = vpop.f32.mrf.mxu1 }
 0x2fa   :  { %v8688_v35 = vpop.f32.mrf.mxu0 }
 0x2fb   :  { %8861 = vst [vmem:[#allocation10_spill] sm:$0xff] %v8688_v35  ;;  %v8690_v24 = vpop.f32.mrf.mxu1  ;;  %v6037_v35 = vadd.f32 %v6036_v18, %v6035_v23  ;;  %v8728_v18 = vld [vmem:[%s8834_s7] ss:$0 sm:$0xff] }
 0x2fc   :  { %v8692_v45 = vpop.f32.mrf.mxu0 }
 0x2fd   :  { %8862 = vst [vmem:[#allocation11_spill] sm:$0xff] %v8692_v45  ;;  %v4608_v62 = vadd.f32 %v6037_v35, %v8581_v32 }
 0x2fe   :  { %v8694_v22 = vpop.f32.mrf.mxu0 }
 0x2ff   :  { %8863 = vst [vmem:[#allocation12_spill] sm:$0xff] %v8694_v22  ;;  %v8696_v8 = vpop.f32.mrf.mxu1 }
 0x300   :  { %8864 = vst [vmem:[#allocation13_spill] sm:$0xff] %v8696_v8  ;;  %v6052_v8 = vadd.f32 %v6051_v54, %v6050_v28 }
 0x301   :  { %v8698_v47 = vpop.f32.mrf.mxu1  ;;  %v8700_v0 = vpop.f32.mrf.mxu0 }
 0x302   :  { %8865 = vst [vmem:[#allocation14_spill] sm:$0xff] %v8698_v47  ;;  %8866 = vst [vmem:[#allocation15_spill] sm:$0xff] %v8700_v0  ;;  %v6040_v47 = vadd.f32 %v6039_v10, %v6038_v58  ;;  %v6034_v0 = vadd.f32 %v8631_v14, %v8626_v60  ;;  %v6049_v58 = vadd.f32 %v6048_v16, %v6047_v30 }
 0x303   :  { %v8702_v4 = vpop.f32.mrf.mxu1  ;;  %v8704_v26 = vpop.f32.mrf.mxu0  ;;  %v6043_v14 = vadd.f32 %v6042_v17, %v6041_v12  ;;  %v4627_v54 = vadd.f32 %v6052_v8, %v8596_v59  ;;  %v6110_v59 = vadd.f32 %v8647_v41, %v8645_v56 }
 0x304   :  { %8867 = vst [vmem:[#allocation16_spill] sm:$0xff] %v8702_v4  ;;  %8868 = vst [vmem:[#allocation17_spill] sm:$0xff] %v8704_v26  ;;  %v4611_v32 = vadd.f32 %v6040_v47, %v8584_v11  ;;  %v4603_v60 = vadd.f32 %v6034_v0, %v8578_v55 }
 0x305   :  { %v8706_v6 = vpop.f32.mrf.mxu1  ;;  %v8708_v43 = vpop.f32.mrf.mxu0 }
 0x306   :  { %8869 = vst [vmem:[#allocation18_spill] sm:$0xff] %v8706_v6  ;;  %8870 = vst [vmem:[#allocation19_spill] sm:$0xff] %v8708_v43  ;;  %v6101_v43 = vadd.f32 %v8635_v33, %v8629_v37  ;;  %v6104_v37 = vadd.f32 %v8639_v42, %v8637_v51  ;;  %v4616_v51 = vadd.f32 %v6043_v14, %v8587_v3 }
 0x307   :  { %v8710_v21 = vpop.f32.mrf.mxu1  ;;  %v8712_v45 = vpop.f32.mrf.mxu0  ;;  %v6046_v42 = vadd.f32 %v8655_v39, %v8651_v46 }
 0x308   :  { %8871 = vst [vmem:[#allocation20_spill] sm:$0xff] %v8712_v45  ;;  %v4705_v10 = vadd.f32 %v6101_v43, %v4608_v62  ;;  %v4624_v62 = vadd.f32 %v6049_v58, %v8593_v53  ;;  %v4708_v43 = vadd.f32 %v6104_v37, %v4611_v32 }
 0x309   :  { %v8714_v22 = vpop.f32.mrf.mxu1  ;;  %v6235_v44 = vpop.f32.mrf.mxu0  ;;  %v4619_v47 = vadd.f32 %v6046_v42, %v8590_v31 }
 0x30b   :  { %v8719_v4 = vpop.f32.mrf.mxu1  ;;  %v5010_v26 = vpop.f32.mrf.mxu0  ;;  %v4716_v37 = vadd.f32 %v6110_v59, %v4619_v47 }
 0x30c   :  { %8872 = vst [vmem:[#allocation21_spill] sm:$0xff] %v8719_v4  ;;  %v6098_v4 = vadd.f32 %v8624_v1, %v8620_v57  ;;  %v5011_v11 = vadd.f32 %v8728_v18, %v5010_v26  ;;  %v6113_v1 = vadd.f32 %v8653_v27, %v8649_v20  ;;  %v6116_v20 = vadd.f32 %v8659_v61, %v8657_v63 }
 0x30d   :  { %v8723_v23 = vpop.f32.mrf.mxu1  ;;  %v6236_v45 = vpop.f32.mrf.mxu0  ;;  %v8880_v59 = vld [vmem:[#allocation18_spill] sm:$0xff] }
 0x30e   :  { %8873 = vst [vmem:[#allocation22_spill] sm:$0xff] %v8723_v23  ;;  %v5019_v23 = vadd.f32 %v6235_v44, %v8728_v18  ;;  %v5022_v12 = vadd.f32 %v6236_v45, %v8728_v18  ;;  %v4700_v16 = vadd.f32 %v6098_v4, %v4603_v60  ;;  %v4721_v39 = vadd.f32 %v6113_v1, %v4624_v62 }
 0x30f   :  { %v6211_v35 = vpop.f32.mrf.mxu1  ;;  %v5013_v6 = vpop.f32.mrf.mxu0 }
 0x310   :  { %v4802_v33 = vadd.f32 %v6211_v35, %v4705_v10  ;;  %v5014_v53 = vadd.f32 %v8728_v18, %v5013_v6  ;;  %v4724_v10 = vadd.f32 %v6116_v20, %v4627_v54  ;;  %v6125_v20 = vadd.f32 %v8670_v5, %v8665_v34 }
 0x311   :  { %v4793_v48 = vpop.f32.mrf.mxu1  ;;  %v6239_v30 = vpop.f32.mrf.mxu0 }
 0x312   :  { %v4794_v55 = vadd.f32 %v4793_v48, %v8633_v29  ;;  %v5075_v26 = vadd.f32 %v5019_v23, %v4802_v33  ;;  %v6107_v29 = vadd.f32 %v8643_v7, %v8641_v36  ;;  %v5035_v0 = vadd.f32 %v6239_v30, %v8728_v18 }
 0x313   :  { %v6212_v17 = vpop.f32.mrf.mxu1  ;;  %v5026_v57 = vpop.f32.mrf.mxu0  ;;  %v8877_v5 = vld [vmem:[#allocation21_spill] sm:$0xff] }
 0x314   :  { %v4805_v28 = vadd.f32 %v6212_v17, %v4708_v43  ;;  %v5073_v48 = vadd.f32 %v5011_v11, %v4794_v55  ;;  %v4713_v6 = vadd.f32 %v6107_v29, %v4616_v51  ;;  %v5091_v4 = vmax.f32 %v5075_v26, 0.0 }
 0x315   :  { %v4796_v3 = vpop.f32.mrf.mxu1  ;;  %v6240_v44 = vpop.f32.mrf.mxu0  ;;  %v5027_v58 = vadd.f32 %v8728_v18, %v5026_v57 }
 0x316   :  { %v5076_v45 = vadd.f32 %v5022_v12, %v4805_v28  ;;  %v4797_v46 = vadd.f32 %v4796_v3, %v4700_v16  ;;  %v5089_v8 = vmax.f32 %v5073_v48, 0.0  ;;  %v5038_v61 = vadd.f32 %v6240_v44, %v8728_v18 }
 0x317   :  { %v6215_v27 = vpop.f32.mrf.mxu1  ;;  %v5029_v31 = vpop.f32.mrf.mxu0  ;;  %v6061_v48 = vadd.f32 %v8682_v9, %v8678_v40  ;;  %v6064_v44 = vadd.f32 %v8690_v24, %v8686_v25  ;;  %v6073_v40 = vadd.f32 %v8714_v22, %v8710_v21  ;;  %v6128_v25 = vadd.f32 %v8680_v52, %v8674_v38  ;;  %v8879_v22 = vld [vmem:[#allocation16_spill] sm:$0xff]  ;;  %v8881_v52 = vld [vmem:[#allocation5_spill] sm:$0xff] }
 0x318   :  { %v5092_v23 = vmax.f32 %v5076_v45, 0.0  ;;  %v5074_v36 = vadd.f32 %v5014_v53, %v4797_v46  ;;  %v4818_v7 = vadd.f32 %v6215_v27, %v4721_v39  ;;  %v5030_v41 = vadd.f32 %v8728_v18, %v5029_v31 }
 0x319   :  { %v4809_v32 = vpop.f32.mrf.mxu1  ;;  %v6058_v45 = vadd.f32 %v8672_v13, %v8667_v49  ;;  %v4640_v39 = vadd.f32 %v6061_v48, %v8605_v19  ;;  %v4643_v27 = vadd.f32 %v6064_v44, %v8608_v50  ;;  %v8874_v19 = vld [vmem:[#allocation7_spill] sm:$0xff]  ;;  %v8878_v50 = vld [vmem:[#allocation22_spill] sm:$0xff]  ;;  %v6070_v38 = vadd.f32 %v8880_v59, %v8879_v22 }
 0x31a   :  { %v5706_v60 = vpack.c.bf16 %v5092_v23, %v5091_v4  ;;  %v5090_v14 = vmax.f32 %v5074_v36, 0.0  ;;  %v4810_v63 = vadd.f32 %v4809_v32, %v4713_v6  ;;  %v5079_v11 = vadd.f32 %v5035_v0, %v4818_v7  ;;  %v8875_v6 = vld [vmem:[#allocation13_spill] sm:$0xff]  ;;  %v8876_v4 = vld [vmem:[#allocation14_spill] sm:$0xff] }
 0x31b   :  { %v6216_v35 = vpop.f32.mrf.mxu1  ;;  %v4635_v0 = vadd.f32 %v6058_v45, %v8602_v15  ;;  %v4737_v24 = vadd.f32 %v6125_v20, %v4640_v39  ;;  %v6122_v13 = vadd.f32 %v8874_v19, %v8661_v2  ;;  %v6067_v34 = vadd.f32 %v8876_v4, %v8875_v6  ;;  %v8893_v20 = vld [vmem:[#allocation12_spill] sm:$0xff] }
 0x31c   :  { %5738 = vst [vmem:[%s8835_s8 + $0x8] sm:$0xff] %v5706_v60   ;;  %v5701_v33 = vpack.c.bf16 %v5090_v14, %v5089_v8  ;;  %v4821_v56 = vadd.f32 %v6216_v35, %v4724_v10  ;;  %v5077_v62 = vadd.f32 %v5027_v58, %v4810_v63  ;;  %v5095_v51 = vmax.f32 %v5079_v11, 0.0  ;;  %v8882_v10 = vld [vmem:[#allocation8_spill] sm:$0xff]  ;;  %v8883_v63 = vld [vmem:[#allocation3_spill] sm:$0xff]  ;;  %v8886_v11 = vld [vmem:[#allocation6_spill] sm:$0xff] }
 0x31d   :  { %v4812_v30 = vpop.f32.mrf.mxu1  ;;  %v6076_v23 = vadd.f32 %v8878_v50, %v8877_v5  ;;  %v4740_v7 = vadd.f32 %v6128_v25, %v4643_v27  ;;  %v4656_v8 = vadd.f32 %v6073_v40, %v8881_v52  ;;  %v4732_v32 = vadd.f32 %v6122_v13, %v4635_v0  ;;  %v8884_v35 = vld [vmem:[#allocation15_spill] sm:$0xff] }
 0x31e   :  { %5702 = vst [vmem:[%s8835_s8] sm:$0xff] %v5701_v33   ;;  %v5080_v55 = vadd.f32 %v5038_v61, %v4821_v56  ;;  %v4813_v43 = vadd.f32 %v4812_v30, %v4716_v37  ;;  %v5093_v57 = vmax.f32 %v5077_v62, 0.0  ;;  %v4648_v61 = vadd.f32 %v6067_v34, %v8883_v63  ;;  %v8885_v37 = vld [vmem:[#allocation17_spill] sm:$0xff] }
 0x31f   :  { %v6219_v12 = vpop.f32.mrf.mxu1  ;;  %v6137_v33 = vadd.f32 %v8885_v37, %v8884_v35  ;;  %v4659_v56 = vadd.f32 %v6076_v23, %v8886_v11 }
 0x320   :  { %v5096_v42 = vmax.f32 %v5080_v55, 0.0  ;;  %v5078_v17 = vadd.f32 %v5030_v41, %v4813_v43  ;;  %v4834_v36 = vadd.f32 %v6219_v12, %v4737_v24  ;;  %v8887_v12 = vld [vmem:[#allocation9_spill] sm:$0xff] }
 0x321   :  { %v4825_v16 = vpop.f32.mrf.mxu1 }
 0x322   :  { %v5716_v1 = vpack.c.bf16 %v5096_v42, %v5095_v51  ;;  %v5094_v26 = vmax.f32 %v5078_v17, 0.0  ;;  %v4826_v2 = vadd.f32 %v4825_v16, %v8882_v10  ;;  %v8888_v51 = vld [vmem:[#allocation10_spill] sm:$0xff]  ;;  %v8889_v17 = vld [vmem:[#allocation4_spill] sm:$0xff] }
 0x323   :  { %v6220_v28 = vpop.f32.mrf.mxu1  ;;  %v6131_v42 = vadd.f32 %v8888_v51, %v8887_v12  ;;  %v4651_v16 = vadd.f32 %v6070_v38, %v8889_v17 }
 0x324   :  { %5740 = vst [vmem:[%s8835_s8 + $0x18] sm:$0xff] %v5716_v1   ;;  %v5711_v53 = vpack.c.bf16 %v5094_v26, %v5093_v57  ;;  %v4837_v31 = vadd.f32 %v6220_v28, %v4740_v7  ;;  %v8890_v57 = vld [vmem:[#allocation19_spill] sm:$0xff]  ;;  %v8891_v1 = vld [vmem:[#allocation20_spill] sm:$0xff]  ;;  %v4753_v28 = vadd.f32 %v6137_v33, %v4656_v8 }
 0x325   :  { %v4828_v29 = vpop.f32.mrf.mxu1  ;;  %v6140_v26 = vadd.f32 %v8891_v1, %v8890_v57  ;;  %v4745_v40 = vadd.f32 %v6131_v42, %v4648_v61 }
 0x326   :  { %5739 = vst [vmem:[%s8835_s8 + $0x10] sm:$0xff] %v5711_v53   ;;  %v4829_v30 = vadd.f32 %v4828_v29, %v4732_v32  ;;  %v8892_v29 = vld [vmem:[#allocation11_spill] sm:$0xff] }
 0x327   :  { %v6223_v54 = vpop.f32.mrf.mxu1  ;;  %v6134_v27 = vadd.f32 %v8893_v20, %v8892_v29 }
 0x328   :  { %v4850_v0 = vadd.f32 %v6223_v54, %v4753_v28 }
 0x329   :  { %v4841_v3 = vpop.f32.mrf.mxu1  ;;  %v4748_v4 = vadd.f32 %v6134_v27, %v4651_v16 }
 0x32a   :  { %v4842_v6 = vadd.f32 %v4841_v3, %v4745_v40 }
 0x32b   :  { %v6224_v46 = vpop.f32.mrf.mxu1 }
 0x32d   :  { %v4844_v47 = vpop.f32.mrf.mxu1 }
 0x32f   :  { %v6243_v9 = vpop.f32.mrf.mxu1 }
 0x330   :  { %v5051_v49 = vadd.f32 %v6243_v9, %v8728_v18  ;;  %v4756_v9 = vadd.f32 %v6140_v26, %v4659_v56 }
 0x331   :  { %v5042_v15 = vpop.f32.mrf.mxu1 }
 0x332   :  { %v5043_v21 = vadd.f32 %v8728_v18, %v5042_v15  ;;  %v5083_v60 = vadd.f32 %v5051_v49, %v4834_v36  ;;  %v4853_v5 = vadd.f32 %v6224_v46, %v4756_v9  ;;  %v4845_v36 = vadd.f32 %v4844_v47, %v4748_v4 }
 0x333   :  { %v6244_v58 = vpop.f32.mrf.mxu1 }
 0x334   :  { %v5054_v14 = vadd.f32 %v6244_v58, %v8728_v18  ;;  %v5081_v62 = vadd.f32 %v5043_v21, %v4826_v2  ;;  %v5099_v48 = vmax.f32 %v5083_v60, 0.0 }
 0x335   :  { %v5045_v41 = vpop.f32.mrf.mxu1 }
 0x336   :  { %v5084_v55 = vadd.f32 %v5054_v14, %v4837_v31  ;;  %v5046_v43 = vadd.f32 %v8728_v18, %v5045_v41  ;;  %v5097_v24 = vmax.f32 %v5081_v62, 0.0 }
 0x337   :  { %v6247_v53 = vpop.f32.mrf.mxu1 }
 0x338   :  { %v5100_v44 = vmax.f32 %v5084_v55, 0.0  ;;  %v5082_v45 = vadd.f32 %v5046_v43, %v4829_v30  ;;  %v5067_v39 = vadd.f32 %v6247_v53, %v8728_v18 }
 0x339   :  { %v5058_v25 = vpop.f32.mrf.mxu1 }
 0x33a   :  { %v5726_v49 = vpack.c.bf16 %v5100_v44, %v5099_v48  ;;  %v5098_v19 = vmax.f32 %v5082_v45, 0.0  ;;  %v5059_v13 = vadd.f32 %v8728_v18, %v5058_v25  ;;  %v5087_v23 = vadd.f32 %v5067_v39, %v4850_v0 }
 0x33b   :  { %v6248_v34 = vpop.f32.mrf.mxu1 }
 0x33c   :  { %5742 = vst [vmem:[%s8835_s8 + $0x28] sm:$0xff] %v5726_v49   ;;  %v5721_v50 = vpack.c.bf16 %v5098_v19, %v5097_v24  ;;  %v5070_v54 = vadd.f32 %v6248_v34, %v8728_v18  ;;  %v5085_v7 = vadd.f32 %v5059_v13, %v4842_v6  ;;  %v5103_v22 = vmax.f32 %v5087_v23, 0.0 }
 0x33d   :  { %v5061_v15 = vpop.f32.mrf.mxu1 }
 0x33e   :  { %5741 = vst [vmem:[%s8835_s8 + $0x20] sm:$0xff] %v5721_v50   ;;  %v5088_v21 = vadd.f32 %v5070_v54, %v4853_v5  ;;  %v5062_v3 = vadd.f32 %v8728_v18, %v5061_v15  ;;  %v5101_v38 = vmax.f32 %v5085_v7, 0.0 }
 0x340   :  { %v5104_v46 = vmax.f32 %v5088_v21, 0.0  ;;  %v5086_v59 = vadd.f32 %v5062_v3, %v4845_v36 }
 0x342   :  { %v5736_v52 = vpack.c.bf16 %v5104_v46, %v5103_v22  ;;  %v5102_v8 = vmax.f32 %v5086_v59, 0.0 }
 0x344   :  { %5744 = vst [vmem:[%s8835_s8 + $0x38] sm:$0xff] %v5736_v52   ;;  %v5731_v32 = vpack.c.bf16 %v5102_v8, %v5101_v38 }
 0x346   :  { %5743 = vst [vmem:[%s8835_s8 + $0x30] sm:$0xff] %v5731_v32  }

// kernel: forward.3
= control target key start
LH: loop header
LB: loop body
LE: loop exit
PB: predicated region body
PF: predicated region fallthrough
CT: control target
= control target key end

     0   :  { %vm336_vm0 = vcmask 1042432   ;;  %vm337_vm1 = vcmask 1046532   ;;  %vm61_vm2 = vsmask.f32 3328  ;;  %vm62_vm3 = vsmask.f32 7440  ;;  %s9661_s0 = inlined_call_operand.vmem [shape: bf16[2,1,10,10,128], index: 0, kind: input, shape index: {}]   ;;  %s9662_s1 = inlined_call_operand.vmem [shape: bf16[1152,128], index: 1, kind: input, shape index: {}]   ;;  %s9663_s2 = inlined_call_operand.vmem [shape: f32[1,128], index: 2, kind: input, shape index: {}]   ;;  %s9664_s3 = inlined_call_operand.vmem [shape: bf16[1152,128], index: 3, kind: input, shape index: {}]   ;;  %s9665_s4 = inlined_call_operand.vmem [shape: f32[1,128], index: 4, kind: input, shape index: {}]   ;;  %s9666_s5 = inlined_call_operand.vmem [shape: bf16[2,64,128], index: 5, kind: input, shape index: {}]   ;;  %s9667_s6 = inlined_call_operand.hbm [shape: f32[2,64,128], index: 6, kind: output, shape index: {}]  }
   0x1   :  { %v6691_v0 = vld [vmem:[%s9662_s1 + $0x78] sm:$0xff]   ;;  %v6695_v4 = vld [vmem:[%s9662_s1 + $0x70] sm:$0xff]   ;;  %v6699_v8 = vld [vmem:[%s9662_s1 + $0x68] sm:$0xff]   ;;  %v9677_v54 = vmov 0 }
   0x2   :  { %v6692_v1 = vld [vmem:[%s9662_s1 + $0x38] sm:$0xff]   ;;  %6079 = vmatprep.subr.bf16.mxu0 %v6691_v0  ;;  %v6696_v5 = vld [vmem:[%s9662_s1 + $0x30] sm:$0xff]   ;;  %v6700_v9 = vld [vmem:[%s9662_s1 + $0x28] sm:$0xff]  }
   0x3   :  { %v6693_v2 = vld [vmem:[%s9662_s1 + $0xf8] sm:$0xff]   ;;  %6080 = vmatpush3.bf16.msra.mxu0 %v6692_v1  ;;  %v6697_v6 = vld [vmem:[%s9662_s1 + $0xf0] sm:$0xff]   ;;  %v6701_v10 = vld [vmem:[%s9662_s1 + $0xe8] sm:$0xff]  }
   0x4   :  { %v6694_v3 = vld [vmem:[%s9662_s1 + $0xb8] sm:$0xff]   ;;  %6143 = vmatprep.subr.bf16.mxu1 %v6693_v2  ;;  %6081 = vmatprep.subr.bf16.mxu0 %v6695_v4  ;;  %v6698_v7 = vld [vmem:[%s9662_s1 + $0xb0] sm:$0xff]   ;;  %v6702_v11 = vld [vmem:[%s9662_s1 + $0xa8] sm:$0xff]  }
   0x5   :  { %6144 = vmatpush3.bf16.msra.mxu1 %v6694_v3  ;;  %v6703_v12 = vld [vmem:[%s9662_s1 + $0x60] sm:$0xff]   ;;  %v6707_v16 = vld [vmem:[%s9662_s1 + $0x58] sm:$0xff]   ;;  %v6711_v20 = vld [vmem:[%s9662_s1 + $0x50] sm:$0xff]  }
   0x6   :  { %6145 = vmatprep.subr.bf16.mxu1 %v6697_v6  ;;  %v6704_v13 = vld [vmem:[%s9662_s1 + $0x20] sm:$0xff]   ;;  %v6708_v17 = vld [vmem:[%s9662_s1 + $0x18] sm:$0xff]   ;;  %v6712_v21 = vld [vmem:[%s9662_s1 + $0x10] sm:$0xff]  }
   0x7   :  { %6082 = vmatpush3.bf16.msra.mxu0 %v6696_v5  ;;  %v6705_v14 = vld [vmem:[%s9662_s1 + $0xe0] sm:$0xff]   ;;  %v6709_v18 = vld [vmem:[%s9662_s1 + $0xd8] sm:$0xff]   ;;  %v6713_v22 = vld [vmem:[%s9662_s1 + $0xd0] sm:$0xff]   ;;  %v9680_v5 = vmov 0 }
   0x8   :  { %6083 = vmatprep.subr.bf16.mxu0 %v6699_v8  ;;  %v6706_v15 = vld [vmem:[%s9662_s1 + $0xa0] sm:$0xff]   ;;  %v6710_v19 = vld [vmem:[%s9662_s1 + $0x98] sm:$0xff]   ;;  %v6714_v23 = vld [vmem:[%s9662_s1 + $0x90] sm:$0xff]  }
   0x9   :  { %6146 = vmatpush3.bf16.msra.mxu1 %v6698_v7  ;;  %v6715_v24 = vld [vmem:[%s9662_s1 + $0x48] sm:$0xff]   ;;  %v6719_v28 = vld [vmem:[%s9662_s1 + $0x40] sm:$0xff]   ;;  %v6724_v48 = vld [vmem:[%s9662_s1 + $0x178] sm:$0xff]  }
   0xa   :  { %6147 = vmatprep.subr.bf16.mxu1 %v6701_v10  ;;  %v6716_v25 = vld [vmem:[%s9662_s1 + $0x8] sm:$0xff]   ;;  %v6720_v29 = vld [vmem:[%s9662_s1] sm:$0xff]   ;;  %v5541_v53 = vld [vmem:[%s9661_s0 + $0x10] sm:$0xf] }
   0xb   :  { %6084 = vmatpush3.bf16.msra.mxu0 %v6700_v9  ;;  %v6717_v26 = vld [vmem:[%s9662_s1 + $0xc8] sm:$0xff]   ;;  %v6721_v30 = vld [vmem:[%s9662_s1 + $0xc0] sm:$0xff]   ;;  %vm7072_vm4 = vmor %vm61_vm2, %vm62_vm3  ;;  %v451_v58 = vshrl.u32 %v5541_v53, 16  ;;  %v454_v61 = vshll.u32 %v5541_v53, 16 }
   0xc   :  { %6085 = vmatprep.subr.bf16.mxu0 %v6703_v12  ;;  %v6718_v27 = vld [vmem:[%s9662_s1 + $0x88] sm:$0xff]   ;;  %v7041_v31 = vld [vmem:[%s9661_s0] sm:$0xf]  ;;  %v45_v33 = vld [vmem:[%s9661_s0 + $0x4] sm:$0x1]  ;;  %v9678_v54 = vsel %vm7072_vm4, 4294967295, %v9677_v54 }
   0xd   :  { %6148 = vmatpush3.bf16.msra.mxu1 %v6702_v11  ;;  %v7046_v32 = vld [vmem:[%s9661_s0 + $0x8] sm:$0xf]  ;;  %v46_v34 = vld [vmem:[%s9661_s0 + $0xc] sm:$0x1]  ;;  %v65_v35 = vshrl.u32 %v7041_v31, 16  ;;  %v68_v36 = vshll.u32 %v7041_v31, 16  ;;  %vm7086_vm5 = vmor %vm336_vm0, %vm337_vm1 }
   0xe   :  { %6149 = vmatprep.subr.bf16.mxu1 %v6705_v14  ;;  %v74_v37 = vshll.u32 %v45_v33, 16  ;;  %v79_v38 = vshrl.u32 %v7046_v32, 16  ;;  %v82_v39 = vshll.u32 %v7046_v32, 16  ;;  %v88_v40 = vshll.u32 %v46_v34, 16  ;;  %v6722_v47 = vld [vmem:[%s9662_s1 + $0x80] sm:$0xff]   ;;  %9679 = vst [vmem:[#allocation6_spill] sm:$0xff] %v9678_v54 }
   0xf   :  { %6086 = vmatpush3.bf16.msra.mxu0 %v6704_v13  ;;  %v341_v41 = vrot.slane %v45_v33, 5  ;;  %v345_v42 = vrot.slane %v46_v34, 5  ;;  %v67_v43 = vrot.slane %v65_v35, 4  ;;  %v70_v44 = vrot.slane %v68_v36, 5  ;;  %v5540_v52 = vld [vmem:[%s9661_s0 + $0x8] sm:$0xf] }
  0x10   :  { %6087 = vmatprep.subr.bf16.mxu0 %v6707_v16  ;;  %v76_v45 = vrot.slane %v74_v37, 5  ;;  %v81_v46 = vrot.slane %v79_v38, 4  ;;  %v84_v49 = vrot.slane %v82_v39, 5  ;;  %v90_v50 = vrot.slane %v88_v40, 5  ;;  %v288_v63 = vld [vmem:[%s9661_s0] sm:$0xe] }
  0x11   :  { %6150 = vmatpush3.bf16.msra.mxu1 %v6706_v15  ;;  %v71_v51 = vor.u32 %v70_v44, %v67_v43  ;;  %v437_v56 = vshrl.u32 %v5540_v52, 16  ;;  %v440_v57 = vshll.u32 %v5540_v52, 16  ;;  %v5668_v60 = vcombine.low %v7041_v31, %v7046_v32  ;;  %v289_v0 = vld [vmem:[%s9661_s0 + $0x8] sm:$0xe]  ;;  %v7093_v6 = vld [vmem:[%s9661_s0 + $0x10] sm:$0xf] }
  0x12   :  { %6151 = vmatprep.subr.bf16.mxu1 %v6709_v18  ;;  %v85_v55 = vor.u32 %v84_v49, %v81_v46  ;;  %v5692_v62 = vcombine.low %v5540_v52, %v5541_v53  ;;  %v453_v4 = vrot.slane %v451_v58, 4  ;;  %v9681_v5 = vsel %vm7086_vm5, 4294967295, %v9680_v5  ;;  %v6726_v9 = vld [vmem:[%s9662_s1 + $0x138] sm:$0xff]   ;;  %v47_v15 = vld [vmem:[%s9661_s0 + $0x14] sm:$0x1] }
  0x13   :  { %6088 = vmatpush3.bf16.msra.mxu0 %v6708_v17  ;;  %v72_v59 = vrot.slane %v71_v51, 4  ;;  %v439_v2 = vrot.slane %v437_v56, 4  ;;  %v442_v3 = vrot.slane %v440_v57, 5  ;;  %9682 = vst [vmem:[#allocation7_spill] sm:$0xff] %v9681_v5  ;;  %v456_v8 = vrot.slane %v454_v61, 5  ;;  %v6730_v34 = vld [vmem:[%s9662_s1 + $0x130] sm:$0xff]  }
  0x14   :  { %6089 = vmatprep.subr.bf16.mxu0 %v6711_v20  ;;  %v86_v1 = vrot.slane %v85_v55, 4  ;;  %2189 = vmatprep.mubr.bf16.mxu1 %v5692_v62  ;;  %v5524_v10 = vrot.slane %v288_v63, 9  ;;  %v5525_v11 = vrot.slane %v289_v0, 9  ;;  %v7103_v12 = vld [vmem:[%s9661_s0 + $0x18] sm:$0xf]  ;;  %v93_v17 = vshrl.u32 %v7093_v6, 16 }
  0x15   :  { %6152 = vmatpush3.bf16.msra.mxu1 %v6710_v19  ;;  %v77_v7 = vsel %vm7072_vm4, %v72_v59, %v76_v45  ;;  %v443_v14 = vor.u32 %v442_v3, %v439_v2  ;;  %v7113_v16 = vld [vmem:[%s9661_s0 + $0x1c] sm:$0x1]  ;;  %v96_v18 = vshll.u32 %v7093_v6, 16  ;;  %v457_v20 = vor.u32 %v456_v8, %v453_v4  ;;  %v290_v39 = vld [vmem:[%s9661_s0 + $0x10] sm:$0xe]  ;;  %v6732_v62 = vld [vmem:[%s9662_s1 + $0x168] sm:$0xff]  }
  0x16   :  { %6153 = vmatprep.subr.bf16.mxu1 %v6713_v22  ;;  %v91_v13 = vsel %vm7072_vm4, %v86_v1, %v90_v50  ;;  %v346_v22 = vsel %vm7086_vm5, %v5525_v11, %v345_v42  ;;  %v102_v31 = vshll.u32 %v47_v15, 16  ;;  %v107_v32 = vshrl.u32 %v7103_v12, 16  ;;  %v291_v44 = vld [vmem:[%s9661_s0 + $0x18] sm:$0xe]  ;;  %v7153_v49 = vld [vmem:[%s9661_s0 + $0x20] sm:$0xf] }
  0x17   :  { %6090 = vmatpush3.bf16.msra.mxu0 %v6712_v21  ;;  %v5676_v19 = vcombine.low %v77_v7, %v91_v13  ;;  %v342_v21 = vsel %vm7086_vm5, %v5524_v10, %v341_v41  ;;  %v110_v33 = vshll.u32 %v7103_v12, 16  ;;  %v116_v36 = vshll.u32 %v7113_v16, 16  ;;  %v7160_v55 = vld [vmem:[%s9661_s0 + $0x28] sm:$0xf]  ;;  %v7165_v56 = vld [vmem:[%s9661_s0 + $0x24] sm:$0x1] }
  0x18   :  { %6091 = vmatprep.subr.bf16.mxu0 %v6715_v24  ;;  %v7124_v24 = vrot.slane %v443_v14, 4  ;;  %v5669_v37 = vcombine.low %v7093_v6, %v7103_v12  ;;  %v104_v40 = vrot.slane %v102_v31, 5  ;;  %v109_v41 = vrot.slane %v107_v32, 4  ;;  %v7174_v61 = vld [vmem:[%s9661_s0 + $0x2c] sm:$0x1] }
  0x19   :  { %6154 = vmatpush3.bf16.msra.mxu1 %v6714_v23  ;;  %v5542_v23 = vld [vmem:[%s9661_s0 + $0x18] sm:$0xf]  ;;  %2092 = vmatprep.mubr.bf16.mxu0 %v5676_v19  ;;  %v112_v42 = vrot.slane %v110_v33, 5  ;;  %v118_v46 = vrot.slane %v116_v36, 5  ;;  %v5526_v59 = vrot.slane %v290_v39, 9  ;;  %v5527_v1 = vrot.slane %v291_v44, 9 }
  0x1a   :  { %6155 = vmatprep.subr.bf16.mxu1 %v6717_v26  ;;  %v95_v26 = vrot.slane %v93_v17, 4  ;;  %v465_v38 = vshrl.u32 %v5542_v23, 16  ;;  %v468_v43 = vshll.u32 %v5542_v23, 16  ;;  %v353_v2 = vrot.slane %v7113_v16, 5  ;;  %v6734_v8 = vld [vmem:[%s9662_s1 + $0x128] sm:$0xff]  }
  0x1b   :  { %6092 = vmatpush3.bf16.msra.mxu0 %v6716_v25  ;;  %v5684_v25 = vcombine.low %v342_v21, %v346_v22  ;;  %v113_v50 = vor.u32 %v112_v42, %v109_v41  ;;  %v121_v4 = vshrl.u32 %v7153_v49, 16  ;;  %v124_v6 = vshll.u32 %v7153_v49, 16  ;;  %v5544_v13 = vld [vmem:[%s9661_s0 + $0x28] sm:$0xf]  ;;  %v5545_v14 = vld [vmem:[%s9661_s0 + $0x30] sm:$0xf] }
  0x1c   :  { %6093 = vmatprep.subr.bf16.mxu0 %v6719_v28  ;;  %v6728_v28 = vld [vmem:[%s9662_s1 + $0x170] sm:$0xff]   ;;  %v7155_v51 = vrot.slane %v468_v43, 5  ;;  %v130_v7 = vshll.u32 %v7165_v56, 16  ;;  %v354_v10 = vsel %vm7086_vm5, %v5527_v1, %v353_v2  ;;  %v135_v11 = vshrl.u32 %v7160_v55, 16  ;;  %v7219_v36 = vld [vmem:[%s9661_s0 + $0x38] sm:$0xf] }
  0x1d   :  { %6156 = vmatpush3.bf16.msra.mxu1 %v6718_v27  ;;  %v98_v27 = vrot.slane %v96_v18, 5  ;;  %v114_v63 = vrot.slane %v113_v50, 4  ;;  %v138_v12 = vshll.u32 %v7160_v55, 16  ;;  %v123_v17 = vrot.slane %v121_v4, 4  ;;  %v7214_v31 = vld [vmem:[%s9661_s0 + $0x30] sm:$0xf] }
  0x1e   :  { %6157 = vmatprep.subr.bf16.mxu1 %v6721_v30  ;;  %v7132_v30 = vrot.slane %v457_v20, 4  ;;  %v126_v18 = vrot.slane %v124_v6, 5  ;;  %v132_v19 = vrot.slane %v130_v7, 5  ;;  %v137_v20 = vrot.slane %v135_v11, 4  ;;  %v6738_v43 = vld [vmem:[%s9662_s1 + $0x120] sm:$0xff]   ;;  %v6743_v7 = vld [vmem:[%s9662_s1 + $0x1f8] sm:$0xff]  }
  0x1f   :  { %6094 = vmatpush3.bf16.msra.mxu0 %v6720_v29  ;;  %v5543_v29 = vld [vmem:[%s9661_s0 + $0x20] sm:$0xf]  ;;  %v99_v35 = vor.u32 %v98_v27, %v95_v26  ;;  %v140_v21 = vrot.slane %v138_v12, 5  ;;  %v144_v22 = vshll.u32 %v7174_v61, 16  ;;  %v5670_v26 = vcombine.low %v7153_v49, %v7160_v55  ;;  %v7243_v49 = vld [vmem:[%s9661_s0 + $0x3c] sm:$0x1] }
  0x20   :  { %6207 = vmatprep.subr.bf16.mxu0 %v6724_v48  ;;  %v479_v48 = vshrl.u32 %v5543_v29, 16  ;;  %v482_v52 = vshll.u32 %v5543_v29, 16  ;;  %v5693_v53 = vcombine.low %v5542_v23, %v5543_v29  ;;  %v292_v23 = vld [vmem:[%s9661_s0 + $0x20] sm:$0xe]  ;;  %v493_v27 = vshrl.u32 %v5544_v13, 16  ;;  %v6744_v12 = vld [vmem:[%s9662_s1 + $0x1b8] sm:$0xff]  }
  0x21   :  { %6158 = vmatpush3.bf16.msra.mxu1 %v6722_v47  ;;  %v100_v45 = vrot.slane %v99_v35, 4  ;;  %v7148_v47 = vrot.slane %v465_v38, 4  ;;  %v293_v29 = vld [vmem:[%s9661_s0 + $0x28] sm:$0xe]  ;;  %v141_v32 = vor.u32 %v140_v21, %v137_v20  ;;  %v146_v33 = vrot.slane %v144_v22, 5  ;;  %v6736_v38 = vld [vmem:[%s9662_s1 + $0x160] sm:$0xff]  }
  0x22   :  { %2093 = vmatmul.mubr.bf16.vlgmr.msra.gmra.mxu0 %v5668_v60  ;;  %v7169_v58 = vrot.slane %v479_v48, 4  ;;  %v349_v60 = vrot.slane %v47_v15, 5  ;;  %v7179_v0 = vrot.slane %v482_v52, 5  ;;  %v510_v35 = vshll.u32 %v5545_v14, 16  ;;  %v5546_v4 = vld [vmem:[%s9661_s0 + $0x38] sm:$0xf]  ;;  %6271 = vmatprep.subr.bf16.mxu1 %v6743_v7 }
  0x23   :  { %6208 = vmatpush3.bf16.msra.mxu0 %v6726_v9  ;;  %v105_v57 = vsel %vm7072_vm4, %v100_v45, %v104_v40  ;;  %v119_v9 = vsel %vm7072_vm4, %v114_v63, %v118_v46  ;;  %v7224_v40 = vrot.slane %v493_v27, 4  ;;  %v5694_v42 = vcombine.low %v5544_v13, %v5545_v14  ;;  %v5547_v6 = vld [vmem:[%s9661_s0 + $0x40] sm:$0xf]  ;;  %v294_v21 = vld [vmem:[%s9661_s0 + $0x30] sm:$0xe] }
  0x24   :  { %2190 = vmatmul.mubr.bf16.vlgmr.msra.gmra.mxu1 %v5684_v25  ;;  %6209 = vmatprep.subr.bf16.mxu0 %v6728_v28  ;;  %v350_v3 = vsel %vm7086_vm5, %v5526_v59, %v349_v60  ;;  %v5677_v15 = vcombine.low %v105_v57, %v119_v9  ;;  %v127_v25 = vor.u32 %v126_v18, %v123_v17  ;;  %v496_v28 = vshll.u32 %v5544_v13, 16  ;;  %v6740_v57 = vld [vmem:[%s9662_s1 + $0x158] sm:$0xff]   ;;  %v6746_v22 = vld [vmem:[%s9662_s1 + $0x1b0] sm:$0xff]  }
  0x25   :  { %2197 = vmatprep.mubr.bf16.mxu1 %v5693_v53  ;;  %v5685_v16 = vcombine.low %v350_v3, %v354_v10  ;;  %v142_v44 = vrot.slane %v141_v32, 4  ;;  %v7238_v46 = vrot.slane %v510_v35, 5  ;;  %v5528_v48 = vrot.slane %v292_v23, 9  ;;  %6272 = vmatpush3.bf16.msra.mxu1 %v6744_v12 }
  0x26   :  { %2100 = vmatprep.mubr.bf16.mxu0 %v5677_v15  ;;  %v128_v39 = vrot.slane %v127_v25, 4  ;;  %v7226_v41 = vrot.slane %v496_v28, 5  ;;  %v357_v52 = vrot.slane %v7165_v56, 5  ;;  %v5529_v53 = vrot.slane %v293_v29, 9  ;;  %v6742_v56 = vld [vmem:[%s9662_s1 + $0x118] sm:$0xff]   ;;  %v6748_v29 = vld [vmem:[%s9662_s1 + $0x150] sm:$0xff]  }
  0x27   :  { %6210 = vmatpush3.bf16.msra.mxu0 %v6730_v34  ;;  %v507_v34 = vshrl.u32 %v5545_v14, 16  ;;  %v361_v55 = vrot.slane %v7174_v61, 5  ;;  %v147_v59 = vsel %vm7072_vm4, %v142_v44, %v146_v33  ;;  %v149_v60 = vshrl.u32 %v7214_v31, 16 }
  0x28   :  { %6211 = vmatprep.subr.bf16.mxu0 %v6732_v62  ;;  %v133_v50 = vsel %vm7072_vm4, %v128_v39, %v132_v19  ;;  %v152_v62 = vshll.u32 %v7214_v31, 16  ;;  %v358_v61 = vsel %vm7086_vm5, %v5528_v48, %v357_v52  ;;  %v163_v3 = vshrl.u32 %v7219_v36, 16  ;;  %v7313_v48 = vld [vmem:[%s9661_s0 + $0x58] sm:$0xf] }
  0x29   :  { %v7236_v45 = vrot.slane %v507_v34, 4  ;;  %v5678_v1 = vcombine.low %v133_v50, %v147_v59  ;;  %v362_v2 = vsel %vm7086_vm5, %v5529_v53, %v361_v55  ;;  %v151_v9 = vrot.slane %v149_v60, 4  ;;  %v6750_v50 = vld [vmem:[%s9662_s1 + $0x110] sm:$0xff]   ;;  %v7332_v59 = vld [vmem:[%s9661_s0 + $0x5c] sm:$0x1] }
  0x2a   :  { %2101 = vmatmul.mubr.bf16.gmra.mxu0 %v5669_v37  ;;  %v7231_v37 = vld [vmem:[%s9661_s0 + $0x34] sm:$0x1]  ;;  %v154_v10 = vrot.slane %v152_v62, 5  ;;  %v165_v13 = vrot.slane %v163_v3, 4  ;;  %v166_v14 = vshll.u32 %v7219_v36, 16  ;;  %v172_v15 = vshll.u32 %v7243_v49, 16 }
  0x2b   :  { %6212 = vmatpush3.bf16.msra.mxu0 %v6734_v8  ;;  %v158_v63 = vshll.u32 %v7231_v37, 16  ;;  %v5686_v8 = vcombine.low %v358_v61, %v362_v2  ;;  %2108 = vmatprep.mubr.bf16.mxu0 %v5678_v1  ;;  %v521_v18 = vshrl.u32 %v5546_v4, 16  ;;  %v524_v19 = vshll.u32 %v5546_v4, 16  ;;  %v6752_v2 = vld [vmem:[%s9662_s1 + $0x1a8] sm:$0xff]  }
  0x2c   :  { %2198 = vmatmul.mubr.bf16.gmra.mxu1 %v5685_v16  ;;  %6213 = vmatprep.subr.bf16.mxu0 %v6736_v38  ;;  %v6745_v16 = vld [vmem:[%s9662_s1 + $0x1f0] sm:$0xff]   ;;  %v155_v17 = vor.u32 %v154_v10, %v151_v9  ;;  %v535_v20 = vshrl.u32 %v5547_v6, 16  ;;  %v168_v23 = vrot.slane %v166_v14, 5  ;;  %v174_v25 = vrot.slane %v172_v15, 5  ;;  %v5549_v9 = vld [vmem:[%s9661_s0 + $0x60] sm:$0xf] }
  0x2d   :  { %2205 = vmatprep.mubr.bf16.mxu1 %v5694_v42  ;;  %v7274_v11 = vrot.slane %v158_v63, 5  ;;  %v538_v27 = vshll.u32 %v5547_v6, 16  ;;  %v5695_v28 = vcombine.low %v5546_v4, %v5547_v6  ;;  %v7296_v33 = vrot.slane %v521_v18, 4  ;;  %v7305_v38 = vld [vmem:[%s9661_s0 + $0x50] sm:$0xf]  ;;  %6273 = vmatprep.subr.bf16.mxu1 %v6745_v16  ;;  %v6753_v14 = vld [vmem:[%s9662_s1 + $0x1e0] sm:$0xff]  }
  0x2e   :  { %v156_v32 = vrot.slane %v155_v17, 4  ;;  %v7298_v34 = vrot.slane %v524_v19, 5  ;;  %v7300_v35 = vrot.slane %v535_v20, 4  ;;  %v169_v39 = vor.u32 %v168_v23, %v165_v13  ;;  %6274 = vmatpush3.bf16.msra.mxu1 %v6746_v22  ;;  %v6754_v19 = vld [vmem:[%s9662_s1 + $0x1a0] sm:$0xff]  }
  0x2f   :  { %6214 = vmatpush3.bf16.msra.mxu0 %v6738_v43  ;;  %v7307_v42 = vrot.slane %v538_v27, 5  ;;  %v5530_v43 = vrot.slane %v294_v21, 9  ;;  %v365_v44 = vrot.slane %v7231_v37, 5  ;;  %v5671_v53 = vcombine.low %v7214_v31, %v7219_v36  ;;  %v297_v27 = vld [vmem:[%s9661_s0 + $0x58] sm:$0xe] }
  0x30   :  { %6215 = vmatprep.subr.bf16.mxu0 %v6740_v57  ;;  %v161_v52 = vsel %vm7072_vm4, %v156_v32, %v7274_v11  ;;  %v369_v37 = vrot.slane %v7243_v49, 5  ;;  %v7327_v57 = vld [vmem:[%s9661_s0 + $0x54] sm:$0x1]  ;;  %v170_v60 = vrot.slane %v169_v39, 4  ;;  %v177_v31 = vshrl.u32 %v7305_v38, 16  ;;  %v6751_v49 = vld [vmem:[%s9662_s1 + $0x1e8] sm:$0xff]  }
  0x31   :  { %v366_v62 = vsel %vm7086_vm5, %v5530_v43, %v365_v44  ;;  %v180_v36 = vshll.u32 %v7305_v38, 16  ;;  %v191_v1 = vshrl.u32 %v7313_v48, 16  ;;  %v194_v61 = vshll.u32 %v7313_v48, 16  ;;  %6275 = vmatprep.subr.bf16.mxu1 %v6751_v49 }
  0x32   :  { %2109 = vmatmul.mubr.bf16.gmra.mxu0 %v5670_v26  ;;  %v295_v26 = vld [vmem:[%s9661_s0 + $0x38] sm:$0xe]  ;;  %v175_v3 = vsel %vm7072_vm4, %v170_v60, %v174_v25  ;;  %v179_v6 = vrot.slane %v177_v31, 4  ;;  %v200_v16 = vshll.u32 %v7332_v59, 16  ;;  %v563_v21 = vshrl.u32 %v5549_v9, 16  ;;  %6276 = vmatpush3.bf16.msra.mxu1 %v6752_v2  ;;  %v6756_v60 = vld [vmem:[%s9662_s1 + $0x148] sm:$0xff]  }
  0x33   :  { %6216 = vmatpush3.bf16.msra.mxu0 %v6742_v56  ;;  %v5531_v55 = vrot.slane %v295_v26, 9  ;;  %v186_v56 = vshll.u32 %v7327_v57, 16  ;;  %v182_v7 = vrot.slane %v180_v36, 5  ;;  %v5679_v10 = vcombine.low %v161_v52, %v175_v3  ;;  %v296_v25 = vld [vmem:[%s9661_s0 + $0x50] sm:$0xe]  ;;  %6277 = vmatprep.subr.bf16.mxu1 %v6753_v14  ;;  %v6758_v3 = vld [vmem:[%s9662_s1 + $0x108] sm:$0xff]  }
  0x34   :  { %2206 = vmatmul.mubr.bf16.gmra.mxu1 %v5686_v8  ;;  %6217 = vmatprep.subr.bf16.mxu0 %v6748_v29  ;;  %v5548_v8 = vld [vmem:[%s9661_s0 + $0x58] sm:$0xf]  ;;  %v193_v12 = vrot.slane %v191_v1, 4  ;;  %v196_v13 = vrot.slane %v194_v61, 5  ;;  %v566_v22 = vshll.u32 %v5549_v9, 16  ;;  %v202_v26 = vrot.slane %v200_v16, 5 }
  0x35   :  { %2213 = vmatprep.mubr.bf16.mxu1 %v5695_v28  ;;  %v370_v63 = vsel %vm7086_vm5, %v5531_v55, %v369_v37  ;;  %v188_v11 = vrot.slane %v186_v56, 5  ;;  %v183_v15 = vor.u32 %v182_v7, %v179_v6  ;;  %v549_v17 = vshrl.u32 %v5548_v8, 16  ;;  %2116 = vmatprep.mubr.bf16.mxu0 %v5679_v10  ;;  %v56_v56 = vld [vmem:[%s9661_s0 + $0x6c] sm:$0x1] }
  0x36   :  { %v5687_v4 = vcombine.low %v366_v62, %v370_v63  ;;  %v552_v18 = vshll.u32 %v5548_v8, 16  ;;  %v197_v20 = vor.u32 %v196_v13, %v193_v12  ;;  %v5696_v23 = vcombine.low %v5548_v8, %v5549_v9  ;;  %6278 = vmatpush3.bf16.msra.mxu1 %v6754_v19  ;;  %v7401_v63 = vld [vmem:[%s9661_s0 + $0x68] sm:$0xf]  ;;  %v6759_v8 = vld [vmem:[%s9662_s1 + $0x1d8] sm:$0xff]   ;;  %v5551_v19 = vld [vmem:[%s9661_s0 + $0x70] sm:$0xf] }
  0x37   :  { %6218 = vmatpush3.bf16.msra.mxu0 %v6750_v50  ;;  %v184_v28 = vrot.slane %v183_v15, 4  ;;  %v7370_v29 = vrot.slane %v549_v17, 4  ;;  %v7374_v43 = vrot.slane %v563_v21, 4  ;;  %v7376_v44 = vrot.slane %v566_v22, 5  ;;  %6279 = vmatprep.subr.bf16.mxu1 %v6759_v8 }
  0x38   :  { %v7372_v32 = vrot.slane %v552_v18, 5  ;;  %v198_v39 = vrot.slane %v197_v20, 4  ;;  %v5532_v50 = vrot.slane %v296_v25, 9  ;;  %v373_v55 = vrot.slane %v7327_v57, 5  ;;  %6219 = vmatprep.subr.bf16.mxu0 %v6756_v60  ;;  %v5550_v18 = vld [vmem:[%s9661_s0 + $0x68] sm:$0xf] }
  0x39   :  { %v189_v52 = vsel %vm7072_vm4, %v184_v28, %v188_v11  ;;  %v377_v37 = vrot.slane %v7332_v59, 5  ;;  %v5672_v36 = vcombine.low %v7305_v38, %v7313_v48  ;;  %v7396_v59 = vld [vmem:[%s9661_s0 + $0x60] sm:$0xf]  ;;  %v55_v38 = vld [vmem:[%s9661_s0 + $0x64] sm:$0x1]  ;;  %v222_v6 = vshll.u32 %v7401_v63, 16 }
  0x3a   :  { %2117 = vmatmul.mubr.bf16.gmra.mxu0 %v5671_v53  ;;  %v5533_v53 = vrot.slane %v297_v27, 9  ;;  %v203_v62 = vsel %vm7072_vm4, %v198_v39, %v202_v26  ;;  %v374_v49 = vsel %vm7086_vm5, %v5532_v50, %v373_v55  ;;  %v205_v1 = vshrl.u32 %v7396_v59, 16  ;;  %v6760_v25 = vld [vmem:[%s9662_s1 + $0x198] sm:$0xff]   ;;  %v298_v39 = vld [vmem:[%s9661_s0 + $0x60] sm:$0xe] }
  0x3b   :  { %v5680_v31 = vcombine.low %v189_v52, %v203_v62  ;;  %v208_v61 = vshll.u32 %v7396_v59, 16  ;;  %v214_v2 = vshll.u32 %v55_v38, 16  ;;  %v228_v7 = vshll.u32 %v56_v56, 16  ;;  %6220 = vmatpush3.bf16.msra.mxu0 %v6758_v3  ;;  %6280 = vmatpush3.bf16.msra.mxu1 %v6760_v25  ;;  %v7463_v3 = vld [vmem:[%s9661_s0 + $0x78] sm:$0xf] }
  0x3c   :  { %2214 = vmatmul.mubr.bf16.gmra.mxu1 %v5687_v4  ;;  %v378_v57 = vsel %vm7086_vm5, %v5533_v53, %v377_v37  ;;  %v219_v4 = vshrl.u32 %v7401_v63, 16  ;;  %v207_v9 = vrot.slane %v205_v1, 4  ;;  %v381_v12 = vrot.slane %v55_v38, 5  ;;  %v299_v37 = vld [vmem:[%s9661_s0 + $0x68] sm:$0xe] }
  0x3d   :  { %2221 = vmatprep.mubr.bf16.mxu1 %v5696_v23  ;;  %v5688_v48 = vcombine.low %v374_v49, %v378_v57  ;;  %2124 = vmatprep.mubr.bf16.mxu0 %v5680_v31  ;;  %v210_v10 = vrot.slane %v208_v61, 5  ;;  %v216_v11 = vrot.slane %v214_v2, 5  ;;  %v224_v14 = vrot.slane %v222_v6, 5  ;;  %v6761_v49 = vld [vmem:[%s9662_s1 + $0x1d0] sm:$0xff]  }
  0x3e   :  { %v221_v13 = vrot.slane %v219_v4, 4  ;;  %v230_v15 = vrot.slane %v228_v7, 5  ;;  %v385_v16 = vrot.slane %v56_v56, 5  ;;  %v577_v21 = vshrl.u32 %v5550_v18, 16  ;;  %v7458_v61 = vld [vmem:[%s9661_s0 + $0x70] sm:$0xf]  ;;  %6281 = vmatprep.subr.bf16.mxu1 %v6761_v49 }
  0x3f   :  { %v211_v17 = vor.u32 %v210_v10, %v207_v9  ;;  %v580_v22 = vshll.u32 %v5550_v18, 16  ;;  %v591_v23 = vshrl.u32 %v5551_v19, 16  ;;  %v594_v28 = vshll.u32 %v5551_v19, 16 }
  0x40   :  { %v225_v20 = vor.u32 %v224_v14, %v221_v13  ;;  %v5697_v26 = vcombine.low %v5550_v18, %v5551_v19  ;;  %v7431_v52 = vrot.slane %v577_v21, 4  ;;  %v5534_v31 = vrot.slane %v298_v39, 9  ;;  %v5553_v18 = vld [vmem:[%s9661_s0 + $0x80] sm:$0xf] }
  0x41   :  { %v212_v27 = vrot.slane %v211_v17, 4  ;;  %v7433_v55 = vrot.slane %v580_v22, 5  ;;  %v7435_v53 = vrot.slane %v591_v23, 4  ;;  %v7442_v62 = vrot.slane %v594_v28, 5  ;;  %v5552_v17 = vld [vmem:[%s9661_s0 + $0x78] sm:$0xf] }
  0x42   :  { %2125 = vmatmul.mubr.bf16.gmra.mxu0 %v5672_v36  ;;  %v226_v50 = vrot.slane %v225_v20, 4  ;;  %v5535_v36 = vrot.slane %v299_v37, 9  ;;  %v5673_v38 = vcombine.low %v7396_v59, %v7401_v63  ;;  %v382_v56 = vsel %vm7086_vm5, %v5534_v31, %v381_v12  ;;  %v57_v59 = vld [vmem:[%s9661_s0 + $0x74] sm:$0x1]  ;;  %v58_v63 = vld [vmem:[%s9661_s0 + $0x7c] sm:$0x1] }
  0x43   :  { %v217_v60 = vsel %vm7072_vm4, %v212_v27, %v216_v11  ;;  %v233_v4 = vshrl.u32 %v7458_v61, 16  ;;  %v236_v6 = vshll.u32 %v7458_v61, 16  ;;  %v242_v7 = vshll.u32 %v57_v59, 16  ;;  %v6762_v23 = vld [vmem:[%s9662_s1 + $0x190] sm:$0xff]  }
  0x44   :  { %2222 = vmatmul.mubr.bf16.gmra.mxu1 %v5688_v48  ;;  %v231_v57 = vsel %vm7072_vm4, %v226_v50, %v230_v15  ;;  %v386_v1 = vsel %vm7086_vm5, %v5535_v36, %v385_v16  ;;  %v247_v8 = vshrl.u32 %v7463_v3, 16  ;;  %v250_v9 = vshll.u32 %v7463_v3, 16  ;;  %v301_v36 = vld [vmem:[%s9661_s0 + $0x78] sm:$0xe] }
  0x45   :  { %2229 = vmatprep.mubr.bf16.mxu1 %v5697_v26  ;;  %v5681_v48 = vcombine.low %v217_v60, %v231_v57  ;;  %v5689_v2 = vcombine.low %v382_v56, %v386_v1  ;;  %v256_v10 = vshll.u32 %v58_v63, 16  ;;  %v235_v11 = vrot.slane %v233_v4, 4  ;;  %v300_v26 = vld [vmem:[%s9661_s0 + $0x70] sm:$0xe]  ;;  %6282 = vmatpush3.bf16.msra.mxu1 %v6762_v23 }
  0x46   :  { %v238_v12 = vrot.slane %v236_v6, 5  ;;  %v244_v13 = vrot.slane %v242_v7, 5  ;;  %v249_v14 = vrot.slane %v247_v8, 4  ;;  %v252_v15 = vrot.slane %v250_v9, 5  ;;  %v7519_v9 = vld [vmem:[%s9661_s0 + $0x88] sm:$0xf] }
  0x47   :  { %2132 = vmatprep.mubr.bf16.mxu0 %v5681_v48  ;;  %v258_v16 = vrot.slane %v256_v10, 5  ;;  %v605_v20 = vshrl.u32 %v5552_v17, 16  ;;  %v608_v21 = vshll.u32 %v5552_v17, 16  ;;  %v619_v22 = vshrl.u32 %v5553_v18, 16  ;;  %v60_v10 = vld [vmem:[%s9661_s0 + $0x8c] sm:$0x1] }
  0x48   :  { %v239_v19 = vor.u32 %v238_v12, %v235_v11  ;;  %v253_v25 = vor.u32 %v252_v15, %v249_v14  ;;  %v622_v27 = vshll.u32 %v5553_v18, 16  ;;  %v5698_v28 = vcombine.low %v5552_v17, %v5553_v18  ;;  %v6766_v14 = vld [vmem:[%s9662_s1 + $0x100] sm:$0xff]   ;;  %v6767_v18 = vld [vmem:[%s9662_s1 + $0x1c8] sm:$0xff]  }
  0x49   :  { %v389_v39 = vrot.slane %v57_v59, 5  ;;  %v7487_v37 = vrot.slane %v605_v20, 4  ;;  %v7489_v60 = vrot.slane %v608_v21, 5  ;;  %v7491_v31 = vrot.slane %v619_v22, 4  ;;  %6283 = vmatprep.subr.bf16.mxu1 %v6767_v18 }
  0x4a   :  { %2133 = vmatmul.mubr.bf16.gmra.mxu0 %v5673_v38  ;;  %v240_v50 = vrot.slane %v239_v19, 4  ;;  %v254_v49 = vrot.slane %v253_v25, 4  ;;  %v7496_v57 = vrot.slane %v622_v27, 5  ;;  %v5536_v38 = vrot.slane %v300_v26, 9 }
  0x4b   :  { %v5537_v48 = vrot.slane %v301_v36, 9  ;;  %v393_v1 = vrot.slane %v58_v63, 5  ;;  %v5674_v4 = vcombine.low %v7458_v61, %v7463_v3  ;;  %v7514_v63 = vld [vmem:[%s9661_s0 + $0x80] sm:$0xf]  ;;  %v59_v61 = vld [vmem:[%s9661_s0 + $0x84] sm:$0x1]  ;;  %v471_v36 = vor.u32 %v7155_v51, %v7148_v47 }
  0x4c   :  { %2230 = vmatmul.mubr.bf16.gmra.mxu1 %v5689_v2  ;;  %v245_v56 = vsel %vm7072_vm4, %v240_v50, %v244_v13  ;;  %v6764_v2 = vld [vmem:[%s9662_s1 + $0x140] sm:$0xff]   ;;  %v259_v59 = vsel %vm7072_vm4, %v254_v49, %v258_v16  ;;  %v390_v6 = vsel %vm7086_vm5, %v5536_v38, %v389_v39  ;;  %v261_v11 = vshrl.u32 %v7514_v63, 16  ;;  %v5554_v39 = vld [vmem:[%s9661_s0 + $0x88] sm:$0xf]  ;;  %v5555_v50 = vld [vmem:[%s9661_s0 + $0x90] sm:$0xf] }
  0x4d   :  { %2237 = vmatprep.mubr.bf16.mxu1 %v5698_v28  ;;  %v5682_v7 = vcombine.low %v245_v56, %v259_v59  ;;  %v394_v8 = vsel %vm7086_vm5, %v5537_v48, %v393_v1  ;;  %6221 = vmatprep.subr.bf16.mxu0 %v6764_v2  ;;  %v264_v12 = vshll.u32 %v7514_v63, 16  ;;  %v270_v13 = vshll.u32 %v59_v61, 16  ;;  %v6768_v1 = vld [vmem:[%s9662_s1 + $0x188] sm:$0xff]  }
  0x4e   :  { %v5690_v3 = vcombine.low %v390_v6, %v394_v8  ;;  %v275_v15 = vshrl.u32 %v7519_v9, 16  ;;  %v278_v16 = vshll.u32 %v7519_v9, 16  ;;  %v284_v17 = vshll.u32 %v60_v10, 16  ;;  %6222 = vmatpush3.bf16.msra.mxu0 %v6766_v14  ;;  %v302_v6 = vld [vmem:[%s9661_s0 + $0x80] sm:$0xe]  ;;  %6284 = vmatpush3.bf16.msra.mxu1 %v6768_v1  ;;  %v6775_v47 = vld [vmem:[%s9662_s1 + $0x228] sm:$0xff]  }
  0x4f   :  { %2140 = vmatprep.mubr.bf16.mxu0 %v5682_v7  ;;  %v263_v19 = vrot.slane %v261_v11, 4  ;;  %v266_v20 = vrot.slane %v264_v12, 5  ;;  %v272_v21 = vrot.slane %v270_v13, 5  ;;  %v397_v22 = vrot.slane %v59_v61, 5  ;;  %v303_v11 = vld [vmem:[%s9661_s0 + $0x88] sm:$0xe] }
  0x50   :  { %v277_v23 = vrot.slane %v275_v15, 4  ;;  %v280_v25 = vrot.slane %v278_v16, 5  ;;  %v286_v27 = vrot.slane %v284_v17, 5  ;;  %v401_v28 = vrot.slane %v60_v10, 5  ;;  %v6769_v16 = vld [vmem:[%s9662_s1 + $0x1c0] sm:$0xff]  }
  0x51   :  { %v267_v26 = vor.u32 %v266_v20, %v263_v19  ;;  %v633_v38 = vshrl.u32 %v5554_v39, 16  ;;  %v636_v48 = vshll.u32 %v5554_v39, 16  ;;  %v647_v56 = vshrl.u32 %v5555_v50, 16  ;;  %6285 = vmatprep.subr.bf16.mxu1 %v6769_v16  ;;  %v6770_v1 = vld [vmem:[%s9662_s1 + $0x180] sm:$0xff]  }
  0x52   :  { %2141 = vmatmul.mubr.bf16.gmra.mxu0 %v5674_v4  ;;  %v281_v49 = vor.u32 %v280_v25, %v277_v23  ;;  %v650_v59 = vshll.u32 %v5555_v50, 16  ;;  %v5699_v4 = vcombine.low %v5554_v39, %v5555_v50  ;;  %v485_v7 = vor.u32 %v7179_v0, %v7169_v58  ;;  %6286 = vmatpush3.bf16.msra.mxu1 %v6770_v1  ;;  %v5559_v1 = vld [vmem:[%s9661_s0 + $0x24] sm:$0x1]  ;;  %v7693_v58 = vld [vmem:[%s9661_s0 + $0x28] sm:$0xf] }
  0x53   :  { %v268_v2 = vrot.slane %v267_v26, 4  ;;  %v7553_v61 = vrot.slane %v633_v38, 4  ;;  %v7557_v10 = vrot.slane %v647_v56, 4  ;;  %v5538_v14 = vrot.slane %v302_v6, 9  ;;  %v5557_v26 = vld [vmem:[%s9661_s0 + $0x14] sm:$0x1] }
  0x54   :  { %2238 = vmatmul.mubr.bf16.gmra.mxu1 %v5690_v3  ;;  %v282_v8 = vrot.slane %v281_v49, 4  ;;  %v7555_v3 = vrot.slane %v636_v48, 5  ;;  %v7564_v13 = vrot.slane %v650_v59, 5  ;;  %v5539_v15 = vrot.slane %v303_v11, 9  ;;  %v5573_v38 = vld [vmem:[%s9661_s0 + $0x10] sm:$0xe] }
  0x55   :  { %v273_v12 = vsel %vm7072_vm4, %v268_v2, %v272_v21  ;;  %2245 = vmatprep.mubr.bf16.mxu1 %v5699_v4  ;;  %v5675_v18 = vcombine.low %v7514_v63, %v7519_v9  ;;  %v499_v19 = vor.u32 %v7226_v41, %v7224_v40  ;;  %v513_v20 = vor.u32 %v7238_v46, %v7236_v45  ;;  %v7698_v0 = vld [vmem:[%s9661_s0 + $0x24] sm:$0x1] }
  0x56   :  { %v287_v17 = vsel %vm7072_vm4, %v282_v8, %v286_v27  ;;  %v398_v23 = vsel %vm7086_vm5, %v5538_v14, %v397_v22  ;;  %v402_v25 = vsel %vm7086_vm5, %v5539_v15, %v401_v28  ;;  %v5556_v27 = vld [vmem:[%s9661_s0 + $0xc] sm:$0x1]  ;;  %v527_v63 = vor.u32 %v7298_v34, %v7296_v33  ;;  %v5572_v22 = vld [vmem:[%s9661_s0 + $0x8] sm:$0xe]  ;;  %v6771_v14 = vld [vmem:[%s9662_s1 + $0x238] sm:$0xff]  }
  0x57   :  { %v5683_v21 = vcombine.low %v273_v12, %v287_v17  ;;  %v5691_v9 = vcombine.low %v398_v23, %v402_v25  ;;  %v446_v39 = vshll.u32 %v5556_v27, 16  ;;  %v710_v50 = vrot.slane %v5556_v27, 5  ;;  %v7628_v23 = vld [vmem:[%s9661_s0 + $0x18] sm:$0xf]  ;;  %v7633_v25 = vld [vmem:[%s9661_s0 + $0x14] sm:$0x1]  ;;  %6623 = vmatprep.subr.bf16.mxu0 %v6771_v14 }
  0x58   :  { %v460_v49 = vshll.u32 %v5557_v26, 16  ;;  %v5588_v48 = vrot.slane %v5572_v22, 9  ;;  %v714_v56 = vrot.slane %v5557_v26, 5  ;;  %v5589_v4 = vrot.slane %v5573_v38, 9 }
  0x59   :  { %2148 = vmatprep.mubr.bf16.mxu0 %v5683_v21  ;;  %v448_v59 = vrot.slane %v446_v39, 5  ;;  %v7623_v21 = vld [vmem:[%s9661_s0 + $0x10] sm:$0xf]  ;;  %v7645_v39 = vld [vmem:[%s9661_s0 + $0x1c] sm:$0x1]  ;;  %v722_v2 = vrot.slane %v5559_v1, 5 }
  0x5a   :  { %2149 = vmatmul.mubr.bf16.gmra.mxu0 %v5675_v18  ;;  %v462_v11 = vrot.slane %v460_v49, 5  ;;  %v711_v12 = vsel %vm7086_vm5, %v5588_v48, %v710_v50  ;;  %v715_v17 = vsel %vm7086_vm5, %v5589_v4, %v714_v56  ;;  %v806_v22 = vshrl.u32 %v7623_v21, 16  ;;  %v5558_v49 = vld [vmem:[%s9661_s0 + $0x1c] sm:$0x1] }
  0x5b   :  { %v449_v18 = vsel %vm7072_vm4, %v7124_v24, %v448_v59  ;;  %v809_v50 = vshll.u32 %v7623_v21, 16  ;;  %v815_v48 = vshll.u32 %v7633_v25, 16  ;;  %v820_v56 = vshrl.u32 %v7628_v23, 16 }
  0x5c   :  { %2246 = vmatmul.mubr.bf16.gmra.mxu1 %v5691_v9  ;;  %v5708_v9 = vcombine.low %v711_v12, %v715_v17  ;;  %v463_v26 = vsel %vm7072_vm4, %v7132_v30, %v462_v11  ;;  %v823_v30 = vshll.u32 %v7628_v23, 16  ;;  %v808_v59 = vrot.slane %v806_v22, 4  ;;  %v5574_v12 = vld [vmem:[%s9661_s0 + $0x18] sm:$0xe]  ;;  %v6773_v17 = vld [vmem:[%s9662_s1 + $0x230] sm:$0xff]  }
  0x5d   :  { %v5700_v38 = vcombine.low %v449_v18, %v463_v26  ;;  %v811_v4 = vrot.slane %v809_v50, 5  ;;  %v829_v11 = vshll.u32 %v7645_v39, 16  ;;  %v817_v26 = vrot.slane %v815_v48, 5 }
  0x5e   :  { %2286 = vmatprep.mubr.bf16.mxu0 %v5708_v9  ;;  %v822_v24 = vrot.slane %v820_v56, 4  ;;  %v825_v27 = vrot.slane %v823_v30, 5  ;;  %v5575_v9 = vld [vmem:[%s9661_s0 + $0x20] sm:$0xe]  ;;  %v5590_v22 = vrot.slane %v5574_v12, 9  ;;  %v718_v15 = vrot.slane %v5558_v49, 5 }
  0x5f   :  { %v812_v50 = vor.u32 %v811_v4, %v808_v59  ;;  %v831_v16 = vrot.slane %v829_v11, 5  ;;  %v5591_v8 = vrot.slane %v5575_v9, 9  ;;  %v472_v28 = vrot.slane %v471_v36, 4  ;;  %v5561_v4 = vld [vmem:[%s9661_s0 + $0x34] sm:$0x1] }
  0x60   :  { %v826_v6 = vor.u32 %v825_v27, %v822_v24  ;;  %v474_v18 = vshll.u32 %v5558_v49, 16  ;;  %v719_v56 = vsel %vm7086_vm5, %v5590_v22, %v718_v15  ;;  %v486_v30 = vrot.slane %v485_v7, 4  ;;  %v7681_v27 = vld [vmem:[%s9661_s0 + $0x20] sm:$0xf]  ;;  %v5576_v11 = vld [vmem:[%s9661_s0 + $0x28] sm:$0xe] }
  0x61   :  { %v813_v48 = vrot.slane %v812_v50, 4  ;;  %v488_v59 = vshll.u32 %v5559_v1, 16  ;;  %v5716_v36 = vcombine.low %v7623_v21, %v7628_v23  ;;  %v837_v49 = vshll.u32 %v7681_v27, 16  ;;  %v5560_v1 = vld [vmem:[%s9661_s0 + $0x2c] sm:$0x1] }
  0x62   :  { %2287 = vmatmul.mubr.bf16.vlgmr.msra.gmra.mxu0 %v5700_v38  ;;  %v827_v51 = vrot.slane %v826_v6, 4  ;;  %v476_v15 = vrot.slane %v474_v18, 5  ;;  %v843_v38 = vshll.u32 %v7698_v0, 16  ;;  %v848_v18 = vshrl.u32 %v7693_v58, 16 }
  0x63   :  { %6624 = vmatpush3.bf16.msra.mxu0 %v6771_v14  ;;  %v723_v14 = vsel %vm7086_vm5, %v5591_v8, %v722_v2  ;;  %v818_v7 = vsel %vm7072_vm4, %v813_v48, %v817_v26  ;;  %v490_v21 = vrot.slane %v488_v59, 5  ;;  %v7705_v2 = vld [vmem:[%s9661_s0 + $0x2c] sm:$0x1]  ;;  %v834_v8 = vshrl.u32 %v7681_v27, 16  ;;  %v5577_v26 = vld [vmem:[%s9661_s0 + $0x30] sm:$0xe] }
  0x64   :  { %6625 = vmatprep.subr.bf16.mxu0 %v6773_v17  ;;  %v5709_v6 = vcombine.low %v719_v56, %v723_v14  ;;  %v832_v23 = vsel %vm7072_vm4, %v827_v51, %v831_v16  ;;  %v477_v24 = vsel %vm7072_vm4, %v472_v28, %v476_v15  ;;  %v839_v22 = vrot.slane %v837_v49, 5  ;;  %v6777_v56 = vld [vmem:[%s9662_s1 + $0x220] sm:$0xff]   ;;  %v7741_v49 = vld [vmem:[%s9661_s0 + $0x30] sm:$0xf] }
  0x65   :  { %v5724_v16 = vcombine.low %v818_v7, %v832_v23  ;;  %v491_v28 = vsel %vm7072_vm4, %v486_v30, %v490_v21  ;;  %v836_v12 = vrot.slane %v834_v8, 4  ;;  %v845_v50 = vrot.slane %v843_v38, 5 }
  0x66   :  { %2294 = vmatprep.mubr.bf16.mxu0 %v5709_v6  ;;  %v5701_v9 = vcombine.low %v477_v24, %v491_v28  ;;  %v851_v48 = vshll.u32 %v7693_v58, 16  ;;  %v850_v30 = vrot.slane %v848_v18, 4  ;;  %v857_v59 = vshll.u32 %v7705_v2, 16 }
  0x67   :  { %6626 = vmatpush3.bf16.msra.mxu0 %v6773_v17  ;;  %2383 = vmatprep.mubr.bf16.mxu1 %v5724_v16  ;;  %v1087_v17 = vrot.slane %v7698_v0, 5  ;;  %v1091_v51 = vrot.slane %v7705_v2, 5  ;;  %v840_v14 = vor.u32 %v839_v22, %v836_v12  ;;  %v5717_v7 = vcombine.low %v7681_v27, %v7693_v58  ;;  %v7749_v27 = vld [vmem:[%s9661_s0 + $0x34] sm:$0x1]  ;;  %v6779_v58 = vld [vmem:[%s9662_s1 + $0x218] sm:$0xff]  }
  0x68   :  { %6627 = vmatprep.subr.bf16.mxu0 %v6775_v47  ;;  %2384 = vmatmul.mubr.bf16.vlgmr.msra.gmra.mxu1 %v5716_v36  ;;  %v853_v15 = vrot.slane %v851_v48, 5  ;;  %v5592_v6 = vrot.slane %v5576_v11, 9  ;;  %v859_v21 = vrot.slane %v857_v59, 5  ;;  %v726_v8 = vrot.slane %v5560_v1, 5  ;;  %v5646_v0 = vld [vmem:[%s9661_s0 + $0x70] sm:$0xe] }
  0x69   :  { %v5593_v23 = vrot.slane %v5577_v26, 9  ;;  %v730_v24 = vrot.slane %v5561_v4, 5  ;;  %v841_v38 = vrot.slane %v840_v14, 4  ;;  %v500_v36 = vrot.slane %v499_v19, 4  ;;  %v7764_v19 = vld [vmem:[%s9661_s0 + $0x38] sm:$0xf] }
  0x6a   :  { %2295 = vmatmul.mubr.bf16.gmra.mxu0 %v5701_v9  ;;  %v854_v16 = vor.u32 %v853_v15, %v850_v30  ;;  %v502_v28 = vshll.u32 %v5560_v1, 16  ;;  %v514_v40 = vrot.slane %v513_v20, 4  ;;  %v516_v41 = vshll.u32 %v5561_v4, 16  ;;  %v7771_v9 = vld [vmem:[%s9661_s0 + $0x3c] sm:$0x1]  ;;  %v6781_v4 = vld [vmem:[%s9662_s1 + $0x210] sm:$0xff]  }
  0x6b   :  { %6628 = vmatpush3.bf16.msra.mxu0 %v6775_v47  ;;  %v727_v47 = vsel %vm7086_vm5, %v5592_v6, %v726_v8  ;;  %v731_v11 = vsel %vm7086_vm5, %v5593_v23, %v730_v24  ;;  %v846_v1 = vsel %vm7072_vm4, %v841_v38, %v845_v50  ;;  %v862_v45 = vshrl.u32 %v7741_v49, 16  ;;  %v5562_v14 = vld [vmem:[%s9661_s0 + $0x3c] sm:$0x1]  ;;  %v5563_v23 = vld [vmem:[%s9661_s0 + $0x44] sm:$0x1] }
  0x6c   :  { %6629 = vmatprep.subr.bf16.mxu0 %v6777_v56  ;;  %v855_v12 = vrot.slane %v854_v16, 4  ;;  %v5710_v18 = vcombine.low %v727_v47, %v731_v11  ;;  %v504_v26 = vrot.slane %v502_v28, 5  ;;  %v518_v22 = vrot.slane %v516_v41, 5  ;;  %v5579_v24 = vld [vmem:[%s9661_s0 + $0x40] sm:$0xe] }
  0x6d   :  { %v865_v46 = vshll.u32 %v7741_v49, 16  ;;  %v871_v20 = vshll.u32 %v7749_v27, 16  ;;  %v876_v30 = vshrl.u32 %v7764_v19, 16  ;;  %v879_v59 = vshll.u32 %v7764_v19, 16 }
  0x6e   :  { %v860_v50 = vsel %vm7072_vm4, %v855_v12, %v859_v21  ;;  %2302 = vmatprep.mubr.bf16.mxu0 %v5710_v18  ;;  %v505_v48 = vsel %vm7072_vm4, %v500_v36, %v504_v26  ;;  %v519_v6 = vsel %vm7072_vm4, %v514_v40, %v518_v22  ;;  %v864_v21 = vrot.slane %v862_v45, 4  ;;  %v7810_v45 = vld [vmem:[%s9661_s0 + $0x44] sm:$0x1] }
  0x6f   :  { %6630 = vmatpush3.bf16.msra.mxu0 %v6777_v56  ;;  %v5578_v56 = vld [vmem:[%s9661_s0 + $0x38] sm:$0xe]  ;;  %v5725_v15 = vcombine.low %v846_v1, %v860_v50  ;;  %v867_v8 = vrot.slane %v865_v46, 5  ;;  %v5702_v38 = vcombine.low %v505_v48, %v519_v6  ;;  %v873_v16 = vrot.slane %v871_v20, 5  ;;  %v7805_v1 = vld [vmem:[%s9661_s0 + $0x40] sm:$0xf] }
  0x70   :  { %6631 = vmatprep.subr.bf16.mxu0 %v6779_v58  ;;  %v878_v36 = vrot.slane %v876_v30, 4  ;;  %v881_v28 = vrot.slane %v879_v59, 5  ;;  %v885_v11 = vshll.u32 %v7771_v9, 16  ;;  %v5718_v40 = vcombine.low %v7741_v49, %v7764_v19  ;;  %v6783_v49 = vld [vmem:[%s9662_s1 + $0x208] sm:$0xff]  }
  0x71   :  { %2391 = vmatprep.mubr.bf16.mxu1 %v5725_v15  ;;  %v868_v47 = vor.u32 %v867_v8, %v864_v21  ;;  %v5594_v41 = vrot.slane %v5578_v56, 9  ;;  %v734_v18 = vrot.slane %v5562_v14, 5  ;;  %v5595_v26 = vrot.slane %v5579_v24, 9  ;;  %v7828_v56 = vld [vmem:[%s9661_s0 + $0x48] sm:$0xf] }
  0x72   :  { %2392 = vmatmul.mubr.bf16.gmra.mxu1 %v5717_v7  ;;  %2303 = vmatmul.mubr.bf16.gmra.mxu0 %v5702_v38  ;;  %v882_v12 = vor.u32 %v881_v28, %v878_v36  ;;  %v738_v22 = vrot.slane %v5563_v23, 5  ;;  %v887_v46 = vrot.slane %v885_v11, 5  ;;  %v528_v7 = vrot.slane %v527_v63, 4  ;;  %v7835_v15 = vld [vmem:[%s9661_s0 + $0x4c] sm:$0x1] }
  0x73   :  { %6632 = vmatpush3.bf16.msra.mxu0 %v6779_v58  ;;  %v869_v19 = vrot.slane %v868_v47, 4  ;;  %v530_v58 = vshll.u32 %v5562_v14, 16  ;;  %v735_v50 = vsel %vm7086_vm5, %v5594_v41, %v734_v18  ;;  %v9683_v30 = vor.u32 %v7307_v42, %v7300_v35  ;;  %v5564_v8 = vld [vmem:[%s9661_s0 + $0x5c] sm:$0x1]  ;;  %v5565_v36 = vld [vmem:[%s9661_s0 + $0x64] sm:$0x1] }
  0x74   :  { %6633 = vmatprep.subr.bf16.mxu0 %v6781_v4  ;;  %v883_v20 = vrot.slane %v882_v12, 4  ;;  %v739_v48 = vsel %vm7086_vm5, %v5595_v26, %v738_v22  ;;  %v544_v14 = vshll.u32 %v5563_v23, 16  ;;  %v890_v42 = vshrl.u32 %v7805_v1, 16  ;;  %v6785_v23 = vld [vmem:[%s9662_s1 + $0x200] sm:$0xff]   ;;  %v5580_v28 = vld [vmem:[%s9661_s0 + $0x58] sm:$0xe] }
  0x75   :  { %v542_v59 = vrot.slane %v9683_v30, 4  ;;  %v874_v33 = vsel %vm7072_vm4, %v869_v19, %v873_v16  ;;  %v5711_v34 = vcombine.low %v735_v50, %v739_v48  ;;  %v532_v63 = vrot.slane %v530_v58, 5  ;;  %v5581_v18 = vld [vmem:[%s9661_s0 + $0x60] sm:$0xe] }
  0x76   :  { %v888_v35 = vsel %vm7072_vm4, %v883_v20, %v887_v46  ;;  %v893_v6 = vshll.u32 %v7805_v1, 16  ;;  %v899_v21 = vshll.u32 %v7810_v45, 16  ;;  %v546_v38 = vrot.slane %v544_v14, 5 }
  0x77   :  { %6634 = vmatpush3.bf16.msra.mxu0 %v6781_v4  ;;  %v5726_v24 = vcombine.low %v874_v33, %v888_v35  ;;  %2310 = vmatprep.mubr.bf16.mxu0 %v5711_v34  ;;  %v533_v4 = vsel %vm7072_vm4, %v528_v7, %v532_v63  ;;  %v904_v16 = vshrl.u32 %v7828_v56, 16  ;;  %v892_v47 = vrot.slane %v890_v42, 4 }
  0x78   :  { %6635 = vmatprep.subr.bf16.mxu0 %v6783_v49  ;;  %v895_v11 = vrot.slane %v893_v6, 5  ;;  %v901_v41 = vrot.slane %v899_v21, 5  ;;  %v907_v12 = vshll.u32 %v7828_v56, 16  ;;  %v547_v26 = vsel %vm7072_vm4, %v542_v59, %v546_v38  ;;  %v7869_v59 = vld [vmem:[%s9661_s0 + $0x60] sm:$0xf] }
  0x79   :  { %2399 = vmatprep.mubr.bf16.mxu1 %v5726_v24  ;;  %v906_v22 = vrot.slane %v904_v16, 4  ;;  %v913_v19 = vshll.u32 %v7835_v15, 16  ;;  %v5719_v46 = vcombine.low %v7805_v1, %v7828_v56  ;;  %v5703_v7 = vcombine.low %v533_v4, %v547_v26  ;;  %v7877_v56 = vld [vmem:[%s9661_s0 + $0x64] sm:$0x1]  ;;  %v7896_v16 = vld [vmem:[%s9661_s0 + $0x6c] sm:$0x1] }
  0x7a   :  { %2400 = vmatmul.mubr.bf16.gmra.mxu1 %v5718_v40  ;;  %v896_v58 = vor.u32 %v895_v11, %v892_v47  ;;  %v909_v20 = vrot.slane %v907_v12, 5  ;;  %v5596_v50 = vrot.slane %v5580_v28, 9  ;;  %v742_v30 = vrot.slane %v5564_v8, 5  ;;  %v5582_v47 = vld [vmem:[%s9661_s0 + $0x68] sm:$0xe] }
  0x7b   :  { %6636 = vmatpush3.bf16.msra.mxu0 %v6783_v49  ;;  %v915_v48 = vrot.slane %v913_v19, 5  ;;  %v5597_v33 = vrot.slane %v5581_v18, 9  ;;  %v746_v34 = vrot.slane %v5565_v36, 5  ;;  %v9684_v40 = vor.u32 %v7372_v32, %v7370_v29  ;;  %v7889_v29 = vld [vmem:[%s9661_s0 + $0x68] sm:$0xf] }
  0x7c   :  { %6637 = vmatprep.subr.bf16.mxu0 %v6785_v23  ;;  %2311 = vmatmul.mubr.bf16.gmra.mxu0 %v5703_v7  ;;  %v897_v63 = vrot.slane %v896_v58, 4  ;;  %v910_v14 = vor.u32 %v909_v20, %v906_v22  ;;  %v558_v49 = vshll.u32 %v5564_v8, 16  ;;  %v743_v35 = vsel %vm7086_vm5, %v5596_v50, %v742_v30  ;;  %v5567_v58 = vld [vmem:[%s9661_s0 + $0x74] sm:$0x1]  ;;  %v5583_v20 = vld [vmem:[%s9661_s0 + $0x70] sm:$0xe] }
  0x7d   :  { %v556_v1 = vrot.slane %v9684_v40, 4  ;;  %v747_v42 = vsel %vm7086_vm5, %v5597_v33, %v746_v34  ;;  %v9685_v6 = vor.u32 %v7376_v44, %v7374_v43  ;;  %v572_v24 = vshll.u32 %v5565_v36, 16 }
  0x7e   :  { %v902_v32 = vsel %vm7072_vm4, %v897_v63, %v901_v41  ;;  %v911_v8 = vrot.slane %v910_v14, 4  ;;  %v5712_v4 = vcombine.low %v743_v35, %v747_v42  ;;  %v560_v38 = vrot.slane %v558_v49, 5 }
  0x7f   :  { %v570_v21 = vrot.slane %v9685_v6, 4  ;;  %6638 = vmatpush3.bf16.msra.mxu0 %v6785_v23  ;;  %v574_v43 = vrot.slane %v572_v24, 5  ;;  %v918_v44 = vshrl.u32 %v7869_v59, 16  ;;  %v921_v36 = vshll.u32 %v7869_v59, 16  ;;  %v5566_v23 = vld [vmem:[%s9661_s0 + $0x6c] sm:$0x1] }
  0x80   :  { %v927_v28 = vshll.u32 %v7877_v56, 16  ;;  %v916_v11 = vsel %vm7072_vm4, %v911_v8, %v915_v48  ;;  %2318 = vmatprep.mubr.bf16.mxu0 %v5712_v4  ;;  %v561_v41 = vsel %vm7072_vm4, %v556_v1, %v560_v38  ;;  %v932_v12 = vshrl.u32 %v7889_v29, 16  ;;  %v7927_v6 = vld [vmem:[%s9661_s0 + $0x70] sm:$0xf] }
  0x81   :  { %v935_v18 = vshll.u32 %v7889_v29, 16  ;;  %v5727_v26 = vcombine.low %v902_v32, %v916_v11  ;;  %v575_v22 = vsel %vm7072_vm4, %v570_v21, %v574_v43  ;;  %v920_v19 = vrot.slane %v918_v44, 4 }
  0x82   :  { %v923_v7 = vrot.slane %v921_v36, 5  ;;  %v5704_v50 = vcombine.low %v561_v41, %v575_v22  ;;  %v929_v48 = vrot.slane %v927_v28, 5  ;;  %v934_v30 = vrot.slane %v932_v12, 4  ;;  %v5568_v12 = vld [vmem:[%s9661_s0 + $0x7c] sm:$0x1] }
  0x83   :  { %v937_v33 = vrot.slane %v935_v18, 5  ;;  %2407 = vmatprep.mubr.bf16.mxu1 %v5727_v26  ;;  %v941_v63 = vshll.u32 %v7896_v16, 16  ;;  %v5720_v14 = vcombine.low %v7869_v59, %v7889_v29  ;;  %v5598_v40 = vrot.slane %v5582_v47, 9  ;;  %v7954_v47 = vld [vmem:[%s9661_s0 + $0x7c] sm:$0x1] }
  0x84   :  { %v924_v34 = vor.u32 %v923_v7, %v920_v19  ;;  %2408 = vmatmul.mubr.bf16.gmra.mxu1 %v5719_v46  ;;  %2319 = vmatmul.mubr.bf16.gmra.mxu0 %v5704_v50  ;;  %v750_v49 = vrot.slane %v5566_v23, 5  ;;  %v5599_v35 = vrot.slane %v5583_v20, 9  ;;  %v754_v42 = vrot.slane %v5567_v58, 5  ;;  %v7935_v46 = vld [vmem:[%s9661_s0 + $0x74] sm:$0x1] }
  0x85   :  { %v938_v1 = vor.u32 %v937_v33, %v934_v30  ;;  %v943_v24 = vrot.slane %v941_v63, 5  ;;  %v9686_v32 = vor.u32 %v7433_v55, %v7431_v52  ;;  %v586_v4 = vshll.u32 %v5566_v23, 16  ;;  %v7947_v52 = vld [vmem:[%s9661_s0 + $0x78] sm:$0xf]  ;;  %v5569_v7 = vld [vmem:[%s9661_s0 + $0x84] sm:$0x1] }
  0x86   :  { %v925_v21 = vrot.slane %v924_v34, 4  ;;  %v751_v29 = vsel %vm7086_vm5, %v5598_v40, %v750_v49  ;;  %v755_v38 = vsel %vm7086_vm5, %v5599_v35, %v754_v42  ;;  %v9687_v43 = vor.u32 %v7442_v62, %v7435_v53  ;;  %v5585_v33 = vld [vmem:[%s9661_s0 + $0x80] sm:$0xe] }
  0x87   :  { %v584_v8 = vrot.slane %v9686_v32, 4  ;;  %v939_v59 = vrot.slane %v938_v1, 4  ;;  %v5713_v36 = vcombine.low %v751_v29, %v755_v38  ;;  %v588_v28 = vrot.slane %v586_v4, 5 }
  0x88   :  { %v598_v44 = vrot.slane %v9687_v43, 4  ;;  %v930_v55 = vsel %vm7072_vm4, %v925_v21, %v929_v48  ;;  %v600_v23 = vshll.u32 %v5567_v58, 16  ;;  %v946_v62 = vshrl.u32 %v7927_v6, 16  ;;  %v5584_v58 = vld [vmem:[%s9661_s0 + $0x78] sm:$0xe] }
  0x89   :  { %v944_v53 = vsel %vm7072_vm4, %v939_v59, %v943_v24  ;;  %v949_v11 = vshll.u32 %v7927_v6, 16  ;;  %v955_v41 = vshll.u32 %v7935_v46, 16  ;;  %2326 = vmatprep.mubr.bf16.mxu0 %v5713_v36  ;;  %v589_v26 = vsel %vm7072_vm4, %v584_v8, %v588_v28  ;;  %v7985_v59 = vld [vmem:[%s9661_s0 + $0x80] sm:$0xf] }
  0x8a   :  { %v5728_v18 = vcombine.low %v930_v55, %v944_v53  ;;  %v602_v22 = vrot.slane %v600_v23, 5  ;;  %v960_v19 = vshrl.u32 %v7947_v52, 16  ;;  %v948_v20 = vrot.slane %v946_v62, 4 }
  0x8b   :  { %v951_v50 = vrot.slane %v949_v11, 5  ;;  %v957_v48 = vrot.slane %v955_v41, 5  ;;  %v963_v30 = vshll.u32 %v7947_v52, 16  ;;  %v969_v40 = vshll.u32 %v7954_v47, 16 }
  0x8c   :  { %2415 = vmatprep.mubr.bf16.mxu1 %v5728_v18  ;;  %v603_v34 = vsel %vm7072_vm4, %v598_v44, %v602_v22  ;;  %v962_v63 = vrot.slane %v960_v19, 4  ;;  %v5721_v1 = vcombine.low %v7927_v6, %v7947_v52  ;;  %v5600_v21 = vrot.slane %v5584_v58, 9  ;;  %v7993_v44 = vld [vmem:[%s9661_s0 + $0x84] sm:$0x1]  ;;  %v5570_v58 = vld [vmem:[%s9661_s0 + $0x8c] sm:$0x1] }
  0x8d   :  { %2416 = vmatmul.mubr.bf16.gmra.mxu1 %v5720_v14  ;;  %v5705_v49 = vcombine.low %v589_v26, %v603_v34  ;;  %v952_v35 = vor.u32 %v951_v50, %v948_v20  ;;  %v965_v42 = vrot.slane %v963_v30, 5  ;;  %v971_v24 = vrot.slane %v969_v40, 5  ;;  %v5586_v20 = vld [vmem:[%s9661_s0 + $0x88] sm:$0xe]  ;;  %v5571_v34 = vld [vmem:[%s9661_s0 + $0x94] sm:$0x1] }
  0x8e   :  { %v758_v32 = vrot.slane %v5568_v12, 5  ;;  %v5601_v8 = vrot.slane %v5585_v33, 9  ;;  %v762_v4 = vrot.slane %v5569_v7, 5  ;;  %v9688_v6 = vor.u32 %v7489_v60, %v7487_v37  ;;  %v8005_v37 = vld [vmem:[%s9661_s0 + $0x88] sm:$0xf] }
  0x8f   :  { %2327 = vmatmul.mubr.bf16.gmra.mxu0 %v5705_v49  ;;  %v953_v29 = vrot.slane %v952_v35, 4  ;;  %v966_v38 = vor.u32 %v965_v42, %v962_v63  ;;  %v614_v43 = vshll.u32 %v5568_v12, 16  ;;  %v9689_v36 = vor.u32 %v7496_v57, %v7491_v31  ;;  %v8012_v12 = vld [vmem:[%s9661_s0 + $0x8c] sm:$0x1]  ;;  %v5587_v63 = vld [vmem:[%s9661_s0 + $0x90] sm:$0xe] }
  0x90   :  { %v612_v14 = vrot.slane %v9688_v6, 4  ;;  %v759_v52 = vsel %vm7086_vm5, %v5600_v21, %v758_v32  ;;  %v763_v55 = vsel %vm7086_vm5, %v5601_v8, %v762_v4  ;;  %v628_v23 = vshll.u32 %v5569_v7, 16  ;;  %v8043_v4 = vld [vmem:[%s9661_s0 + $0x90] sm:$0xf] }
  0x91   :  { %v626_v28 = vrot.slane %v9689_v36, 4  ;;  %v958_v60 = vsel %vm7072_vm4, %v953_v29, %v957_v48  ;;  %v967_v53 = vrot.slane %v966_v38, 4  ;;  %v5714_v62 = vcombine.low %v759_v52, %v763_v55  ;;  %v8048_v29 = vld [vmem:[%s9661_s0 + $0x94] sm:$0x1] }
  0x92   :  { %v616_v11 = vrot.slane %v614_v43, 5  ;;  %v630_v41 = vrot.slane %v628_v23, 5  ;;  %v974_v31 = vshrl.u32 %v7985_v59, 16  ;;  %v977_v57 = vshll.u32 %v7985_v59, 16 }
  0x93   :  { %v983_v18 = vshll.u32 %v7993_v44, 16  ;;  %v972_v26 = vsel %vm7072_vm4, %v967_v53, %v971_v24  ;;  %2334 = vmatprep.mubr.bf16.mxu0 %v5714_v62  ;;  %v988_v19 = vshrl.u32 %v8005_v37, 16  ;;  %v991_v7 = vshll.u32 %v8005_v37, 16 }
  0x94   :  { %v617_v22 = vsel %vm7072_vm4, %v612_v14, %v616_v11  ;;  %v5729_v50 = vcombine.low %v958_v60, %v972_v26  ;;  %v631_v48 = vsel %vm7072_vm4, %v626_v28, %v630_v41  ;;  %v976_v30 = vrot.slane %v974_v31, 4  ;;  %v8068_v11 = vld [vmem:[%s9661_s0 + $0x9c] sm:$0x1] }
  0x95   :  { %v979_v33 = vrot.slane %v977_v57, 5  ;;  %v5706_v40 = vcombine.low %v617_v22, %v631_v48  ;;  %v985_v49 = vrot.slane %v983_v18, 5  ;;  %v990_v35 = vrot.slane %v988_v19, 4  ;;  %v5636_v57 = vld [vmem:[%s9661_s0 + $0x10] sm:$0xe] }
  0x96   :  { %v993_v42 = vrot.slane %v991_v7, 5  ;;  %2423 = vmatprep.mubr.bf16.mxu1 %v5729_v50  ;;  %v997_v24 = vshll.u32 %v8012_v12, 16  ;;  %v5722_v32 = vcombine.low %v7985_v59, %v8005_v37  ;;  %v5602_v8 = vrot.slane %v5586_v20, 9  ;;  %v8053_v59 = vld [vmem:[%s9661_s0 + $0x98] sm:$0xf] }
  0x97   :  { %v980_v21 = vor.u32 %v979_v33, %v976_v30  ;;  %2424 = vmatmul.mubr.bf16.gmra.mxu1 %v5721_v1  ;;  %2335 = vmatmul.mubr.bf16.gmra.mxu0 %v5706_v40  ;;  %v766_v6 = vrot.slane %v5570_v58, 5  ;;  %v5603_v14 = vrot.slane %v5587_v63, 9  ;;  %v770_v43 = vrot.slane %v5571_v34, 5  ;;  %v5637_v22 = vld [vmem:[%s9661_s0 + $0x18] sm:$0xe] }
  0x98   :  { %v994_v38 = vor.u32 %v993_v42, %v990_v35  ;;  %v999_v55 = vrot.slane %v997_v24, 5  ;;  %v9690_v36 = vor.u32 %v7555_v3, %v7553_v61  ;;  %v642_v23 = vshll.u32 %v5570_v58, 16  ;;  %v5638_v50 = vld [vmem:[%s9661_s0 + $0x20] sm:$0xe]  ;;  %v5639_v48 = vld [vmem:[%s9661_s0 + $0x28] sm:$0xe] }
  0x99   :  { %v981_v52 = vrot.slane %v980_v21, 4  ;;  %v767_v1 = vsel %vm7086_vm5, %v5602_v8, %v766_v6  ;;  %v771_v60 = vsel %vm7086_vm5, %v5603_v14, %v770_v43  ;;  %v9691_v53 = vor.u32 %v7564_v13, %v7557_v10  ;;  %v5640_v40 = vld [vmem:[%s9661_s0 + $0x30] sm:$0xe]  ;;  %v5641_v14 = vld [vmem:[%s9661_s0 + $0x38] sm:$0xe] }
  0x9a   :  { %v640_v28 = vrot.slane %v9690_v36, 4  ;;  %v995_v37 = vrot.slane %v994_v38, 4  ;;  %v5715_v3 = vcombine.low %v767_v1, %v771_v60  ;;  %v644_v41 = vrot.slane %v642_v23, 5 }
  0x9b   :  { %v654_v62 = vrot.slane %v9691_v53, 4  ;;  %v986_v61 = vsel %vm7072_vm4, %v981_v52, %v985_v49  ;;  %v656_v31 = vshll.u32 %v5571_v34, 16  ;;  %v1002_v10 = vshrl.u32 %v8043_v4, 16  ;;  %v5644_v53 = vld [vmem:[%s9661_s0 + $0x60] sm:$0xe] }
  0x9c   :  { %v1000_v18 = vsel %vm7072_vm4, %v995_v37, %v999_v55  ;;  %v1005_v13 = vshll.u32 %v8043_v4, 16  ;;  %v1011_v26 = vshll.u32 %v8048_v29, 16  ;;  %2342 = vmatprep.mubr.bf16.mxu0 %v5715_v3  ;;  %v645_v7 = vsel %vm7072_vm4, %v640_v28, %v644_v41  ;;  %v5642_v28 = vld [vmem:[%s9661_s0 + $0x40] sm:$0xe]  ;;  %v5643_v37 = vld [vmem:[%s9661_s0 + $0x48] sm:$0xe] }
  0x9d   :  { %v5730_v19 = vcombine.low %v986_v61, %v1000_v18  ;;  %v658_v58 = vrot.slane %v656_v31, 5  ;;  %v1016_v20 = vshrl.u32 %v8053_v59, 16  ;;  %v1004_v30 = vrot.slane %v1002_v10, 4  ;;  %v5645_v31 = vld [vmem:[%s9661_s0 + $0x68] sm:$0xe] }
  0x9e   :  { %v1007_v33 = vrot.slane %v1005_v13, 5  ;;  %v1013_v34 = vrot.slane %v1011_v26, 5  ;;  %v1019_v63 = vshll.u32 %v8053_v59, 16  ;;  %v1025_v42 = vshll.u32 %v8068_v11, 16 }
  0x9f   :  { %2431 = vmatprep.mubr.bf16.mxu1 %v5730_v19  ;;  %v659_v49 = vsel %vm7072_vm4, %v654_v62, %v658_v58  ;;  %v1018_v35 = vrot.slane %v1016_v20, 4  ;;  %v5723_v21 = vcombine.low %v8043_v4, %v8053_v59  ;;  %v5652_v6 = vrot.slane %v5636_v57, 9  ;;  %v5649_v20 = vld [vmem:[%s9661_s0 + $0x88] sm:$0xe] }
  0xa0   :  { %2432 = vmatmul.mubr.bf16.gmra.mxu1 %v5722_v32  ;;  %v5707_v24 = vcombine.low %v645_v7, %v659_v49  ;;  %v1008_v8 = vor.u32 %v1007_v33, %v1004_v30  ;;  %v1021_v38 = vrot.slane %v1019_v63, 5  ;;  %v1027_v43 = vrot.slane %v1025_v42, 5  ;;  %v5650_v30 = vld [vmem:[%s9661_s0 + $0x90] sm:$0xe] }
  0xa1   :  { %v1079_v52 = vrot.slane %v7633_v25, 5  ;;  %v5653_v55 = vrot.slane %v5637_v22, 9  ;;  %v1083_v36 = vrot.slane %v7645_v39, 5  ;;  %v5654_v59 = vrot.slane %v5638_v50, 9 }
  0xa2   :  { %2343 = vmatmul.mubr.bf16.gmra.mxu0 %v5707_v24  ;;  %v1009_v32 = vrot.slane %v1008_v8, 4  ;;  %v1022_v4 = vor.u32 %v1021_v38, %v1018_v35  ;;  %v5655_v23 = vrot.slane %v5639_v48, 9  ;;  %v5656_v39 = vrot.slane %v5640_v40, 9 }
  0xa3   :  { %v1080_v1 = vsel %vm7086_vm5, %v5652_v6, %v1079_v52  ;;  %v1084_v25 = vsel %vm7086_vm5, %v5653_v55, %v1083_v36  ;;  %v1095_v60 = vrot.slane %v7749_v27, 5  ;;  %v1088_v41 = vsel %vm7086_vm5, %v5654_v59, %v1087_v17 }
  0xa4   :  { %v1014_v62 = vsel %vm7072_vm4, %v1009_v32, %v1013_v34  ;;  %v1023_v61 = vrot.slane %v1022_v4, 4  ;;  %v5732_v3 = vcombine.low %v1080_v1, %v1084_v25  ;;  %v1092_v27 = vsel %vm7086_vm5, %v5655_v23, %v1091_v51  ;;  %v5647_v51 = vld [vmem:[%s9661_s0 + $0x78] sm:$0xe] }
  0xa5   :  { %v1096_v57 = vsel %vm7086_vm5, %v5656_v39, %v1095_v60  ;;  %v5657_v18 = vrot.slane %v5641_v14, 9  ;;  %v1099_v10 = vrot.slane %v7771_v9, 5  ;;  %v5733_v13 = vcombine.low %v1088_v41, %v1092_v27  ;;  %v5648_v9 = vld [vmem:[%s9661_s0 + $0x80] sm:$0xe] }
  0xa6   :  { %v1028_v17 = vsel %vm7072_vm4, %v1023_v61, %v1027_v43  ;;  %6639 = vmatprep.mubr.bf16.mxu0 %v5732_v3  ;;  %v5658_v26 = vrot.slane %v5642_v28, 9  ;;  %v1103_v2 = vrot.slane %v7810_v45, 5  ;;  %v5659_v7 = vrot.slane %v5643_v37, 9 }
  0xa7   :  { %v5731_v22 = vcombine.low %v1014_v62, %v1028_v17  ;;  %v1100_v19 = vsel %vm7086_vm5, %v5657_v18, %v1099_v10  ;;  %v1107_v58 = vrot.slane %v7835_v15, 5  ;;  %v5660_v50 = vrot.slane %v5644_v53, 9  ;;  %v5651_v15 = vld [vmem:[%s9661_s0 + $0x98] sm:$0xe] }
  0xa8   :  { %v5734_v45 = vcombine.low %v1096_v57, %v1100_v19  ;;  %v1111_v48 = vrot.slane %v7877_v56, 5  ;;  %v5661_v33 = vrot.slane %v5645_v31, 9  ;;  %v1115_v34 = vrot.slane %v7896_v16, 5 }
  0xa9   :  { %2439 = vmatprep.mubr.bf16.mxu1 %v5731_v22  ;;  %v1104_v63 = vsel %vm7086_vm5, %v5658_v26, %v1103_v2  ;;  %v1108_v56 = vsel %vm7086_vm5, %v5659_v7, %v1107_v58  ;;  %v5662_v40 = vrot.slane %v5646_v0, 9  ;;  %v1119_v49 = vrot.slane %v7935_v46, 5 }
  0xaa   :  { %2440 = vmatmul.mubr.bf16.gmra.mxu1 %v5723_v21  ;;  %6640 = vmatmul.mubr.bf16.vlgmr.msra.gmra.mxu0 %v5733_v13  ;;  %v5663_v35 = vrot.slane %v5647_v51, 9  ;;  %v1123_v42 = vrot.slane %v7954_v47, 5  ;;  %v5664_v16 = vrot.slane %v5648_v9, 9  ;;  %v1127_v24 = vrot.slane %v7993_v44, 5 }
  0xab   :  { %6643 = vmatprep.mubr.bf16.mxu0 %v5734_v45  ;;  %v1112_v21 = vsel %vm7086_vm5, %v5660_v50, %v1111_v48  ;;  %v1116_v8 = vsel %vm7086_vm5, %v5661_v33, %v1115_v34  ;;  %v5665_v38 = vrot.slane %v5649_v20, 9  ;;  %v1131_v6 = vrot.slane %v8012_v12, 5 }
  0xac   :  { %v5666_v14 = vrot.slane %v5650_v30, 9  ;;  %v1135_v43 = vrot.slane %v8048_v29, 5  ;;  %v5735_v46 = vcombine.low %v1104_v63, %v1108_v56  ;;  %v5667_v52 = vrot.slane %v5651_v15, 9 }
  0xad   :  { %v1139_v55 = vrot.slane %v8068_v11, 5  ;;  %v5736_v47 = vcombine.low %v1112_v21, %v1116_v8  ;;  %v1120_v44 = vsel %vm7086_vm5, %v5662_v40, %v1119_v49  ;;  %v1124_v36 = vsel %vm7086_vm5, %v5663_v35, %v1123_v42 }
  0xae   :  { %v1128_v28 = vsel %vm7086_vm5, %v5664_v16, %v1127_v24  ;;  %v1132_v12 = vsel %vm7086_vm5, %v5665_v38, %v1131_v6  ;;  %v5737_v29 = vcombine.low %v1120_v44, %v1124_v36  ;;  %v1136_v11 = vsel %vm7086_vm5, %v5666_v14, %v1135_v43 }
  0xaf   :  { %v5738_v32 = vcombine.low %v1128_v28, %v1132_v12  ;;  %v1140_v4 = vsel %vm7086_vm5, %v5667_v52, %v1139_v55 }
  0xb0   :  { %v5739_v59 = vcombine.low %v1136_v11, %v1140_v4 }
  0xb2   :  { %6644 = vmatmul.mubr.bf16.gmra.mxu0 %v5735_v46 }
  0xb3   :  { %6647 = vmatprep.mubr.bf16.mxu0 %v5736_v47 }
  0xba   :  { %6648 = vmatmul.mubr.bf16.gmra.mxu0 %v5737_v29 }
  0xbb   :  { %6651 = vmatprep.mubr.bf16.mxu0 %v5738_v32 }
  0xc2   :  { %6652 = vmatmul.mubr.bf16.gmra.mxu0 %v5739_v59 }
  0xc3   :  { %11 = vsyncpa [#allocation4], 0  ;;  %v6787_v23 = vld [vmem:[%s9664_s3 + $0x78] sm:$0xff]   ;;  %v8194_v25 = vld [vmem:[%s9663_s2] ss:$0 sm:$0xff]  ;;  %vm2713_vm7 = vcmask 1040384  }
  0xc4   :  { %6351 = vmatprep.subr.bf16.mxu1 %v6787_v23  ;;  %v6788_v53 = vld [vmem:[%s9664_s3 + $0x38] sm:$0xff]   ;;  %v6789_v13 = vld [vmem:[%s9664_s3 + $0x70] sm:$0xff]   ;;  %v6791_v33 = vld [vmem:[%s9664_s3 + $0x68] sm:$0xff]   ;;  %vm2714_vm6 = vsmask.f32 256  ;;  %vm2733_vm8 = vcmask 1044480  }
  0xc5   :  { %6352 = vmatpush3.bf16.msra.mxu1 %v6788_v53  ;;  %v6790_v22 = vld [vmem:[%s9664_s3 + $0x30] sm:$0xff]   ;;  %v6792_v35 = vld [vmem:[%s9664_s3 + $0x28] sm:$0xff]   ;;  %v6793_v44 = vld [vmem:[%s9664_s3 + $0x60] sm:$0xff]   ;;  %vm2734_vm9 = vsmask.f32 4352 }
  0xc6   :  { %6353 = vmatprep.subr.bf16.mxu1 %v6789_v13  ;;  %v6795_v12 = vld [vmem:[%s9664_s3 + $0xf8] sm:$0xff]   ;;  %vm8301_vm10 = vmand %vm2713_vm7, %vm2714_vm6 }
  0xc7   :  { %v6796_v4 = vld [vmem:[%s9664_s3 + $0xb8] sm:$0xff]   ;;  %6415 = vmatprep.subr.bf16.mxu0 %v6795_v12  ;;  %v6804_v12 = vld [vmem:[%s9664_s3 + $0x50] sm:$0xff]   ;;  %vm8307_vm11 = vmand %vm2733_vm8, %vm2734_vm9 }
  0xc8   :  { %6416 = vmatpush3.bf16.msra.mxu0 %v6796_v4 }
  0xc9   :  { %6354 = vmatpush3.bf16.msra.mxu1 %v6790_v22  ;;  %v6794_v22 = vld [vmem:[%s9664_s3 + $0x20] sm:$0xff]  }
  0xca   :  { %6355 = vmatprep.subr.bf16.mxu1 %v6791_v33 }
  0xcd   :  { %6356 = vmatpush3.bf16.msra.mxu1 %v6792_v35  ;;  %v6798_v35 = vld [vmem:[%s9664_s3 + $0x58] sm:$0xff]  }
  0xce   :  { %6357 = vmatprep.subr.bf16.mxu1 %v6793_v44 }
  0xd1   :  { %6358 = vmatpush3.bf16.msra.mxu1 %v6794_v22 }
  0xd2   :  { %6359 = vmatprep.subr.bf16.mxu1 %v6798_v35  ;;  %v6816_v35 = vld [vmem:[%s9664_s3 + $0x40] sm:$0xff]  }
  0xe2   :  { %v6095_v37 = vpop.f32.mrf.mxu0 }
  0xe4   :  { %v6159_v1 = vpop.f32.mrf.mxu1  ;;  %v6096_v39 = vpop.f32.mrf.mxu0 }
  0xe5   :  { %v6097_v62 = vadd.f32 %v6096_v39, %v6095_v37  ;;  %v6797_v39 = vld [vmem:[%s9664_s3 + $0xf0] sm:$0xff]  }
  0xe6   :  { %v6160_v60 = vpop.f32.mrf.mxu1  ;;  %v6098_v3 = vpop.f32.mrf.mxu0  ;;  %6417 = vmatprep.subr.bf16.mxu0 %v6797_v39 }
  0xe7   :  { %v6161_v61 = vadd.f32 %v6160_v60, %v6159_v1  ;;  %v2095_v31 = vadd.f32 %v6097_v62, %v8194_v25  ;;  %v6799_v62 = vld [vmem:[%s9664_s3 + $0xb0] sm:$0xff]  }
  0xe8   :  { %v6162_v41 = vpop.f32.mrf.mxu1  ;;  %v6099_v27 = vpop.f32.mrf.mxu0  ;;  %6418 = vmatpush3.bf16.msra.mxu0 %v6799_v62  ;;  %v9699_v62 = vmov 0 }
  0xe9   :  { %v8200_v18 = vadd.f32 %v6161_v61, %v2095_v31  ;;  %v6100_v10 = vadd.f32 %v6099_v27, %v6098_v3  ;;  %v9700_v62 = vsel %vm8307_vm11, 4294967295, %v9699_v62 }
  0xea   :  { %v6163_v57 = vpop.f32.mrf.mxu1  ;;  %v6101_v2 = vpop.f32.mrf.mxu0  ;;  %9701 = vst [vmem:[#allocation13_spill] sm:$0xff] %v9700_v62 }
  0xeb   :  { %v6164_v0 = vadd.f32 %v6163_v57, %v6162_v41  ;;  %v2098_v17 = vadd.f32 %v6100_v10, %v8194_v25  ;;  %v6801_v10 = vld [vmem:[%s9664_s3 + $0xe8] sm:$0xff]  }
  0xec   :  { %v6165_v26 = vpop.f32.mrf.mxu1  ;;  %v6102_v19 = vpop.f32.mrf.mxu0  ;;  %6419 = vmatprep.subr.bf16.mxu0 %v6801_v10 }
  0xed   :  { %v8206_v51 = vadd.f32 %v6164_v0, %v2098_v17  ;;  %v6103_v58 = vadd.f32 %v6102_v19, %v6101_v2  ;;  %v6802_v17 = vld [vmem:[%s9664_s3 + $0xa8] sm:$0xff]  }
  0xee   :  { %v6166_v9 = vpop.f32.mrf.mxu1  ;;  %v6104_v45 = vpop.f32.mrf.mxu0  ;;  %6420 = vmatpush3.bf16.msra.mxu0 %v6802_v17 }
  0xef   :  { %v6167_v7 = vadd.f32 %v6166_v9, %v6165_v26  ;;  %v2103_v50 = vadd.f32 %v6103_v58, %v8194_v25 }
  0xf0   :  { %v6168_v20 = vpop.f32.mrf.mxu1  ;;  %v6105_v30 = vpop.f32.mrf.mxu0 }
  0xf1   :  { %v8215_v34 = vadd.f32 %v6167_v7, %v2103_v50  ;;  %v6106_v15 = vadd.f32 %v6105_v30, %v6104_v45  ;;  %v6805_v50 = vld [vmem:[%s9664_s3 + $0xa0] sm:$0xff]  }
  0xf2   :  { %v6169_v48 = vpop.f32.mrf.mxu1  ;;  %v6107_v56 = vpop.f32.mrf.mxu0 }
  0xf3   :  { %v6170_v63 = vadd.f32 %v6169_v48, %v6168_v20  ;;  %v2106_v49 = vadd.f32 %v6106_v15, %v8194_v25  ;;  %v6803_v20 = vld [vmem:[%s9664_s3 + $0xe0] sm:$0xff]  }
  0xf4   :  { %v6171_v40 = vpop.f32.mrf.mxu1  ;;  %v6108_v42 = vpop.f32.mrf.mxu0  ;;  %6421 = vmatprep.subr.bf16.mxu0 %v6803_v20 }
  0xf5   :  { %v8221_v24 = vadd.f32 %v6170_v63, %v2106_v49  ;;  %v6109_v21 = vadd.f32 %v6108_v42, %v6107_v56  ;;  %6422 = vmatpush3.bf16.msra.mxu0 %v6805_v50  ;;  %v6808_v42 = vld [vmem:[%s9664_s3 + $0x98] sm:$0xff]   ;;  %v6812_v50 = vld [vmem:[%s9664_s3 + $0x8] sm:$0xff]  }
  0xf6   :  { %v6172_v16 = vpop.f32.mrf.mxu1  ;;  %v6110_v38 = vpop.f32.mrf.mxu0 }
  0xf7   :  { %v6173_v8 = vadd.f32 %v6172_v16, %v6171_v40  ;;  %v2111_v14 = vadd.f32 %v6109_v21, %v8194_v25  ;;  %v6807_v40 = vld [vmem:[%s9664_s3 + $0xd8] sm:$0xff]  }
  0xf8   :  { %v6174_v6 = vpop.f32.mrf.mxu1  ;;  %v6111_v43 = vpop.f32.mrf.mxu0  ;;  %6423 = vmatprep.subr.bf16.mxu0 %v6807_v40 }
  0xf9   :  { %v8224_v52 = vadd.f32 %v6173_v8, %v2111_v14  ;;  %v6112_v55 = vadd.f32 %v6111_v43, %v6110_v38  ;;  %v6800_v8 = vld [vmem:[%s9664_s3 + $0x18] sm:$0xff]   ;;  %6424 = vmatpush3.bf16.msra.mxu0 %v6808_v42 }
  0xfa   :  { %v6175_v46 = vpop.f32.mrf.mxu1  ;;  %v6113_v29 = vpop.f32.mrf.mxu0  ;;  %6360 = vmatpush3.bf16.msra.mxu1 %v6800_v8 }
  0xfb   :  { %v6176_v47 = vadd.f32 %v6175_v46, %v6174_v6  ;;  %v2114_v36 = vadd.f32 %v6112_v55, %v8194_v25  ;;  %6361 = vmatprep.subr.bf16.mxu1 %v6804_v12 }
  0xfc   :  { %v6177_v28 = vpop.f32.mrf.mxu1  ;;  %v6114_v23 = vpop.f32.mrf.mxu0 }
  0xfd   :  { %v8233_v32 = vadd.f32 %v6176_v47, %v2114_v36  ;;  %v6115_v1 = vadd.f32 %v6114_v23, %v6113_v29  ;;  %v6809_v29 = vld [vmem:[%s9664_s3 + $0xd0] sm:$0xff]  }
  0xfe   :  { %v6178_v11 = vpop.f32.mrf.mxu1  ;;  %v6116_v60 = vpop.f32.mrf.mxu0  ;;  %v6811_v23 = vld [vmem:[%s9664_s3 + $0x90] sm:$0xff]   ;;  %6425 = vmatprep.subr.bf16.mxu0 %v6809_v29 }
  0xff   :  { %v6179_v59 = vadd.f32 %v6178_v11, %v6177_v28  ;;  %v2119_v61 = vadd.f32 %v6115_v1, %v8194_v25  ;;  %v6906_v1 = vmov 0   ;;  %6426 = vmatpush3.bf16.msra.mxu0 %v6811_v23 }
 0x100   :  { %v6180_v37 = vpop.f32.mrf.mxu1  ;;  %v6117_v3 = vpop.f32.mrf.mxu0  ;;  %v2580_v39 = vrot.slane %v6906_v1, 7 }
 0x101   :  { %v8245_v41 = vadd.f32 %v6179_v59, %v2119_v61  ;;  %v6118_v31 = vadd.f32 %v6117_v3, %v6116_v60  ;;  %v6813_v61 = vld [vmem:[%s9664_s3 + $0xc8] sm:$0xff]  }
 0x102   :  { %v6181_v53 = vpop.f32.mrf.mxu1  ;;  %v6119_v0 = vpop.f32.mrf.mxu0  ;;  %v2716_v3 = vsel %vm8301_vm10, 0, %v2580_v39  ;;  %6427 = vmatprep.subr.bf16.mxu0 %v6813_v61  ;;  %v6822_v61 = vld [vmem:[%s9664_s3 + $0x178] sm:$0xff]  }
 0x103   :  { %v6182_v27 = vadd.f32 %v6181_v53, %v6180_v37  ;;  %v2122_v13 = vadd.f32 %v6118_v31, %v8194_v25  ;;  %v6806_v37 = vld [vmem:[%s9664_s3 + $0x10] sm:$0xff]   ;;  %v9696_v53 = vmov 0 }
 0x104   :  { %v6183_v57 = vpop.f32.mrf.mxu1  ;;  %v6120_v2 = vpop.f32.mrf.mxu0  ;;  %v9697_v53 = vsel %vm8301_vm10, 4294967295, %v9696_v53  ;;  %6362 = vmatpush3.bf16.msra.mxu1 %v6806_v37 }
 0x105   :  { %v8257_v19 = vadd.f32 %v6182_v27, %v2122_v13  ;;  %v6121_v7 = vadd.f32 %v6120_v2, %v6119_v0  ;;  %9698 = vst [vmem:[#allocation12_spill] sm:$0xff] %v9697_v53  ;;  %v6814_v27 = vld [vmem:[%s9664_s3 + $0x88] sm:$0xff]  }
 0x106   :  { %v6184_v26 = vpop.f32.mrf.mxu1  ;;  %v6122_v45 = vpop.f32.mrf.mxu0  ;;  %6428 = vmatpush3.bf16.msra.mxu0 %v6814_v27 }
 0x107   :  { %v6185_v9 = vadd.f32 %v6184_v26, %v6183_v57  ;;  %9692 = vst [vmem:[#allocation8_spill] sm:$0xff] %v8257_v19  ;;  %v2127_v48 = vadd.f32 %v6121_v7, %v8194_v25  ;;  %v2736_v57 = vsel %vm8307_vm11, %v2716_v3, 0  ;;  %v6810_v7 = vld [vmem:[%s9664_s3 + $0x48] sm:$0xff]  }
 0x108   :  { %v6186_v58 = vpop.f32.mrf.mxu1  ;;  %v6123_v33 = vpop.f32.mrf.mxu0  ;;  %v5813_v17 = vcombine.low %v2736_v57, %v2736_v57  ;;  %v5814_v13 = vcombine.high %v2736_v57, %v2736_v57  ;;  %6363 = vmatprep.subr.bf16.mxu1 %v6810_v7 }
 0x109   :  { %v8266_v15 = vadd.f32 %v6185_v9, %v2127_v48  ;;  %v6124_v63 = vadd.f32 %v6123_v33, %v6122_v45  ;;  %v6817_v48 = vld [vmem:[%s9664_s3 + $0x80] sm:$0xff]   ;;  %6364 = vmatpush3.bf16.msra.mxu1 %v6812_v50 }
 0x10a   :  { %v6187_v30 = vpop.f32.mrf.mxu1  ;;  %v6125_v16 = vpop.f32.mrf.mxu0  ;;  %2872 = vst [vmem:[#allocation2] sm:$0xf] %v5813_v17  ;;  %2873 = vst [vmem:[#allocation2 + $0x4] sm:$0x1] %v5814_v13  ;;  %6365 = vmatprep.subr.bf16.mxu1 %v6816_v35 }
 0x10b   :  { %9693 = vst [vmem:[#allocation9_spill] sm:$0xff] %v8266_v15  ;;  %v6188_v56 = vadd.f32 %v6187_v30, %v6186_v58  ;;  %v2130_v49 = vadd.f32 %v6124_v63, %v8194_v25  ;;  %2890 = vst [vmem:[#allocation2 + $0x48] sm:$0xf] %v5813_v17  ;;  %v6815_v58 = vld [vmem:[%s9664_s3 + $0xc0] sm:$0xff]  }
 0x10c   :  { %v6189_v21 = vpop.f32.mrf.mxu1  ;;  %v6126_v6 = vpop.f32.mrf.mxu0  ;;  %2891 = vst [vmem:[#allocation2 + $0x4c] sm:$0x1] %v5814_v13  ;;  %2892 = vst [vmem:[#allocation2 + $0x50] sm:$0xf] %v5813_v17  ;;  %6429 = vmatprep.subr.bf16.mxu0 %v6815_v58 }
 0x10d   :  { %v8281_v38 = vadd.f32 %v6188_v56, %v2130_v49  ;;  %v6127_v43 = vadd.f32 %v6126_v6, %v6125_v16  ;;  %2893 = vst [vmem:[#allocation2 + $0x54] sm:$0x1] %v5814_v13  ;;  %2910 = vst [vmem:[#allocation2 + $0x98] sm:$0xf] %v5813_v17  ;;  %6430 = vmatpush3.bf16.msra.mxu0 %v6817_v48  ;;  %v6818_v16 = vld [vmem:[%s9664_s3] sm:$0xff]  }
 0x10e   :  { %v6190_v14 = vpop.f32.mrf.mxu1  ;;  %v6128_v55 = vpop.f32.mrf.mxu0  ;;  %2911 = vst [vmem:[#allocation2 + $0x9c] sm:$0x1] %v5814_v13  ;;  %6366 = vmatpush3.bf16.msra.mxu1 %v6818_v16 }
 0x10f   :  { %9694 = vst [vmem:[#allocation10_spill] sm:$0xff] %v8281_v38  ;;  %v6191_v46 = vadd.f32 %v6190_v14, %v6189_v21  ;;  %v2135_v44 = vadd.f32 %v6127_v43, %v8194_v25  ;;  %6479 = vmatprep.subr.bf16.mxu1 %v6822_v61 }
 0x110   :  { %v6192_v47 = vpop.f32.mrf.mxu1  ;;  %v6129_v36 = vpop.f32.mrf.mxu0 }
 0x111   :  { %v8290_v11 = vadd.f32 %v6191_v46, %v2135_v44  ;;  %v6130_v4 = vadd.f32 %v6129_v36, %v6128_v55 }
 0x112   :  { %v6193_v28 = vpop.f32.mrf.mxu1  ;;  %v6131_v10 = vpop.f32.mrf.mxu0 }
 0x113   :  { %9695 = vst [vmem:[#allocation11_spill] sm:$0xff] %v8290_v11  ;;  %v6194_v59 = vadd.f32 %v6193_v28, %v6192_v47  ;;  %v2138_v60 = vadd.f32 %v6130_v4, %v8194_v25 }
 0x114   :  { %v6195_v0 = vpop.f32.mrf.mxu1  ;;  %v6132_v26 = vpop.f32.mrf.mxu0 }
 0x115   :  { %v8316_v31 = vadd.f32 %v6194_v59, %v2138_v60  ;;  %v6133_v9 = vadd.f32 %v6132_v26, %v6131_v10 }
 0x116   :  { %v6196_v2 = vpop.f32.mrf.mxu1  ;;  %v6134_v20 = vpop.f32.mrf.mxu0 }
 0x117   :  { %9702 = vst [vmem:[#allocation14_spill] sm:$0xff] %v8316_v31  ;;  %v6197_v22 = vadd.f32 %v6196_v2, %v6195_v0  ;;  %v2143_v30 = vadd.f32 %v6133_v9, %v8194_v25  ;;  %v8421_v31 = vld [vmem:[#allocation2] sm:$0xf] }
 0x118   :  { %v6198_v45 = vpop.f32.mrf.mxu1  ;;  %v6135_v33 = vpop.f32.mrf.mxu0  ;;  %9715 = vst [vmem:[#allocation27_spill] sm:$0xff] %v8421_v31  ;;  %v2948_v38 = vshrl.u32 %v8421_v31, 16 }
 0x119   :  { %v8336_v56 = vadd.f32 %v6197_v22, %v2143_v30  ;;  %v6136_v40 = vadd.f32 %v6135_v33, %v6134_v20 }
 0x11a   :  { %v6199_v63 = vpop.f32.mrf.mxu1  ;;  %v6137_v21 = vpop.f32.mrf.mxu0 }
 0x11b   :  { %9703 = vst [vmem:[#allocation15_spill] sm:$0xff] %v8336_v56  ;;  %v6200_v49 = vadd.f32 %v6199_v63, %v6198_v45  ;;  %v2146_v42 = vadd.f32 %v6136_v40, %v8194_v25 }
 0x11c   :  { %v8347_v6 = vpop.f32.mrf.mxu1  ;;  %v6138_v14 = vpop.f32.mrf.mxu0 }
 0x11d   :  { %v8345_v8 = vadd.f32 %v6200_v49, %v2146_v42  ;;  %v6139_v43 = vadd.f32 %v6138_v14, %v6137_v21  ;;  %v6836_v14 = vld [vmem:[%s9664_s3 + $0x1f8] sm:$0xff]  }
 0x11e   :  { %v6140_v46 = vpop.f32.mrf.mxu0  ;;  %v6202_v55 = vpop.f32.mrf.mxu1  ;;  %6543 = vmatprep.subr.bf16.mxu0 %v6836_v14  ;;  %v2951_v14 = vshll.u32 %v8421_v31, 16 }
 0x11f   :  { %9704 = vst [vmem:[#allocation16_spill] sm:$0xff] %v8345_v8 }
 0x120   :  { %v6141_v47 = vpop.f32.mrf.mxu0  ;;  %v8349_v44 = vpop.f32.mrf.mxu1  ;;  %v2953_v31 = vrot.slane %v2951_v14, 5 }
 0x122   :  { %v6223_v36 = vpop.f32.mrf.mxu0  ;;  %v8351_v12 = vpop.f32.mrf.mxu1 }
 0x124   :  { %v6224_v28 = vpop.f32.mrf.mxu0 }
 0x125   :  { %v6225_v19 = vadd.f32 %v6224_v28, %v6223_v36 }
 0x126   :  { %v6226_v29 = vpop.f32.mrf.mxu0 }
 0x128   :  { %v6227_v4 = vpop.f32.mrf.mxu0  ;;  %v8353_v59 = vpop.f32.mrf.mxu1 }
 0x12a   :  { %v6229_v23 = vpop.f32.mrf.mxu0  ;;  %v8355_v37 = vpop.f32.mrf.mxu1 }
 0x12c   :  { %v6230_v1 = vpop.f32.mrf.mxu0  ;;  %v8357_v39 = vpop.f32.mrf.mxu1 }
 0x12e   :  { %v6232_v60 = vpop.f32.mrf.mxu0  ;;  %v8362_v3 = vpop.f32.mrf.mxu1 }
 0x130   :  { %v6233_v27 = vpop.f32.mrf.mxu0 }
 0x132   :  { %v8364_v57 = vpop.f32.mrf.mxu1  ;;  %v6235_v10 = vpop.f32.mrf.mxu0 }
 0x134   :  { %v8366_v0 = vpop.f32.mrf.mxu1  ;;  %v6236_v17 = vpop.f32.mrf.mxu0 }
 0x135   :  { %v6237_v36 = vadd.f32 %v6236_v17, %v6235_v10  ;;  %v6295_v10 = vadd.f32 %v8366_v0, %v8364_v57 }
 0x136   :  { %v8368_v13 = vpop.f32.mrf.mxu1  ;;  %v6238_v26 = vpop.f32.mrf.mxu0 }
 0x138   :  { %v8370_v2 = vpop.f32.mrf.mxu1  ;;  %v6239_v9 = vpop.f32.mrf.mxu0 }
 0x13a   :  { %v8372_v22 = vpop.f32.mrf.mxu1 }
 0x13c   :  { %v8374_v7 = vpop.f32.mrf.mxu1  ;;  %v8376_v58 = vpop.f32.mrf.mxu0 }
 0x13e   :  { %v8378_v20 = vpop.f32.mrf.mxu1  ;;  %v8380_v45 = vpop.f32.mrf.mxu0 }
 0x140   :  { %v8382_v50 = vpop.f32.mrf.mxu1  ;;  %v8384_v48 = vpop.f32.mrf.mxu0 }
 0x142   :  { %v8386_v30 = vpop.f32.mrf.mxu0 }
 0x144   :  { %v8388_v33 = vpop.f32.mrf.mxu1  ;;  %v8390_v63 = vpop.f32.mrf.mxu0 }
 0x145   :  { %9705 = vst [vmem:[#allocation17_spill] sm:$0xff] %v8388_v33  ;;  %v8439_v33 = vld [vmem:[#allocation2] sm:$0xe] }
 0x146   :  { %v8392_v40 = vpop.f32.mrf.mxu1  ;;  %v8394_v49 = vpop.f32.mrf.mxu0 }
 0x147   :  { %9706 = vst [vmem:[#allocation18_spill] sm:$0xff] %v8392_v40  ;;  %v8437_v40 = vld [vmem:[#allocation2 + $0x4] sm:$0x1] }
 0x148   :  { %v8396_v35 = vpop.f32.mrf.mxu1  ;;  %v8398_v42 = vpop.f32.mrf.mxu0 }
 0x149   :  { %9707 = vst [vmem:[#allocation19_spill] sm:$0xff] %v8396_v35  ;;  %v6142_v35 = vadd.f32 %v6141_v47, %v6140_v46  ;;  %v3224_v46 = vrot.slane %v8437_v40, 5 }
 0x14a   :  { %v8400_v16 = vpop.f32.mrf.mxu1  ;;  %v8402_v21 = vpop.f32.mrf.mxu0 }
 0x14b   :  { %9708 = vst [vmem:[#allocation20_spill] sm:$0xff] %v8400_v16  ;;  %v6203_v16 = vadd.f32 %v6202_v55, %v8347_v6  ;;  %v5847_v6 = vrot.slane %v8439_v33, 9  ;;  %v2154_v47 = vadd.f32 %v6142_v35, %v8194_v25 }
 0x14d   :  { %v8407_v61 = vpop.f32.mrf.mxu1 }
 0x14e   :  { %9709 = vst [vmem:[#allocation21_spill] sm:$0xff] %v8407_v61 }
 0x14f   :  { %v8409_v54 = vpop.f32.mrf.mxu1  ;;  %v8411_v5 = vpop.f32.mrf.mxu0 }
 0x150   :  { %9710 = vst [vmem:[#allocation22_spill] sm:$0xff] %v8409_v54 }
 0x151   :  { %v8413_v62 = vpop.f32.mrf.mxu1  ;;  %v8415_v53 = vpop.f32.mrf.mxu0 }
 0x152   :  { %9711 = vst [vmem:[#allocation23_spill] sm:$0xff] %v8413_v62  ;;  %9712 = vst [vmem:[#allocation24_spill] sm:$0xff] %v8415_v53  ;;  %v2151_v62 = vadd.f32 %v6139_v43, %v8194_v25  ;;  %v6234_v43 = vadd.f32 %v6233_v27, %v6232_v60  ;;  %v2957_v60 = vshll.u32 %v8437_v40, 16  ;;  %v6292_v25 = vadd.f32 %v8362_v3, %v8357_v39 }
 0x153   :  { %v8417_v8 = vpop.f32.mrf.mxu1  ;;  %v8419_v56 = vpop.f32.mrf.mxu0 }
 0x154   :  { %9713 = vst [vmem:[#allocation25_spill] sm:$0xff] %v8417_v8  ;;  %9714 = vst [vmem:[#allocation26_spill] sm:$0xff] %v8419_v56  ;;  %v6228_v56 = vadd.f32 %v6227_v4, %v6226_v29  ;;  %v8445_v55 = vadd.f32 %v6203_v16, %v2151_v62  ;;  %v2920_v29 = vld [vmem:[#allocation2 + $0x50] sm:$0xf]  ;;  %v2289_v4 = vadd.f32 %v6225_v19, %v8200_v18  ;;  %v8475_v57 = vrot.slane %v2957_v60, 5  ;;  %v9726_v60 = vld [vmem:[#allocation18_spill] sm:$0xff] }
 0x155   :  { %v8423_v11 = vpop.f32.mrf.mxu0  ;;  %v6289_v62 = vadd.f32 %v8355_v37, %v8353_v59  ;;  %v2300_v18 = vadd.f32 %v6234_v43, %v8221_v24  ;;  %v3060_v19 = vshrl.u32 %v2920_v29, 16  ;;  %v2305_v59 = vadd.f32 %v6237_v36, %v8224_v52  ;;  %v9723_v36 = vld [vmem:[#allocation8_spill] sm:$0xff] }
 0x156   :  { %9716 = vst [vmem:[#allocation28_spill] sm:$0xff] %v8423_v11  ;;  %v2950_v11 = vrot.slane %v2948_v38, 4  ;;  %v2292_v27 = vadd.f32 %v6228_v56, %v8206_v51  ;;  %v6301_v51 = vadd.f32 %v8374_v7, %v8372_v22  ;;  %v6243_v56 = vadd.f32 %v8380_v45, %v8376_v58  ;;  %v8487_v22 = vld [vmem:[#allocation2 + $0x54] sm:$0x1] }
 0x157   :  { %v8427_v61 = vpop.f32.mrf.mxu1  ;;  %v8429_v54 = vpop.f32.mrf.mxu0  ;;  %v6304_v24 = vadd.f32 %v8382_v50, %v8378_v20  ;;  %v6246_v52 = vadd.f32 %v8386_v30, %v8384_v48  ;;  %v8489_v7 = vrot.slane %v3060_v19, 4  ;;  %v6252_v45 = vadd.f32 %v8402_v21, %v8398_v42 }
 0x158   :  { %9717 = vst [vmem:[#allocation29_spill] sm:$0xff] %v8427_v61  ;;  %9718 = vst [vmem:[#allocation30_spill] sm:$0xff] %v8429_v54  ;;  %v6231_v61 = vadd.f32 %v6230_v1, %v6229_v23  ;;  %v6240_v23 = vadd.f32 %v6239_v9, %v6238_v26  ;;  %v2954_v1 = vor.u32 %v2953_v31, %v2950_v11  ;;  %v3063_v11 = vshll.u32 %v2920_v29, 16  ;;  %v8483_v9 = vld [vmem:[#allocation2 + $0x50] sm:$0xe] }
 0x159   :  { %v8433_v8 = vpop.f32.mrf.mxu1  ;;  %v8435_v15 = vpop.f32.mrf.mxu0  ;;  %v6298_v31 = vadd.f32 %v8370_v2, %v8368_v13  ;;  %v2386_v13 = vadd.f32 %v6289_v62, %v2289_v4  ;;  %v8479_v26 = vadd.f32 %v6292_v25, %v2292_v27  ;;  %v2313_v20 = vadd.f32 %v6243_v56, %v8245_v41  ;;  %v9720_v16 = vld [vmem:[#allocation24_spill] sm:$0xff] }
 0x15a   :  { %9719 = vst [vmem:[#allocation31_spill] sm:$0xff] %v8433_v8  ;;  %v6206_v8 = vadd.f32 %v8351_v12, %v8349_v44  ;;  %v2297_v44 = vadd.f32 %v6231_v61, %v8215_v34  ;;  %v2308_v3 = vadd.f32 %v6240_v23, %v8233_v32  ;;  %v8481_v2 = vrot.slane %v2954_v1, 4  ;;  %v9725_v1 = vld [vmem:[#allocation17_spill] sm:$0xff] }
 0x15b   :  { %v8441_v53 = vpop.f32.mrf.mxu1  ;;  %v6262_v54 = vpop.f32.mrf.mxu0  ;;  %v6249_v32 = vadd.f32 %v8394_v49, %v8390_v63  ;;  %v8491_v58 = vrot.slane %v3063_v11, 5  ;;  %v2397_v30 = vadd.f32 %v6298_v31, %v2300_v18  ;;  %v8496_v35 = vadd.f32 %v6301_v51, %v2305_v59  ;;  %v9721_v49 = vld [vmem:[#allocation26_spill] sm:$0xff]  ;;  %v9729_v18 = vld [vmem:[#allocation20_spill] sm:$0xff]  ;;  %v9730_v11 = vld [vmem:[#allocation21_spill] sm:$0xff] }
 0x15c   :  { %v8470_v39 = vadd.f32 %v6206_v8, %v2154_v47  ;;  %v2394_v8 = vadd.f32 %v6295_v10, %v2297_v44  ;;  %v6255_v63 = vadd.f32 %v9720_v16, %v8411_v5  ;;  %v8502_v43 = vadd.f32 %v6304_v24, %v2308_v3  ;;  %v9727_v5 = vld [vmem:[#allocation9_spill] sm:$0xff]  ;;  %v9728_v10 = vld [vmem:[#allocation19_spill] sm:$0xff]  ;;  %v9731_v31 = vld [vmem:[#allocation22_spill] sm:$0xff] }
 0x15d   :  { %v8450_v38 = vpop.f32.mrf.mxu1  ;;  %v6263_v28 = vpop.f32.mrf.mxu0  ;;  %v9722_v61 = vld [vmem:[#allocation28_spill] sm:$0xff]  ;;  %v2316_v41 = vadd.f32 %v6246_v52, %v9723_v36  ;;  %v6307_v62 = vadd.f32 %v9726_v60, %v9725_v1  ;;  %v2321_v27 = vadd.f32 %v6249_v32, %v9727_v5  ;;  %v3066_v25 = vor.u32 %v8491_v58, %v8489_v7  ;;  %v9733_v59 = vld [vmem:[#allocation23_spill] sm:$0xff]  ;;  %v9734_v51 = vld [vmem:[#allocation25_spill] sm:$0xff] }
 0x15e   :  { %v6258_v14 = vadd.f32 %v9722_v61, %v9721_v49  ;;  %v6264_v21 = vadd.f32 %v6263_v28, %v6262_v54  ;;  %v3069_v44 = vshll.u32 %v8487_v22, 16  ;;  %v6310_v19 = vadd.f32 %v9729_v18, %v9728_v10  ;;  %v9732_v54 = vld [vmem:[#allocation10_spill] sm:$0xff]  ;;  %v9735_v52 = vld [vmem:[#allocation11_spill] sm:$0xff]  ;;  %v9740_v18 = vld [vmem:[#allocation16_spill] sm:$0xff] }
 0x15f   :  { %v9724_v29 = vld [vmem:[#allocation30_spill] sm:$0xff]  ;;  %v2324_v28 = vadd.f32 %v6252_v45, %v9732_v54  ;;  %v6316_v56 = vadd.f32 %v9734_v51, %v9733_v59  ;;  %v2329_v32 = vadd.f32 %v6255_v63, %v9735_v52  ;;  %v9736_v16 = vld [vmem:[#allocation29_spill] sm:$0xff]  ;;  %v6322_v60 = vadd.f32 %v8450_v38, %v8441_v53  ;;  %v9739_v5 = vld [vmem:[#allocation15_spill] sm:$0xff] }
 0x160   :  { %v6323_v12 = vpop.f32.mrf.mxu1  ;;  %v6261_v42 = vadd.f32 %v8435_v15, %v9724_v29  ;;  %v6313_v15 = vadd.f32 %v9731_v31, %v9730_v11  ;;  %v9738_v36 = vld [vmem:[#allocation14_spill] sm:$0xff]  ;;  %v2340_v45 = vadd.f32 %v6264_v21, %v9740_v18  ;;  %v3225_v58 = vsel %vm7086_vm5, %v5847_v6, %v3224_v46 }
 0x161   :  { %v9737_v49 = vld [vmem:[#allocation31_spill] sm:$0xff]  ;;  %v2332_v29 = vadd.f32 %v6258_v14, %v9738_v36  ;;  %v8530_v14 = vadd.f32 %v6310_v19, %v2316_v41  ;;  %v2960_v18 = vsel %vm7072_vm4, %v8481_v2, %v8475_v57 }
 0x162   :  { %v6324_v34 = vpop.f32.mrf.mxu1  ;;  %v6265_v37 = vpop.f32.mrf.mxu0  ;;  %v6319_v61 = vadd.f32 %v9737_v49, %v9736_v16  ;;  %v2337_v10 = vadd.f32 %v6261_v42, %v9739_v5  ;;  %v2410_v49 = vadd.f32 %v6307_v62, %v2313_v20 }
 0x163   :  { %v6325_v59 = vadd.f32 %v6324_v34, %v6323_v12 }
 0x164   :  { %v6326_v0 = vpop.f32.mrf.mxu1  ;;  %v6266_v17 = vpop.f32.mrf.mxu0 }
 0x165   :  { %v6267_v11 = vadd.f32 %v6266_v17, %v6265_v37 }
 0x166   :  { %v6327_v50 = vpop.f32.mrf.mxu1  ;;  %v6268_v48 = vpop.f32.mrf.mxu0 }
 0x167   :  { %v6328_v51 = vadd.f32 %v6327_v50, %v6326_v0  ;;  %v2345_v37 = vadd.f32 %v6267_v11, %v8445_v55  ;;  %v8537_v0 = vadd.f32 %v6319_v61, %v2329_v32 }
 0x168   :  { %v6269_v4 = vpop.f32.mrf.mxu0 }
 0x169   :  { %v6270_v52 = vadd.f32 %v6269_v4, %v6268_v48  ;;  %v8541_v48 = vadd.f32 %v6325_v59, %v2337_v10  ;;  %v8543_v41 = vadd.f32 %v6328_v51, %v2340_v45 }
 0x16a   :  { %v6329_v3 = vpop.f32.mrf.mxu1  ;;  %v6641_v24 = vpop.f32.mrf.mxu0 }
 0x16b   :  { %v2491_v1 = vadd.f32 %v6641_v24, %v2394_v8  ;;  %v8532_v8 = vadd.f32 %v6313_v15, %v2321_v27  ;;  %v8534_v24 = vadd.f32 %v6316_v56, %v2324_v28 }
 0x16c   :  { %v6330_v31 = vpop.f32.mrf.mxu1  ;;  %v2482_v54 = vpop.f32.mrf.mxu0 }
 0x16d   :  { %v2547_v47 = vmax.f32 %v2491_v1, 0.0  ;;  %v2483_v63 = vadd.f32 %v2482_v54, %v2386_v13  ;;  %v6331_v17 = vadd.f32 %v6330_v31, %v6329_v3  ;;  %v8539_v13 = vadd.f32 %v6322_v60, %v2332_v29 }
 0x16e   :  { %v6332_v23 = vpop.f32.mrf.mxu1  ;;  %v6642_v16 = vpop.f32.mrf.mxu0 }
 0x16f   :  { %v2563_v53 = vpack.c.bf16 %v2547_v47, %v2547_v47  ;;  %v2545_v38 = vmax.f32 %v2483_v63, 0.0  ;;  %v2494_v42 = vadd.f32 %v6642_v16, %v2397_v30  ;;  %v2348_v47 = vadd.f32 %v6270_v52, %v8470_v39 }
 0x170   :  { %v6333_v12 = vpop.f32.mrf.mxu1  ;;  %v2485_v34 = vpop.f32.mrf.mxu0  ;;  %v8547_v61 = vadd.f32 %v6331_v17, %v2345_v37 }
 0x171   :  { %v2599_v50 = vshrl.u32 %v2563_v53, 16  ;;  %v2561_v20 = vpack.c.bf16 %v2545_v38, %v2545_v38  ;;  %v6334_v30 = vadd.f32 %v6333_v12, %v6332_v23  ;;  %v2548_v21 = vmax.f32 %v2494_v42, 0.0 }
 0x172   :  { %v2486_v4 = vadd.f32 %v2485_v34, %v8479_v26  ;;  %v6645_v55 = vpop.f32.mrf.mxu0  ;;  %v2602_v27 = vshll.u32 %v2563_v53, 16 }
 0x173   :  { %v2601_v62 = vrot.slane %v2599_v50, 7  ;;  %v2585_v19 = vshrl.u32 %v2561_v20, 16  ;;  %v2507_v15 = vadd.f32 %v6645_v55, %v2410_v49  ;;  %v2588_v28 = vshll.u32 %v2561_v20, 16 }
 0x174   :  { %v2564_v56 = vpack.c.bf16 %v2548_v21, %v2548_v21  ;;  %v2546_v3 = vmax.f32 %v2486_v4, 0.0  ;;  %v2498_v32 = vpop.f32.mrf.mxu0  ;;  %v8550_v10 = vadd.f32 %v6334_v30, %v2348_v47 }
 0x175   :  { %v2604_v36 = vor.u32 %v2602_v27, %v2601_v62  ;;  %v2587_v29 = vrot.slane %v2585_v19, 7  ;;  %v2551_v1 = vmax.f32 %v2507_v15, 0.0  ;;  %v2499_v39 = vadd.f32 %v2498_v32, %v8496_v35 }
 0x176   :  { %v2606_v23 = vshrl.u32 %v2564_v56, 16  ;;  %v2609_v60 = vshll.u32 %v2564_v56, 16  ;;  %v2562_v5 = vpack.c.bf16 %v2546_v3, %v2546_v3  ;;  %v6646_v26 = vpop.f32.mrf.mxu0 }
 0x177   :  { %v2719_v45 = vsel %vm8301_vm10, 0, %v2604_v36  ;;  %v2590_v11 = vor.u32 %v2588_v28, %v2587_v29  ;;  %v2567_v31 = vpack.c.bf16 %v2551_v1, %v2551_v1  ;;  %v2549_v54 = vmax.f32 %v2499_v39, 0.0 }
 0x178   :  { %v2739_v51 = vsel %vm8307_vm11, %v2719_v45, 0  ;;  %v2608_v63 = vrot.slane %v2606_v23, 7  ;;  %v2592_v52 = vshrl.u32 %v2562_v5, 16  ;;  %v2595_v16 = vshll.u32 %v2562_v5, 16  ;;  %v2501_v49 = vpop.f32.mrf.mxu0 }
 0x179   :  { %v5819_v35 = vcombine.low %v2739_v51, %v2739_v51  ;;  %v5820_v53 = vcombine.high %v2739_v51, %v2739_v51  ;;  %v2717_v38 = vsel %vm8301_vm10, 0, %v2590_v11  ;;  %v2627_v42 = vshrl.u32 %v2567_v31, 16 }
 0x17a   :  { %v2737_v37 = vsel %vm8307_vm11, %v2717_v38, 0  ;;  %v2611_v17 = vor.u32 %v2609_v60, %v2608_v63  ;;  %v2594_v12 = vrot.slane %v2592_v52, 7  ;;  %v2630_v34 = vshll.u32 %v2567_v31, 16  ;;  %v6649_v50 = vpop.f32.mrf.mxu0 }
 0x17b   :  { %2878 = vst [vmem:[#allocation2 + $0x18] sm:$0xf] %v5819_v35  ;;  %2879 = vst [vmem:[#allocation2 + $0x1c] sm:$0x1] %v5820_v53  ;;  %v5815_v20 = vcombine.low %v2737_v37, %v2737_v37  ;;  %v5816_v47 = vcombine.high %v2737_v37, %v2737_v37  ;;  %v2629_v30 = vrot.slane %v2627_v42, 7  ;;  %v2565_v21 = vpack.c.bf16 %v2549_v54, %v2549_v54 }
 0x17c   :  { %v2720_v4 = vsel %vm8301_vm10, 0, %v2611_v17  ;;  %v2597_v55 = vor.u32 %v2595_v16, %v2594_v12  ;;  %v2510_v62 = vadd.f32 %v6646_v26, %v8530_v14  ;;  %v2502_v27 = vadd.f32 %v2501_v49, %v8502_v43  ;;  %v2514_v19 = vpop.f32.mrf.mxu0 }
 0x17d   :  { %2874 = vst [vmem:[#allocation2 + $0x8] sm:$0xf] %v5815_v20  ;;  %2875 = vst [vmem:[#allocation2 + $0xc] sm:$0x1] %v5816_v47  ;;  %v2740_v15 = vsel %vm8307_vm11, %v2720_v4, 0  ;;  %v2632_v28 = vor.u32 %v2630_v34, %v2629_v30  ;;  %v2613_v56 = vshrl.u32 %v2565_v21, 16  ;;  %v2523_v35 = vadd.f32 %v6649_v50, %v8537_v0 }
 0x17e   :  { %v2616_v3 = vshll.u32 %v2565_v21, 16  ;;  %v5821_v32 = vcombine.low %v2740_v15, %v2740_v15  ;;  %v5822_v36 = vcombine.high %v2740_v15, %v2740_v15  ;;  %v2718_v29 = vsel %vm8301_vm10, 0, %v2597_v55  ;;  %v6650_v39 = vpop.f32.mrf.mxu0 }
 0x17f   :  { %v2552_v1 = vmax.f32 %v2510_v62, 0.0  ;;  %v2738_v14 = vsel %vm8307_vm11, %v2718_v29, 0  ;;  %v2723_v43 = vsel %vm8301_vm10, 0, %v2632_v28  ;;  %v2615_v23 = vrot.slane %v2613_v56, 7 }
 0x180   :  { %v2550_v60 = vmax.f32 %v2502_v27, 0.0  ;;  %2880 = vst [vmem:[#allocation2 + $0x20] sm:$0xf] %v5821_v32  ;;  %2881 = vst [vmem:[#allocation2 + $0x24] sm:$0x1] %v5822_v36  ;;  %v5817_v5 = vcombine.low %v2738_v14, %v2738_v14  ;;  %v5818_v26 = vcombine.high %v2738_v14, %v2738_v14  ;;  %v2743_v45 = vsel %vm8307_vm11, %v2723_v43, 0  ;;  %v2517_v31 = vpop.f32.mrf.mxu0 }
 0x181   :  { %v2568_v11 = vpack.c.bf16 %v2552_v1, %v2552_v1  ;;  %v5827_v54 = vcombine.low %v2743_v45, %v2743_v45  ;;  %v5828_v51 = vcombine.high %v2743_v45, %v2743_v45  ;;  %v2618_v63 = vor.u32 %v2616_v3, %v2615_v23 }
 0x182   :  { %v2566_v52 = vpack.c.bf16 %v2550_v60, %v2550_v60  ;;  %2876 = vst [vmem:[#allocation2 + $0x10] sm:$0xf] %v5817_v5  ;;  %2877 = vst [vmem:[#allocation2 + $0x14] sm:$0x1] %v5818_v26  ;;  %v2515_v53 = vadd.f32 %v2514_v19, %v8532_v8  ;;  %v6653_v38 = vpop.f32.mrf.mxu0  ;;  %v2526_v12 = vadd.f32 %v6650_v39, %v8539_v13  ;;  %v2555_v47 = vmax.f32 %v2523_v35, 0.0 }
 0x183   :  { %v2634_v16 = vshrl.u32 %v2568_v11, 16  ;;  %v2637_v49 = vshll.u32 %v2568_v11, 16  ;;  %2886 = vst [vmem:[#allocation2 + $0x38] sm:$0xf] %v5827_v54  ;;  %2887 = vst [vmem:[#allocation2 + $0x3c] sm:$0x1] %v5828_v51  ;;  %v2518_v19 = vadd.f32 %v2517_v31, %v8534_v24  ;;  %v2539_v56 = vadd.f32 %v6653_v38, %v8547_v61 }
 0x184   :  { %v2721_v42 = vsel %vm8301_vm10, 0, %v2618_v63  ;;  %v2620_v37 = vshrl.u32 %v2566_v52, 16  ;;  %v2623_v17 = vshll.u32 %v2566_v52, 16  ;;  %v2553_v30 = vmax.f32 %v2515_v53, 0.0  ;;  %v2530_v21 = vpop.f32.mrf.mxu0  ;;  %v8662_v6 = vld [vmem:[#allocation2 + $0x8] sm:$0xf] }
 0x185   :  { %v2741_v34 = vsel %vm8307_vm11, %v2721_v42, 0  ;;  %v2636_v20 = vrot.slane %v2634_v16, 7  ;;  %v2556_v4 = vmax.f32 %v2526_v12, 0.0  ;;  %v2571_v62 = vpack.c.bf16 %v2555_v47, %v2555_v47 }
 0x186   :  { %v5823_v0 = vcombine.low %v2741_v34, %v2741_v34  ;;  %v5824_v50 = vcombine.high %v2741_v34, %v2741_v34  ;;  %v2622_v8 = vrot.slane %v2620_v37, 7  ;;  %v2569_v27 = vpack.c.bf16 %v2553_v30, %v2553_v30  ;;  %v6654_v15 = vpop.f32.mrf.mxu0 }
 0x187   :  { %v2639_v55 = vor.u32 %v2637_v49, %v2636_v20  ;;  %v2572_v28 = vpack.c.bf16 %v2556_v4, %v2556_v4  ;;  %v2531_v3 = vadd.f32 %v2530_v21, %v8541_v48  ;;  %v2655_v36 = vshrl.u32 %v2571_v62, 16  ;;  %v8660_v40 = vld [vmem:[#allocation2 + $0x20] sm:$0xf] }
 0x188   :  { %2882 = vst [vmem:[#allocation2 + $0x28] sm:$0xf] %v5823_v0  ;;  %2883 = vst [vmem:[#allocation2 + $0x2c] sm:$0x1] %v5824_v50  ;;  %v2625_v13 = vor.u32 %v2623_v17, %v2622_v8  ;;  %v2658_v29 = vshll.u32 %v2571_v62, 16  ;;  %v2641_v1 = vshrl.u32 %v2569_v27, 16  ;;  %v2533_v5 = vpop.f32.mrf.mxu0  ;;  %v2542_v35 = vadd.f32 %v6654_v15, %v8550_v10 }
 0x189   :  { %v2724_v32 = vsel %vm8301_vm10, 0, %v2639_v55  ;;  %v2644_v14 = vshll.u32 %v2569_v27, 16  ;;  %v2662_v43 = vshrl.u32 %v2572_v28, 16  ;;  %v2657_v48 = vrot.slane %v2655_v36, 7  ;;  %v8606_v55 = vld [vmem:[#allocation2 + $0x8] sm:$0xf] }
 0x18a   :  { %v2744_v39 = vsel %vm8307_vm11, %v2724_v32, 0  ;;  %v2722_v24 = vsel %vm8301_vm10, 0, %v2625_v13  ;;  %v2643_v11 = vrot.slane %v2641_v1, 7  ;;  %v2665_v51 = vshll.u32 %v2572_v28, 16  ;;  %v8608_v13 = vld [vmem:[#allocation2 + $0x10] sm:$0xf] }
 0x18b   :  { %v5829_v23 = vcombine.low %v2744_v39, %v2744_v39  ;;  %v5830_v60 = vcombine.high %v2744_v39, %v2744_v39  ;;  %v2742_v61 = vsel %vm8307_vm11, %v2722_v24, 0  ;;  %v2664_v31 = vrot.slane %v2662_v43, 7 }
 0x18c   :  { %v5825_v26 = vcombine.low %v2742_v61, %v2742_v61  ;;  %v5826_v45 = vcombine.high %v2742_v61, %v2742_v61  ;;  %v2660_v54 = vor.u32 %v2658_v29, %v2657_v48  ;;  %v2554_v63 = vmax.f32 %v2518_v19, 0.0 }
 0x18d   :  { %2888 = vst [vmem:[#allocation2 + $0x40] sm:$0xf] %v5829_v23  ;;  %2889 = vst [vmem:[#allocation2 + $0x44] sm:$0x1] %v5830_v60  ;;  %v2559_v52 = vmax.f32 %v2539_v56, 0.0  ;;  %v2646_v16 = vor.u32 %v2644_v14, %v2643_v11  ;;  %v2557_v49 = vmax.f32 %v2531_v3, 0.0  ;;  %v2534_v53 = vadd.f32 %v2533_v5, %v8543_v41 }
 0x18e   :  { %2884 = vst [vmem:[#allocation2 + $0x30] sm:$0xf] %v5825_v26  ;;  %2885 = vst [vmem:[#allocation2 + $0x34] sm:$0x1] %v5826_v45  ;;  %v2727_v38 = vsel %vm8301_vm10, 0, %v2660_v54  ;;  %v2667_v42 = vor.u32 %v2665_v51, %v2664_v31  ;;  %v2570_v37 = vpack.c.bf16 %v2554_v63, %v2554_v63  ;;  %v2560_v47 = vmax.f32 %v2542_v35, 0.0 }
 0x18f   :  { %v2575_v17 = vpack.c.bf16 %v2559_v52, %v2559_v52  ;;  %v2747_v12 = vsel %vm8307_vm11, %v2727_v38, 0  ;;  %v2725_v34 = vsel %vm8301_vm10, 0, %v2646_v16  ;;  %v2573_v20 = vpack.c.bf16 %v2557_v49, %v2557_v49 }
 0x190   :  { %v5835_v30 = vcombine.low %v2747_v12, %v2747_v12  ;;  %v5836_v21 = vcombine.high %v2747_v12, %v2747_v12  ;;  %v2745_v10 = vsel %vm8307_vm11, %v2725_v34, 0  ;;  %v2728_v41 = vsel %vm8301_vm10, 0, %v2667_v42  ;;  %v3172_v12 = vld [vmem:[#allocation2 + $0x8] sm:$0xe] }
 0x191   :  { %v5831_v0 = vcombine.low %v2745_v10, %v2745_v10  ;;  %v5832_v50 = vcombine.high %v2745_v10, %v2745_v10  ;;  %v2748_v8 = vsel %vm8307_vm11, %v2728_v41, 0  ;;  %v2648_v4 = vshrl.u32 %v2570_v37, 16  ;;  %v8628_v41 = vld [vmem:[#allocation2 + $0xc] sm:$0x1] }
 0x192   :  { %2898 = vst [vmem:[#allocation2 + $0x68] sm:$0xf] %v5835_v30  ;;  %2899 = vst [vmem:[#allocation2 + $0x6c] sm:$0x1] %v5836_v21  ;;  %v5837_v62 = vcombine.low %v2748_v8, %v2748_v8  ;;  %v5838_v27 = vcombine.high %v2748_v8, %v2748_v8  ;;  %v2651_v19 = vshll.u32 %v2570_v37, 16  ;;  %v2683_v15 = vshrl.u32 %v2575_v17, 16 }
 0x193   :  { %2894 = vst [vmem:[#allocation2 + $0x58] sm:$0xf] %v5831_v0  ;;  %2895 = vst [vmem:[#allocation2 + $0x5c] sm:$0x1] %v5832_v50  ;;  %v2650_v28 = vrot.slane %v2648_v4, 7  ;;  %v2686_v56 = vshll.u32 %v2575_v17, 16  ;;  %v2576_v29 = vpack.c.bf16 %v2560_v47, %v2560_v47 }
 0x194   :  { %v2669_v3 = vshrl.u32 %v2573_v20, 16  ;;  %v2672_v32 = vshll.u32 %v2573_v20, 16  ;;  %2900 = vst [vmem:[#allocation2 + $0x70] sm:$0xf] %v5837_v62  ;;  %2901 = vst [vmem:[#allocation2 + $0x74] sm:$0x1] %v5838_v27  ;;  %v5919_v62 = vcombine.low %v8606_v55, %v8608_v13 }
 0x195   :  { %v2685_v36 = vrot.slane %v2683_v15, 7  ;;  %v2558_v1 = vmax.f32 %v2534_v53, 0.0  ;;  %v3320_v39 = vshrl.u32 %v8606_v55, 16  ;;  %v2653_v24 = vor.u32 %v2651_v19, %v2650_v28 }
 0x196   :  { %v2671_v14 = vrot.slane %v2669_v3, 7  ;;  %v3323_v43 = vshll.u32 %v8606_v55, 16  ;;  %v3334_v23 = vshrl.u32 %v8608_v13, 16  ;;  %v2690_v61 = vshrl.u32 %v2576_v29, 16  ;;  %5072 = vmatprep.mubr.bf16.mxu0 %v5919_v62 }
 0x197   :  { %v2688_v60 = vor.u32 %v2686_v56, %v2685_v36  ;;  %v2693_v48 = vshll.u32 %v2576_v29, 16  ;;  %v2574_v5 = vpack.c.bf16 %v2558_v1, %v2558_v1  ;;  %v2726_v26 = vsel %vm8301_vm10, 0, %v2653_v24 }
 0x198   :  { %v2674_v45 = vor.u32 %v2672_v32, %v2671_v14  ;;  %v3322_v11 = vrot.slane %v3320_v39, 4  ;;  %v3325_v31 = vrot.slane %v3323_v43, 5  ;;  %v2746_v54 = vsel %vm8307_vm11, %v2726_v26, 0  ;;  %v8678_v39 = vld [vmem:[#allocation2 + $0x10] sm:$0xf] }
 0x199   :  { %v2731_v51 = vsel %vm8301_vm10, 0, %v2688_v60  ;;  %v2692_v63 = vrot.slane %v2690_v61, 7  ;;  %v2676_v52 = vshrl.u32 %v2574_v5, 16  ;;  %v5833_v16 = vcombine.low %v2746_v54, %v2746_v54  ;;  %v8691_v60 = vld [vmem:[#allocation2 + $0x18] sm:$0xf]  ;;  %v6839_v61 = vld [vmem:[%s9664_s3 + $0x1f0] sm:$0xff]  }
 0x19a   :  { %v5834_v49 = vcombine.high %v2746_v54, %v2746_v54  ;;  %v2751_v35 = vsel %vm8307_vm11, %v2731_v51, 0  ;;  %v2729_v53 = vsel %vm8301_vm10, 0, %v2674_v45  ;;  %v2679_v30 = vshll.u32 %v2574_v5, 16 }
 0x19b   :  { %v5843_v38 = vcombine.low %v2751_v35, %v2751_v35  ;;  %v5844_v42 = vcombine.high %v2751_v35, %v2751_v35  ;;  %v2749_v37 = vsel %vm8307_vm11, %v2729_v53, 0  ;;  %v2695_v17 = vor.u32 %v2693_v48, %v2692_v63  ;;  %2896 = vst [vmem:[#allocation2 + $0x60] sm:$0xf] %v5833_v16  ;;  %v2931_v63 = vld [vmem:[#allocation2 + $0x1c] sm:$0x1] }
 0x19c   :  { %2897 = vst [vmem:[#allocation2 + $0x64] sm:$0x1] %v5834_v49  ;;  %v5839_v34 = vcombine.low %v2749_v37, %v2749_v37  ;;  %v5840_v20 = vcombine.high %v2749_v37, %v2749_v37  ;;  %v2678_v47 = vrot.slane %v2676_v52, 7  ;;  %v3337_v10 = vshll.u32 %v8608_v13, 16  ;;  %v8656_v13 = vld [vmem:[#allocation2 + $0x18] sm:$0xf] }
 0x19d   :  { %2906 = vst [vmem:[#allocation2 + $0x88] sm:$0xf] %v5843_v38  ;;  %2907 = vst [vmem:[#allocation2 + $0x8c] sm:$0x1] %v5844_v42  ;;  %v2732_v21 = vsel %vm8301_vm10, 0, %v2695_v17  ;;  %v8633_v0 = vrot.slane %v3066_v25, 4  ;;  %v3326_v28 = vor.u32 %v3325_v31, %v3322_v11  ;;  %v5920_v5 = vcombine.low %v8656_v13, %v8660_v40 }
 0x19e   :  { %v8637_v50 = vrot.slane %v3069_v44, 5  ;;  %2902 = vst [vmem:[#allocation2 + $0x78] sm:$0xf] %v5839_v34  ;;  %2903 = vst [vmem:[#allocation2 + $0x7c] sm:$0x1] %v5840_v20  ;;  %v2752_v8 = vsel %vm8307_vm11, %v2732_v21, 0  ;;  %v2681_v4 = vor.u32 %v2679_v30, %v2678_v47 }
 0x19f   :  { %v5848_v27 = vrot.slane %v3172_v12, 9  ;;  %v5845_v19 = vcombine.low %v2752_v8, %v2752_v8  ;;  %v5846_v15 = vcombine.high %v2752_v8, %v2752_v8  ;;  %v8651_v44 = vrot.slane %v3334_v23, 4  ;;  %v2930_v11 = vld [vmem:[#allocation2 + $0x14] sm:$0x1]  ;;  %v6844_v49 = vld [vmem:[%s9664_s3 + $0x1e8] sm:$0xff]  }
 0x1a0   :  { %v2730_v25 = vsel %vm8301_vm10, 0, %v2681_v4  ;;  %v8653_v56 = vrot.slane %v3337_v10, 5  ;;  %v3228_v55 = vrot.slane %v8628_v41, 5  ;;  %v9745_v3 = vrot.slane %v8487_v22, 5  ;;  %v6842_v31 = vld [vmem:[%s9664_s3 + $0x1b0] sm:$0xff]  }
 0x1a1   :  { %2908 = vst [vmem:[#allocation2 + $0x90] sm:$0xf] %v5845_v19  ;;  %2909 = vst [vmem:[#allocation2 + $0x94] sm:$0x1] %v5846_v15  ;;  %v2750_v33 = vsel %vm8307_vm11, %v2730_v25, 0  ;;  %v9746_v32 = vrot.slane %v8483_v9, 9  ;;  %v3072_v24 = vsel %vm7072_vm4, %v8633_v0, %v8637_v50 }
 0x1a2   :  { %v5841_v29 = vcombine.low %v2750_v33, %v2750_v33  ;;  %v5842_v59 = vcombine.high %v2750_v33, %v2750_v33  ;;  %v3229_v1 = vsel %vm7086_vm5, %v5848_v27, %v3228_v55  ;;  %v6838_v9 = vld [vmem:[%s9664_s3 + $0x1b8] sm:$0xff]   ;;  %v8687_v22 = vrot.slane %v3326_v28, 4  ;;  %v3173_v37 = vld [vmem:[#allocation2 + $0x10] sm:$0xe]  ;;  %v6846_v25 = vld [vmem:[%s9664_s3 + $0x1a8] sm:$0xff]  }
 0x1a3   :  { %v8674_v36 = vsel %vm7086_vm5, %v9746_v32, %v9745_v3  ;;  %v5911_v14 = vcombine.low %v3225_v58, %v3229_v1  ;;  %v3348_v43 = vshrl.u32 %v8656_v13, 16  ;;  %v3351_v23 = vshll.u32 %v8656_v13, 16  ;;  %v3174_v47 = vld [vmem:[#allocation2 + $0x18] sm:$0xe]  ;;  %v6847_v3 = vld [vmem:[%s9664_s3 + $0x1e0] sm:$0xff]  }
 0x1a4   :  { %2904 = vst [vmem:[#allocation2 + $0x80] sm:$0xf] %v5841_v29  ;;  %2905 = vst [vmem:[#allocation2 + $0x84] sm:$0x1] %v5842_v59  ;;  %v3340_v48 = vor.u32 %v8653_v56, %v8651_v44  ;;  %v2962_v26 = vshrl.u32 %v8662_v6, 16  ;;  %v2965_v45 = vshll.u32 %v8662_v6, 16 }
 0x1a5   :  { %5073 = vmatmul.mubr.bf16.vlgmr.msra.gmra.mxu0 %v5911_v14  ;;  %v3362_v54 = vshrl.u32 %v8660_v40, 16  ;;  %v3365_v51 = vshll.u32 %v8660_v40, 16  ;;  %v2976_v52 = vshrl.u32 %v8678_v39, 16  ;;  %v2979_v16 = vshll.u32 %v8678_v39, 16  ;;  %v8722_v40 = vld [vmem:[#allocation2 + $0x20] sm:$0xf] }
 0x1a6   :  { %5080 = vmatprep.mubr.bf16.mxu0 %v5920_v5  ;;  %v2964_v35 = vrot.slane %v2962_v26, 4  ;;  %v2967_v53 = vrot.slane %v2965_v45, 5  ;;  %v2971_v38 = vshll.u32 %v8628_v41, 16  ;;  %v2990_v42 = vshrl.u32 %v8691_v60, 16  ;;  %6544 = vmatpush3.bf16.msra.mxu0 %v6838_v9  ;;  %v3291_v9 = vld [vmem:[#allocation2 + $0x28] sm:$0xf] }
 0x1a7   :  { %v2978_v17 = vrot.slane %v2976_v52, 4  ;;  %v2981_v12 = vrot.slane %v2979_v16, 5  ;;  %v2985_v34 = vshll.u32 %v2930_v11, 16  ;;  %v2993_v20 = vshll.u32 %v8691_v60, 16  ;;  %6545 = vmatprep.subr.bf16.mxu0 %v6839_v61  ;;  %v3292_v14 = vld [vmem:[#allocation2 + $0x30] sm:$0xf] }
 0x1a8   :  { %v8715_v30 = vrot.slane %v3348_v43, 4  ;;  %v2968_v21 = vor.u32 %v2967_v53, %v2964_v35  ;;  %v2992_v10 = vrot.slane %v2990_v42, 4  ;;  %v2999_v8 = vshll.u32 %v2931_v63, 16  ;;  %v6823_v61 = vld [vmem:[%s9664_s3 + $0x138] sm:$0xff]   ;;  %v6826_v45 = vld [vmem:[%s9664_s3 + $0x170] sm:$0xff]   ;;  %v6850_v16 = vld [vmem:[%s9664_s3 + $0x1a0] sm:$0xff]  }
 0x1a9   :  { %v2982_v4 = vor.u32 %v2981_v12, %v2978_v17  ;;  %v2995_v62 = vrot.slane %v2993_v20, 5  ;;  %v5849_v27 = vrot.slane %v3173_v37, 9  ;;  %v3232_v41 = vrot.slane %v2930_v11, 5  ;;  %v8746_v11 = vld [vmem:[#allocation2 + $0x24] sm:$0x1]  ;;  %v6852_v17 = vld [vmem:[%s9664_s3 + $0x1d8] sm:$0xff]  }
 0x1aa   :  { %v2969_v19 = vrot.slane %v2968_v21, 4  ;;  %v2973_v15 = vrot.slane %v2971_v38, 5  ;;  %v5850_v28 = vrot.slane %v3174_v47, 9  ;;  %v3236_v58 = vrot.slane %v2931_v63, 5  ;;  %6546 = vmatpush3.bf16.msra.mxu0 %v6842_v31  ;;  %v8758_v52 = vld [vmem:[#allocation2 + $0x28] sm:$0xf] }
 0x1ab   :  { %v2983_v44 = vrot.slane %v2982_v4, 4  ;;  %v2987_v56 = vrot.slane %v2985_v34, 5  ;;  %v2996_v55 = vor.u32 %v2995_v62, %v2992_v10  ;;  %v3233_v33 = vsel %vm7086_vm5, %v5849_v27, %v3232_v41  ;;  %6547 = vmatprep.subr.bf16.mxu0 %v6844_v49  ;;  %v2933_v49 = vld [vmem:[#allocation2 + $0x2c] sm:$0x1]  ;;  %v3175_v35 = vld [vmem:[#allocation2 + $0x20] sm:$0xe] }
 0x1ac   :  { %v8727_v32 = vrot.slane %v3340_v48, 4  ;;  %v2974_v29 = vsel %vm7072_vm4, %v2969_v19, %v2973_v15  ;;  %v3001_v59 = vrot.slane %v2999_v8, 5  ;;  %v3237_v1 = vsel %vm7086_vm5, %v5850_v28, %v3236_v58  ;;  %v3176_v37 = vld [vmem:[#allocation2 + $0x28] sm:$0xe]  ;;  %v6827_v21 = vld [vmem:[%s9664_s3 + $0x130] sm:$0xff]  }
 0x1ad   :  { %v5903_v43 = vcombine.low %v2960_v18, %v2974_v29  ;;  %v2988_v48 = vsel %vm7072_vm4, %v2983_v44, %v2987_v56  ;;  %v2997_v5 = vrot.slane %v2996_v55, 4  ;;  %v5912_v26 = vcombine.low %v3233_v33, %v3237_v1  ;;  %v9747_v18 = vld [vmem:[#allocation27_spill] sm:$0xff]  ;;  %v6855_v29 = vld [vmem:[%s9664_s3 + $0x1d0] sm:$0xff]  }
 0x1ae   :  { %v8750_v31 = vrot.slane %v3351_v23, 5  ;;  %v8752_v57 = vrot.slane %v3362_v54, 4  ;;  %v8754_v2 = vrot.slane %v3365_v51, 5  ;;  %v5895_v63 = vcombine.low %v9747_v18, %v8662_v6  ;;  %6548 = vmatpush3.bf16.msra.mxu0 %v6846_v25  ;;  %v6830_v27 = vld [vmem:[%s9664_s3 + $0x168] sm:$0xff]   ;;  %v6854_v25 = vld [vmem:[%s9664_s3 + $0x198] sm:$0xff]  }
 0x1af   :  { %4975 = vmatprep.mubr.bf16.mxu1 %v5903_v43  ;;  %v3002_v13 = vsel %vm7072_vm4, %v2997_v5, %v3001_v59  ;;  %5081 = vmatmul.mubr.bf16.gmra.mxu0 %v5912_v26  ;;  %v3376_v23 = vshrl.u32 %v3291_v9, 16  ;;  %v5921_v54 = vcombine.low %v3291_v9, %v3292_v14  ;;  %v3004_v51 = vshrl.u32 %v8722_v40, 16  ;;  %v6831_v58 = vld [vmem:[%s9664_s3 + $0x128] sm:$0xff]   ;;  %v8801_v43 = vld [vmem:[#allocation2 + $0x40] sm:$0xf] }
 0x1b0   :  { %4976 = vmatmul.mubr.bf16.vlgmr.msra.gmra.mxu1 %v5895_v63  ;;  %v5904_v6 = vcombine.low %v2988_v48, %v3002_v13  ;;  %v3379_v53 = vshll.u32 %v3291_v9, 16  ;;  %v3390_v38 = vshrl.u32 %v3292_v14, 16  ;;  %v3007_v42 = vshll.u32 %v8722_v40, 16  ;;  %6549 = vmatprep.subr.bf16.mxu0 %v6847_v3  ;;  %v8790_v3 = vld [vmem:[#allocation2 + $0x38] sm:$0xf] }
 0x1b1   :  { %6480 = vmatpush3.bf16.msra.mxu1 %v6823_v61  ;;  %v3393_v12 = vshll.u32 %v3292_v14, 16  ;;  %5088 = vmatprep.mubr.bf16.mxu0 %v5921_v54  ;;  %v3006_v34 = vrot.slane %v3004_v51, 4  ;;  %v3018_v20 = vshrl.u32 %v8758_v52, 16  ;;  %v3021_v47 = vshll.u32 %v8758_v52, 16  ;;  %v8803_v61 = vld [vmem:[#allocation2 + $0x30] sm:$0xf] }
 0x1b2   :  { %4983 = vmatprep.mubr.bf16.mxu1 %v5904_v6  ;;  %6481 = vmatprep.subr.bf16.mxu1 %v6826_v45  ;;  %v3009_v10 = vrot.slane %v3007_v42, 5  ;;  %v3013_v8 = vshll.u32 %v8746_v11, 16  ;;  %v5851_v4 = vrot.slane %v3175_v35, 9  ;;  %v3240_v62 = vrot.slane %v8746_v11, 5  ;;  %v8809_v11 = vld [vmem:[#allocation2 + $0x38] sm:$0xf] }
 0x1b3   :  { %v3020_v41 = vrot.slane %v3018_v20, 4  ;;  %v3023_v19 = vrot.slane %v3021_v47, 5  ;;  %v3027_v15 = vshll.u32 %v2933_v49, 16  ;;  %v5852_v28 = vrot.slane %v3176_v37, 9  ;;  %6550 = vmatpush3.bf16.msra.mxu0 %v6850_v16  ;;  %v2934_v13 = vld [vmem:[#allocation2 + $0x34] sm:$0x1] }
 0x1b4   :  { %v8786_v44 = vrot.slane %v3376_v23, 4  ;;  %v8788_v56 = vrot.slane %v3379_v53, 5  ;;  %v3010_v55 = vor.u32 %v3009_v10, %v3006_v34  ;;  %v3244_v33 = vrot.slane %v2933_v49, 5  ;;  %6551 = vmatprep.subr.bf16.mxu0 %v6852_v17  ;;  %v6835_v23 = vld [vmem:[%s9664_s3 + $0x120] sm:$0xff]   ;;  %v6858_v54 = vld [vmem:[%s9664_s3 + $0x190] sm:$0xff]  }
 0x1b5   :  { %v8795_v59 = vrot.slane %v3390_v38, 4  ;;  %v8797_v1 = vrot.slane %v3393_v12, 5  ;;  %v5896_v9 = vcombine.low %v8678_v39, %v8691_v60  ;;  %v3024_v14 = vor.u32 %v3023_v19, %v3020_v41  ;;  %6482 = vmatpush3.bf16.msra.mxu1 %v6827_v21  ;;  %v6834_v39 = vld [vmem:[%s9664_s3 + $0x160] sm:$0xff]   ;;  %v3177_v53 = vld [vmem:[#allocation2 + $0x30] sm:$0xe]  ;;  %v6860_v38 = vld [vmem:[%s9664_s3 + $0x1c8] sm:$0xff]  }
 0x1b6   :  { %v3011_v48 = vrot.slane %v3010_v55, 4  ;;  %v3015_v5 = vrot.slane %v3013_v8, 5  ;;  %v3241_v26 = vsel %vm7086_vm5, %v5851_v4, %v3240_v62  ;;  %v3245_v45 = vsel %vm7086_vm5, %v5852_v28, %v3244_v33  ;;  %6483 = vmatprep.subr.bf16.mxu1 %v6830_v27  ;;  %v2935_v17 = vld [vmem:[#allocation2 + $0x3c] sm:$0x1]  ;;  %v3178_v20 = vld [vmem:[#allocation2 + $0x38] sm:$0xe] }
 0x1b7   :  { %v3025_v60 = vrot.slane %v3024_v14, 4  ;;  %v3029_v18 = vrot.slane %v3027_v15, 5  ;;  %v5913_v63 = vcombine.low %v3241_v26, %v3245_v45  ;;  %v3404_v16 = vshrl.u32 %v8790_v3, 16  ;;  %6552 = vmatpush3.bf16.msra.mxu0 %v6854_v25  ;;  %v6841_v4 = vld [vmem:[%s9664_s3 + $0x158] sm:$0xff]   ;;  %v6861_v62 = vld [vmem:[%s9664_s3 + $0x188] sm:$0xff]  }
 0x1b8   :  { %4984 = vmatmul.mubr.bf16.gmra.mxu1 %v5896_v9  ;;  %v3407_v49 = vshll.u32 %v8790_v3, 16  ;;  %v3418_v51 = vshrl.u32 %v8801_v43, 16  ;;  %v5922_v35 = vcombine.low %v8790_v3, %v8801_v43  ;;  %v3032_v6 = vshrl.u32 %v8803_v61, 16  ;;  %6553 = vmatprep.subr.bf16.mxu0 %v6855_v29  ;;  %v3295_v28 = vld [vmem:[#allocation2 + $0x58] sm:$0xf]  ;;  %v6863_v3 = vld [vmem:[%s9664_s3 + $0x1c0] sm:$0xff]  }
 0x1b9   :  { %v3016_v42 = vsel %vm7072_vm4, %v3011_v48, %v3015_v5  ;;  %v3030_v37 = vsel %vm7072_vm4, %v3025_v60, %v3029_v18  ;;  %5089 = vmatmul.mubr.bf16.gmra.mxu0 %v5913_v63  ;;  %v3035_v12 = vshll.u32 %v8803_v61, 16  ;;  %v3046_v34 = vshrl.u32 %v8809_v11, 16  ;;  %6484 = vmatpush3.bf16.msra.mxu1 %v6831_v58  ;;  %v6843_v5 = vld [vmem:[%s9664_s3 + $0x118] sm:$0xff]   ;;  %v3296_v60 = vld [vmem:[#allocation2 + $0x60] sm:$0xf] }
 0x1ba   :  { %v5905_v47 = vcombine.low %v3016_v42, %v3030_v37  ;;  %v3421_v21 = vshll.u32 %v8801_v43, 16  ;;  %5096 = vmatprep.mubr.bf16.mxu0 %v5922_v35  ;;  %v3034_v10 = vrot.slane %v3032_v6, 4  ;;  %v3049_v8 = vshll.u32 %v8809_v11, 16  ;;  %6485 = vmatprep.subr.bf16.mxu1 %v6834_v39  ;;  %v8857_v63 = vld [vmem:[#allocation2 + $0x58] sm:$0xf] }
 0x1bb   :  { %v3037_v27 = vrot.slane %v3035_v12, 5  ;;  %v3041_v41 = vshll.u32 %v2934_v13, 16  ;;  %v3048_v19 = vrot.slane %v3046_v34, 4  ;;  %v5853_v15 = vrot.slane %v3177_v53, 9  ;;  %6554 = vmatpush3.bf16.msra.mxu0 %v6858_v54  ;;  %v3180_v42 = vld [vmem:[#allocation2 + $0x58] sm:$0xe] }
 0x1bc   :  { %4991 = vmatprep.mubr.bf16.mxu1 %v5905_v47  ;;  %v3051_v58 = vrot.slane %v3049_v8, 5  ;;  %v3055_v25 = vshll.u32 %v2935_v17, 16  ;;  %v3248_v55 = vrot.slane %v2934_v13, 5  ;;  %v5854_v33 = vrot.slane %v3178_v20, 9  ;;  %6555 = vmatprep.subr.bf16.mxu0 %v6860_v38  ;;  %v8871_v20 = vld [vmem:[#allocation2 + $0x68] sm:$0xf] }
 0x1bd   :  { %v8846_v29 = vrot.slane %v3404_v16, 4  ;;  %v8848_v9 = vrot.slane %v3407_v49, 5  ;;  %v3038_v14 = vor.u32 %v3037_v27, %v3034_v10  ;;  %v3252_v48 = vrot.slane %v2935_v17, 5  ;;  %6486 = vmatpush3.bf16.msra.mxu1 %v6835_v23  ;;  %v6849_v16 = vld [vmem:[%s9664_s3 + $0x150] sm:$0xff]   ;;  %v6857_v27 = vld [vmem:[%s9664_s3 + $0x148] sm:$0xff]  }
 0x1be   :  { %v5897_v26 = vcombine.low %v8722_v40, %v8758_v52  ;;  %v3052_v45 = vor.u32 %v3051_v58, %v3048_v19  ;;  %v3249_v39 = vsel %vm7086_vm5, %v5853_v15, %v3248_v55  ;;  %v3432_v18 = vshrl.u32 %v3295_v28, 16  ;;  %6487 = vmatprep.subr.bf16.mxu1 %v6841_v4  ;;  %v2937_v40 = vld [vmem:[#allocation2 + $0x5c] sm:$0x1]  ;;  %v6866_v52 = vld [vmem:[%s9664_s3 + $0x180] sm:$0xff]  }
 0x1bf   :  { %v3039_v13 = vrot.slane %v3038_v14, 4  ;;  %v3043_v23 = vrot.slane %v3041_v41, 5  ;;  %v3253_v54 = vsel %vm7086_vm5, %v5854_v33, %v3252_v48  ;;  %v3435_v49 = vshll.u32 %v3295_v28, 16  ;;  %6556 = vmatpush3.bf16.msra.mxu0 %v6861_v62  ;;  %v3298_v62 = vld [vmem:[#allocation2 + $0x70] sm:$0xf] }
 0x1c0   :  { %v8867_v35 = vrot.slane %v3418_v51, 4  ;;  %4992 = vmatmul.mubr.bf16.gmra.mxu1 %v5897_v26  ;;  %v3053_v6 = vrot.slane %v3052_v45, 4  ;;  %v3057_v53 = vrot.slane %v3055_v25, 5  ;;  %v5914_v38 = vcombine.low %v3249_v39, %v3253_v54  ;;  %6557 = vmatprep.subr.bf16.mxu0 %v6863_v3  ;;  %v6851_v51 = vld [vmem:[%s9664_s3 + $0x110] sm:$0xff]   ;;  %v6859_v3 = vld [vmem:[%s9664_s3 + $0x108] sm:$0xff]  }
 0x1c1   :  { %v3044_v37 = vsel %vm7072_vm4, %v3039_v13, %v3043_v23  ;;  %v3446_v17 = vshrl.u32 %v3296_v60, 16  ;;  %v3449_v12 = vshll.u32 %v3296_v60, 16  ;;  %v5923_v34 = vcombine.low %v3295_v28, %v3296_v60  ;;  %6488 = vmatpush3.bf16.msra.mxu1 %v6843_v5  ;;  %v8898_v45 = vld [vmem:[#allocation2 + $0x60] sm:$0xf] }
 0x1c2   :  { %v3058_v47 = vsel %vm7072_vm4, %v3053_v6, %v3057_v53  ;;  %5097 = vmatmul.mubr.bf16.gmra.mxu0 %v5914_v38  ;;  %v8878_v10 = vrot.slane %v3432_v18, 4  ;;  %v3074_v8 = vshrl.u32 %v8857_v63, 16  ;;  %v3077_v4 = vshll.u32 %v8857_v63, 16  ;;  %6489 = vmatprep.subr.bf16.mxu1 %v6849_v16  ;;  %v8904_v18 = vld [vmem:[#allocation2 + $0x68] sm:$0xf]  ;;  %v6865_v16 = vld [vmem:[%s9664_s3 + $0x140] sm:$0xff]  }
 0x1c3   :  { %v5906_v41 = vcombine.low %v3044_v37, %v3058_v47  ;;  %v8885_v19 = vrot.slane %v3435_v49, 5  ;;  %5104 = vmatprep.mubr.bf16.mxu0 %v5923_v34  ;;  %v3083_v15 = vshll.u32 %v2937_v40, 16  ;;  %v5856_v28 = vrot.slane %v3180_v42, 9  ;;  %6558 = vmatpush3.bf16.msra.mxu0 %v6866_v52  ;;  %v2938_v6 = vld [vmem:[#allocation2 + $0x64] sm:$0x1] }
 0x1c4   :  { %v8889_v58 = vrot.slane %v3421_v21, 5  ;;  %v3076_v25 = vrot.slane %v3074_v8, 4  ;;  %v3079_v55 = vrot.slane %v3077_v4, 5  ;;  %v3260_v33 = vrot.slane %v2937_v40, 5  ;;  %v6867_v38 = vld [vmem:[%s9664_s3 + $0x100] sm:$0xff]   ;;  %v8925_v8 = vld [vmem:[%s9664_s3 + $0x238] sm:$0xff]  }
 0x1c5   :  { %4999 = vmatprep.mubr.bf16.mxu1 %v5906_v41  ;;  %v8894_v14 = vrot.slane %v3446_v17, 4  ;;  %v3460_v48 = vshrl.u32 %v8871_v20, 16  ;;  %v3463_v5 = vshll.u32 %v8871_v20, 16  ;;  %v3474_v26 = vshrl.u32 %v3298_v62, 16  ;;  %6490 = vmatpush3.bf16.msra.mxu1 %v6851_v51  ;;  %v3182_v34 = vld [vmem:[#allocation2 + $0x68] sm:$0xe] }
 0x1c6   :  { %v5898_v43 = vcombine.low %v8803_v61, %v8809_v11  ;;  %v3080_v21 = vor.u32 %v3079_v55, %v3076_v25  ;;  %v3261_v39 = vsel %vm7086_vm5, %v5856_v28, %v3260_v33  ;;  %v3477_v60 = vshll.u32 %v3298_v62, 16  ;;  %6491 = vmatprep.subr.bf16.mxu1 %v6857_v27  ;;  %v2939_v61 = vld [vmem:[#allocation2 + $0x6c] sm:$0x1] }
 0x1c7   :  { %v3438_v13 = vor.u32 %v8885_v19, %v8878_v10  ;;  %v3451_v23 = vrot.slane %v3449_v12, 5  ;;  %v3085_v54 = vrot.slane %v3083_v15, 5  ;;  %v5924_v49 = vcombine.low %v8871_v20, %v3298_v62  ;;  %v3181_v10 = vld [vmem:[#allocation2 + $0x60] sm:$0xe]  ;;  %v6883_v19 = vld [vmem:[#allocation2 + $0x50] sm:$0xf] }
 0x1c8   :  { %5000 = vmatmul.mubr.bf16.gmra.mxu1 %v5898_v43  ;;  %v3081_v11 = vrot.slane %v3080_v21, 4  ;;  %v5915_v40 = vcombine.low %v8674_v36, %v3261_v39  ;;  %v3462_v52 = vrot.slane %v3460_v48, 4  ;;  %v3088_v53 = vshrl.u32 %v8898_v45, 16 }
 0x1c9   :  { %v3465_v42 = vrot.slane %v3463_v5, 5  ;;  %v3476_v37 = vrot.slane %v3474_v26, 4  ;;  %v3091_v17 = vshll.u32 %v8898_v45, 16  ;;  %v3102_v12 = vshrl.u32 %v8904_v18, 16  ;;  %6492 = vmatpush3.bf16.msra.mxu1 %v6859_v3  ;;  %v3299_v5 = vld [vmem:[#allocation2 + $0x78] sm:$0xf] }
 0x1ca   :  { %v3086_v20 = vsel %vm7072_vm4, %v3081_v11, %v3085_v54  ;;  %5105 = vmatmul.mubr.bf16.gmra.mxu0 %v5915_v40  ;;  %v3479_v36 = vrot.slane %v3477_v60, 5  ;;  %v3090_v51 = vrot.slane %v3088_v53, 4  ;;  %v3105_v47 = vshll.u32 %v8904_v18, 16  ;;  %6493 = vmatprep.subr.bf16.mxu1 %v6865_v16  ;;  %v3300_v60 = vld [vmem:[#allocation2 + $0x80] sm:$0xf] }
 0x1cb   :  { %v3452_v4 = vor.u32 %v3451_v23, %v8894_v14  ;;  %v5907_v62 = vcombine.low %v3072_v24, %v3086_v20  ;;  %5112 = vmatprep.mubr.bf16.mxu0 %v5924_v49  ;;  %v3093_v27 = vrot.slane %v3091_v17, 5  ;;  %v3097_v41 = vshll.u32 %v2938_v6, 16  ;;  %v8941_v11 = vld [vmem:[#allocation2 + $0x70] sm:$0xf]  ;;  %v2940_v17 = vld [vmem:[#allocation2 + $0x74] sm:$0x1] }
 0x1cc   :  { %v5899_v15 = vcombine.low %v6883_v19, %v8857_v63  ;;  %v3104_v28 = vrot.slane %v3102_v12, 4  ;;  %v3107_v25 = vrot.slane %v3105_v47, 5  ;;  %v3111_v55 = vshll.u32 %v2939_v61, 16  ;;  %v3183_v12 = vld [vmem:[#allocation2 + $0x70] sm:$0xe] }
 0x1cd   :  { %5007 = vmatprep.mubr.bf16.mxu1 %v5907_v62  ;;  %v3094_v33 = vor.u32 %v3093_v27, %v3090_v51  ;;  %v5857_v3 = vrot.slane %v3181_v10, 9  ;;  %v3264_v48 = vrot.slane %v2938_v6, 5  ;;  %v5858_v14 = vrot.slane %v3182_v34, 9  ;;  %6494 = vmatpush3.bf16.msra.mxu1 %v6867_v38  ;;  %v8947_v6 = vld [vmem:[#allocation2 + $0x78] sm:$0xf] }
 0x1ce   :  { %v3466_v26 = vor.u32 %v3465_v42, %v3462_v52  ;;  %v3480_v43 = vor.u32 %v3479_v36, %v3476_v37  ;;  %v3108_v0 = vor.u32 %v3107_v25, %v3104_v28  ;;  %v3268_v50 = vrot.slane %v2939_v61, 5  ;;  %6655 = vmatprep.subr.bf16.mxu1 %v8925_v8  ;;  %v2941_v36 = vld [vmem:[#allocation2 + $0x7c] sm:$0x1] }
 0x1cf   :  { %v8935_v24 = vrot.slane %v3438_v13, 4  ;;  %v3095_v21 = vrot.slane %v3094_v33, 4  ;;  %v3099_v63 = vrot.slane %v3097_v41, 5  ;;  %v3265_v39 = vsel %vm7086_vm5, %v5857_v3, %v3264_v48  ;;  %v3184_v41 = vld [vmem:[#allocation2 + $0x78] sm:$0xe] }
 0x1d0   :  { %5008 = vmatmul.mubr.bf16.gmra.mxu1 %v5899_v15  ;;  %v3109_v16 = vrot.slane %v3108_v0, 4  ;;  %v3113_v23 = vrot.slane %v3111_v55, 5  ;;  %v3269_v54 = vsel %vm7086_vm5, %v5858_v14, %v3268_v50  ;;  %v3488_v49 = vshrl.u32 %v3299_v5, 16  ;;  %v3301_v55 = vld [vmem:[#allocation2 + $0x88] sm:$0xf] }
 0x1d1   :  { %v8943_v61 = vrot.slane %v3452_v4, 4  ;;  %v3100_v13 = vsel %vm7072_vm4, %v3095_v21, %v3099_v63  ;;  %v5916_v40 = vcombine.low %v3265_v39, %v3269_v54  ;;  %v3491_v52 = vshll.u32 %v3299_v5, 16  ;;  %v3302_v39 = vld [vmem:[#allocation2 + $0x90] sm:$0xf] }
 0x1d2   :  { %v8949_v53 = vrot.slane %v3466_v26, 4  ;;  %v8951_v38 = vrot.slane %v3480_v43, 4  ;;  %v3114_v42 = vsel %vm7072_vm4, %v3109_v16, %v3113_v23  ;;  %v5925_v37 = vcombine.low %v3299_v5, %v3300_v60 }
 0x1d3   :  { %v5908_v34 = vcombine.low %v3100_v13, %v3114_v42  ;;  %5113 = vmatmul.mubr.bf16.gmra.mxu0 %v5916_v40  ;;  %v3502_v20 = vshrl.u32 %v3300_v60, 16  ;;  %v3116_v51 = vshrl.u32 %v8941_v11, 16  ;;  %v3119_v47 = vshll.u32 %v8941_v11, 16 }
 0x1d4   :  { %v8957_v10 = vrot.slane %v3488_v49, 4  ;;  %v3505_v4 = vshll.u32 %v3300_v60, 16  ;;  %5120 = vmatprep.mubr.bf16.mxu0 %v5925_v37  ;;  %v3130_v62 = vshrl.u32 %v8947_v6, 16  ;;  %v3133_v27 = vshll.u32 %v8947_v6, 16 }
 0x1d5   :  { %5015 = vmatprep.mubr.bf16.mxu1 %v5908_v34  ;;  %v8961_v19 = vrot.slane %v3491_v52, 5  ;;  %v3118_v15 = vrot.slane %v3116_v51, 4  ;;  %v3121_v28 = vrot.slane %v3119_v47, 5  ;;  %v3125_v25 = vshll.u32 %v2940_v17, 16  ;;  %v8973_v52 = vld [vmem:[#allocation2 + $0x80] sm:$0xf] }
 0x1d6   :  { %v5900_v33 = vcombine.low %v8898_v45, %v8904_v18  ;;  %v3132_v3 = vrot.slane %v3130_v62, 4  ;;  %v3135_v48 = vrot.slane %v3133_v27, 5  ;;  %v3139_v14 = vshll.u32 %v2941_v36, 16  ;;  %v8979_v34 = vld [vmem:[#allocation2 + $0x88] sm:$0xf] }
 0x1d7   :  { %v8965_v5 = vrot.slane %v3502_v20, 4  ;;  %v3122_v26 = vor.u32 %v3121_v28, %v3118_v15  ;;  %v5859_v43 = vrot.slane %v3183_v12, 9  ;;  %v3272_v0 = vrot.slane %v2940_v17, 5  ;;  %v2942_v20 = vld [vmem:[#allocation2 + $0x84] sm:$0x1] }
 0x1d8   :  { %5016 = vmatmul.mubr.bf16.gmra.mxu1 %v5900_v33  ;;  %v3136_v50 = vor.u32 %v3135_v48, %v3132_v3  ;;  %v5860_v21 = vrot.slane %v3184_v41, 9  ;;  %v3276_v63 = vrot.slane %v2941_v36, 5  ;;  %v3516_v60 = vshrl.u32 %v3301_v55, 16  ;;  %v2943_v62 = vld [vmem:[#allocation2 + $0x8c] sm:$0x1] }
 0x1d9   :  { %v8967_v16 = vrot.slane %v3505_v4, 5  ;;  %v3123_v23 = vrot.slane %v3122_v26, 4  ;;  %v3127_v54 = vrot.slane %v3125_v25, 5  ;;  %v3519_v49 = vshll.u32 %v3301_v55, 16  ;;  %v8989_v25 = vld [vmem:[#allocation2 + $0x10] sm:$0xf] }
 0x1da   :  { %v3137_v45 = vrot.slane %v3136_v50, 4  ;;  %v3141_v18 = vrot.slane %v3139_v14, 5  ;;  %v3273_v13 = vsel %vm7086_vm5, %v5859_v43, %v3272_v0  ;;  %v3277_v40 = vsel %vm7086_vm5, %v5860_v21, %v3276_v63  ;;  %v3185_v14 = vld [vmem:[#allocation2 + $0x80] sm:$0xe]  ;;  %v3186_v21 = vld [vmem:[#allocation2 + $0x88] sm:$0xe] }
 0x1db   :  { %v3494_v42 = vor.u32 %v8961_v19, %v8957_v10  ;;  %v5917_v37 = vcombine.low %v3273_v13, %v3277_v40  ;;  %v8977_v17 = vrot.slane %v3516_v60, 4  ;;  %v3530_v12 = vshrl.u32 %v3302_v39, 16  ;;  %v9070_v19 = vld [vmem:[#allocation2 + $0x30] sm:$0xf] }
 0x1dc   :  { %v3128_v36 = vsel %vm7072_vm4, %v3123_v23, %v3127_v54  ;;  %v3142_v51 = vsel %vm7072_vm4, %v3137_v45, %v3141_v18  ;;  %v3533_v47 = vshll.u32 %v3302_v39, 16  ;;  %v5926_v4 = vcombine.low %v3301_v55, %v3302_v39  ;;  %v9001_v18 = vld [vmem:[#allocation2 + $0x18] sm:$0xf] }
 0x1dd   :  { %v5909_v27 = vcombine.low %v3128_v36, %v3142_v51  ;;  %5121 = vmatmul.mubr.bf16.gmra.mxu0 %v5917_v37  ;;  %v8985_v41 = vrot.slane %v3519_v49, 5  ;;  %v3144_v15 = vshrl.u32 %v8973_v52, 16  ;;  %v3147_v28 = vshll.u32 %v8973_v52, 16 }
 0x1de   :  { %5128 = vmatprep.mubr.bf16.mxu0 %v5926_v4  ;;  %v5901_v33 = vcombine.low %v8941_v11, %v8947_v6  ;;  %v3153_v3 = vshll.u32 %v2942_v20, 16  ;;  %v3158_v48 = vshrl.u32 %v8979_v34, 16  ;;  %v3161_v55 = vshll.u32 %v8979_v34, 16  ;;  %v8999_v11 = vld [vmem:[#allocation2 + $0x14] sm:$0x1] }
 0x1df   :  { %5023 = vmatprep.mubr.bf16.mxu1 %v5909_v27  ;;  %v8995_v26 = vrot.slane %v3530_v12, 4  ;;  %v3146_v43 = vrot.slane %v3144_v15, 4  ;;  %v3149_v0 = vrot.slane %v3147_v28, 5  ;;  %v3167_v50 = vshll.u32 %v2943_v62, 16 }
 0x1e0   :  { %v8997_v63 = vrot.slane %v3533_v47, 5  ;;  %5024 = vmatmul.mubr.bf16.gmra.mxu1 %v5901_v33  ;;  %v3155_v39 = vrot.slane %v3153_v3, 5  ;;  %v3160_v60 = vrot.slane %v3158_v48, 4  ;;  %v3163_v23 = vrot.slane %v3161_v55, 5  ;;  %v9006_v47 = vld [vmem:[#allocation2 + $0x1c] sm:$0x1] }
 0x1e1   :  { %v3150_v6 = vor.u32 %v3149_v0, %v3146_v43  ;;  %v3169_v54 = vrot.slane %v3167_v50, 5  ;;  %v5861_v49 = vrot.slane %v3185_v14, 9  ;;  %v3280_v45 = vrot.slane %v2942_v20, 5  ;;  %v3303_v14 = vld [vmem:[#allocation2 + $0xc] sm:$0x1] }
 0x1e2   :  { %v3164_v13 = vor.u32 %v3163_v23, %v3160_v60  ;;  %v5862_v40 = vrot.slane %v3186_v21, 9  ;;  %v3284_v37 = vrot.slane %v2943_v62, 5  ;;  %v3689_v12 = vshrl.u32 %v8989_v25, 16  ;;  %v3543_v43 = vld [vmem:[#allocation2 + $0x8] sm:$0xe] }
 0x1e3   :  { %v3151_v36 = vrot.slane %v3150_v6, 4  ;;  %v3281_v51 = vsel %vm7086_vm5, %v5861_v49, %v3280_v45  ;;  %v3692_v4 = vshll.u32 %v8989_v25, 16  ;;  %v3698_v27 = vshll.u32 %v8999_v11, 16  ;;  %v3544_v23 = vld [vmem:[#allocation2 + $0x10] sm:$0xe] }
 0x1e4   :  { %v3165_v15 = vrot.slane %v3164_v13, 4  ;;  %v3285_v20 = vsel %vm7086_vm5, %v5862_v40, %v3284_v37  ;;  %v3691_v28 = vrot.slane %v3689_v12, 4  ;;  %v3703_v33 = vshrl.u32 %v9001_v18, 16  ;;  %v3304_v49 = vld [vmem:[#allocation2 + $0x14] sm:$0x1] }
 0x1e5   :  { %v3508_v62 = vor.u32 %v8967_v16, %v8965_v5  ;;  %v3156_v3 = vsel %vm7072_vm4, %v3151_v36, %v3155_v39  ;;  %v5918_v48 = vcombine.low %v3281_v51, %v3285_v20  ;;  %v3694_v55 = vrot.slane %v3692_v4, 5  ;;  %v9027_v37 = vld [vmem:[#allocation2 + $0x20] sm:$0xf] }
 0x1e6   :  { %v3170_v0 = vsel %vm7072_vm4, %v3165_v15, %v3169_v54  ;;  %v3705_v50 = vrot.slane %v3703_v33, 4  ;;  %v3706_v21 = vshll.u32 %v9001_v18, 16  ;;  %v3712_v60 = vshll.u32 %v9006_v47, 16 }
 0x1e7   :  { %v3522_v6 = vor.u32 %v8985_v41, %v8977_v17  ;;  %v3536_v5 = vor.u32 %v8997_v63, %v8995_v26  ;;  %v5910_v16 = vcombine.low %v3156_v3, %v3170_v0  ;;  %5129 = vmatmul.mubr.bf16.gmra.mxu0 %v5918_v48  ;;  %v3695_v39 = vor.u32 %v3694_v55, %v3691_v28  ;;  %v9029_v41 = vld [vmem:[#allocation2 + $0x28] sm:$0xf]  ;;  %v9041_v55 = vld [vmem:[#allocation2 + $0x2c] sm:$0x1] }
 0x1e8   :  { %v3700_v45 = vrot.slane %v3698_v27, 5  ;;  %v3708_v13 = vrot.slane %v3706_v21, 5  ;;  %v5902_v54 = vcombine.low %v8973_v52, %v8979_v34  ;;  %v3329_v40 = vshll.u32 %v3303_v14, 16  ;;  %v9033_v52 = vld [vmem:[#allocation2 + $0x24] sm:$0x1] }
 0x1e9   :  { %5031 = vmatprep.mubr.bf16.mxu1 %v5910_v16  ;;  %v3696_v12 = vrot.slane %v3695_v39, 4  ;;  %v5863_v36 = vrot.slane %v3543_v43, 9  ;;  %v3593_v51 = vrot.slane %v3303_v14, 5  ;;  %v5864_v17 = vrot.slane %v3544_v23, 9 }
 0x1ea   :  { %v3709_v26 = vor.u32 %v3708_v13, %v3705_v50  ;;  %v3714_v63 = vrot.slane %v3712_v60, 5  ;;  %5032 = vmatmul.mubr.bf16.gmra.mxu1 %v5902_v54  ;;  %v3343_v4 = vshll.u32 %v3304_v49, 16  ;;  %v3597_v15 = vrot.slane %v3304_v49, 5  ;;  %v9048_v49 = vld [vmem:[#allocation2 + $0x1c] sm:$0x1] }
 0x1eb   :  { %v3701_v27 = vsel %vm7072_vm4, %v3696_v12, %v3700_v45  ;;  %v3331_v20 = vrot.slane %v3329_v40, 5  ;;  %v3717_v34 = vshrl.u32 %v9027_v37, 16  ;;  %v3720_v28 = vshll.u32 %v9027_v37, 16  ;;  %v9051_v12 = vld [vmem:[#allocation2 + $0x24] sm:$0x1] }
 0x1ec   :  { %v3710_v33 = vrot.slane %v3709_v26, 4  ;;  %v3594_v3 = vsel %vm7086_vm5, %v5863_v36, %v3593_v51  ;;  %v3598_v48 = vsel %vm7086_vm5, %v5864_v17, %v3597_v15  ;;  %v3731_v14 = vshrl.u32 %v9029_v41, 16  ;;  %v3545_v36 = vld [vmem:[#allocation2 + $0x18] sm:$0xe] }
 0x1ed   :  { %v5935_v43 = vcombine.low %v3594_v3, %v3598_v48  ;;  %v3719_v0 = vrot.slane %v3717_v34, 4  ;;  %v3722_v50 = vrot.slane %v3720_v28, 5  ;;  %v3734_v21 = vshll.u32 %v9029_v41, 16  ;;  %v9076_v28 = vld [vmem:[#allocation2 + $0x34] sm:$0x1] }
 0x1ee   :  { %v3715_v60 = vsel %vm7072_vm4, %v3710_v33, %v3714_v63  ;;  %v3345_v23 = vrot.slane %v3343_v4, 5  ;;  %v3726_v16 = vshll.u32 %v9033_v52, 16  ;;  %v3733_v39 = vrot.slane %v3731_v14, 4  ;;  %v3546_v4 = vld [vmem:[#allocation2 + $0x20] sm:$0xe] }
 0x1ef   :  { %v5951_v45 = vcombine.low %v3701_v27, %v3715_v60  ;;  %5169 = vmatprep.mubr.bf16.mxu1 %v5935_v43  ;;  %v3723_v13 = vor.u32 %v3722_v50, %v3719_v0  ;;  %v3736_v54 = vrot.slane %v3734_v21, 5  ;;  %v3740_v40 = vshll.u32 %v9041_v55, 16  ;;  %v9092_v21 = vld [vmem:[#allocation2 + $0x3c] sm:$0x1] }
 0x1f0   :  { %v9056_v51 = vrot.slane %v3494_v42, 4  ;;  %v9058_v17 = vrot.slane %v3508_v62, 4  ;;  %v9060_v26 = vrot.slane %v3522_v6, 4  ;;  %v5943_v63 = vcombine.low %v8989_v25, %v9001_v18  ;;  %v9072_v42 = vld [vmem:[#allocation2 + $0x38] sm:$0xf] }
 0x1f1   :  { %5266 = vmatprep.mubr.bf16.mxu0 %v5951_v45  ;;  %v3724_v15 = vrot.slane %v3723_v13, 4  ;;  %v3737_v27 = vor.u32 %v3736_v54, %v3733_v39  ;;  %v3332_v34 = vsel %vm7072_vm4, %v8687_v22, %v3331_v20  ;;  %v3346_v10 = vsel %vm7072_vm4, %v8727_v32, %v3345_v23  ;;  %v6870_v22 = vld [vmem:[%s9664_s3 + $0x230] sm:$0xff]   ;;  %v3547_v54 = vld [vmem:[#allocation2 + $0x28] sm:$0xe] }
 0x1f2   :  { %v9074_v62 = vrot.slane %v3536_v5, 4  ;;  %5267 = vmatmul.mubr.bf16.vlgmr.msra.gmra.mxu0 %v5943_v63  ;;  %v3728_v25 = vrot.slane %v3726_v16, 5  ;;  %v5927_v18 = vcombine.low %v3332_v34, %v3346_v10  ;;  %v5865_v6 = vrot.slane %v3545_v36, 9 }
 0x1f3   :  { %v3738_v20 = vrot.slane %v3737_v27, 4  ;;  %v3742_v33 = vrot.slane %v3740_v40, 5  ;;  %v3601_v32 = vrot.slane %v9048_v49, 5  ;;  %v5866_v3 = vrot.slane %v3546_v4, 9  ;;  %v6872_v40 = vld [vmem:[%s9664_s3 + $0x228] sm:$0xff]  }
 0x1f4   :  { %v3729_v48 = vsel %vm7072_vm4, %v3724_v15, %v3728_v25  ;;  %5170 = vmatmul.mubr.bf16.vlgmr.msra.gmra.mxu1 %v5927_v18  ;;  %v3605_v5 = vrot.slane %v9051_v12, 5  ;;  %v3745_v14 = vshrl.u32 %v9070_v19, 16  ;;  %v3748_v43 = vshll.u32 %v9070_v19, 16  ;;  %v9108_v25 = vld [vmem:[#allocation2 + $0x2c] sm:$0x1] }
 0x1f5   :  { %v3743_v0 = vsel %vm7072_vm4, %v3738_v20, %v3742_v33  ;;  %v3602_v50 = vsel %vm7086_vm5, %v5865_v6, %v3601_v32  ;;  %6656 = vmatpush3.bf16.msra.mxu1 %v8925_v8  ;;  %v3754_v60 = vshll.u32 %v9076_v28, 16  ;;  %v3759_v23 = vshrl.u32 %v9072_v42, 16  ;;  %v9110_v18 = vld [vmem:[#allocation2 + $0x34] sm:$0x1]  ;;  %v3548_v20 = vld [vmem:[#allocation2 + $0x30] sm:$0xe] }
 0x1f6   :  { %v5952_v16 = vcombine.low %v3729_v48, %v3743_v0  ;;  %v3606_v39 = vsel %vm7086_vm5, %v5866_v3, %v3605_v5  ;;  %v3747_v45 = vrot.slane %v3745_v14, 4  ;;  %v3750_v13 = vrot.slane %v3748_v43, 5  ;;  %6657 = vmatprep.subr.bf16.mxu1 %v6870_v22  ;;  %v9118_v48 = vld [vmem:[#allocation2 + $0x40] sm:$0xf] }
 0x1f7   :  { %v5936_v36 = vcombine.low %v3602_v50, %v3606_v39  ;;  %v5944_v8 = vcombine.low %v9027_v37, %v9029_v41  ;;  %v3761_v63 = vrot.slane %v3759_v23, 4  ;;  %v3762_v4 = vshll.u32 %v9072_v42, 16 }
 0x1f8   :  { %5274 = vmatprep.mubr.bf16.mxu0 %v5952_v16  ;;  %v3751_v15 = vor.u32 %v3750_v13, %v3747_v45  ;;  %v3768_v27 = vshll.u32 %v9092_v21, 16  ;;  %v3354_v34 = vor.u32 %v8750_v31, %v8715_v30  ;;  %v3357_v10 = vshll.u32 %v9048_v49, 16  ;;  %v6874_v30 = vld [vmem:[%s9664_s3 + $0x220] sm:$0xff]  }
 0x1f9   :  { %5177 = vmatprep.mubr.bf16.mxu1 %v5936_v36  ;;  %v3764_v6 = vrot.slane %v3762_v4, 5  ;;  %v3368_v37 = vor.u32 %v8754_v2, %v8752_v57  ;;  %v3371_v41 = vshll.u32 %v9051_v12, 16  ;;  %v5867_v33 = vrot.slane %v3547_v54, 9  ;;  %6658 = vmatpush3.bf16.msra.mxu1 %v6870_v22  ;;  %v9121_v12 = vld [vmem:[#allocation2 + $0x48] sm:$0xf]  ;;  %v6876_v4 = vld [vmem:[%s9664_s3 + $0x218] sm:$0xff]  }
 0x1fa   :  { %5275 = vmatmul.mubr.bf16.gmra.mxu0 %v5944_v8  ;;  %v3752_v31 = vrot.slane %v3751_v15, 4  ;;  %v3756_v49 = vrot.slane %v3754_v60, 5  ;;  %v3355_v32 = vrot.slane %v3354_v34, 4  ;;  %v3359_v3 = vrot.slane %v3357_v10, 5  ;;  %6659 = vmatprep.subr.bf16.mxu1 %v6872_v40  ;;  %v9126_v60 = vld [vmem:[#allocation2 + $0x44] sm:$0x1] }
 0x1fb   :  { %v3765_v5 = vor.u32 %v3764_v6, %v3761_v63  ;;  %v3369_v14 = vrot.slane %v3368_v37, 4  ;;  %v3373_v57 = vrot.slane %v3371_v41, 5  ;;  %v3609_v2 = vrot.slane %v9108_v25, 5  ;;  %v9134_v13 = vld [vmem:[#allocation2 + $0x20] sm:$0xe] }
 0x1fc   :  { %v3757_v22 = vsel %vm7072_vm4, %v3752_v31, %v3756_v49  ;;  %v3770_v43 = vrot.slane %v3768_v27, 5  ;;  %v5868_v0 = vrot.slane %v3548_v20, 9  ;;  %v3613_v50 = vrot.slane %v9110_v18, 5  ;;  %v9147_v6 = vld [vmem:[#allocation2 + $0x4c] sm:$0x1] }
 0x1fd   :  { %v3766_v23 = vrot.slane %v3765_v5, 4  ;;  %v3360_v16 = vsel %vm7072_vm4, %v3355_v32, %v3359_v3  ;;  %v3374_v39 = vsel %vm7072_vm4, %v3369_v14, %v3373_v57  ;;  %v3610_v45 = vsel %vm7086_vm5, %v5867_v33, %v3609_v2  ;;  %6660 = vmatpush3.bf16.msra.mxu1 %v6872_v40  ;;  %v3549_v3 = vld [vmem:[#allocation2 + $0x38] sm:$0xe]  ;;  %v6878_v5 = vld [vmem:[%s9664_s3 + $0x210] sm:$0xff]  }
 0x1fe   :  { %v5928_v54 = vcombine.low %v3360_v16, %v3374_v39  ;;  %v3614_v36 = vsel %vm7086_vm5, %v5868_v0, %v3613_v50  ;;  %v3773_v8 = vshrl.u32 %v9118_v48, 16  ;;  %v3776_v63 = vshll.u32 %v9118_v48, 16  ;;  %6661 = vmatprep.subr.bf16.mxu1 %v6874_v30  ;;  %v9161_v0 = vld [vmem:[#allocation2 + $0x44] sm:$0x1] }
 0x1ff   :  { %v3771_v15 = vsel %vm7072_vm4, %v3766_v23, %v3770_v43  ;;  %v5937_v27 = vcombine.low %v3610_v45, %v3614_v36  ;;  %v3782_v40 = vshll.u32 %v9126_v60, 16  ;;  %v3787_v34 = vshrl.u32 %v9121_v12, 16  ;;  %v9159_v43 = vld [vmem:[#allocation2 + $0x3c] sm:$0x1]  ;;  %v3550_v23 = vld [vmem:[#allocation2 + $0x40] sm:$0xe] }
 0x200   :  { %v5953_v10 = vcombine.low %v3757_v22, %v3771_v15  ;;  %5178 = vmatmul.mubr.bf16.gmra.mxu1 %v5928_v54  ;;  %v3775_v37 = vrot.slane %v3773_v8, 4  ;;  %v3778_v41 = vrot.slane %v3776_v63, 5  ;;  %v3790_v20 = vshll.u32 %v9121_v12, 16  ;;  %v9168_v63 = vld [vmem:[#allocation2 + $0x60] sm:$0xf] }
 0x201   :  { %v5881_v33 = vrot.slane %v9134_v13, 9  ;;  %5185 = vmatprep.mubr.bf16.mxu1 %v5937_v27  ;;  %v5945_v31 = vcombine.low %v9070_v19, %v9072_v42  ;;  %v3789_v49 = vrot.slane %v3787_v34, 4  ;;  %v3796_v32 = vshll.u32 %v9147_v6, 16  ;;  %6662 = vmatpush3.bf16.msra.mxu1 %v6874_v30  ;;  %v6880_v27 = vld [vmem:[%s9664_s3 + $0x208] sm:$0xff]  }
 0x202   :  { %5282 = vmatprep.mubr.bf16.mxu0 %v5953_v10  ;;  %v3779_v14 = vor.u32 %v3778_v41, %v3775_v37  ;;  %v3784_v57 = vrot.slane %v3782_v40, 5  ;;  %v3792_v2 = vrot.slane %v3790_v20, 5  ;;  %v3382_v22 = vor.u32 %v8788_v56, %v8786_v44  ;;  %6663 = vmatprep.subr.bf16.mxu1 %v6876_v4  ;;  %v9186_v37 = vld [vmem:[#allocation2 + $0x68] sm:$0xf]  ;;  %v9188_v41 = vld [vmem:[#allocation2 + $0x6c] sm:$0x1] }
 0x203   :  { %5283 = vmatmul.mubr.bf16.gmra.mxu0 %v5945_v31  ;;  %v3798_v19 = vrot.slane %v3796_v32, 5  ;;  %v3385_v42 = vshll.u32 %v9108_v25, 16  ;;  %v3396_v30 = vor.u32 %v8797_v1, %v8795_v59  ;;  %v3399_v50 = vshll.u32 %v9110_v18, 16  ;;  %v9173_v18 = vld [vmem:[#allocation2 + $0x64] sm:$0x1] }
 0x204   :  { %v3780_v16 = vrot.slane %v3779_v14, 4  ;;  %v3793_v39 = vor.u32 %v3792_v2, %v3789_v49  ;;  %v3383_v45 = vrot.slane %v3382_v22, 4  ;;  %v5869_v54 = vrot.slane %v3549_v3, 9  ;;  %v9195_v3 = vld [vmem:[#allocation2 + $0x28] sm:$0xe] }
 0x205   :  { %v3387_v44 = vrot.slane %v3385_v42, 5  ;;  %v3397_v56 = vrot.slane %v3396_v30, 4  ;;  %v3401_v36 = vrot.slane %v3399_v50, 5  ;;  %v3617_v8 = vrot.slane %v9159_v43, 5  ;;  %6664 = vmatpush3.bf16.msra.mxu1 %v6876_v4  ;;  %v6882_v30 = vld [vmem:[%s9664_s3 + $0x200] sm:$0xff]  }
 0x206   :  { %v3785_v25 = vsel %vm7072_vm4, %v3780_v16, %v3784_v57  ;;  %v3794_v15 = vrot.slane %v3793_v39, 4  ;;  %v5870_v59 = vrot.slane %v3550_v23, 9  ;;  %v3621_v1 = vrot.slane %v9161_v0, 5  ;;  %6665 = vmatprep.subr.bf16.mxu1 %v6878_v5  ;;  %v3311_v39 = vld [vmem:[#allocation2 + $0x5c] sm:$0x1] }
 0x207   :  { %v3388_v40 = vsel %vm7072_vm4, %v3383_v45, %v3387_v44  ;;  %v3402_v4 = vsel %vm7072_vm4, %v3397_v56, %v3401_v36  ;;  %v3618_v34 = vsel %vm7086_vm5, %v5869_v54, %v3617_v8  ;;  %v5946_v10 = vcombine.low %v9118_v48, %v9121_v12  ;;  %v3551_v36 = vld [vmem:[#allocation2 + $0x58] sm:$0xe] }
 0x208   :  { %v3799_v20 = vsel %vm7072_vm4, %v3794_v15, %v3798_v19  ;;  %v5929_v31 = vcombine.low %v3388_v40, %v3402_v4  ;;  %v3622_v49 = vsel %vm7086_vm5, %v5870_v59, %v3621_v1  ;;  %v3801_v32 = vshrl.u32 %v9168_v63, 16  ;;  %v3312_v1 = vld [vmem:[#allocation2 + $0x64] sm:$0x1]  ;;  %v3552_v4 = vld [vmem:[#allocation2 + $0x60] sm:$0xe] }
 0x209   :  { %v5954_v14 = vcombine.low %v3785_v25, %v3799_v20  ;;  %v5938_v57 = vcombine.low %v3618_v34, %v3622_v49  ;;  %v3804_v2 = vshll.u32 %v9168_v63, 16  ;;  %v3810_v48 = vshll.u32 %v9173_v18, 16  ;;  %6666 = vmatpush3.bf16.msra.mxu1 %v6878_v5 }
 0x20a   :  { %5186 = vmatmul.mubr.bf16.gmra.mxu1 %v5929_v31  ;;  %v3803_v12 = vrot.slane %v3801_v32, 4  ;;  %v3815_v22 = vshrl.u32 %v9186_v37, 16  ;;  %v3818_v19 = vshll.u32 %v9186_v37, 16  ;;  %v3824_v42 = vshll.u32 %v9188_v41, 16  ;;  %6667 = vmatprep.subr.bf16.mxu1 %v6880_v27 }
 0x20b   :  { %v3970_v50 = vrot.slane %v9033_v52, 5  ;;  %5290 = vmatprep.mubr.bf16.mxu0 %v5954_v14  ;;  %5193 = vmatprep.mubr.bf16.mxu1 %v5938_v57  ;;  %v3806_v23 = vrot.slane %v3804_v2, 5  ;;  %v3410_v5 = vor.u32 %v8848_v9, %v8846_v29  ;;  %v3413_v16 = vshll.u32 %v9159_v43, 16  ;;  %v9215_v14 = vld [vmem:[#allocation2 + $0x70] sm:$0xf] }
 0x20c   :  { %v5882_v45 = vrot.slane %v9195_v3, 9  ;;  %5291 = vmatmul.mubr.bf16.gmra.mxu0 %v5946_v10  ;;  %v3817_v54 = vrot.slane %v3815_v22, 4  ;;  %v3820_v44 = vrot.slane %v3818_v19, 5  ;;  %v3424_v56 = vor.u32 %v8889_v58, %v8867_v35 }
 0x20d   :  { %v3807_v8 = vor.u32 %v3806_v23, %v3803_v12  ;;  %v3812_v25 = vrot.slane %v3810_v48, 5  ;;  %v3411_v15 = vrot.slane %v3410_v5, 4  ;;  %v3427_v59 = vshll.u32 %v9161_v0, 16  ;;  %6668 = vmatpush3.bf16.msra.mxu1 %v6880_v27  ;;  %v9221_v48 = vld [vmem:[#allocation2 + $0x78] sm:$0xf] }
 0x20e   :  { %v3821_v29 = vor.u32 %v3820_v44, %v3817_v54  ;;  %v3826_v9 = vrot.slane %v3824_v42, 5  ;;  %v3415_v43 = vrot.slane %v3413_v16, 5  ;;  %v3425_v40 = vrot.slane %v3424_v56, 4  ;;  %6669 = vmatprep.subr.bf16.mxu1 %v6882_v30  ;;  %v9223_v12 = vld [vmem:[#allocation2 + $0x74] sm:$0x1] }
 0x20f   :  { %v3808_v34 = vrot.slane %v3807_v8, 4  ;;  %v3429_v10 = vrot.slane %v3427_v59, 5  ;;  %v3441_v20 = vshll.u32 %v3311_v39, 16  ;;  %v5871_v31 = vrot.slane %v3551_v36, 9  ;;  %v3313_v44 = vld [vmem:[#allocation2 + $0x6c] sm:$0x1] }
 0x210   :  { %v3822_v49 = vrot.slane %v3821_v29, 4  ;;  %v3416_v35 = vsel %vm7072_vm4, %v3411_v15, %v3415_v43  ;;  %v3455_v58 = vshll.u32 %v3312_v1, 16  ;;  %v3625_v32 = vrot.slane %v3311_v39, 5  ;;  %v9233_v39 = vld [vmem:[#allocation2 + $0x7c] sm:$0x1] }
 0x211   :  { %v3813_v0 = vsel %vm7072_vm4, %v3808_v34, %v3812_v25  ;;  %v3430_v27 = vsel %vm7072_vm4, %v3425_v40, %v3429_v10  ;;  %v5872_v57 = vrot.slane %v3552_v4, 9  ;;  %v3629_v2 = vrot.slane %v3312_v1, 5  ;;  %6670 = vmatpush3.bf16.msra.mxu1 %v6882_v30  ;;  %v3553_v29 = vld [vmem:[#allocation2 + $0x68] sm:$0xe]  ;;  %v3554_v34 = vld [vmem:[#allocation2 + $0x70] sm:$0xe] }
 0x212   :  { %v3827_v22 = vsel %vm7072_vm4, %v3822_v49, %v3826_v9  ;;  %v5930_v19 = vcombine.low %v3416_v35, %v3430_v27  ;;  %v3626_v42 = vsel %vm7086_vm5, %v5871_v31, %v3625_v32  ;;  %v5947_v23 = vcombine.low %v9168_v63, %v9186_v37  ;;  %v3314_v63 = vld [vmem:[#allocation2 + $0x74] sm:$0x1]  ;;  %v9248_v27 = vld [vmem:[#allocation2 + $0x80] sm:$0xf] }
 0x213   :  { %v5955_v5 = vcombine.low %v3813_v0, %v3827_v22  ;;  %v3630_v16 = vsel %vm7086_vm5, %v5872_v57, %v3629_v2  ;;  %v3829_v54 = vshrl.u32 %v9215_v14, 16  ;;  %v3832_v30 = vshll.u32 %v9215_v14, 16 }
 0x214   :  { %5194 = vmatmul.mubr.bf16.gmra.mxu1 %v5930_v19  ;;  %v5939_v56 = vcombine.low %v3626_v42, %v3630_v16  ;;  %v3838_v36 = vshll.u32 %v9223_v12, 16  ;;  %v3843_v8 = vshrl.u32 %v9221_v48, 16  ;;  %v3846_v25 = vshll.u32 %v9221_v48, 16  ;;  %v9250_v42 = vld [vmem:[#allocation2 + $0x84] sm:$0x1] }
 0x215   :  { %5298 = vmatprep.mubr.bf16.mxu0 %v5955_v5  ;;  %v3443_v37 = vrot.slane %v3441_v20, 5  ;;  %v3457_v15 = vrot.slane %v3455_v58, 5  ;;  %v3831_v59 = vrot.slane %v3829_v54, 4  ;;  %v3834_v1 = vrot.slane %v3832_v30, 5  ;;  %v9252_v54 = vld [vmem:[#allocation2 + $0x88] sm:$0xf] }
 0x216   :  { %v3974_v9 = vrot.slane %v9041_v55, 5  ;;  %5201 = vmatprep.mubr.bf16.mxu1 %v5939_v56  ;;  %5299 = vmatmul.mubr.bf16.gmra.mxu0 %v5947_v23  ;;  %v3845_v43 = vrot.slane %v3843_v8, 4  ;;  %v3848_v40 = vrot.slane %v3846_v25, 5  ;;  %v3852_v4 = vshll.u32 %v9233_v39, 16 }
 0x217   :  { %v3835_v10 = vor.u32 %v3834_v1, %v3831_v59  ;;  %v3840_v31 = vrot.slane %v3838_v36, 5  ;;  %v3444_v49 = vsel %vm7072_vm4, %v8935_v24, %v3443_v37  ;;  %v3458_v20 = vsel %vm7072_vm4, %v8943_v61, %v3457_v15  ;;  %v9258_v36 = vld [vmem:[#allocation2 + $0x8c] sm:$0x1]  ;;  %v3315_v15 = vld [vmem:[#allocation2 + $0x7c] sm:$0x1] }
 0x218   :  { %v3849_v35 = vor.u32 %v3848_v40, %v3845_v43  ;;  %v5931_v58 = vcombine.low %v3444_v49, %v3458_v20  ;;  %v3469_v32 = vshll.u32 %v3313_v44, 16  ;;  %v3483_v0 = vshll.u32 %v3314_v63, 16 }
 0x219   :  { %v3836_v57 = vrot.slane %v3835_v10, 4  ;;  %v5873_v2 = vrot.slane %v3553_v29, 9  ;;  %v3633_v22 = vrot.slane %v3313_v44, 5  ;;  %v5874_v19 = vrot.slane %v3554_v34, 9 }
 0x21a   :  { %v3850_v23 = vrot.slane %v3849_v35, 4  ;;  %v3854_v5 = vrot.slane %v3852_v4, 5  ;;  %v3471_v16 = vrot.slane %v3469_v32, 5  ;;  %v3637_v24 = vrot.slane %v3314_v63, 5 }
 0x21b   :  { %v3841_v61 = vsel %vm7072_vm4, %v3836_v57, %v3840_v31  ;;  %v3485_v30 = vrot.slane %v3483_v0, 5  ;;  %v3634_v56 = vsel %vm7086_vm5, %v5873_v2, %v3633_v22  ;;  %v3857_v44 = vshrl.u32 %v9248_v27, 16  ;;  %v3555_v31 = vld [vmem:[#allocation2 + $0x78] sm:$0xe] }
 0x21c   :  { %v3855_v8 = vsel %vm7072_vm4, %v3850_v23, %v3854_v5  ;;  %5202 = vmatmul.mubr.bf16.gmra.mxu1 %v5931_v58  ;;  %v3638_v25 = vsel %vm7086_vm5, %v5874_v19, %v3637_v24  ;;  %v3860_v63 = vshll.u32 %v9248_v27, 16  ;;  %v3866_v37 = vshll.u32 %v9250_v42, 16  ;;  %v3316_v58 = vld [vmem:[#allocation2 + $0x84] sm:$0x1]  ;;  %v9288_v5 = vld [vmem:[#allocation2 + $0x98] sm:$0xf] }
 0x21d   :  { %v5956_v59 = vcombine.low %v3841_v61, %v3855_v8  ;;  %v5940_v1 = vcombine.low %v3634_v56, %v3638_v25  ;;  %v3859_v29 = vrot.slane %v3857_v44, 4  ;;  %v3871_v43 = vshrl.u32 %v9252_v54, 16  ;;  %v9290_v61 = vld [vmem:[#allocation2 + $0x94] sm:$0x1] }
 0x21e   :  { %v5948_v40 = vcombine.low %v9215_v14, %v9221_v48  ;;  %v3862_v4 = vrot.slane %v3860_v63, 5  ;;  %v3874_v34 = vshll.u32 %v9252_v54, 16  ;;  %v3880_v10 = vshll.u32 %v9258_v36, 16  ;;  %v3556_v14 = vld [vmem:[#allocation2 + $0x80] sm:$0xe] }
 0x21f   :  { %5306 = vmatprep.mubr.bf16.mxu0 %v5956_v59  ;;  %5209 = vmatprep.mubr.bf16.mxu1 %v5940_v1  ;;  %v3873_v49 = vrot.slane %v3871_v43, 4  ;;  %v3472_v20 = vsel %vm7072_vm4, %v8949_v53, %v3471_v16  ;;  %v3486_v35 = vsel %vm7072_vm4, %v8951_v38, %v3485_v30  ;;  %v3497_v32 = vshll.u32 %v3315_v15, 16  ;;  %v9286_v53 = vld [vmem:[#allocation2 + $0x90] sm:$0xf]  ;;  %v9299_v63 = vld [vmem:[#allocation2 + $0x9c] sm:$0x1] }
 0x220   :  { %v9284_v48 = vsel %vm7086_vm5, %v5881_v33, %v3970_v50  ;;  %5307 = vmatmul.mubr.bf16.gmra.mxu0 %v5948_v40  ;;  %v3863_v0 = vor.u32 %v3862_v4, %v3859_v29  ;;  %v3876_v57 = vrot.slane %v3874_v34, 5  ;;  %v5932_v2 = vcombine.low %v3472_v20, %v3486_v35  ;;  %v3317_v43 = vld [vmem:[#allocation2 + $0x8c] sm:$0x1] }
 0x221   :  { %v3868_v22 = vrot.slane %v3866_v37, 5  ;;  %v3882_v19 = vrot.slane %v3880_v10, 5  ;;  %v5875_v38 = vrot.slane %v3555_v31, 9  ;;  %v3641_v23 = vrot.slane %v3315_v15, 5  ;;  %v3318_v31 = vld [vmem:[#allocation2 + $0x94] sm:$0x1] }
 0x222   :  { %v3864_v16 = vrot.slane %v3863_v0, 4  ;;  %v3877_v52 = vor.u32 %v3876_v57, %v3873_v49  ;;  %v5876_v24 = vrot.slane %v3556_v14, 9  ;;  %v3645_v13 = vrot.slane %v3316_v58, 5 }
 0x223   :  { %v3499_v33 = vrot.slane %v3497_v32, 5  ;;  %v3511_v50 = vshll.u32 %v3316_v58, 16  ;;  %v3642_v30 = vsel %vm7086_vm5, %v5875_v38, %v3641_v23  ;;  %v3885_v56 = vshrl.u32 %v9286_v53, 16  ;;  %v3557_v32 = vld [vmem:[#allocation2 + $0x88] sm:$0xe] }
 0x224   :  { %v3869_v44 = vsel %vm7072_vm4, %v3864_v16, %v3868_v22  ;;  %v3878_v8 = vrot.slane %v3877_v52, 4  ;;  %5210 = vmatmul.mubr.bf16.gmra.mxu1 %v5932_v2  ;;  %v3646_v25 = vsel %vm7086_vm5, %v5876_v24, %v3645_v13  ;;  %v3888_v37 = vshll.u32 %v9286_v53, 16  ;;  %v3558_v22 = vld [vmem:[#allocation2 + $0x90] sm:$0xe] }
 0x225   :  { %v5941_v15 = vcombine.low %v3642_v30, %v3646_v25  ;;  %v3887_v59 = vrot.slane %v3885_v56, 4  ;;  %v3894_v1 = vshll.u32 %v9290_v61, 16  ;;  %v3899_v29 = vshrl.u32 %v9288_v5, 16  ;;  %v3912_v13 = vld [vmem:[#allocation2 + $0x10] sm:$0xe] }
 0x226   :  { %v3883_v40 = vsel %vm7072_vm4, %v3878_v8, %v3882_v19  ;;  %v3890_v4 = vrot.slane %v3888_v37, 5  ;;  %v3902_v34 = vshll.u32 %v9288_v5, 16  ;;  %v3908_v10 = vshll.u32 %v9299_v63, 16  ;;  %v3913_v25 = vld [vmem:[#allocation2 + $0x18] sm:$0xe] }
 0x227   :  { %v5957_v49 = vcombine.low %v3869_v44, %v3883_v40  ;;  %v3513_v20 = vrot.slane %v3511_v50, 5  ;;  %5217 = vmatprep.mubr.bf16.mxu1 %v5941_v15  ;;  %v5949_v35 = vcombine.low %v9248_v27, %v9252_v54  ;;  %v3901_v58 = vrot.slane %v3899_v29, 4 }
 0x228   :  { %v3891_v14 = vor.u32 %v3890_v4, %v3887_v59  ;;  %v3896_v0 = vrot.slane %v3894_v1, 5  ;;  %v3904_v57 = vrot.slane %v3902_v34, 5  ;;  %v3910_v2 = vrot.slane %v3908_v10, 5  ;;  %v3916_v34 = vld [vmem:[#allocation2 + $0x30] sm:$0xe] }
 0x229   :  { %5314 = vmatprep.mubr.bf16.mxu0 %v5957_v49  ;;  %v3500_v19 = vsel %vm7072_vm4, %v9056_v51, %v3499_v33  ;;  %v3514_v38 = vsel %vm7072_vm4, %v9058_v17, %v3513_v20  ;;  %v3525_v23 = vshll.u32 %v3317_v43, 16  ;;  %v3539_v16 = vshll.u32 %v3318_v31, 16  ;;  %v3918_v20 = vld [vmem:[#allocation2 + $0x40] sm:$0xe] }
 0x22a   :  { %5315 = vmatmul.mubr.bf16.gmra.mxu0 %v5949_v35  ;;  %v3892_v27 = vrot.slane %v3891_v14, 4  ;;  %v3905_v54 = vor.u32 %v3904_v57, %v3901_v58  ;;  %v5933_v52 = vcombine.low %v3500_v19, %v3514_v38  ;;  %v5877_v24 = vrot.slane %v3557_v32, 9  ;;  %v3919_v35 = vld [vmem:[#allocation2 + $0x48] sm:$0xe]  ;;  %v3920_v58 = vld [vmem:[#allocation2 + $0x60] sm:$0xe] }
 0x22b   :  { %v3527_v50 = vrot.slane %v3525_v23, 5  ;;  %v3541_v30 = vrot.slane %v3539_v16, 5  ;;  %v3649_v56 = vrot.slane %v3317_v43, 5  ;;  %v5878_v44 = vrot.slane %v3558_v22, 9  ;;  %v3921_v22 = vld [vmem:[#allocation2 + $0x68] sm:$0xe] }
 0x22c   :  { %v3975_v51 = vsel %vm7086_vm5, %v5882_v45, %v3974_v9  ;;  %v3897_v17 = vsel %vm7072_vm4, %v3892_v27, %v3896_v0  ;;  %v3906_v33 = vrot.slane %v3905_v54, 4  ;;  %5218 = vmatmul.mubr.bf16.gmra.mxu1 %v5933_v52  ;;  %v3653_v8 = vrot.slane %v3318_v31, 5  ;;  %v3917_v31 = vld [vmem:[#allocation2 + $0x38] sm:$0xe]  ;;  %v3924_v54 = vld [vmem:[#allocation2 + $0x80] sm:$0xe] }
 0x22d   :  { %v3650_v37 = vsel %vm7086_vm5, %v5877_v24, %v3649_v56  ;;  %v3528_v15 = vsel %vm7072_vm4, %v9060_v26, %v3527_v50  ;;  %v3542_v55 = vsel %vm7072_vm4, %v9074_v62, %v3541_v30  ;;  %v5879_v3 = vrot.slane %v3912_v13, 9  ;;  %v3923_v27 = vld [vmem:[#allocation2 + $0x78] sm:$0xe]  ;;  %v3925_v30 = vld [vmem:[#allocation2 + $0x88] sm:$0xe] }
 0x22e   :  { %v3911_v45 = vsel %vm7072_vm4, %v3906_v33, %v3910_v2  ;;  %v3654_v9 = vsel %vm7086_vm5, %v5878_v44, %v3653_v8  ;;  %v5934_v59 = vcombine.low %v3528_v15, %v3542_v55  ;;  %v3962_v1 = vrot.slane %v8999_v11, 5  ;;  %v3927_v15 = vld [vmem:[#allocation2 + $0x98] sm:$0xe] }
 0x22f   :  { %v5958_v29 = vcombine.low %v3897_v17, %v3911_v45  ;;  %v5942_v43 = vcombine.low %v3650_v37, %v3654_v9  ;;  %v5880_v40 = vrot.slane %v3913_v25, 9  ;;  %v3966_v4 = vrot.slane %v9006_v47, 5  ;;  %v3926_v37 = vld [vmem:[#allocation2 + $0x90] sm:$0xe] }
 0x230   :  { %v5950_v26 = vcombine.low %v9286_v53, %v9288_v5  ;;  %v3963_v62 = vsel %vm7086_vm5, %v5879_v3, %v3962_v1  ;;  %v5960_v46 = vcombine.low %v9284_v48, %v3975_v51  ;;  %v5883_v49 = vrot.slane %v3916_v34, 9 }
 0x231   :  { %5322 = vmatprep.mubr.bf16.mxu0 %v5958_v29  ;;  %5225 = vmatprep.mubr.bf16.mxu1 %v5942_v43  ;;  %v3967_v11 = vsel %vm7086_vm5, %v5880_v40, %v3966_v4  ;;  %v3978_v47 = vrot.slane %v9076_v28, 5  ;;  %v5884_v53 = vrot.slane %v3917_v31, 9  ;;  %v3982_v5 = vrot.slane %v9092_v21, 5 }
 0x232   :  { %5323 = vmatmul.mubr.bf16.gmra.mxu0 %v5950_v26  ;;  %v5959_v10 = vcombine.low %v3963_v62, %v3967_v11  ;;  %v3986_v32 = vrot.slane %v9126_v60, 5  ;;  %v3990_v0 = vrot.slane %v9147_v6, 5  ;;  %v5885_v2 = vrot.slane %v3918_v20, 9 }
 0x233   :  { %v3979_v48 = vsel %vm7086_vm5, %v5883_v49, %v3978_v47  ;;  %v3983_v14 = vsel %vm7086_vm5, %v5884_v53, %v3982_v5  ;;  %v5886_v28 = vrot.slane %v3919_v35, 9  ;;  %v5887_v19 = vrot.slane %v3920_v58, 9 }
 0x234   :  { %5226 = vmatmul.mubr.bf16.gmra.mxu1 %v5934_v59  ;;  %v5961_v57 = vcombine.low %v3979_v48, %v3983_v14  ;;  %v3994_v21 = vrot.slane %v9173_v18, 5  ;;  %v5888_v38 = vrot.slane %v3921_v22, 9  ;;  %v3998_v23 = vrot.slane %v9188_v41, 5  ;;  %v3922_v18 = vld [vmem:[#allocation2 + $0x70] sm:$0xe] }
 0x235   :  { %6671 = vmatprep.mubr.bf16.mxu1 %v5959_v10  ;;  %v3987_v60 = vsel %vm7086_vm5, %v5885_v2, %v3986_v32  ;;  %v3991_v16 = vsel %vm7086_vm5, %v5886_v28, %v3990_v0  ;;  %v4006_v13 = vrot.slane %v9233_v39, 5  ;;  %v5890_v41 = vrot.slane %v3923_v27, 9  ;;  %v9384_v10 = vld [vmem:[%s9665_s4] ss:$0 sm:$0xff] }
 0x236   :  { %v3995_v6 = vsel %vm7086_vm5, %v5887_v19, %v3994_v21  ;;  %v5962_v52 = vcombine.low %v3987_v60, %v3991_v16  ;;  %v3999_v24 = vsel %vm7086_vm5, %v5888_v38, %v3998_v23  ;;  %v5891_v56 = vrot.slane %v3924_v54, 9 }
 0x237   :  { %v5963_v50 = vcombine.low %v3995_v6, %v3999_v24  ;;  %v4010_v44 = vrot.slane %v9250_v42, 5  ;;  %v4002_v51 = vrot.slane %v9223_v12, 5  ;;  %v5889_v17 = vrot.slane %v3922_v18, 9 }
 0x238   :  { %v5892_v33 = vrot.slane %v3925_v30, 9  ;;  %v4014_v8 = vrot.slane %v9258_v36, 5  ;;  %v4007_v25 = vsel %vm7086_vm5, %v5890_v41, %v4006_v13  ;;  %v4018_v42 = vrot.slane %v9290_v61, 5 }
 0x239   :  { %v4011_v39 = vsel %vm7086_vm5, %v5891_v56, %v4010_v44  ;;  %v4003_v55 = vsel %vm7086_vm5, %v5889_v17, %v4002_v51  ;;  %v4022_v45 = vrot.slane %v9299_v63, 5  ;;  %v5893_v9 = vrot.slane %v3926_v37, 9 }
 0x23a   :  { %v5964_v3 = vcombine.low %v4003_v55, %v4007_v25  ;;  %v4015_v12 = vsel %vm7086_vm5, %v5892_v33, %v4014_v8  ;;  %v5894_v59 = vrot.slane %v3927_v15, 9 }
 0x23b   :  { %v5965_v36 = vcombine.low %v4011_v39, %v4015_v12  ;;  %v4019_v1 = vsel %vm7086_vm5, %v5893_v9, %v4018_v42 }
 0x23c   :  { %6672 = vmatmul.mubr.bf16.vlgmr.msra.gmra.mxu1 %v5960_v46  ;;  %v4023_v29 = vsel %vm7086_vm5, %v5894_v59, %v4022_v45 }
 0x23d   :  { %6675 = vmatprep.mubr.bf16.mxu1 %v5961_v57  ;;  %v5966_v43 = vcombine.low %v4019_v1, %v4023_v29 }
 0x244   :  { %6676 = vmatmul.mubr.bf16.gmra.mxu1 %v5962_v52 }
 0x245   :  { %6679 = vmatprep.mubr.bf16.mxu1 %v5963_v50 }
 0x24c   :  { %6680 = vmatmul.mubr.bf16.gmra.mxu1 %v5964_v3 }
 0x24d   :  { %6683 = vmatprep.mubr.bf16.mxu1 %v5965_v36 }
 0x254   :  { %6684 = vmatmul.mubr.bf16.gmra.mxu1 %v5966_v43 }
 0x265   :  { %v6431_v61 = vpop.f32.mrf.mxu0 }
 0x267   :  { %v6432_v40 = vpop.f32.mrf.mxu0 }
 0x268   :  { %v6433_v4 = vadd.f32 %v6432_v40, %v6431_v61 }
 0x269   :  { %v6434_v26 = vpop.f32.mrf.mxu0 }
 0x26b   :  { %v6435_v62 = vpop.f32.mrf.mxu0 }
 0x26c   :  { %v6436_v46 = vadd.f32 %v6435_v62, %v6434_v26 }
 0x26f   :  { %v6437_v63 = vpop.f32.mrf.mxu0 }
 0x270   :  { %v6367_v34 = vpop.f32.mrf.mxu1 }
 0x271   :  { %v6438_v11 = vpop.f32.mrf.mxu0 }
 0x272   :  { %v6368_v31 = vpop.f32.mrf.mxu1  ;;  %v6439_v49 = vadd.f32 %v6438_v11, %v6437_v63 }
 0x273   :  { %v6369_v7 = vadd.f32 %v6368_v31, %v6367_v34  ;;  %v6440_v47 = vpop.f32.mrf.mxu0 }
 0x274   :  { %v6370_v53 = vpop.f32.mrf.mxu1 }
 0x275   :  { %v4978_v5 = vadd.f32 %v6369_v7, %v9384_v10  ;;  %v6441_v48 = vpop.f32.mrf.mxu0 }
 0x276   :  { %v6371_v20 = vpop.f32.mrf.mxu1  ;;  %v6442_v35 = vadd.f32 %v6441_v48, %v6440_v47 }
 0x277   :  { %v6372_v58 = vadd.f32 %v6371_v20, %v6370_v53  ;;  %v9387_v32 = vadd.f32 %v6433_v4, %v4978_v5 }
 0x278   :  { %v6373_v14 = vpop.f32.mrf.mxu1 }
 0x279   :  { %v4981_v0 = vadd.f32 %v6372_v58, %v9384_v10  ;;  %v6443_v57 = vpop.f32.mrf.mxu0 }
 0x27a   :  { %v6374_v2 = vpop.f32.mrf.mxu1 }
 0x27b   :  { %v6375_v28 = vadd.f32 %v6374_v2, %v6373_v14  ;;  %v6444_v22 = vpop.f32.mrf.mxu0  ;;  %v9390_v19 = vadd.f32 %v6436_v46, %v4981_v0 }
 0x27c   :  { %v6376_v21 = vpop.f32.mrf.mxu1  ;;  %v6445_v38 = vadd.f32 %v6444_v22, %v6443_v57 }
 0x27d   :  { %v4986_v23 = vadd.f32 %v6375_v28, %v9384_v10  ;;  %v6446_v60 = vpop.f32.mrf.mxu0 }
 0x27e   :  { %v6377_v16 = vpop.f32.mrf.mxu1 }
 0x27f   :  { %v6378_v6 = vadd.f32 %v6377_v16, %v6376_v21  ;;  %v6447_v27 = vpop.f32.mrf.mxu0  ;;  %v9393_v54 = vadd.f32 %v6439_v49, %v4986_v23 }
 0x280   :  { %v6379_v52 = vpop.f32.mrf.mxu1  ;;  %v6448_v24 = vadd.f32 %v6447_v27, %v6446_v60 }
 0x281   :  { %v4989_v18 = vadd.f32 %v6378_v6, %v9384_v10 }
 0x282   :  { %v6380_v13 = vpop.f32.mrf.mxu1  ;;  %v6449_v50 = vpop.f32.mrf.mxu0 }
 0x283   :  { %v6381_v41 = vadd.f32 %v6380_v13, %v6379_v52  ;;  %v9396_v30 = vadd.f32 %v6442_v35, %v4989_v18 }
 0x284   :  { %v6382_v56 = vpop.f32.mrf.mxu1  ;;  %v6450_v44 = vpop.f32.mrf.mxu0 }
 0x285   :  { %v4994_v51 = vadd.f32 %v6381_v41, %v9384_v10  ;;  %v6451_v17 = vadd.f32 %v6450_v44, %v6449_v50 }
 0x286   :  { %v6383_v33 = vpop.f32.mrf.mxu1  ;;  %v6452_v8 = vpop.f32.mrf.mxu0 }
 0x287   :  { %v6384_v25 = vadd.f32 %v6383_v33, %v6382_v56  ;;  %v9399_v39 = vadd.f32 %v6445_v38, %v4994_v51 }
 0x288   :  { %v6385_v37 = vpop.f32.mrf.mxu1  ;;  %v6453_v15 = vpop.f32.mrf.mxu0 }
 0x289   :  { %v4997_v55 = vadd.f32 %v6384_v25, %v9384_v10  ;;  %v6454_v42 = vadd.f32 %v6453_v15, %v6452_v8 }
 0x28a   :  { %v6386_v3 = vpop.f32.mrf.mxu1  ;;  %v6455_v12 = vpop.f32.mrf.mxu0 }
 0x28b   :  { %v6387_v45 = vadd.f32 %v6386_v3, %v6385_v37  ;;  %v9402_v36 = vadd.f32 %v6448_v24, %v4997_v55 }
 0x28c   :  { %v6388_v9 = vpop.f32.mrf.mxu1  ;;  %v6456_v59 = vpop.f32.mrf.mxu0 }
 0x28d   :  { %v5002_v1 = vadd.f32 %v6387_v45, %v9384_v10  ;;  %v6457_v29 = vadd.f32 %v6456_v59, %v6455_v12 }
 0x28e   :  { %v6389_v43 = vpop.f32.mrf.mxu1  ;;  %v6458_v61 = vpop.f32.mrf.mxu0 }
 0x28f   :  { %v6390_v40 = vadd.f32 %v6389_v43, %v6388_v9  ;;  %v9405_v4 = vadd.f32 %v6451_v17, %v5002_v1 }
 0x290   :  { %v6391_v26 = vpop.f32.mrf.mxu1  ;;  %v6459_v62 = vpop.f32.mrf.mxu0 }
 0x291   :  { %v5005_v46 = vadd.f32 %v6390_v40, %v9384_v10  ;;  %v6460_v63 = vadd.f32 %v6459_v62, %v6458_v61 }
 0x292   :  { %v6392_v34 = vpop.f32.mrf.mxu1 }
 0x293   :  { %v6393_v11 = vadd.f32 %v6392_v34, %v6391_v26  ;;  %v6461_v31 = vpop.f32.mrf.mxu0  ;;  %v9408_v49 = vadd.f32 %v6454_v42, %v5005_v46 }
 0x294   :  { %v6394_v7 = vpop.f32.mrf.mxu1 }
 0x295   :  { %v5010_v47 = vadd.f32 %v6393_v11, %v9384_v10  ;;  %v6462_v53 = vpop.f32.mrf.mxu0 }
 0x296   :  { %v6463_v5 = vadd.f32 %v6462_v53, %v6461_v31  ;;  %v6395_v48 = vpop.f32.mrf.mxu1 }
 0x297   :  { %v6396_v20 = vadd.f32 %v6395_v48, %v6394_v7  ;;  %v6464_v35 = vpop.f32.mrf.mxu0  ;;  %v9411_v58 = vadd.f32 %v6457_v29, %v5010_v47 }
 0x298   :  { %v6397_v14 = vpop.f32.mrf.mxu1 }
 0x299   :  { %v5013_v0 = vadd.f32 %v6396_v20, %v9384_v10  ;;  %v6465_v57 = vpop.f32.mrf.mxu0 }
 0x29a   :  { %v6466_v2 = vadd.f32 %v6465_v57, %v6464_v35  ;;  %v6398_v28 = vpop.f32.mrf.mxu1 }
 0x29b   :  { %v6399_v22 = vadd.f32 %v6398_v28, %v6397_v14  ;;  %v9414_v21 = vadd.f32 %v6460_v63, %v5013_v0 }
 0x29c   :  { %v6400_v38 = vpop.f32.mrf.mxu1 }
 0x29d   :  { %9748 = vst [vmem:[#allocation24_spill] sm:$0xff] %v9414_v21  ;;  %v5018_v23 = vadd.f32 %v6399_v22, %v9384_v10  ;;  %v6467_v60 = vpop.f32.mrf.mxu0 }
 0x29e   :  { %v6401_v16 = vpop.f32.mrf.mxu1 }
 0x29f   :  { %v6468_v6 = vpop.f32.mrf.mxu0  ;;  %v6402_v27 = vadd.f32 %v6401_v16, %v6400_v38  ;;  %v9417_v52 = vadd.f32 %v6463_v5, %v5018_v23 }
 0x2a0   :  { %v6469_v24 = vadd.f32 %v6468_v6, %v6467_v60  ;;  %v6403_v18 = vpop.f32.mrf.mxu1 }
 0x2a1   :  { %v5021_v13 = vadd.f32 %v6402_v27, %v9384_v10  ;;  %v6470_v50 = vpop.f32.mrf.mxu0 }
 0x2a2   :  { %v6404_v41 = vpop.f32.mrf.mxu1 }
 0x2a3   :  { %v6471_v56 = vpop.f32.mrf.mxu0  ;;  %v6405_v44 = vadd.f32 %v6404_v41, %v6403_v18  ;;  %v9420_v51 = vadd.f32 %v6466_v2, %v5021_v13 }
 0x2a4   :  { %v6472_v17 = vadd.f32 %v6471_v56, %v6470_v50  ;;  %v6406_v33 = vpop.f32.mrf.mxu1 }
 0x2a5   :  { %9749 = vst [vmem:[#allocation26_spill] sm:$0xff] %v9420_v51  ;;  %v5026_v8 = vadd.f32 %v6405_v44, %v9384_v10 }
 0x2a6   :  { %v6407_v25 = vpop.f32.mrf.mxu1 }
 0x2a7   :  { %v9423_v37 = vpop.f32.mrf.mxu0  ;;  %v6408_v15 = vadd.f32 %v6407_v25, %v6406_v33  ;;  %v9425_v55 = vadd.f32 %v6469_v24, %v5026_v8 }
 0x2a9   :  { %9750 = vst [vmem:[#allocation28_spill] sm:$0xff] %v9425_v55  ;;  %v9427_v42 = vpop.f32.mrf.mxu0  ;;  %v5029_v3 = vadd.f32 %v6408_v15, %v9384_v10 }
 0x2aa   :  { %v6409_v12 = vpop.f32.mrf.mxu1 }
 0x2ab   :  { %v9430_v45 = vpop.f32.mrf.mxu0  ;;  %v9432_v9 = vadd.f32 %v6472_v17, %v5029_v3 }
 0x2ac   :  { %9751 = vst [vmem:[#allocation8_spill] sm:$0xff] %v9430_v45  ;;  %v6410_v59 = vpop.f32.mrf.mxu1 }
 0x2ad   :  { %9752 = vst [vmem:[#allocation30_spill] sm:$0xff] %v9432_v9  ;;  %v9434_v1 = vadd.f32 %v6410_v59, %v6409_v12  ;;  %v9436_v29 = vpop.f32.mrf.mxu0 }
 0x2ae   :  { %9753 = vst [vmem:[#allocation17_spill] sm:$0xff] %v9436_v29  ;;  %v6412_v43 = vpop.f32.mrf.mxu1 }
 0x2b0   :  { %v6413_v61 = vpop.f32.mrf.mxu1 }
 0x2b1   :  { %v9438_v40 = vadd.f32 %v6413_v61, %v6412_v43 }
 0x2b2   :  { %v9440_v26 = vpop.f32.mrf.mxu0 }
 0x2b3   :  { %9754 = vst [vmem:[#allocation18_spill] sm:$0xff] %v9438_v40 }
 0x2b4   :  { %v9442_v62 = vpop.f32.mrf.mxu0  ;;  %v6495_v46 = vpop.f32.mrf.mxu1 }
 0x2b6   :  { %v9444_v63 = vpop.f32.mrf.mxu0  ;;  %v6496_v34 = vpop.f32.mrf.mxu1 }
 0x2b8   :  { %v9446_v11 = vpop.f32.mrf.mxu0  ;;  %v6498_v31 = vpop.f32.mrf.mxu1 }
 0x2ba   :  { %v6565_v7 = vpop.f32.mrf.mxu0  ;;  %v6499_v53 = vpop.f32.mrf.mxu1 }
 0x2bc   :  { %v6566_v47 = vpop.f32.mrf.mxu0 }
 0x2be   :  { %v9448_v5 = vpop.f32.mrf.mxu0 }
 0x2c0   :  { %v6501_v48 = vpop.f32.mrf.mxu1  ;;  %v9450_v20 = vpop.f32.mrf.mxu0 }
 0x2c2   :  { %v6502_v35 = vpop.f32.mrf.mxu1 }
 0x2c3   :  { %v9452_v14 = vpop.f32.mrf.mxu0 }
 0x2c4   :  { %v6504_v0 = vpop.f32.mrf.mxu1 }
 0x2c5   :  { %v9454_v57 = vpop.f32.mrf.mxu0 }
 0x2c6   :  { %v6505_v2 = vpop.f32.mrf.mxu1 }
 0x2c7   :  { %v9456_v28 = vpop.f32.mrf.mxu0 }
 0x2c9   :  { %v9458_v22 = vpop.f32.mrf.mxu0 }
 0x2ca   :  { %v9460_v38 = vpop.f32.mrf.mxu1 }
 0x2cc   :  { %v9462_v23 = vpop.f32.mrf.mxu1  ;;  %v9464_v60 = vpop.f32.mrf.mxu0 }
 0x2ce   :  { %v9466_v16 = vpop.f32.mrf.mxu1  ;;  %v9468_v6 = vpop.f32.mrf.mxu0 }
 0x2d0   :  { %v9470_v27 = vpop.f32.mrf.mxu1  ;;  %v9472_v24 = vpop.f32.mrf.mxu0 }
 0x2d2   :  { %v9474_v18 = vpop.f32.mrf.mxu0 }
 0x2d4   :  { %v6513_v13 = vpop.f32.mrf.mxu1 }
 0x2d6   :  { %v6514_v50 = vpop.f32.mrf.mxu1  ;;  %v9476_v41 = vpop.f32.mrf.mxu0 }
 0x2d7   :  { %9755 = vst [vmem:[#allocation9_spill] sm:$0xff] %v9476_v41 }
 0x2d8   :  { %v6516_v56 = vpop.f32.mrf.mxu1  ;;  %v9478_v44 = vpop.f32.mrf.mxu0 }
 0x2d9   :  { %9756 = vst [vmem:[#allocation19_spill] sm:$0xff] %v9478_v44  ;;  %v6503_v44 = vadd.f32 %v6502_v35, %v6501_v48  ;;  %v6500_v48 = vadd.f32 %v6499_v53, %v6498_v31 }
 0x2da   :  { %v6517_v17 = vpop.f32.mrf.mxu1  ;;  %v9482_v8 = vpop.f32.mrf.mxu0 }
 0x2db   :  { %9757 = vst [vmem:[#allocation20_spill] sm:$0xff] %v9482_v8 }
 0x2dc   :  { %v9480_v33 = vpop.f32.mrf.mxu1  ;;  %v9488_v3 = vpop.f32.mrf.mxu0 }
 0x2dd   :  { %9759 = vst [vmem:[#allocation22_spill] sm:$0xff] %v9488_v3 }
 0x2de   :  { %v9484_v25 = vpop.f32.mrf.mxu1 }
 0x2e0   :  { %v9486_v15 = vpop.f32.mrf.mxu1  ;;  %v9494_v43 = vpop.f32.mrf.mxu0 }
 0x2e1   :  { %9758 = vst [vmem:[#allocation21_spill] sm:$0xff] %v9486_v15  ;;  %9761 = vst [vmem:[#allocation23_spill] sm:$0xff] %v9494_v43  ;;  %v6506_v43 = vadd.f32 %v6505_v2, %v6504_v0  ;;  %v9542_v0 = vld [vmem:[%s9666_s5 + $0x10] sm:$0xff]   ;;  %v6515_v2 = vadd.f32 %v6514_v50, %v6513_v13 }
 0x2e2   :  { %v9490_v12 = vpop.f32.mrf.mxu1  ;;  %v9500_v55 = vpop.f32.mrf.mxu0  ;;  %v6050_v50 = vunpack.c.l.bf16 %v9542_v0 }
 0x2e3   :  { %9760 = vst [vmem:[#allocation10_spill] sm:$0xff] %v9490_v12  ;;  %9762 = vst [vmem:[#allocation25_spill] sm:$0xff] %v9500_v55  ;;  %v6497_v12 = vadd.f32 %v6496_v34, %v6495_v46  ;;  %v6567_v34 = vadd.f32 %v6566_v47, %v6565_v7  ;;  %v6561_v7 = vadd.f32 %v9442_v62, %v9440_v26 }
 0x2e4   :  { %v9492_v59 = vpop.f32.mrf.mxu1  ;;  %v9506_v45 = vpop.f32.mrf.mxu0  ;;  %v5183_v47 = vadd.f32 %v6506_v43, %v9396_v30  ;;  %v6570_v30 = vadd.f32 %v9450_v20, %v9448_v5  ;;  %v6509_v26 = vadd.f32 %v9462_v23, %v9460_v38  ;;  %v5196_v43 = vadd.f32 %v6515_v2, %v9405_v4 }
 0x2e5   :  { %v5172_v46 = vadd.f32 %v6497_v12, %v9387_v32  ;;  %v6051_v5 = vunpack.c.h.bf16 %v9542_v0 }
 0x2e6   :  { %v9496_v61 = vpop.f32.mrf.mxu1  ;;  %v9512_v40 = vpop.f32.mrf.mxu0 }
 0x2e7   :  { %9766 = vst [vmem:[#allocation14_spill] sm:$0xff] %v9512_v40 }
 0x2e8   :  { %v9498_v9 = vpop.f32.mrf.mxu1 }
 0x2ea   :  { %v9502_v29 = vpop.f32.mrf.mxu1  ;;  %v9518_v15 = vpop.f32.mrf.mxu0 }
 0x2eb   :  { %9768 = vst [vmem:[#allocation16_spill] sm:$0xff] %v9518_v15 }
 0x2ec   :  { %v9504_v8 = vpop.f32.mrf.mxu1 }
 0x2ed   :  { %9763 = vst [vmem:[#allocation11_spill] sm:$0xff] %v9504_v8  ;;  %v5180_v8 = vadd.f32 %v6503_v44, %v9393_v54  ;;  %v9537_v54 = vld [vmem:[%s9666_s5 + $0x18] sm:$0xff]   ;;  %v9544_v44 = vpop.f32.mrf.mxu0 }
 0x2ee   :  { %v9508_v21 = vpop.f32.mrf.mxu1  ;;  %9770 = vst [vmem:[#allocation13_spill] sm:$0xff] %v9544_v44  ;;  %v6054_v13 = vunpack.c.l.bf16 %v9537_v54 }
 0x2ef   :  { %9764 = vst [vmem:[#allocation29_spill] sm:$0xff] %v9508_v21  ;;  %v6072_v21 = vld [vmem:[%s9666_s5 + $0x8] sm:$0xff]   ;;  %v5277_v12 = vadd.f32 %v6567_v34, %v5180_v8  ;;  %v9569_v8 = vld [vmem:[%s9666_s5 + $0x20] sm:$0xff]   ;;  %v9574_v34 = vpop.f32.mrf.mxu0 }
 0x2f0   :  { %v9510_v3 = vpop.f32.mrf.mxu1  ;;  %v6046_v31 = vunpack.c.l.bf16 %v6072_v21  ;;  %v6047_v32 = vunpack.c.h.bf16 %v6072_v21  ;;  %v9560_v21 = vld [vmem:[%s9666_s5 + $0x28] sm:$0xff]   ;;  %v6058_v4 = vunpack.c.l.bf16 %v9569_v8 }
 0x2f1   :  { %9765 = vst [vmem:[#allocation31_spill] sm:$0xff] %v9510_v3  ;;  %v9529_v3 = vld [vmem:[%s9666_s5] sm:$0xff]   ;;  %v6062_v23 = vunpack.c.l.bf16 %v9560_v21 }
 0x2f2   :  { %v9514_v51 = vpop.f32.mrf.mxu1  ;;  %v6042_v53 = vunpack.c.l.bf16 %v9529_v3 }
 0x2f3   :  { %9767 = vst [vmem:[#allocation15_spill] sm:$0xff] %v9514_v51  ;;  %v6043_v51 = vunpack.c.h.bf16 %v9529_v3  ;;  %v6564_v3 = vadd.f32 %v9446_v11, %v9444_v63 }
 0x2f4   :  { %v9516_v41 = vpop.f32.mrf.mxu1 }
 0x2f6   :  { %v9520_v55 = vpop.f32.mrf.mxu1 }
 0x2f8   :  { %v9531_v35 = vpop.f32.mrf.mxu1 }
 0x2f9   :  { %9769 = vst [vmem:[#allocation12_spill] sm:$0xff] %v9531_v35  ;;  %v5175_v35 = vadd.f32 %v6500_v48, %v9390_v19  ;;  %v5269_v19 = vadd.f32 %v6561_v7, %v5172_v46  ;;  %v6518_v48 = vadd.f32 %v6517_v17, %v6516_v56  ;;  %v6579_v46 = vadd.f32 %v9468_v6, %v9464_v60 }
 0x2fa   :  { %v9546_v15 = vpop.f32.mrf.mxu1  ;;  %v6512_v7 = vadd.f32 %v9470_v27, %v9466_v16  ;;  %v5188_v56 = vadd.f32 %v6509_v26, %v9399_v39  ;;  %v6063_v16 = vunpack.c.h.bf16 %v9560_v21  ;;  %v6527_v27 = vadd.f32 %v9496_v61, %v9492_v59 }
 0x2fb   :  { %v5272_v11 = vadd.f32 %v6564_v3, %v5175_v35  ;;  %v5293_v6 = vadd.f32 %v6579_v46, %v5196_v43  ;;  %v6059_v26 = vunpack.c.h.bf16 %v9569_v8  ;;  %v5034_v61 = vadd.f32 %v9434_v1, %v9384_v10 }
 0x2fc   :  { %v6673_v40 = vpop.f32.mrf.mxu1 }
 0x2fd   :  { %v5374_v62 = vadd.f32 %v6673_v40, %v5277_v12  ;;  %v5280_v40 = vadd.f32 %v6570_v30, %v5183_v47  ;;  %v9587_v47 = vpop.f32.mrf.mxu0 }
 0x2fe   :  { %v5365_v44 = vpop.f32.mrf.mxu1 }
 0x2ff   :  { %v5462_v20 = vadd.f32 %v6046_v31, %v5374_v62  ;;  %v5366_v38 = vadd.f32 %v5365_v44, %v5269_v19  ;;  %v6573_v44 = vadd.f32 %v9454_v57, %v9452_v14  ;;  %v5199_v31 = vadd.f32 %v6518_v48, %v9408_v49 }
 0x300   :  { %v6674_v63 = vpop.f32.mrf.mxu1  ;;  %v6582_v14 = vadd.f32 %v9474_v18, %v9472_v24  ;;  %v6521_v49 = vadd.f32 %v9484_v25, %v9480_v33  ;;  %v6530_v24 = vadd.f32 %v9502_v29, %v9498_v9  ;;  %v6601_v18 = vpop.f32.mrf.mxu0  ;;  %v5212_v25 = vadd.f32 %v6527_v27, %v9417_v52  ;;  %v9773_v9 = vld [vmem:[#allocation21_spill] sm:$0xff]  ;;  %v9774_v29 = vld [vmem:[#allocation10_spill] sm:$0xff] }
 0x301   :  { %v5478_v17 = vmax.f32 %v5462_v20, 0.0  ;;  %v5460_v2 = vadd.f32 %v6042_v53, %v5366_v38  ;;  %v5377_v12 = vadd.f32 %v6674_v63, %v5280_v40  ;;  %v5191_v53 = vadd.f32 %v6512_v7, %v9402_v36  ;;  %v9771_v38 = vld [vmem:[#allocation23_spill] sm:$0xff]  ;;  %v9772_v40 = vld [vmem:[#allocation25_spill] sm:$0xff] }
 0x302   :  { %v5368_v60 = vpop.f32.mrf.mxu1  ;;  %v5285_v59 = vadd.f32 %v6573_v44, %v5188_v56  ;;  %v6576_v36 = vadd.f32 %v9458_v22, %v9456_v28  ;;  %v5296_v33 = vadd.f32 %v6582_v14, %v5199_v31  ;;  %v6475_v20 = vadd.f32 %v9427_v42, %v9423_v37  ;;  %v9776_v56 = vld [vmem:[#allocation19_spill] sm:$0xff]  ;;  %v9777_v37 = vld [vmem:[#allocation26_spill] sm:$0xff] }
 0x303   :  { %5494 = vst [vmem:[#allocation3 + $0x10] sm:$0xff] %v5478_v17  ;;  %v5476_v35 = vmax.f32 %v5460_v2, 0.0  ;;  %v5463_v39 = vadd.f32 %v6047_v32, %v5377_v12  ;;  %v5369_v30 = vadd.f32 %v5368_v60, %v5272_v11  ;;  %v5204_v1 = vadd.f32 %v6521_v49, %v9411_v58  ;;  %v9775_v11 = vld [vmem:[#allocation9_spill] sm:$0xff]  ;;  %v6602_v58 = vpop.f32.mrf.mxu0  ;;  %v9781_v14 = vld [vmem:[#allocation11_spill] sm:$0xff] }
 0x304   :  { %v6677_v57 = vpop.f32.mrf.mxu1  ;;  %v6591_v28 = vadd.f32 %v9772_v40, %v9771_v38  ;;  %v5288_v46 = vadd.f32 %v6576_v36, %v5191_v53  ;;  %v6524_v7 = vadd.f32 %v9774_v29, %v9773_v9  ;;  %v6585_v17 = vadd.f32 %v9776_v56, %v9775_v11  ;;  %v9782_v49 = vld [vmem:[#allocation29_spill] sm:$0xff]  ;;  %v9789_v40 = vld [vmem:[#allocation28_spill] sm:$0xff]  ;;  %v9791_v9 = vld [vmem:[#allocation15_spill] sm:$0xff] }
 0x305   :  { %5492 = vst [vmem:[#allocation3] sm:$0xff] %v5476_v35  ;;  %v5479_v62 = vmax.f32 %v5463_v39, 0.0  ;;  %v5461_v19 = vadd.f32 %v6043_v51, %v5369_v30  ;;  %v5390_v3 = vadd.f32 %v6677_v57, %v5293_v6  ;;  %v5215_v42 = vadd.f32 %v6530_v24, %v9777_v37  ;;  %v9780_v30 = vld [vmem:[#allocation14_spill] sm:$0xff]  ;;  %v9785_v36 = vld [vmem:[#allocation17_spill] sm:$0xff]  ;;  %v6077_v11 = vld [vmem:[%s9666_s5 + $0x30] sm:$0xff]  }
 0x306   :  { %v5381_v32 = vpop.f32.mrf.mxu1  ;;  %v5131_v2 = vadd.f32 %v6475_v20, %v5034_v61  ;;  %v6539_v12 = vadd.f32 %v9520_v55, %v9516_v41  ;;  %v9778_v60 = vunpack.c.h.bf16 %v9537_v54  ;;  %v5309_v35 = vadd.f32 %v6591_v28, %v5212_v25  ;;  %v9783_v55 = vld [vmem:[#allocation24_spill] sm:$0xff]  ;;  %v6078_v38 = vld [vmem:[%s9666_s5 + $0x38] sm:$0xff]   ;;  %s6907_s5 = smov [#allocation3]  }
 0x307   :  { %5495 = vst [vmem:[#allocation3 + $0x18] sm:$0xff] %v5479_v62  ;;  %v5477_v43 = vmax.f32 %v5461_v19, 0.0  ;;  %v5466_v48 = vadd.f32 %v6054_v13, %v5390_v3  ;;  %v5382_v51 = vadd.f32 %v5381_v32, %v5285_v59  ;;  %v6594_v53 = vadd.f32 %v9780_v30, %v9506_v45  ;;  %v9784_v61 = vld [vmem:[#allocation8_spill] sm:$0xff]  ;;  %v9787_v32 = vld [vmem:[#allocation22_spill] sm:$0xff]  ;;  %v6604_v45 = vpop.f32.mrf.mxu0  ;;  %s5513_s0 = sshll.u32 %s6907_s5, 4  ;;  %s5514_s0 = int_to_ptr.vmem [resolvable:$true] %s5513_s0 }
 0x308   :  { %v6678_v22 = vpop.f32.mrf.mxu1  ;;  %v6533_v57 = vadd.f32 %v9782_v49, %v9781_v14  ;;  %v5301_v19 = vadd.f32 %v6585_v17, %v5204_v1  ;;  %v5207_v41 = vadd.f32 %v6524_v7, %v9783_v55  ;;  %v6478_v24 = vadd.f32 %v9785_v36, %v9784_v61  ;;  %v9792_v56 = vld [vmem:[#allocation16_spill] sm:$0xff]  ;;  %v9793_v17 = vld [vmem:[#allocation13_spill] sm:$0xff]  ;;  %s6884_s17 = scalar_lea.vmem %s5514_s0, 2048  ;;  %p6889_p1 = scmp.lt.s32.totalorder %s5514_s0, %s5514_s0 }
 0x309   :  { %5493 = vst [vmem:[#allocation3 + $0x8] sm:$0xff] %v5477_v43  ;;  %v5482_v63 = vmax.f32 %v5466_v48, 0.0  ;;  %v5464_v52 = vadd.f32 %v6050_v50, %v5382_v51  ;;  %v5393_v13 = vadd.f32 %v6678_v22, %v5296_v33  ;;  %v9779_v50 = vld [vmem:[#allocation18_spill] sm:$0xff]  ;;  %v5228_v25 = vadd.f32 %v6539_v12, %v5131_v2  ;;  %v9788_v51 = vld [vmem:[#allocation12_spill] sm:$0xff]  ;;  %p6885_p0 = scmp.ne.s32.totalorder %s5514_s0, %s6884_s17  ;;  %p6890_p2 = scmp.lt.s32.totalorder %s6884_s17, %s6884_s17 }
 0x30a   :  { %v5384_v44 = vpop.f32.mrf.mxu1  ;;  %v5037_v39 = vadd.f32 %v9779_v50, %v9384_v10  ;;  %v9786_v10 = vld [vmem:[#allocation20_spill] sm:$0xff]  ;;  %v5312_v48 = vadd.f32 %v6594_v53, %v5215_v42  ;;  %v6542_v20 = vadd.f32 %v9546_v15, %v9788_v51  ;;  %v5220_v28 = vadd.f32 %v6533_v57, %v9789_v40 }
 0x30b   :  { %5498 = vst [vmem:[#allocation3 + $0x30] sm:$0xff] %v5482_v63  ;;  %v5480_v31 = vmax.f32 %v5464_v52, 0.0  ;;  %v5467_v6 = vadd.f32 %v9778_v60, %v5393_v13  ;;  %v5385_v27 = vadd.f32 %v5384_v44, %v5288_v46  ;;  %v6588_v33 = vadd.f32 %v9787_v32, %v9786_v10  ;;  %v9790_v46 = vld [vmem:[#allocation31_spill] sm:$0xff]  ;;  %v9794_v60 = vld [vmem:[#allocation30_spill] sm:$0xff]  ;;  %p6891_p3 = por %p6890_p2, %p6889_p1 }
 0x30c   :  { %v6681_v62 = vpop.f32.mrf.mxu1  ;;  %v6603_v22 = vadd.f32 %v6602_v58, %v6601_v18  ;;  %v6536_v29 = vadd.f32 %v9791_v9, %v9790_v46  ;;  %v5134_v7 = vadd.f32 %v6478_v24, %v5037_v39  ;;  %v6597_v37 = vadd.f32 %v9793_v17, %v9792_v56  ;;  %v6605_v18 = vpop.f32.mrf.mxu0 }
 0x30d   :  { %5496 = vst [vmem:[#allocation3 + $0x20] sm:$0xff] %v5480_v31  ;;  %v5483_v3 = vmax.f32 %v5467_v6, 0.0  ;;  %v5465_v54 = vadd.f32 %v6051_v5, %v5385_v27  ;;  %v5406_v59 = vadd.f32 %v6681_v62, %v5309_v35  ;;  %v6070_v2 = vunpack.c.l.bf16 %v6078_v38  ;;  %p6892_p4 = pnand %p6891_p3, %p6885_p0 }
 0x30e   :  { %v5397_v43 = vpop.f32.mrf.mxu1  ;;  %v5325_v58 = vadd.f32 %v6603_v22, %v5228_v25  ;;  %v5231_v12 = vadd.f32 %v6542_v20, %v5134_v7  ;;  %v5223_v6 = vadd.f32 %v6536_v29, %v9794_v60  ;;  %v5317_v35 = vadd.f32 %v6597_v37, %v5220_v28 }
 0x30f   :  { %5499 = vst [vmem:[#allocation3 + $0x38] sm:$0xff] %v5483_v3  ;;  %v5481_v1 = vmax.f32 %v5465_v54, 0.0  ;;  %v5470_v0 = vadd.f32 %v6062_v23, %v5406_v59  ;;  %v5398_v5 = vadd.f32 %v5397_v43, %v5301_v19  ;;  %v5304_v23 = vadd.f32 %v6588_v33, %v5207_v41 }
 0x310   :  { %v6682_v63 = vpop.f32.mrf.mxu1  ;;  %v6066_v50 = vunpack.c.l.bf16 %v6077_v11  ;;  %v6606_v39 = vadd.f32 %v6605_v18, %v6604_v45  ;;  %v6600_v49 = vadd.f32 %v9587_v47, %v9574_v34  ;;  %v6071_v62 = vunpack.c.h.bf16 %v6078_v38 }
 0x311   :  { %5497 = vst [vmem:[#allocation3 + $0x28] sm:$0xff] %v5481_v1  ;;  %v5486_v15 = vmax.f32 %v5470_v0, 0.0  ;;  %v5468_v52 = vadd.f32 %v6058_v4, %v5398_v5  ;;  %v5409_v13 = vadd.f32 %v6682_v63, %v5312_v48  ;;  %v6067_v3 = vunpack.c.h.bf16 %v6077_v11 }
 0x312   :  { %v5400_v42 = vpop.f32.mrf.mxu1  ;;  %v5328_v55 = vadd.f32 %v6606_v39, %v5231_v12  ;;  %v5320_v36 = vadd.f32 %v6600_v49, %v5223_v6 }
 0x313   :  { %5502 = vst [vmem:[#allocation3 + $0x50] sm:$0xff] %v5486_v15  ;;  %v5484_v44 = vmax.f32 %v5468_v52, 0.0  ;;  %v5471_v31 = vadd.f32 %v6063_v16, %v5409_v13  ;;  %v5401_v4 = vadd.f32 %v5400_v42, %v5304_v23 }
 0x314   :  { %v6685_v27 = vpop.f32.mrf.mxu1 }
 0x315   :  { %5500 = vst [vmem:[#allocation3 + $0x40] sm:$0xff] %v5484_v44  ;;  %v5487_v30 = vmax.f32 %v5471_v31, 0.0  ;;  %v5469_v53 = vadd.f32 %v6059_v26, %v5401_v4  ;;  %v5422_v14 = vadd.f32 %v6685_v27, %v5325_v58 }
 0x316   :  { %v5413_v57 = vpop.f32.mrf.mxu1 }
 0x317   :  { %5503 = vst [vmem:[#allocation3 + $0x58] sm:$0xff] %v5487_v30  ;;  %v5485_v21 = vmax.f32 %v5469_v53, 0.0  ;;  %v5474_v16 = vadd.f32 %v6070_v2, %v5422_v14  ;;  %v5414_v19 = vadd.f32 %v5413_v57, %v5317_v35 }
 0x318   :  { %v6686_v41 = vpop.f32.mrf.mxu1 }
 0x319   :  { %5501 = vst [vmem:[#allocation3 + $0x48] sm:$0xff] %v5485_v21  ;;  %v5490_v54 = vmax.f32 %v5474_v16, 0.0  ;;  %v5472_v59 = vadd.f32 %v6066_v50, %v5414_v19  ;;  %v5425_v61 = vadd.f32 %v6686_v41, %v5328_v55 }
 0x31a   :  { %v5416_v8 = vpop.f32.mrf.mxu1 }
 0x31b   :  { %5506 = vst [vmem:[#allocation3 + $0x70] sm:$0xff] %v5490_v54  ;;  %v5488_v26 = vmax.f32 %v5472_v59, 0.0  ;;  %v5475_v24 = vadd.f32 %v6071_v62, %v5425_v61  ;;  %v5417_v10 = vadd.f32 %v5416_v8, %v5320_v36 }
 0x31d   :  { %5504 = vst [vmem:[#allocation3 + $0x60] sm:$0xff] %v5488_v26  ;;  %v5491_v34 = vmax.f32 %v5475_v24, 0.0  ;;  %v5473_v47 = vadd.f32 %v6067_v3, %v5417_v10 }
 0x31f   :  { %5507 = vst [vmem:[#allocation3 + $0x78] sm:$0xff] %v5491_v34  ;;  %v5489_v32 = vmax.f32 %v5473_v47, 0.0 }
 0x321   :  { %5505 = vst [vmem:[#allocation3 + $0x68] sm:$0xff] %v5489_v32 }
 0x322   :  { %6895 = shalt.err (!%p6892_p4)
}
 0x323   :  { %s6908_s18 = smov 128   ;;  %s6909_s19 = smov 8  }
 0x324   :  { %5519 = dma.vmem_to_hbm [thread:$0]  %s5514_s0, 2048, %s9667_s6, [#allocation4], %s6908_s18, %s6908_s18, %s6909_s19  }
 0x325   :  { %6904 = dma.done.wait [#allocation4], 2048  }
 0x326   :  { %6905 = vsyncadd [#allocation4], 4294965248 }
 0x327   :  { %5523 = vsyncpa [#allocation4], 1 }

</bundles_post_ra>
